<compile_context>
chip_gen: v7x
topology: tpu7x:2x2x1
jax: 0.10.0
libtpu: 0.0.40
codegen_flags: <defaults>
</compile_context>

<pallas_src>
import functools

import jax
import jax.numpy as jnp
from jax.experimental import pallas as pl
from jax.experimental.pallas import tpu as pltpu

MXU_BF16 = True        # feed MXU operands as bf16 (f32 accumulate / f32 elementwise)
APPROX_RECIP = True    # softmax denominator via EUP approximate reciprocal


def _mxu(x):
    """Cast an MXU operand to bf16 (accumulation stays f32)."""
    return x.astype(jnp.bfloat16) if MXU_BF16 else x


# ----------------------------------------------------------------------------
# Kernel 1: fused stride-2 3x3 conv + bias + ReLU (down path).
# Input arrives as 4 parity planes packed on the channel axis; the kernel does
# a single deep matmul with K = 16*C over lane-concatenated shifted patches.
# ----------------------------------------------------------------------------
def _downconv_kernel(x_ref, w_ref, b_ref, o_ref, *, batch, ho, wo):
    x = x_ref[...]                                    # (B, ho+1, wo+1, 4*C)
    k4 = x.shape[-1]
    m = batch * ho * wo
    # 4 un-strided shifted patches; each is a 128-lane-aligned piece so the
    # lane concat is cheap -> one deep K = 16*C MXU contraction.
    patches = [_mxu(x[:, dy:dy + ho, dx:dx + wo, :].reshape(m, k4))
               for dy in range(2) for dx in range(2)]
    lhs = jnp.concatenate(patches, axis=-1)           # (M, 16*C)
    acc = jnp.dot(lhs, w_ref[...], preferred_element_type=jnp.float32)
    o_ref[...] = jnp.maximum(acc + b_ref[...], 0.0).astype(o_ref.dtype)


def _s2d_pad(x_nhwc):
    """Zero-pad by 1 and split into 4 parity planes stacked on channels."""
    xp = jnp.pad(x_nhwc, ((0, 0), (1, 1), (1, 1), (0, 0)))
    planes = [xp[:, py::2, px::2, :] for py in range(2) for px in range(2)]
    return jnp.concatenate(planes, axis=-1)           # (B, H/2+1, W/2+1, 4*C)


def _rearrange_w_stride2(w_hwio):
    """(3,3,C,Co) stride-2 conv weight -> (16*C, Co) for parity-packed input."""
    kh, kw, c, co = w_hwio.shape
    w2 = jnp.zeros((2, 2, 4 * c, co), w_hwio.dtype)
    for ky in range(kh):
        for kx in range(kw):
            bdy, py = ky // 2, ky % 2
            bdx, px = kx // 2, kx % 2
            c0 = (py * 2 + px) * c
            w2 = w2.at[bdy, bdx, c0:c0 + c, :].set(w_hwio[ky, kx])
    return w2.reshape(4 * 4 * c, co)


def downconv_pallas(x_nhwc, w_cat, b2):
    B, H, W, C = x_nhwc.shape
    co = w_cat.shape[-1]
    ho, wo = H // 2, W // 2
    m = B * ho * wo
    x4 = _s2d_pad(x_nhwc)                             # (B, ho+1, wo+1, 4*C)
    out = pl.pallas_call(
        functools.partial(_downconv_kernel, batch=B, ho=ho, wo=wo),
        out_shape=jax.ShapeDtypeStruct((m, co), x_nhwc.dtype),
        grid=(1,),
        in_specs=[
            pl.BlockSpec((B, ho + 1, wo + 1, 4 * C), lambda i: (0, 0, 0, 0)),
            pl.BlockSpec(w_cat.shape, lambda i: (0, 0)),
            pl.BlockSpec((1, co), lambda i: (0, 0)),
        ],
        out_specs=pl.BlockSpec((m, co), lambda i: (0, 0)),
        compiler_params=pltpu.CompilerParams(dimension_semantics=("arbitrary",)),
    )(x4, w_cat, b2)
    return out.reshape(B, ho, wo, co)


# ----------------------------------------------------------------------------
# Kernel 2: fused (skip-concat) + stride-1 3x3 conv + bias + ReLU (up path).
# The conv weight is split along Cin, so the channel-concatenated (B,H,W,2C)
# tensor is never materialized in HBM.  Batch is folded into matmul rows.
# ----------------------------------------------------------------------------
def _upconv_kernel(t_ref, s_ref, wt_ref, ws_ref, b_ref, o_ref, *, batch, ho, wo):
    t = t_ref[...]                                    # (B, ho+2, wo+2, C)
    s = s_ref[...]
    c = t.shape[-1]
    m = batch * ho * wo
    co = o_ref.shape[-1]
    acc = jnp.zeros((m, co), jnp.float32)
    for ky in range(3):
        for kx in range(3):
            idx = ky * 3 + kx
            pt = t[:, ky:ky + ho, kx:kx + wo, :].reshape(m, c)
            ps = s[:, ky:ky + ho, kx:kx + wo, :].reshape(m, c)
            acc = acc + jnp.dot(_mxu(pt), wt_ref[idx],
                                preferred_element_type=jnp.float32)
            acc = acc + jnp.dot(_mxu(ps), ws_ref[idx],
                                preferred_element_type=jnp.float32)
    o_ref[...] = jnp.maximum(acc + b_ref[...], 0.0).astype(o_ref.dtype)


def upconv_pallas(t_nhwc, skip_nhwc, wt, ws, b2):
    B, H, W, C = skip_nhwc.shape
    co = wt.shape[-1]
    m = B * H * W
    # TODO(synk): fold the 2x nearest upsample into the kernel (transposed-conv
    # parity decomposition) to remove these wrapper copy passes.
    up = jnp.repeat(jnp.repeat(t_nhwc, 2, axis=1), 2, axis=2)
    up_p = jnp.pad(up, ((0, 0), (1, 1), (1, 1), (0, 0)))
    sk_p = jnp.pad(skip_nhwc, ((0, 0), (1, 1), (1, 1), (0, 0)))
    out = pl.pallas_call(
        functools.partial(_upconv_kernel, batch=B, ho=H, wo=W),
        out_shape=jax.ShapeDtypeStruct((m, co), skip_nhwc.dtype),
        grid=(1,),
        in_specs=[
            pl.BlockSpec((B, H + 2, W + 2, C), lambda i: (0, 0, 0, 0)),
            pl.BlockSpec((B, H + 2, W + 2, C), lambda i: (0, 0, 0, 0)),
            pl.BlockSpec((9, C, co), lambda i: (0, 0, 0)),
            pl.BlockSpec((9, C, co), lambda i: (0, 0, 0)),
            pl.BlockSpec((1, co), lambda i: (0, 0)),
        ],
        out_specs=pl.BlockSpec((m, co), lambda i: (0, 0)),
        compiler_params=pltpu.CompilerParams(dimension_semantics=("arbitrary",)),
    )(up_p, sk_p, wt, ws, b2)
    return out.reshape(B, H, W, co)


# ----------------------------------------------------------------------------
# Kernel 3: transformer trunk on a (B, L) grid.
#   l == 0 : tokens = (feat + pos) @ W_img + b_img  (into VMEM scratch)
#   every l: one self-attention layer (fused QKV matmul, transpose-free scores,
#            scale pre-folded into wq, (p@v) @ wo_h association, EUP reciprocal)
#   l == L-1: write tokens out.
# Per-layer weights are streamed / double-buffered by their BlockSpecs.
# ----------------------------------------------------------------------------
def _transformer_kernel(x_ref, pos_ref, wimg_ref, bimg_ref,
                        wqkv_ref, wo_ref, bo_ref, o_ref, tok_ref,
                        *, heads, dh, layers):
    l = pl.program_id(1)
    inner = heads * dh

    @pl.when(l == 0)
    def _():
        xp = x_ref[0] + pos_ref[...]
        tok_ref[...] = (jnp.dot(_mxu(xp), wimg_ref[...],
                                preferred_element_type=jnp.float32)
                        + bimg_ref[...])

    tok = tok_ref[...]                                 # (S, C) f32
    qkv = jnp.dot(_mxu(tok), wqkv_ref[0],
                  preferred_element_type=jnp.float32)  # (S, 3*inner)
    wo = wo_ref[0]                                     # (inner, C) f32
    out = bo_ref[0]                                    # (1, C) bias, broadcasts
    for h in range(heads):
        c0 = h * dh
        q_h = qkv[:, c0:c0 + dh]
        k_h = qkv[:, inner + c0:inner + c0 + dh]
        v_h = qkv[:, 2 * inner + c0:2 * inner + c0 + dh]
        # q @ k^T via dot_general contracting dims -> no XLU transpose.
        s = jax.lax.dot_general(_mxu(q_h), _mxu(k_h),
                                (((1,), (1,)), ((), ())),
                                preferred_element_type=jnp.float32)
        s = s - jnp.max(s, axis=-1, keepdims=True)
        p = jnp.exp(s)
        den = jnp.sum(p, axis=-1, keepdims=True)
        if APPROX_RECIP:
            p = p * pl.reciprocal(den, approx=True)
        else:
            p = p / den
        ctx_h = jnp.dot(_mxu(p), _mxu(v_h), preferred_element_type=jnp.float32)
        out = out + jnp.dot(_mxu(ctx_h), _mxu(wo[c0:c0 + dh, :]),
                            preferred_element_type=jnp.float32)
    tok_ref[...] = out

    @pl.when(l == layers - 1)
    def _():
        o_ref[0] = tok_ref[...].astype(o_ref.dtype)


def transformer_pallas(feat_bsc, pos_sc, wimg, bimg2, wqkv_all, wo_all, bo_all,
                       *, heads):
    B, S, C = feat_bsc.shape
    L = wqkv_all.shape[0]
    inner = wo_all.shape[1]
    dh = inner // heads
    return pl.pallas_call(
        functools.partial(_transformer_kernel, heads=heads, dh=dh, layers=L),
        out_shape=jax.ShapeDtypeStruct((B, S, C), feat_bsc.dtype),
        grid=(B, L),
        in_specs=[
            pl.BlockSpec((1, S, C), lambda b, l: (b, 0, 0)),
            pl.BlockSpec((S, C), lambda b, l: (0, 0)),
            pl.BlockSpec((C, C), lambda b, l: (0, 0)),
            pl.BlockSpec((1, C), lambda b, l: (0, 0)),
            pl.BlockSpec((1, C, 3 * inner), lambda b, l: (l, 0, 0)),
            pl.BlockSpec((1, inner, C), lambda b, l: (l, 0, 0)),
            pl.BlockSpec((1, 1, C), lambda b, l: (l, 0, 0)),
        ],
        out_specs=pl.BlockSpec((1, S, C), lambda b, l: (b, 0, 0)),
        scratch_shapes=[pltpu.VMEM((S, C), jnp.float32)],
        compiler_params=pltpu.CompilerParams(
            dimension_semantics=("parallel", "arbitrary")),
    )(feat_bsc, pos_sc, wimg, bimg2, wqkv_all, wo_all, bo_all)


# ----------------------------------------------------------------------------
# Parameters: raw (PyTorch-like) init + one-time repacking for the kernels.
# ----------------------------------------------------------------------------
def init_params(key, ch, lowx, lowy, num_down, num_up, num_self_attns, heads=4):
    cnt = [0]

    def _normal(shape, scale=0.05):
        cnt[0] += 1
        return scale * jax.random.normal(jax.random.fold_in(key, cnt[0]),
                                         shape, jnp.float32)

    def _uniform(shape):
        cnt[0] += 1
        return jax.random.uniform(jax.random.fold_in(key, cnt[0]),
                                  shape, jnp.float32)

    inner = (ch // heads) * heads
    return {
        "downconvs": [(_normal((3, 3, ch, ch)), _normal((ch,), 0.01))
                      for _ in range(num_down)],
        "upconvs": [(_normal((3, 3, 2 * ch, ch)), _normal((ch,), 0.01))
                    for _ in range(num_up)],
        "pos_embx": _uniform((lowx, ch // 2)),        # torch.rand -> U[0,1)
        "pos_emby": _uniform((lowy, ch // 2)),
        "img_lin_w": _normal((ch, ch)),
        "img_lin_b": _normal((ch,), 0.01),
        "attns": [(_normal((ch, inner)), _normal((ch, inner)),
                   _normal((ch, inner)), _normal((inner, ch)),
                   _normal((ch,), 0.01))
                  for _ in range(num_self_attns)],
    }


def prepare_params(params, *, lowx, lowy, heads):
    """One-time weight repacking (hoisted out of the jitted forward)."""
    w_dtype = jnp.bfloat16 if MXU_BF16 else jnp.float32
    ch = params["img_lin_w"].shape[0]

    downconvs = [(_rearrange_w_stride2(w).astype(w_dtype), b.reshape(1, -1))
                 for (w, b) in params["downconvs"]]

    upconvs = []
    for (w, b) in params["upconvs"]:
        c = w.shape[2] // 2
        co = w.shape[3]
        wt = w[:, :, :c, :].reshape(9, c, co).astype(w_dtype)   # token half
        ws = w[:, :, c:, :].reshape(9, c, co).astype(w_dtype)   # skip half
        upconvs.append((wt, ws, b.reshape(1, -1)))

    # glob_pos[i, j, :ch//2] = pos_embx[j], glob_pos[i, j, ch//2:] = pos_emby[i]
    px = jnp.broadcast_to(params["pos_embx"][None, :, :], (lowy, lowx, ch // 2))
    py = jnp.broadcast_to(params["pos_emby"][:, None, :], (lowy, lowx, ch // 2))
    pos = jnp.concatenate([px, py], axis=-1).reshape(lowy * lowx, ch)

    inner = params["attns"][0][3].shape[0]
    dh = inner // heads
    scale = float(dh) ** -0.5
    # Fused QKV weight; 1/sqrt(dh) folded into the wq columns (one-time).
    wqkv_all = jnp.stack([jnp.concatenate([wq * scale, wk, wv], axis=1)
                          for (wq, wk, wv, _, _) in params["attns"]]).astype(w_dtype)
    wo_all = jnp.stack([wo for (_, _, _, wo, _) in params["attns"]])       # f32
    bo_all = jnp.stack([bo.reshape(1, -1) for (_, _, _, _, bo) in params["attns"]])

    return {
        "downconvs": downconvs,
        "upconvs": upconvs,
        "pos": pos,
        "img_lin_w": params["img_lin_w"].astype(w_dtype),
        "img_lin_b": params["img_lin_b"].reshape(1, -1),
        "wqkv_all": wqkv_all,
        "wo_all": wo_all,
        "bo_all": bo_all,
    }


def transformer_unet_forward(prep, img_nchw, *, lowx, lowy, heads):
    x = jnp.transpose(img_nchw, (0, 2, 3, 1))          # NCHW -> NHWC
    down_feats = [x]
    for (w_cat, b2) in prep["downconvs"]:
        down_feats.append(downconv_pallas(down_feats[-1], w_cat, b2))
    feat = down_feats[-1]                              # (B, lowy, lowx, ch)
    B, _, _, ch = feat.shape

    tokens = transformer_pallas(feat.reshape(B, lowy * lowx, ch), prep["pos"],
                                prep["img_lin_w"], prep["img_lin_b"],
                                prep["wqkv_all"], prep["wo_all"], prep["bo_all"],
                                heads=heads)

    t = tokens.reshape(B, lowy, lowx, ch)
    for (wt, ws, b2), skip in zip(prep["upconvs"], reversed(down_feats[:-1])):
        t = upconv_pallas(t, skip, wt, ws, b2)
    return jnp.transpose(t, (0, 3, 1, 2))              # NHWC -> NCHW


# ----------------------------------------------------------------------------
# Pure-JAX f32 reference (same math) for a correctness check
# ----------------------------------------------------------------------------
def _conv_ref(x, w, b, stride):
    y = jax.lax.conv_general_dilated(
        x, w, (stride, stride), ((1, 1), (1, 1)),
        dimension_numbers=("NHWC", "HWIO", "NHWC"))
    return jax.nn.relu(y + b)


def _attn_ref(x, wq, wk, wv, wo, bo, heads):
    B, S, C = x.shape
    dh = wq.shape[1] // heads
    q = (x @ wq).reshape(B, S, heads, dh)
    k = (x @ wk).reshape(B, S, heads, dh)
    v = (x @ wv).reshape(B, S, heads, dh)
    s = jnp.einsum("bqhd,bkhd->bhqk", q, k) * dh ** -0.5
    p = jax.nn.softmax(s, axis=-1)
    o = jnp.einsum("bhqk,bkhd->bqhd", p, v).reshape(B, S, heads * dh)
    return o @ wo + bo


def _ref_forward(params, img_nchw, *, lowx, lowy, heads):
    ch = img_nchw.shape[1]
    x = jnp.transpose(img_nchw, (0, 2, 3, 1))
    down_feats = [x]
    for (w, b) in params["downconvs"]:
        down_feats.append(_conv_ref(down_feats[-1], w, b, 2))
    feat = down_feats[-1]
    B = feat.shape[0]
    px = jnp.broadcast_to(params["pos_embx"][None, :, :], (lowy, lowx, ch // 2))
    py = jnp.broadcast_to(params["pos_emby"][:, None, :], (lowy, lowx, ch // 2))
    pos = jnp.concatenate([px, py], axis=-1).reshape(lowy * lowx, ch)
    tokens = (feat.reshape(B, lowy * lowx, ch) + pos[None]) @ params["img_lin_w"] \
        + params["img_lin_b"]
    for (wq, wk, wv, wo, bo) in params["attns"]:
        tokens = _attn_ref(tokens, wq, wk, wv, wo, bo, heads)
    t = tokens.reshape(B, lowy, lowx, ch)
    for (w, b), skip in zip(params["upconvs"], reversed(down_feats[:-1])):
        t = jnp.repeat(jnp.repeat(t, 2, axis=1), 2, axis=2)
        t = _conv_ref(jnp.concatenate([t, skip], axis=-1), w, b, 1)
    return jnp.transpose(t, (0, 3, 1, 2))


# ----------------------------------------------------------------------------
if __name__ == "__main__":
    key = jax.random.PRNGKey(0)
    B, ch, lowx, lowy = 2, 32, 8, 8
    num_down = num_up = 1
    num_self_attns = 2
    heads = 4
    H, W = lowy * (2 ** num_down), lowx * (2 ** num_down)

    kp, ki = jax.random.split(key)
    params = init_params(kp, ch, lowx, lowy, num_down, num_up, num_self_attns,
                         heads=heads)
    prep = prepare_params(params, lowx=lowx, lowy=lowy, heads=heads)  # one-time
    img = jax.random.normal(ki, (B, ch, H, W), jnp.float32)   # NCHW, like PyTorch

    fwd = jax.jit(functools.partial(transformer_unet_forward,
                                    lowx=lowx, lowy=lowy, heads=heads))
    out = jax.block_until_ready(fwd(prep, img))

    assert out.shape == (B, ch, H, W), out.shape
    ref = _ref_forward(params, img, lowx=lowx, lowy=lowy, heads=heads)
    max_err = float(jnp.max(jnp.abs(out - ref)))
    tol = 5e-2 if MXU_BF16 else 1e-2      # bf16 MXU inputs vs exact f32 reference
    assert jnp.allclose(out, ref, atol=tol, rtol=tol), max_err

    print("KERNEL_OK")
</pallas_src>

<mosaic_0001>
module attributes {stable_mosaic.version = 11 : i64} {
  func.func @_transformer_kernel(%arg0: i32, %arg1: i32, %arg2: memref<1x64x32xf32, #tpu.memory_space<vmem>>, %arg3: memref<64x32xf32, #tpu.memory_space<vmem>>, %arg4: memref<32x32xbf16, #tpu.memory_space<vmem>>, %arg5: memref<1x32xf32, #tpu.memory_space<vmem>>, %arg6: memref<1x32x96xbf16, #tpu.memory_space<vmem>>, %arg7: memref<1x32x32xf32, #tpu.memory_space<vmem>>, %arg8: memref<1x1x32xf32, #tpu.memory_space<vmem>>, %arg9: memref<1x64x32xf32, #tpu.memory_space<vmem>>, %arg10: memref<64x32xf32, #tpu.memory_space<vmem>>) attributes {dimension_semantics = [#tpu.dimension_semantics<parallel>, #tpu.dimension_semantics<arbitrary>], iteration_bounds = array<i64: 2, 2>, scalar_prefetch = 0 : i64, scratch_operands = 1 : i64, tpu.core_type = #tpu.core_type<tc>, window_params = [{transform_indices = @transform_0, window_bounds = array<i64: 1, 64, 32>}, {pipeline_mode = #tpu.pipeline_mode<synchronous>, transform_indices = @transform_1, window_bounds = array<i64: 64, 32>}, {pipeline_mode = #tpu.pipeline_mode<synchronous>, transform_indices = @transform_2, window_bounds = array<i64: 32, 32>}, {pipeline_mode = #tpu.pipeline_mode<synchronous>, transform_indices = @transform_3, window_bounds = array<i64: 1, 32>}, {transform_indices = @transform_4, window_bounds = array<i64: 1, 32, 96>}, {transform_indices = @transform_5, window_bounds = array<i64: 1, 32, 32>}, {transform_indices = @transform_6, window_bounds = array<i64: 1, 1, 32>}, {transform_indices = @transform_7, window_bounds = array<i64: 1, 64, 32>}]} {
    %c0_i32 = arith.constant 0 : i32
    %0 = arith.cmpi eq, %arg1, %c0_i32 : i32
    %1 = arith.extui %0 : i1 to i32
    %c0_i32_0 = arith.constant 0 : i32
    %2 = arith.cmpi ne, %1, %c0_i32_0 : i32
    scf.if %2 {
      %c0_34 = arith.constant 0 : index
      %c0_35 = arith.constant 0 : index
      %c0_36 = arith.constant 0 : index
      %113 = vector.load %arg2[%c0_34, %c0_35, %c0_36] : memref<1x64x32xf32, #tpu.memory_space<vmem>>, vector<1x64x32xf32>
      %114 = vector.shape_cast %113 : vector<1x64x32xf32> to vector<64x32xf32>
      %c0_37 = arith.constant 0 : index
      %c0_38 = arith.constant 0 : index
      %115 = vector.load %arg3[%c0_37, %c0_38] : memref<64x32xf32, #tpu.memory_space<vmem>>, vector<64x32xf32>
      %116 = arith.addf %114, %115 : vector<64x32xf32>
      %117 = arith.truncf %116 : vector<64x32xf32> to vector<64x32xbf16>
      %c0_39 = arith.constant 0 : index
      %c0_40 = arith.constant 0 : index
      %118 = vector.load %arg4[%c0_39, %c0_40] : memref<32x32xbf16, #tpu.memory_space<vmem>>, vector<32x32xbf16>
      %cst_41 = arith.constant dense<0.000000e+00> : vector<64x32xf32>
      %119 = tpu.matmul %117, %118, %cst_41 {dimension_numbers = #tpu.dot_dimension_numbers<[1], [0], [0], [1], [0, 0, 1, 1], [], []>} : vector<64x32xbf16>, vector<32x32xbf16>, vector<64x32xf32> -> vector<64x32xf32>
      %c0_42 = arith.constant 0 : index
      %c0_43 = arith.constant 0 : index
      %120 = vector.load %arg5[%c0_42, %c0_43] : memref<1x32xf32, #tpu.memory_space<vmem>>, vector<1x32xf32>
      %121 = vector.broadcast %120 : vector<1x32xf32> to vector<64x32xf32>
      %122 = arith.addf %119, %121 : vector<64x32xf32>
      %c0_44 = arith.constant 0 : index
      %c0_45 = arith.constant 0 : index
      %123 = vector.load %arg10[%c0_44, %c0_45] : memref<64x32xf32, #tpu.memory_space<vmem>>, vector<64x32xf32>
      tpu.vector_store %arg10[%c0_44, %c0_45], %122 {strides = array<i32>} : memref<64x32xf32, #tpu.memory_space<vmem>>, vector<64x32xf32>,
    } else {
    }
    %c0 = arith.constant 0 : index
    %c0_1 = arith.constant 0 : index
    %3 = vector.load %arg10[%c0, %c0_1] : memref<64x32xf32, #tpu.memory_space<vmem>>, vector<64x32xf32>
    %4 = arith.truncf %3 : vector<64x32xf32> to vector<64x32xbf16>
    %c0_2 = arith.constant 0 : index
    %c0_3 = arith.constant 0 : index
    %c0_4 = arith.constant 0 : index
    %5 = vector.load %arg6[%c0_2, %c0_3, %c0_4] : memref<1x32x96xbf16, #tpu.memory_space<vmem>>, vector<1x32x96xbf16>
    %6 = vector.shape_cast %5 : vector<1x32x96xbf16> to vector<32x96xbf16>
    %cst = arith.constant dense<0.000000e+00> : vector<64x96xf32>
    %7 = tpu.matmul %4, %6, %cst {dimension_numbers = #tpu.dot_dimension_numbers<[1], [0], [0], [1], [0, 0, 1, 1], [], []>} : vector<64x32xbf16>, vector<32x96xbf16>, vector<64x96xf32> -> vector<64x96xf32>
    %c0_5 = arith.constant 0 : index
    %c0_6 = arith.constant 0 : index
    %c0_7 = arith.constant 0 : index
    %8 = vector.load %arg7[%c0_5, %c0_6, %c0_7] : memref<1x32x32xf32, #tpu.memory_space<vmem>>, vector<1x32x32xf32>
    %9 = vector.shape_cast %8 : vector<1x32x32xf32> to vector<32x32xf32>
    %c0_8 = arith.constant 0 : index
    %c0_9 = arith.constant 0 : index
    %c0_10 = arith.constant 0 : index
    %10 = vector.load %arg8[%c0_8, %c0_9, %c0_10] : memref<1x1x32xf32, #tpu.memory_space<vmem>>, vector<1x1x32xf32>
    %11 = vector.shape_cast %10 : vector<1x1x32xf32> to vector<1x32xf32>
    %12 = vector.extract_strided_slice %7 {offsets = [0, 0], sizes = [64, 8], strides = [1, 1]} : vector<64x96xf32> to vector<64x8xf32>
    %13 = vector.extract_strided_slice %7 {offsets = [0, 32], sizes = [64, 8], strides = [1, 1]} : vector<64x96xf32> to vector<64x8xf32>
    %14 = vector.extract_strided_slice %7 {offsets = [0, 64], sizes = [64, 8], strides = [1, 1]} : vector<64x96xf32> to vector<64x8xf32>
    %15 = arith.truncf %12 : vector<64x8xf32> to vector<64x8xbf16>
    %16 = arith.truncf %13 : vector<64x8xf32> to vector<64x8xbf16>
    %cst_11 = arith.constant dense<0.000000e+00> : vector<64x64xf32>
    %17 = tpu.matmul %15, %16, %cst_11 {dimension_numbers = #tpu.dot_dimension_numbers<[1], [1], [0], [0], [0, 0, 1, 0], [], []>} : vector<64x8xbf16>, vector<64x8xbf16>, vector<64x64xf32> -> vector<64x64xf32>
    %cst_12 = arith.constant dense<0xFF800000> : vector<64xf32>
    %18 = vector.multi_reduction <maximumf>, %17, %cst_12 [1] : vector<64x64xf32> to vector<64xf32>
    %19 = vector.shape_cast %18 : vector<64xf32> to vector<64x1xf32>
    %20 = vector.broadcast %19 : vector<64x1xf32> to vector<64x64xf32>
    %21 = arith.subf %17, %20 : vector<64x64xf32>
    %22 = math.exp %21 : vector<64x64xf32>
    %cst_13 = arith.constant dense<0.000000e+00> : vector<64xf32>
    %23 = vector.multi_reduction <add>, %22, %cst_13 [1] : vector<64x64xf32> to vector<64xf32>
    %24 = vector.shape_cast %23 : vector<64xf32> to vector<64x1xf32>
    %25 = tpu.reciprocal %24 {approx = true} : vector<64x1xf32> -> vector<64x1xf32>
    %26 = vector.broadcast %25 : vector<64x1xf32> to vector<64x64xf32>
    %27 = arith.mulf %22, %26 : vector<64x64xf32>
    %28 = arith.truncf %27 : vector<64x64xf32> to vector<64x64xbf16>
    %29 = arith.truncf %14 : vector<64x8xf32> to vector<64x8xbf16>
    %cst_14 = arith.constant dense<0.000000e+00> : vector<64x8xf32>
    %30 = tpu.matmul %28, %29, %cst_14 {dimension_numbers = #tpu.dot_dimension_numbers<[1], [0], [0], [1], [0, 0, 1, 1], [], []>} : vector<64x64xbf16>, vector<64x8xbf16>, vector<64x8xf32> -> vector<64x8xf32>
    %31 = arith.truncf %30 : vector<64x8xf32> to vector<64x8xbf16>
    %32 = vector.extract_strided_slice %9 {offsets = [0, 0], sizes = [8, 32], strides = [1, 1]} : vector<32x32xf32> to vector<8x32xf32>
    %33 = arith.truncf %32 : vector<8x32xf32> to vector<8x32xbf16>
    %cst_15 = arith.constant dense<0.000000e+00> : vector<64x32xf32>
    %34 = tpu.matmul %31, %33, %cst_15 {dimension_numbers = #tpu.dot_dimension_numbers<[1], [0], [0], [1], [0, 0, 1, 1], [], []>} : vector<64x8xbf16>, vector<8x32xbf16>, vector<64x32xf32> -> vector<64x32xf32>
    %35 = vector.broadcast %11 : vector<1x32xf32> to vector<64x32xf32>
    %36 = arith.addf %35, %34 : vector<64x32xf32>
    %37 = vector.extract_strided_slice %7 {offsets = [0, 8], sizes = [64, 8], strides = [1, 1]} : vector<64x96xf32> to vector<64x8xf32>
    %38 = vector.extract_strided_slice %7 {offsets = [0, 40], sizes = [64, 8], strides = [1, 1]} : vector<64x96xf32> to vector<64x8xf32>
    %39 = vector.extract_strided_slice %7 {offsets = [0, 72], sizes = [64, 8], strides = [1, 1]} : vector<64x96xf32> to vector<64x8xf32>
    %40 = arith.truncf %37 : vector<64x8xf32> to vector<64x8xbf16>
    %41 = arith.truncf %38 : vector<64x8xf32> to vector<64x8xbf16>
    %cst_16 = arith.constant dense<0.000000e+00> : vector<64x64xf32>
    %42 = tpu.matmul %40, %41, %cst_16 {dimension_numbers = #tpu.dot_dimension_numbers<[1], [1], [0], [0], [0, 0, 1, 0], [], []>} : vector<64x8xbf16>, vector<64x8xbf16>, vector<64x64xf32> -> vector<64x64xf32>
    %cst_17 = arith.constant dense<0xFF800000> : vector<64xf32>
    %43 = vector.multi_reduction <maximumf>, %42, %cst_17 [1] : vector<64x64xf32> to vector<64xf32>
    %44 = vector.shape_cast %43 : vector<64xf32> to vector<64x1xf32>
    %45 = vector.broadcast %44 : vector<64x1xf32> to vector<64x64xf32>
    %46 = arith.subf %42, %45 : vector<64x64xf32>
    %47 = math.exp %46 : vector<64x64xf32>
    %cst_18 = arith.constant dense<0.000000e+00> : vector<64xf32>
    %48 = vector.multi_reduction <add>, %47, %cst_18 [1] : vector<64x64xf32> to vector<64xf32>
    %49 = vector.shape_cast %48 : vector<64xf32> to vector<64x1xf32>
    %50 = tpu.reciprocal %49 {approx = true} : vector<64x1xf32> -> vector<64x1xf32>
    %51 = vector.broadcast %50 : vector<64x1xf32> to vector<64x64xf32>
    %52 = arith.mulf %47, %51 : vector<64x64xf32>
    %53 = arith.truncf %52 : vector<64x64xf32> to vector<64x64xbf16>
    %54 = arith.truncf %39 : vector<64x8xf32> to vector<64x8xbf16>
    %cst_19 = arith.constant dense<0.000000e+00> : vector<64x8xf32>
    %55 = tpu.matmul %53, %54, %cst_19 {dimension_numbers = #tpu.dot_dimension_numbers<[1], [0], [0], [1], [0, 0, 1, 1], [], []>} : vector<64x64xbf16>, vector<64x8xbf16>, vector<64x8xf32> -> vector<64x8xf32>
    %56 = arith.truncf %55 : vector<64x8xf32> to vector<64x8xbf16>
    %57 = vector.extract_strided_slice %9 {offsets = [8, 0], sizes = [8, 32], strides = [1, 1]} : vector<32x32xf32> to vector<8x32xf32>
    %58 = arith.truncf %57 : vector<8x32xf32> to vector<8x32xbf16>
    %cst_20 = arith.constant dense<0.000000e+00> : vector<64x32xf32>
    %59 = tpu.matmul %56, %58, %cst_20 {dimension_numbers = #tpu.dot_dimension_numbers<[1], [0], [0], [1], [0, 0, 1, 1], [], []>} : vector<64x8xbf16>, vector<8x32xbf16>, vector<64x32xf32> -> vector<64x32xf32>
    %60 = arith.addf %36, %59 : vector<64x32xf32>
    %61 = vector.extract_strided_slice %7 {offsets = [0, 16], sizes = [64, 8], strides = [1, 1]} : vector<64x96xf32> to vector<64x8xf32>
    %62 = vector.extract_strided_slice %7 {offsets = [0, 48], sizes = [64, 8], strides = [1, 1]} : vector<64x96xf32> to vector<64x8xf32>
    %63 = vector.extract_strided_slice %7 {offsets = [0, 80], sizes = [64, 8], strides = [1, 1]} : vector<64x96xf32> to vector<64x8xf32>
    %64 = arith.truncf %61 : vector<64x8xf32> to vector<64x8xbf16>
    %65 = arith.truncf %62 : vector<64x8xf32> to vector<64x8xbf16>
    %cst_21 = arith.constant dense<0.000000e+00> : vector<64x64xf32>
    %66 = tpu.matmul %64, %65, %cst_21 {dimension_numbers = #tpu.dot_dimension_numbers<[1], [1], [0], [0], [0, 0, 1, 0], [], []>} : vector<64x8xbf16>, vector<64x8xbf16>, vector<64x64xf32> -> vector<64x64xf32>
    %cst_22 = arith.constant dense<0xFF800000> : vector<64xf32>
    %67 = vector.multi_reduction <maximumf>, %66, %cst_22 [1] : vector<64x64xf32> to vector<64xf32>
    %68 = vector.shape_cast %67 : vector<64xf32> to vector<64x1xf32>
    %69 = vector.broadcast %68 : vector<64x1xf32> to vector<64x64xf32>
    %70 = arith.subf %66, %69 : vector<64x64xf32>
    %71 = math.exp %70 : vector<64x64xf32>
    %cst_23 = arith.constant dense<0.000000e+00> : vector<64xf32>
    %72 = vector.multi_reduction <add>, %71, %cst_23 [1] : vector<64x64xf32> to vector<64xf32>
    %73 = vector.shape_cast %72 : vector<64xf32> to vector<64x1xf32>
    %74 = tpu.reciprocal %73 {approx = true} : vector<64x1xf32> -> vector<64x1xf32>
    %75 = vector.broadcast %74 : vector<64x1xf32> to vector<64x64xf32>
    %76 = arith.mulf %71, %75 : vector<64x64xf32>
    %77 = arith.truncf %76 : vector<64x64xf32> to vector<64x64xbf16>
    %78 = arith.truncf %63 : vector<64x8xf32> to vector<64x8xbf16>
    %cst_24 = arith.constant dense<0.000000e+00> : vector<64x8xf32>
    %79 = tpu.matmul %77, %78, %cst_24 {dimension_numbers = #tpu.dot_dimension_numbers<[1], [0], [0], [1], [0, 0, 1, 1], [], []>} : vector<64x64xbf16>, vector<64x8xbf16>, vector<64x8xf32> -> vector<64x8xf32>
    %80 = arith.truncf %79 : vector<64x8xf32> to vector<64x8xbf16>
    %81 = vector.extract_strided_slice %9 {offsets = [16, 0], sizes = [8, 32], strides = [1, 1]} : vector<32x32xf32> to vector<8x32xf32>
    %82 = arith.truncf %81 : vector<8x32xf32> to vector<8x32xbf16>
    %cst_25 = arith.constant dense<0.000000e+00> : vector<64x32xf32>
    %83 = tpu.matmul %80, %82, %cst_25 {dimension_numbers = #tpu.dot_dimension_numbers<[1], [0], [0], [1], [0, 0, 1, 1], [], []>} : vector<64x8xbf16>, vector<8x32xbf16>, vector<64x32xf32> -> vector<64x32xf32>
    %84 = arith.addf %60, %83 : vector<64x32xf32>
    %85 = vector.extract_strided_slice %7 {offsets = [0, 24], sizes = [64, 8], strides = [1, 1]} : vector<64x96xf32> to vector<64x8xf32>
    %86 = vector.extract_strided_slice %7 {offsets = [0, 56], sizes = [64, 8], strides = [1, 1]} : vector<64x96xf32> to vector<64x8xf32>
    %87 = vector.extract_strided_slice %7 {offsets = [0, 88], sizes = [64, 8], strides = [1, 1]} : vector<64x96xf32> to vector<64x8xf32>
    %88 = arith.truncf %85 : vector<64x8xf32> to vector<64x8xbf16>
    %89 = arith.truncf %86 : vector<64x8xf32> to vector<64x8xbf16>
    %cst_26 = arith.constant dense<0.000000e+00> : vector<64x64xf32>
    %90 = tpu.matmul %88, %89, %cst_26 {dimension_numbers = #tpu.dot_dimension_numbers<[1], [1], [0], [0], [0, 0, 1, 0], [], []>} : vector<64x8xbf16>, vector<64x8xbf16>, vector<64x64xf32> -> vector<64x64xf32>
    %cst_27 = arith.constant dense<0xFF800000> : vector<64xf32>
    %91 = vector.multi_reduction <maximumf>, %90, %cst_27 [1] : vector<64x64xf32> to vector<64xf32>
    %92 = vector.shape_cast %91 : vector<64xf32> to vector<64x1xf32>
    %93 = vector.broadcast %92 : vector<64x1xf32> to vector<64x64xf32>
    %94 = arith.subf %90, %93 : vector<64x64xf32>
    %95 = math.exp %94 : vector<64x64xf32>
    %cst_28 = arith.constant dense<0.000000e+00> : vector<64xf32>
    %96 = vector.multi_reduction <add>, %95, %cst_28 [1] : vector<64x64xf32> to vector<64xf32>
    %97 = vector.shape_cast %96 : vector<64xf32> to vector<64x1xf32>
    %98 = tpu.reciprocal %97 {approx = true} : vector<64x1xf32> -> vector<64x1xf32>
    %99 = vector.broadcast %98 : vector<64x1xf32> to vector<64x64xf32>
    %100 = arith.mulf %95, %99 : vector<64x64xf32>
    %101 = arith.truncf %100 : vector<64x64xf32> to vector<64x64xbf16>
    %102 = arith.truncf %87 : vector<64x8xf32> to vector<64x8xbf16>
    %cst_29 = arith.constant dense<0.000000e+00> : vector<64x8xf32>
    %103 = tpu.matmul %101, %102, %cst_29 {dimension_numbers = #tpu.dot_dimension_numbers<[1], [0], [0], [1], [0, 0, 1, 1], [], []>} : vector<64x64xbf16>, vector<64x8xbf16>, vector<64x8xf32> -> vector<64x8xf32>
    %104 = arith.truncf %103 : vector<64x8xf32> to vector<64x8xbf16>
    %105 = vector.extract_strided_slice %9 {offsets = [24, 0], sizes = [8, 32], strides = [1, 1]} : vector<32x32xf32> to vector<8x32xf32>
    %106 = arith.truncf %105 : vector<8x32xf32> to vector<8x32xbf16>
    %cst_30 = arith.constant dense<0.000000e+00> : vector<64x32xf32>
    %107 = tpu.matmul %104, %106, %cst_30 {dimension_numbers = #tpu.dot_dimension_numbers<[1], [0], [0], [1], [0, 0, 1, 1], [], []>} : vector<64x8xbf16>, vector<8x32xbf16>, vector<64x32xf32> -> vector<64x32xf32>
    %108 = arith.addf %84, %107 : vector<64x32xf32>
    %c0_31 = arith.constant 0 : index
    %c0_32 = arith.constant 0 : index
    %109 = vector.load %arg10[%c0_31, %c0_32] : memref<64x32xf32, #tpu.memory_space<vmem>>, vector<64x32xf32>
    tpu.vector_store %arg10[%c0_31, %c0_32], %108 {strides = array<i32>} : memref<64x32xf32, #tpu.memory_space<vmem>>, vector<64x32xf32>,
    %c1_i32 = arith.constant 1 : i32
    %110 = arith.cmpi eq, %arg1, %c1_i32 : i32
    %111 = arith.extui %110 : i1 to i32
    %c0_i32_33 = arith.constant 0 : i32
    %112 = arith.cmpi ne, %111, %c0_i32_33 : i32
    scf.if %112 {
      %c0_34 = arith.constant 0 : index
      %c0_35 = arith.constant 0 : index
      %113 = vector.load %arg10[%c0_34, %c0_35] : memref<64x32xf32, #tpu.memory_space<vmem>>, vector<64x32xf32>
      %c0_36 = arith.constant 0 : index
      %c0_37 = arith.constant 0 : index
      %c0_38 = arith.constant 0 : index
      %114 = vector.load %arg9[%c0_36, %c0_37, %c0_38] : memref<1x64x32xf32, #tpu.memory_space<vmem>>, vector<1x64x32xf32>
      %115 = vector.shape_cast %114 : vector<1x64x32xf32> to vector<64x32xf32>
      %116 = vector.shape_cast %113 : vector<64x32xf32> to vector<1x64x32xf32>
      tpu.vector_store %arg9[%c0_36, %c0_37, %c0_38], %116 {strides = array<i32>} : memref<1x64x32xf32, #tpu.memory_space<vmem>>, vector<1x64x32xf32>,
    } else {
    }
    return
  }
  func.func @transform_0(%arg0: i32, %arg1: i32) -> (i32, i32, i32) {
    %c0_i32 = arith.constant 0 : i32
    %c0_i32_0 = arith.constant 0 : i32
    %c0_i32_1 = arith.constant 0 : i32
    return %arg0, %c0_i32, %c0_i32_0 : i32, i32, i32
  }
  func.func @transform_1(%arg0: i32, %arg1: i32) -> (i32, i32) {
    %c0_i32 = arith.constant 0 : i32
    %c0_i32_0 = arith.constant 0 : i32
    %c0_i32_1 = arith.constant 0 : i32
    return %c0_i32, %c0_i32_0 : i32, i32
  }
  func.func @transform_2(%arg0: i32, %arg1: i32) -> (i32, i32) {
    %c0_i32 = arith.constant 0 : i32
    %c0_i32_0 = arith.constant 0 : i32
    %c0_i32_1 = arith.constant 0 : i32
    return %c0_i32, %c0_i32_0 : i32, i32
  }
  func.func @transform_3(%arg0: i32, %arg1: i32) -> (i32, i32) {
    %c0_i32 = arith.constant 0 : i32
    %c0_i32_0 = arith.constant 0 : i32
    %c0_i32_1 = arith.constant 0 : i32
    return %c0_i32, %c0_i32_0 : i32, i32
  }
  func.func @transform_4(%arg0: i32, %arg1: i32) -> (i32, i32, i32) {
    %c0_i32 = arith.constant 0 : i32
    %c0_i32_0 = arith.constant 0 : i32
    %c0_i32_1 = arith.constant 0 : i32
    return %arg1, %c0_i32, %c0_i32_0 : i32, i32, i32
  }
  func.func @transform_5(%arg0: i32, %arg1: i32) -> (i32, i32, i32) {
    %c0_i32 = arith.constant 0 : i32
    %c0_i32_0 = arith.constant 0 : i32
    %c0_i32_1 = arith.constant 0 : i32
    return %arg1, %c0_i32, %c0_i32_0 : i32, i32, i32
  }
  func.func @transform_6(%arg0: i32, %arg1: i32) -> (i32, i32, i32) {
    %c0_i32 = arith.constant 0 : i32
    %c0_i32_0 = arith.constant 0 : i32
    %c0_i32_1 = arith.constant 0 : i32
    return %arg1, %c0_i32, %c0_i32_0 : i32, i32, i32
  }
  func.func @transform_7(%arg0: i32, %arg1: i32) -> (i32, i32, i32) {
    %c0_i32 = arith.constant 0 : i32
    %c0_i32_0 = arith.constant 0 : i32
    %c0_i32_1 = arith.constant 0 : i32
    return %arg0, %c0_i32, %c0_i32_0 : i32, i32, i32
  }
}

module attributes {stable_mosaic.version = 11 : i64} {
  func.func @_downconv_kernel(%arg0: i32, %arg1: memref<2x9x9x128xf32, #tpu.memory_space<vmem>>, %arg2: memref<512x32xbf16, #tpu.memory_space<vmem>>, %arg3: memref<1x32xf32, #tpu.memory_space<vmem>>, %arg4: memref<128x32xf32, #tpu.memory_space<vmem>>) attributes {dimension_semantics = [#tpu.dimension_semantics<arbitrary>], iteration_bounds = array<i64: 1>, scalar_prefetch = 0 : i64, scratch_operands = 0 : i64, tpu.core_type = #tpu.core_type<tc>, window_params = [{pipeline_mode = #tpu.pipeline_mode<synchronous>, transform_indices = @transform_0, window_bounds = array<i64: 2, 9, 9, 128>}, {pipeline_mode = #tpu.pipeline_mode<synchronous>, transform_indices = @transform_1, window_bounds = array<i64: 512, 32>}, {pipeline_mode = #tpu.pipeline_mode<synchronous>, transform_indices = @transform_2, window_bounds = array<i64: 1, 32>}, {pipeline_mode = #tpu.pipeline_mode<synchronous>, transform_indices = @transform_3, window_bounds = array<i64: 128, 32>}]} {
    %c0 = arith.constant 0 : index
    %c0_0 = arith.constant 0 : index
    %c0_1 = arith.constant 0 : index
    %c0_2 = arith.constant 0 : index
    %0 = vector.load %arg1[%c0, %c0_0, %c0_1, %c0_2] : memref<2x9x9x128xf32, #tpu.memory_space<vmem>>, vector<2x9x9x128xf32>
    %1 = vector.extract_strided_slice %0 {offsets = [0, 0, 0, 0], sizes = [2, 8, 8, 128], strides = [1, 1, 1, 1]} : vector<2x9x9x128xf32> to vector<2x8x8x128xf32>
    %2 = vector.shape_cast %1 : vector<2x8x8x128xf32> to vector<128x128xf32>
    %3 = arith.truncf %2 : vector<128x128xf32> to vector<128x128xbf16>
    %4 = vector.extract_strided_slice %0 {offsets = [0, 0, 1, 0], sizes = [2, 8, 8, 128], strides = [1, 1, 1, 1]} : vector<2x9x9x128xf32> to vector<2x8x8x128xf32>
    %5 = vector.shape_cast %4 : vector<2x8x8x128xf32> to vector<128x128xf32>
    %6 = arith.truncf %5 : vector<128x128xf32> to vector<128x128xbf16>
    %7 = vector.extract_strided_slice %0 {offsets = [0, 1, 0, 0], sizes = [2, 8, 8, 128], strides = [1, 1, 1, 1]} : vector<2x9x9x128xf32> to vector<2x8x8x128xf32>
    %8 = vector.shape_cast %7 : vector<2x8x8x128xf32> to vector<128x128xf32>
    %9 = arith.truncf %8 : vector<128x128xf32> to vector<128x128xbf16>
    %10 = vector.extract_strided_slice %0 {offsets = [0, 1, 1, 0], sizes = [2, 8, 8, 128], strides = [1, 1, 1, 1]} : vector<2x9x9x128xf32> to vector<2x8x8x128xf32>
    %11 = vector.shape_cast %10 : vector<2x8x8x128xf32> to vector<128x128xf32>
    %12 = arith.truncf %11 : vector<128x128xf32> to vector<128x128xbf16>
    %13 = tpu.concatenate %3, %6, %9, %12 in 1 : vector<128x128xbf16>, vector<128x128xbf16>, vector<128x128xbf16>, vector<128x128xbf16> -> vector<128x512xbf16>
    %c0_3 = arith.constant 0 : index
    %c0_4 = arith.constant 0 : index
    %14 = vector.load %arg2[%c0_3, %c0_4] : memref<512x32xbf16, #tpu.memory_space<vmem>>, vector<512x32xbf16>
    %cst = arith.constant dense<0.000000e+00> : vector<128x32xf32>
    %15 = tpu.matmul %13, %14, %cst {dimension_numbers = #tpu.dot_dimension_numbers<[1], [0], [0], [1], [0, 0, 1, 1], [], []>} : vector<128x512xbf16>, vector<512x32xbf16>, vector<128x32xf32> -> vector<128x32xf32>
    %c0_5 = arith.constant 0 : index
    %c0_6 = arith.constant 0 : index
    %16 = vector.load %arg3[%c0_5, %c0_6] : memref<1x32xf32, #tpu.memory_space<vmem>>, vector<1x32xf32>
    %17 = vector.broadcast %16 : vector<1x32xf32> to vector<128x32xf32>
    %18 = arith.addf %15, %17 : vector<128x32xf32>
    %cst_7 = arith.constant 0.000000e+00 : f32
    %19 = vector.broadcast %cst_7 : f32 to vector<128x32xf32>
    %20 = arith.maximumf %18, %19 : vector<128x32xf32>
    %c0_8 = arith.constant 0 : index
    %c0_9 = arith.constant 0 : index
    %21 = vector.load %arg4[%c0_8, %c0_9] : memref<128x32xf32, #tpu.memory_space<vmem>>, vector<128x32xf32>
    tpu.vector_store %arg4[%c0_8, %c0_9], %20 {strides = array<i32>} : memref<128x32xf32, #tpu.memory_space<vmem>>, vector<128x32xf32>,
    return
  }
  func.func @transform_0(%arg0: i32) -> (i32, i32, i32, i32) {
    %c0_i32 = arith.constant 0 : i32
    %c0_i32_0 = arith.constant 0 : i32
    %c0_i32_1 = arith.constant 0 : i32
    %c0_i32_2 = arith.constant 0 : i32
    %c0_i32_3 = arith.constant 0 : i32
    return %c0_i32, %c0_i32_0, %c0_i32_1, %c0_i32_2 : i32, i32, i32, i32
  }
  func.func @transform_1(%arg0: i32) -> (i32, i32) {
    %c0_i32 = arith.constant 0 : i32
    %c0_i32_0 = arith.constant 0 : i32
    %c0_i32_1 = arith.constant 0 : i32
    return %c0_i32, %c0_i32_0 : i32, i32
  }
  func.func @transform_2(%arg0: i32) -> (i32, i32) {
    %c0_i32 = arith.constant 0 : i32
    %c0_i32_0 = arith.constant 0 : i32
    %c0_i32_1 = arith.constant 0 : i32
    return %c0_i32, %c0_i32_0 : i32, i32
  }
  func.func @transform_3(%arg0: i32) -> (i32, i32) {
    %c0_i32 = arith.constant 0 : i32
    %c0_i32_0 = arith.constant 0 : i32
    %c0_i32_1 = arith.constant 0 : i32
    return %c0_i32, %c0_i32_0 : i32, i32
  }
}

module attributes {stable_mosaic.version = 11 : i64} {
  func.func @_upconv_kernel(%arg0: i32, %arg1: memref<2x18x18x32xf32, #tpu.memory_space<vmem>>, %arg2: memref<2x18x18x32xf32, #tpu.memory_space<vmem>>, %arg3: memref<9x32x32xbf16, #tpu.memory_space<vmem>>, %arg4: memref<9x32x32xbf16, #tpu.memory_space<vmem>>, %arg5: memref<1x32xf32, #tpu.memory_space<vmem>>, %arg6: memref<512x32xf32, #tpu.memory_space<vmem>>) attributes {dimension_semantics = [#tpu.dimension_semantics<arbitrary>], iteration_bounds = array<i64: 1>, scalar_prefetch = 0 : i64, scratch_operands = 0 : i64, tpu.core_type = #tpu.core_type<tc>, window_params = [{pipeline_mode = #tpu.pipeline_mode<synchronous>, transform_indices = @transform_0, window_bounds = array<i64: 2, 18, 18, 32>}, {pipeline_mode = #tpu.pipeline_mode<synchronous>, transform_indices = @transform_1, window_bounds = array<i64: 2, 18, 18, 32>}, {pipeline_mode = #tpu.pipeline_mode<synchronous>, transform_indices = @transform_2, window_bounds = array<i64: 9, 32, 32>}, {pipeline_mode = #tpu.pipeline_mode<synchronous>, transform_indices = @transform_3, window_bounds = array<i64: 9, 32, 32>}, {pipeline_mode = #tpu.pipeline_mode<synchronous>, transform_indices = @transform_4, window_bounds = array<i64: 1, 32>}, {pipeline_mode = #tpu.pipeline_mode<synchronous>, transform_indices = @transform_5, window_bounds = array<i64: 512, 32>}]} {
    %c0 = arith.constant 0 : index
    %c0_0 = arith.constant 0 : index
    %c0_1 = arith.constant 0 : index
    %c0_2 = arith.constant 0 : index
    %0 = vector.load %arg1[%c0, %c0_0, %c0_1, %c0_2] : memref<2x18x18x32xf32, #tpu.memory_space<vmem>>, vector<2x18x18x32xf32>
    %c0_3 = arith.constant 0 : index
    %c0_4 = arith.constant 0 : index
    %c0_5 = arith.constant 0 : index
    %c0_6 = arith.constant 0 : index
    %1 = vector.load %arg2[%c0_3, %c0_4, %c0_5, %c0_6] : memref<2x18x18x32xf32, #tpu.memory_space<vmem>>, vector<2x18x18x32xf32>
    %cst = arith.constant 0.000000e+00 : f32
    %2 = vector.broadcast %cst : f32 to vector<512x32xf32>
    %3 = vector.extract_strided_slice %0 {offsets = [0, 0, 0, 0], sizes = [2, 16, 16, 32], strides = [1, 1, 1, 1]} : vector<2x18x18x32xf32> to vector<2x16x16x32xf32>
    %4 = vector.shape_cast %3 : vector<2x16x16x32xf32> to vector<512x32xf32>
    %5 = vector.extract_strided_slice %1 {offsets = [0, 0, 0, 0], sizes = [2, 16, 16, 32], strides = [1, 1, 1, 1]} : vector<2x18x18x32xf32> to vector<2x16x16x32xf32>
    %6 = vector.shape_cast %5 : vector<2x16x16x32xf32> to vector<512x32xf32>
    %7 = arith.truncf %4 : vector<512x32xf32> to vector<512x32xbf16>
    %c0_7 = arith.constant 0 : index
    %c0_8 = arith.constant 0 : index
    %c0_9 = arith.constant 0 : index
    %8 = vector.load %arg3[%c0_7, %c0_8, %c0_9] : memref<9x32x32xbf16, #tpu.memory_space<vmem>>, vector<1x32x32xbf16>
    %9 = vector.shape_cast %8 : vector<1x32x32xbf16> to vector<32x32xbf16>
    %cst_10 = arith.constant dense<0.000000e+00> : vector<512x32xf32>
    %10 = tpu.matmul %7, %9, %cst_10 {dimension_numbers = #tpu.dot_dimension_numbers<[1], [0], [0], [1], [0, 0, 1, 1], [], []>} : vector<512x32xbf16>, vector<32x32xbf16>, vector<512x32xf32> -> vector<512x32xf32>
    %11 = arith.addf %2, %10 : vector<512x32xf32>
    %12 = arith.truncf %6 : vector<512x32xf32> to vector<512x32xbf16>
    %c0_11 = arith.constant 0 : index
    %c0_12 = arith.constant 0 : index
    %c0_13 = arith.constant 0 : index
    %13 = vector.load %arg4[%c0_11, %c0_12, %c0_13] : memref<9x32x32xbf16, #tpu.memory_space<vmem>>, vector<1x32x32xbf16>
    %14 = vector.shape_cast %13 : vector<1x32x32xbf16> to vector<32x32xbf16>
    %cst_14 = arith.constant dense<0.000000e+00> : vector<512x32xf32>
    %15 = tpu.matmul %12, %14, %cst_14 {dimension_numbers = #tpu.dot_dimension_numbers<[1], [0], [0], [1], [0, 0, 1, 1], [], []>} : vector<512x32xbf16>, vector<32x32xbf16>, vector<512x32xf32> -> vector<512x32xf32>
    %16 = arith.addf %11, %15 : vector<512x32xf32>
    %17 = vector.extract_strided_slice %0 {offsets = [0, 0, 1, 0], sizes = [2, 16, 16, 32], strides = [1, 1, 1, 1]} : vector<2x18x18x32xf32> to vector<2x16x16x32xf32>
    %18 = vector.shape_cast %17 : vector<2x16x16x32xf32> to vector<512x32xf32>
    %19 = vector.extract_strided_slice %1 {offsets = [0, 0, 1, 0], sizes = [2, 16, 16, 32], strides = [1, 1, 1, 1]} : vector<2x18x18x32xf32> to vector<2x16x16x32xf32>
    %20 = vector.shape_cast %19 : vector<2x16x16x32xf32> to vector<512x32xf32>
    %21 = arith.truncf %18 : vector<512x32xf32> to vector<512x32xbf16>
    %c1 = arith.constant 1 : index
    %c0_15 = arith.constant 0 : index
    %c0_16 = arith.constant 0 : index
    %22 = vector.load %arg3[%c1, %c0_15, %c0_16] : memref<9x32x32xbf16, #tpu.memory_space<vmem>>, vector<1x32x32xbf16>
    %23 = vector.shape_cast %22 : vector<1x32x32xbf16> to vector<32x32xbf16>
    %cst_17 = arith.constant dense<0.000000e+00> : vector<512x32xf32>
    %24 = tpu.matmul %21, %23, %cst_17 {dimension_numbers = #tpu.dot_dimension_numbers<[1], [0], [0], [1], [0, 0, 1, 1], [], []>} : vector<512x32xbf16>, vector<32x32xbf16>, vector<512x32xf32> -> vector<512x32xf32>
    %25 = arith.addf %16, %24 : vector<512x32xf32>
    %26 = arith.truncf %20 : vector<512x32xf32> to vector<512x32xbf16>
    %c1_18 = arith.constant 1 : index
    %c0_19 = arith.constant 0 : index
    %c0_20 = arith.constant 0 : index
    %27 = vector.load %arg4[%c1_18, %c0_19, %c0_20] : memref<9x32x32xbf16, #tpu.memory_space<vmem>>, vector<1x32x32xbf16>
    %28 = vector.shape_cast %27 : vector<1x32x32xbf16> to vector<32x32xbf16>
    %cst_21 = arith.constant dense<0.000000e+00> : vector<512x32xf32>
    %29 = tpu.matmul %26, %28, %cst_21 {dimension_numbers = #tpu.dot_dimension_numbers<[1], [0], [0], [1], [0, 0, 1, 1], [], []>} : vector<512x32xbf16>, vector<32x32xbf16>, vector<512x32xf32> -> vector<512x32xf32>
    %30 = arith.addf %25, %29 : vector<512x32xf32>
    %31 = vector.extract_strided_slice %0 {offsets = [0, 0, 2, 0], sizes = [2, 16, 16, 32], strides = [1, 1, 1, 1]} : vector<2x18x18x32xf32> to vector<2x16x16x32xf32>
    %32 = vector.shape_cast %31 : vector<2x16x16x32xf32> to vector<512x32xf32>
    %33 = vector.extract_strided_slice %1 {offsets = [0, 0, 2, 0], sizes = [2, 16, 16, 32], strides = [1, 1, 1, 1]} : vector<2x18x18x32xf32> to vector<2x16x16x32xf32>
    %34 = vector.shape_cast %33 : vector<2x16x16x32xf32> to vector<512x32xf32>
    %35 = arith.truncf %32 : vector<512x32xf32> to vector<512x32xbf16>
    %c2 = arith.constant 2 : index
    %c0_22 = arith.constant 0 : index
    %c0_23 = arith.constant 0 : index
    %36 = vector.load %arg3[%c2, %c0_22, %c0_23] : memref<9x32x32xbf16, #tpu.memory_space<vmem>>, vector<1x32x32xbf16>
    %37 = vector.shape_cast %36 : vector<1x32x32xbf16> to vector<32x32xbf16>
    %cst_24 = arith.constant dense<0.000000e+00> : vector<512x32xf32>
    %38 = tpu.matmul %35, %37, %cst_24 {dimension_numbers = #tpu.dot_dimension_numbers<[1], [0], [0], [1], [0, 0, 1, 1], [], []>} : vector<512x32xbf16>, vector<32x32xbf16>, vector<512x32xf32> -> vector<512x32xf32>
    %39 = arith.addf %30, %38 : vector<512x32xf32>
    %40 = arith.truncf %34 : vector<512x32xf32> to vector<512x32xbf16>
    %c2_25 = arith.constant 2 : index
    %c0_26 = arith.constant 0 : index
    %c0_27 = arith.constant 0 : index
    %41 = vector.load %arg4[%c2_25, %c0_26, %c0_27] : memref<9x32x32xbf16, #tpu.memory_space<vmem>>, vector<1x32x32xbf16>
    %42 = vector.shape_cast %41 : vector<1x32x32xbf16> to vector<32x32xbf16>
    %cst_28 = arith.constant dense<0.000000e+00> : vector<512x32xf32>
    %43 = tpu.matmul %40, %42, %cst_28 {dimension_numbers = #tpu.dot_dimension_numbers<[1], [0], [0], [1], [0, 0, 1, 1], [], []>} : vector<512x32xbf16>, vector<32x32xbf16>, vector<512x32xf32> -> vector<512x32xf32>
    %44 = arith.addf %39, %43 : vector<512x32xf32>
    %45 = vector.extract_strided_slice %0 {offsets = [0, 1, 0, 0], sizes = [2, 16, 16, 32], strides = [1, 1, 1, 1]} : vector<2x18x18x32xf32> to vector<2x16x16x32xf32>
    %46 = vector.shape_cast %45 : vector<2x16x16x32xf32> to vector<512x32xf32>
    %47 = vector.extract_strided_slice %1 {offsets = [0, 1, 0, 0], sizes = [2, 16, 16, 32], strides = [1, 1, 1, 1]} : vector<2x18x18x32xf32> to vector<2x16x16x32xf32>
    %48 = vector.shape_cast %47 : vector<2x16x16x32xf32> to vector<512x32xf32>
    %49 = arith.truncf %46 : vector<512x32xf32> to vector<512x32xbf16>
    %c3 = arith.constant 3 : index
    %c0_29 = arith.constant 0 : index
    %c0_30 = arith.constant 0 : index
    %50 = vector.load %arg3[%c3, %c0_29, %c0_30] : memref<9x32x32xbf16, #tpu.memory_space<vmem>>, vector<1x32x32xbf16>
    %51 = vector.shape_cast %50 : vector<1x32x32xbf16> to vector<32x32xbf16>
    %cst_31 = arith.constant dense<0.000000e+00> : vector<512x32xf32>
    %52 = tpu.matmul %49, %51, %cst_31 {dimension_numbers = #tpu.dot_dimension_numbers<[1], [0], [0], [1], [0, 0, 1, 1], [], []>} : vector<512x32xbf16>, vector<32x32xbf16>, vector<512x32xf32> -> vector<512x32xf32>
    %53 = arith.addf %44, %52 : vector<512x32xf32>
    %54 = arith.truncf %48 : vector<512x32xf32> to vector<512x32xbf16>
    %c3_32 = arith.constant 3 : index
    %c0_33 = arith.constant 0 : index
    %c0_34 = arith.constant 0 : index
    %55 = vector.load %arg4[%c3_32, %c0_33, %c0_34] : memref<9x32x32xbf16, #tpu.memory_space<vmem>>, vector<1x32x32xbf16>
    %56 = vector.shape_cast %55 : vector<1x32x32xbf16> to vector<32x32xbf16>
    %cst_35 = arith.constant dense<0.000000e+00> : vector<512x32xf32>
    %57 = tpu.matmul %54, %56, %cst_35 {dimension_numbers = #tpu.dot_dimension_numbers<[1], [0], [0], [1], [0, 0, 1, 1], [], []>} : vector<512x32xbf16>, vector<32x32xbf16>, vector<512x32xf32> -> vector<512x32xf32>
    %58 = arith.addf %53, %57 : vector<512x32xf32>
    %59 = vector.extract_strided_slice %0 {offsets = [0, 1, 1, 0], sizes = [2, 16, 16, 32], strides = [1, 1, 1, 1]} : vector<2x18x18x32xf32> to vector<2x16x16x32xf32>
    %60 = vector.shape_cast %59 : vector<2x16x16x32xf32> to vector<512x32xf32>
    %61 = vector.extract_strided_slice %1 {offsets = [0, 1, 1, 0], sizes = [2, 16, 16, 32], strides = [1, 1, 1, 1]} : vector<2x18x18x32xf32> to vector<2x16x16x32xf32>
    %62 = vector.shape_cast %61 : vector<2x16x16x32xf32> to vector<512x32xf32>
    %63 = arith.truncf %60 : vector<512x32xf32> to vector<512x32xbf16>
    %c4 = arith.constant 4 : index
    %c0_36 = arith.constant 0 : index
    %c0_37 = arith.constant 0 : index
    %64 = vector.load %arg3[%c4, %c0_36, %c0_37] : memref<9x32x32xbf16, #tpu.memory_space<vmem>>, vector<1x32x32xbf16>
    %65 = vector.shape_cast %64 : vector<1x32x32xbf16> to vector<32x32xbf16>
    %cst_38 = arith.constant dense<0.000000e+00> : vector<512x32xf32>
    %66 = tpu.matmul %63, %65, %cst_38 {dimension_numbers = #tpu.dot_dimension_numbers<[1], [0], [0], [1], [0, 0, 1, 1], [], []>} : vector<512x32xbf16>, vector<32x32xbf16>, vector<512x32xf32> -> vector<512x32xf32>
    %67 = arith.addf %58, %66 : vector<512x32xf32>
    %68 = arith.truncf %62 : vector<512x32xf32> to vector<512x32xbf16>
    %c4_39 = arith.constant 4 : index
    %c0_40 = arith.constant 0 : index
    %c0_41 = arith.constant 0 : index
    %69 = vector.load %arg4[%c4_39, %c0_40, %c0_41] : memref<9x32x32xbf16, #tpu.memory_space<vmem>>, vector<1x32x32xbf16>
    %70 = vector.shape_cast %69 : vector<1x32x32xbf16> to vector<32x32xbf16>
    %cst_42 = arith.constant dense<0.000000e+00> : vector<512x32xf32>
    %71 = tpu.matmul %68, %70, %cst_42 {dimension_numbers = #tpu.dot_dimension_numbers<[1], [0], [0], [1], [0, 0, 1, 1], [], []>} : vector<512x32xbf16>, vector<32x32xbf16>, vector<512x32xf32> -> vector<512x32xf32>
    %72 = arith.addf %67, %71 : vector<512x32xf32>
    %73 = vector.extract_strided_slice %0 {offsets = [0, 1, 2, 0], sizes = [2, 16, 16, 32], strides = [1, 1, 1, 1]} : vector<2x18x18x32xf32> to vector<2x16x16x32xf32>
    %74 = vector.shape_cast %73 : vector<2x16x16x32xf32> to vector<512x32xf32>
    %75 = vector.extract_strided_slice %1 {offsets = [0, 1, 2, 0], sizes = [2, 16, 16, 32], strides = [1, 1, 1, 1]} : vector<2x18x18x32xf32> to vector<2x16x16x32xf32>
    %76 = vector.shape_cast %75 : vector<2x16x16x32xf32> to vector<512x32xf32>
    %77 = arith.truncf %74 : vector<512x32xf32> to vector<512x32xbf16>
    %c5 = arith.constant 5 : index
    %c0_43 = arith.constant 0 : index
    %c0_44 = arith.constant 0 : index
    %78 = vector.load %arg3[%c5, %c0_43, %c0_44] : memref<9x32x32xbf16, #tpu.memory_space<vmem>>, vector<1x32x32xbf16>
    %79 = vector.shape_cast %78 : vector<1x32x32xbf16> to vector<32x32xbf16>
    %cst_45 = arith.constant dense<0.000000e+00> : vector<512x32xf32>
    %80 = tpu.matmul %77, %79, %cst_45 {dimension_numbers = #tpu.dot_dimension_numbers<[1], [0], [0], [1], [0, 0, 1, 1], [], []>} : vector<512x32xbf16>, vector<32x32xbf16>, vector<512x32xf32> -> vector<512x32xf32>
    %81 = arith.addf %72, %80 : vector<512x32xf32>
    %82 = arith.truncf %76 : vector<512x32xf32> to vector<512x32xbf16>
    %c5_46 = arith.constant 5 : index
    %c0_47 = arith.constant 0 : index
    %c0_48 = arith.constant 0 : index
    %83 = vector.load %arg4[%c5_46, %c0_47, %c0_48] : memref<9x32x32xbf16, #tpu.memory_space<vmem>>, vector<1x32x32xbf16>
    %84 = vector.shape_cast %83 : vector<1x32x32xbf16> to vector<32x32xbf16>
    %cst_49 = arith.constant dense<0.000000e+00> : vector<512x32xf32>
    %85 = tpu.matmul %82, %84, %cst_49 {dimension_numbers = #tpu.dot_dimension_numbers<[1], [0], [0], [1], [0, 0, 1, 1], [], []>} : vector<512x32xbf16>, vector<32x32xbf16>, vector<512x32xf32> -> vector<512x32xf32>
    %86 = arith.addf %81, %85 : vector<512x32xf32>
    %87 = vector.extract_strided_slice %0 {offsets = [0, 2, 0, 0], sizes = [2, 16, 16, 32], strides = [1, 1, 1, 1]} : vector<2x18x18x32xf32> to vector<2x16x16x32xf32>
    %88 = vector.shape_cast %87 : vector<2x16x16x32xf32> to vector<512x32xf32>
    %89 = vector.extract_strided_slice %1 {offsets = [0, 2, 0, 0], sizes = [2, 16, 16, 32], strides = [1, 1, 1, 1]} : vector<2x18x18x32xf32> to vector<2x16x16x32xf32>
    %90 = vector.shape_cast %89 : vector<2x16x16x32xf32> to vector<512x32xf32>
    %91 = arith.truncf %88 : vector<512x32xf32> to vector<512x32xbf16>
    %c6 = arith.constant 6 : index
    %c0_50 = arith.constant 0 : index
    %c0_51 = arith.constant 0 : index
    %92 = vector.load %arg3[%c6, %c0_50, %c0_51] : memref<9x32x32xbf16, #tpu.memory_space<vmem>>, vector<1x32x32xbf16>
    %93 = vector.shape_cast %92 : vector<1x32x32xbf16> to vector<32x32xbf16>
    %cst_52 = arith.constant dense<0.000000e+00> : vector<512x32xf32>
    %94 = tpu.matmul %91, %93, %cst_52 {dimension_numbers = #tpu.dot_dimension_numbers<[1], [0], [0], [1], [0, 0, 1, 1], [], []>} : vector<512x32xbf16>, vector<32x32xbf16>, vector<512x32xf32> -> vector<512x32xf32>
    %95 = arith.addf %86, %94 : vector<512x32xf32>
    %96 = arith.truncf %90 : vector<512x32xf32> to vector<512x32xbf16>
    %c6_53 = arith.constant 6 : index
    %c0_54 = arith.constant 0 : index
    %c0_55 = arith.constant 0 : index
    %97 = vector.load %arg4[%c6_53, %c0_54, %c0_55] : memref<9x32x32xbf16, #tpu.memory_space<vmem>>, vector<1x32x32xbf16>
    %98 = vector.shape_cast %97 : vector<1x32x32xbf16> to vector<32x32xbf16>
    %cst_56 = arith.constant dense<0.000000e+00> : vector<512x32xf32>
    %99 = tpu.matmul %96, %98, %cst_56 {dimension_numbers = #tpu.dot_dimension_numbers<[1], [0], [0], [1], [0, 0, 1, 1], [], []>} : vector<512x32xbf16>, vector<32x32xbf16>, vector<512x32xf32> -> vector<512x32xf32>
    %100 = arith.addf %95, %99 : vector<512x32xf32>
    %101 = vector.extract_strided_slice %0 {offsets = [0, 2, 1, 0], sizes = [2, 16, 16, 32], strides = [1, 1, 1, 1]} : vector<2x18x18x32xf32> to vector<2x16x16x32xf32>
    %102 = vector.shape_cast %101 : vector<2x16x16x32xf32> to vector<512x32xf32>
    %103 = vector.extract_strided_slice %1 {offsets = [0, 2, 1, 0], sizes = [2, 16, 16, 32], strides = [1, 1, 1, 1]} : vector<2x18x18x32xf32> to vector<2x16x16x32xf32>
    %104 = vector.shape_cast %103 : vector<2x16x16x32xf32> to vector<512x32xf32>
    %105 = arith.truncf %102 : vector<512x32xf32> to vector<512x32xbf16>
    %c7 = arith.constant 7 : index
    %c0_57 = arith.constant 0 : index
    %c0_58 = arith.constant 0 : index
    %106 = vector.load %arg3[%c7, %c0_57, %c0_58] : memref<9x32x32xbf16, #tpu.memory_space<vmem>>, vector<1x32x32xbf16>
    %107 = vector.shape_cast %106 : vector<1x32x32xbf16> to vector<32x32xbf16>
    %cst_59 = arith.constant dense<0.000000e+00> : vector<512x32xf32>
    %108 = tpu.matmul %105, %107, %cst_59 {dimension_numbers = #tpu.dot_dimension_numbers<[1], [0], [0], [1], [0, 0, 1, 1], [], []>} : vector<512x32xbf16>, vector<32x32xbf16>, vector<512x32xf32> -> vector<512x32xf32>
    %109 = arith.addf %100, %108 : vector<512x32xf32>
    %110 = arith.truncf %104 : vector<512x32xf32> to vector<512x32xbf16>
    %c7_60 = arith.constant 7 : index
    %c0_61 = arith.constant 0 : index
    %c0_62 = arith.constant 0 : index
    %111 = vector.load %arg4[%c7_60, %c0_61, %c0_62] : memref<9x32x32xbf16, #tpu.memory_space<vmem>>, vector<1x32x32xbf16>
    %112 = vector.shape_cast %111 : vector<1x32x32xbf16> to vector<32x32xbf16>
    %cst_63 = arith.constant dense<0.000000e+00> : vector<512x32xf32>
    %113 = tpu.matmul %110, %112, %cst_63 {dimension_numbers = #tpu.dot_dimension_numbers<[1], [0], [0], [1], [0, 0, 1, 1], [], []>} : vector<512x32xbf16>, vector<32x32xbf16>, vector<512x32xf32> -> vector<512x32xf32>
    %114 = arith.addf %109, %113 : vector<512x32xf32>
    %115 = vector.extract_strided_slice %0 {offsets = [0, 2, 2, 0], sizes = [2, 16, 16, 32], strides = [1, 1, 1, 1]} : vector<2x18x18x32xf32> to vector<2x16x16x32xf32>
    %116 = vector.shape_cast %115 : vector<2x16x16x32xf32> to vector<512x32xf32>
    %117 = vector.extract_strided_slice %1 {offsets = [0, 2, 2, 0], sizes = [2, 16, 16, 32], strides = [1, 1, 1, 1]} : vector<2x18x18x32xf32> to vector<2x16x16x32xf32>
    %118 = vector.shape_cast %117 : vector<2x16x16x32xf32> to vector<512x32xf32>
    %119 = arith.truncf %116 : vector<512x32xf32> to vector<512x32xbf16>
    %c8 = arith.constant 8 : index
    %c0_64 = arith.constant 0 : index
    %c0_65 = arith.constant 0 : index
    %120 = vector.load %arg3[%c8, %c0_64, %c0_65] : memref<9x32x32xbf16, #tpu.memory_space<vmem>>, vector<1x32x32xbf16>
    %121 = vector.shape_cast %120 : vector<1x32x32xbf16> to vector<32x32xbf16>
    %cst_66 = arith.constant dense<0.000000e+00> : vector<512x32xf32>
    %122 = tpu.matmul %119, %121, %cst_66 {dimension_numbers = #tpu.dot_dimension_numbers<[1], [0], [0], [1], [0, 0, 1, 1], [], []>} : vector<512x32xbf16>, vector<32x32xbf16>, vector<512x32xf32> -> vector<512x32xf32>
    %123 = arith.addf %114, %122 : vector<512x32xf32>
    %124 = arith.truncf %118 : vector<512x32xf32> to vector<512x32xbf16>
    %c8_67 = arith.constant 8 : index
    %c0_68 = arith.constant 0 : index
    %c0_69 = arith.constant 0 : index
    %125 = vector.load %arg4[%c8_67, %c0_68, %c0_69] : memref<9x32x32xbf16, #tpu.memory_space<vmem>>, vector<1x32x32xbf16>
    %126 = vector.shape_cast %125 : vector<1x32x32xbf16> to vector<32x32xbf16>
    %cst_70 = arith.constant dense<0.000000e+00> : vector<512x32xf32>
    %127 = tpu.matmul %124, %126, %cst_70 {dimension_numbers = #tpu.dot_dimension_numbers<[1], [0], [0], [1], [0, 0, 1, 1], [], []>} : vector<512x32xbf16>, vector<32x32xbf16>, vector<512x32xf32> -> vector<512x32xf32>
    %128 = arith.addf %123, %127 : vector<512x32xf32>
    %c0_71 = arith.constant 0 : index
    %c0_72 = arith.constant 0 : index
    %129 = vector.load %arg5[%c0_71, %c0_72] : memref<1x32xf32, #tpu.memory_space<vmem>>, vector<1x32xf32>
    %130 = vector.broadcast %129 : vector<1x32xf32> to vector<512x32xf32>
    %131 = arith.addf %128, %130 : vector<512x32xf32>
    %cst_73 = arith.constant 0.000000e+00 : f32
    %132 = vector.broadcast %cst_73 : f32 to vector<512x32xf32>
    %133 = arith.maximumf %131, %132 : vector<512x32xf32>
    %c0_74 = arith.constant 0 : index
    %c0_75 = arith.constant 0 : index
    %134 = vector.load %arg6[%c0_74, %c0_75] : memref<512x32xf32, #tpu.memory_space<vmem>>, vector<512x32xf32>
    tpu.vector_store %arg6[%c0_74, %c0_75], %133 {strides = array<i32>} : memref<512x32xf32, #tpu.memory_space<vmem>>, vector<512x32xf32>,
    return
  }
  func.func @transform_0(%arg0: i32) -> (i32, i32, i32, i32) {
    %c0_i32 = arith.constant 0 : i32
    %c0_i32_0 = arith.constant 0 : i32
    %c0_i32_1 = arith.constant 0 : i32
    %c0_i32_2 = arith.constant 0 : i32
    %c0_i32_3 = arith.constant 0 : i32
    return %c0_i32, %c0_i32_0, %c0_i32_1, %c0_i32_2 : i32, i32, i32, i32
  }
  func.func @transform_1(%arg0: i32) -> (i32, i32, i32, i32) {
    %c0_i32 = arith.constant 0 : i32
    %c0_i32_0 = arith.constant 0 : i32
    %c0_i32_1 = arith.constant 0 : i32
    %c0_i32_2 = arith.constant 0 : i32
    %c0_i32_3 = arith.constant 0 : i32
    return %c0_i32, %c0_i32_0, %c0_i32_1, %c0_i32_2 : i32, i32, i32, i32
  }
  func.func @transform_2(%arg0: i32) -> (i32, i32, i32) {
    %c0_i32 = arith.constant 0 : i32
    %c0_i32_0 = arith.constant 0 : i32
    %c0_i32_1 = arith.constant 0 : i32
    %c0_i32_2 = arith.constant 0 : i32
    return %c0_i32, %c0_i32_0, %c0_i32_1 : i32, i32, i32
  }
  func.func @transform_3(%arg0: i32) -> (i32, i32, i32) {
    %c0_i32 = arith.constant 0 : i32
    %c0_i32_0 = arith.constant 0 : i32
    %c0_i32_1 = arith.constant 0 : i32
    %c0_i32_2 = arith.constant 0 : i32
    return %c0_i32, %c0_i32_0, %c0_i32_1 : i32, i32, i32
  }
  func.func @transform_4(%arg0: i32) -> (i32, i32) {
    %c0_i32 = arith.constant 0 : i32
    %c0_i32_0 = arith.constant 0 : i32
    %c0_i32_1 = arith.constant 0 : i32
    return %c0_i32, %c0_i32_0 : i32, i32
  }
  func.func @transform_5(%arg0: i32) -> (i32, i32) {
    %c0_i32 = arith.constant 0 : i32
    %c0_i32_0 = arith.constant 0 : i32
    %c0_i32_1 = arith.constant 0 : i32
    return %c0_i32, %c0_i32_0 : i32, i32
  }
}

</mosaic_0001>

<bundles_post_ra>
// kernel: transformer_unet_forward.4
= control target key start
LH: loop header
LB: loop body
LE: loop exit
PB: predicated region body
PF: predicated region fallthrough
CT: control target
= control target key end

     0   :  { %s2951_s24 = smov 0   ;;  %s2953_s25 = smov 0   ;;  %s3562_s0 = inlined_call_operand.vmem [shape: f32[2,64,32], index: 0, kind: input, shape index: {}]   ;;  %s3563_s1 = inlined_call_operand.vmem [shape: f32[64,32], index: 1, kind: input, shape index: {}]   ;;  %s3564_s2 = inlined_call_operand.vmem [shape: bf16[32,32], index: 2, kind: input, shape index: {}]   ;;  %s3565_s3 = inlined_call_operand.vmem [shape: f32[1,32], index: 3, kind: input, shape index: {}]   ;;  %s3566_s4 = inlined_call_operand.vmem [shape: bf16[2,32,96], index: 4, kind: input, shape index: {}]   ;;  %s3567_s5 = inlined_call_operand.vmem [shape: f32[2,32,32], index: 5, kind: input, shape index: {}]   ;;  %s3568_s6 = inlined_call_operand.vmem [shape: f32[2,1,32], index: 6, kind: input, shape index: {}]   ;;  %s3569_s7 = inlined_call_operand.vmem [shape: f32[2,64,32], index: 7, kind: output, shape index: {}]  }
   0x1   :  { %s2955_s26 = smov 0   ;;  %s2957_s27 = smov 0  }
   0x2   :  { %s2959_s28 = smov 0  }
   0x3 LB: > { %s26_s29 = sadd.s32 1, %s2890_s26  ;;  %s29_s30 = sadd.s32 1, %s2894_s27  ;;  %s2898_s28 = sphi %s2959_s28, %s17_s28   ;;  %s2894_s27 = sphi %s2957_s27, %s3573_s27   ;;  %s2890_s26 = sphi %s2955_s26, %s3572_s26   ;;  %s2886_s25 = sphi %s2953_s25, %s3571_s25   ;;  %s2882_s24 = sphi %s2951_s24, %s3570_s24  }
   0x4   : > { %p27_p0 = scmp.ge.s32.totalorder %s26_s29, 2  ;;  %p2254_p1 = scmp.ge.s32.totalorder %s2898_s28, 1 }
   0x5   : > { %p277_p2 = scmp.lt.s32.totalorder %s2898_s28, 5 }
   0x6   : > { %s3575_s29 = smov (%p27_p0, %s26_s29), 0  ;;  %s3577_s30 = smov (!%p27_p0, %s29_s30), %s2894_s27 }
   0x7   : > { %p278_p3 = pnand %p2254_p1, %p277_p2  ;;  %p31_p4 = scmp.ge.s32.totalorder %s3577_s30, 2 }
   0x8   : > { %p322_p5 = scmp.lt.s32.totalorder (!%p278_p3), %s2886_s25, 1  ;;  %p327_p6 = scmp.lt.s32.totalorder (!%p278_p3), %s2882_s24, 1 }
   0x9   : > { %s3579_s30 = smov (%p31_p4, %s3577_s30), 0  ;;  %281 = sbr.rel (%p278_p3) target bundleno = 2443 (0x98b), region = 48 }
   0xa   : > { %p2263_p7 = scmp.ne.s32.totalorder (!%p278_p3), %s2882_s24, 0 }
  0x10   : > { %s3581_s25 = smov (!%p322_p5, %s2886_s25), 1  ;;  %349 = sbr.rel (%p2263_p7) target bundleno = 247 (0xf7), region = 52 }
  0x11   : > { %s2985_s8 = scalar_select %p327_p6, %s2882_s24, 1 }
  0x12   : > { %s2329_s9 = sshll.u32 %s3581_s25, 6  ;;  %v2728_v0 = vld [vmem:[%s3564_s2] sm:$0xff] (!%p2263_p7)   ;;  %v2729_v1 = vld [vmem:[%s3564_s2 + $0x8] sm:$0xff] (!%p2263_p7)   ;;  %vm401_vm0 = vcmask (!%p2263_p7), 261120   ;;  %v360_v16 = vld [vmem:[%s3563_s1 + $0x10] sm:$0xff] (!%p2263_p7) }
  0x13   : > { %s2990_s12 = scalar_lea.vmem %s3562_s0, %s2329_s9  ;;  %s2330_s13 = sshll.u32 %s2985_s8, 4  ;;  %2429 = vmatprep.subr.bf16.mxu0 (!%p2263_p7), %v2728_v0  ;;  %2621 = vmatprep.subr.bf16.mxu1 (!%p2263_p7), %v2728_v0  ;;  %v358_v4 = vld [vmem:[%s3563_s1] sm:$0xff] (!%p2263_p7)  ;;  %v359_v5 = vld [vmem:[%s3563_s1 + $0x8] sm:$0xff] (!%p2263_p7)  ;;  %v361_v17 = vld [vmem:[%s3563_s1 + $0x18] sm:$0xff] (!%p2263_p7) }
  0x14   : > { %s2996_s16 = scalar_lea.vmem %s3566_s4, %s2330_s13  ;;  %s2331_s17 = sshll.u32 %s2985_s8, 5  ;;  %v350_v2 = vld [vmem:[%s2990_s12] sm:$0xff] (!%p2263_p7)  ;;  %v351_v3 = vld [vmem:[%s2990_s12 + $0x8] sm:$0xff] (!%p2263_p7)  ;;  %2430 = vmatpush3.bf16.msra.mxu0 (!%p2263_p7), %v2728_v0  ;;  %2623 = vmatpush3.bf16.msra.mxu1 (!%p2263_p7), %v2728_v0  ;;  %v352_v12 = vld [vmem:[%s2990_s12 + $0x10] sm:$0xff] (!%p2263_p7) }
  0x15   : > { %s3002_s20 = scalar_lea.vmem %s3567_s5, %s2331_s17  ;;  %s339_s23 = scalar_lea.vmem %s3568_s6, %s2985_s8  ;;  %v366_v6 = vadd.f32 (!%p2263_p7), %v358_v4, %v350_v2  ;;  %v354_v7 = vld [vmem:[%s2990_s12 + $0x20] sm:$0xff] (!%p2263_p7)  ;;  %v355_v8 = vld [vmem:[%s2990_s12 + $0x28] sm:$0xff] (!%p2263_p7)  ;;  %2431 = vmatprep.subr.bf16.mxu0 (!%p2263_p7), %v2729_v1  ;;  %2622 = vmatprep.subr.bf16.mxu1 (!%p2263_p7), %v2729_v1  ;;  %v367_v9 = vadd.f32 (!%p2263_p7), %v359_v5, %v351_v3  ;;  %v353_v15 = vld [vmem:[%s2990_s12 + $0x18] sm:$0xff] (!%p2263_p7)  ;;  %v368_v19 = vadd.f32 (!%p2263_p7), %v360_v16, %v352_v12 }
  0x16   : > { %s3011_s11 = scalar_lea.vmem %s3569_s7, %s2329_s9  ;;  %v362_v10 = vld [vmem:[%s3563_s1 + $0x20] sm:$0xff] (!%p2263_p7)  ;;  %v363_v11 = vld [vmem:[%s3563_s1 + $0x28] sm:$0xff] (!%p2263_p7)  ;;  %v369_v20 = vadd.f32 (!%p2263_p7), %v361_v17, %v353_v15  ;;  %v356_v21 = vld [vmem:[%s2990_s12 + $0x30] sm:$0xff] (!%p2263_p7) }
  0x17   : > { %v370_v13 = vadd.f32 %v362_v10, %v354_v7  ;;  %v371_v14 = vadd.f32 %v363_v11, %v355_v8  ;;  %v374_v18 = vpack.c.bf16 %v367_v9, %v366_v6  ;;  %v357_v22 = vld [vmem:[%s2990_s12 + $0x38] sm:$0xff]  ;;  %v364_v23 = vld [vmem:[%s3563_s1 + $0x30] sm:$0xff]  ;;  %v2264_v30 = vld [vmem:[%s3565_s3] ss:$0 sm:$0xff] }
  0x18   : > { %2432 = vmatpush3.bf16.msra.mxu0 %v2729_v1  ;;  %2624 = vmatpush3.bf16.msra.mxu1 %v2729_v1  ;;  %v365_v25 = vld [vmem:[%s3563_s1 + $0x38] sm:$0xff]  ;;  %v372_v26 = vadd.f32 %v364_v23, %v356_v21  ;;  %v375_v27 = vpack.c.bf16 %v369_v20, %v368_v19 }
  0x19   : > { %v376_v24 = vpack.c.bf16 %v371_v14, %v370_v13  ;;  %2433 = vmatprep.mubr.msk.bf16.mxu0 %vm401_vm0, %v374_v18  ;;  %v373_v28 = vadd.f32 %v365_v25, %v357_v22 }
  0x1b   : > { %2437 = vmatprep.mubr.msk.bf16.mxu1 %vm401_vm0, %v376_v24  ;;  %2434 = vmatmul.mubr.msk.bf16.vlgmr.msra.gmra.mrb[0].mxu0 %vm401_vm0, %v375_v27  ;;  %v377_v29 = vpack.c.bf16 %v373_v28, %v372_v26 }
  0x1d   : > { %2438 = vmatmul.mubr.msk.bf16.vlgmr.msra.gmra.mrb[0].mxu1 %vm401_vm0, %v377_v29 }
  0xee   : > { %v2435_v31 = vpop.f32.mrb[0].mxu0 }
  0xef   : > { %v457_v32 = vadd.f32 %v2435_v31, %v2264_v30  ;;  %v448_v33 = vpop.f32.mrb[1].mxu0 }
  0xf0   : > { %v2439_v34 = vpop.f32.mrb[0].mxu1  ;;  %v449_v35 = vadd.f32 %v2264_v30, %v448_v33  ;;  %v2436_v36 = vpop.f32.mrb[2].mxu0 }
  0xf1   : > { %481 = vst.msk [vmem:[#allocation2 + $0x10] sm:$0xff] %vm401_vm0, %v457_v32  ;;  %v473_v37 = vadd.f32 %v2439_v34, %v2264_v30  ;;  %v464_v38 = vpop.f32.mrb[1].mxu1  ;;  %v460_v39 = vadd.f32 %v2436_v36, %v2264_v30  ;;  %v451_v40 = vpop.f32.mrb[3].mxu0 }
  0xf2   : > { %479 = vst.msk [vmem:[#allocation2] sm:$0xff] %vm401_vm0, %v449_v35  ;;  %v465_v41 = vadd.f32 %v2264_v30, %v464_v38  ;;  %v2440_v42 = vpop.f32.mrb[2].mxu1  ;;  %v452_v43 = vadd.f32 %v2264_v30, %v451_v40 }
  0xf3   : > { %485 = vst.msk [vmem:[#allocation2 + $0x30] sm:$0xff] %vm401_vm0, %v473_v37  ;;  %482 = vst.msk [vmem:[#allocation2 + $0x18] sm:$0xff] %vm401_vm0, %v460_v39  ;;  %v476_v44 = vadd.f32 %v2440_v42, %v2264_v30  ;;  %v467_v45 = vpop.f32.mrb[3].mxu1 }
  0xf4   : > { %483 = vst.msk [vmem:[#allocation2 + $0x20] sm:$0xff] %vm401_vm0, %v465_v41  ;;  %480 = vst.msk [vmem:[#allocation2 + $0x8] sm:$0xff] %vm401_vm0, %v452_v43  ;;  %v468_v46 = vadd.f32 %v2264_v30, %v467_v45 }
  0xf5   : > { %486 = vst.msk [vmem:[#allocation2 + $0x38] sm:$0xff] %vm401_vm0, %v476_v44 }
  0xf6   : > { %484 = vst.msk [vmem:[#allocation2 + $0x28] sm:$0xff] %vm401_vm0, %v468_v46 }
  0xf7 PF: > { %v2730_v47 = vld [vmem:[%s2996_s16] sm:$0xff]   ;;  %v2731_v48 = vld [vmem:[%s2996_s16 + $0x8] sm:$0xff]   ;;  %vm515_vm1 = vcmask 261120   ;;  %vm614_vm2 = vcmask 64512   ;;  %s2900_s16 = smov 96   ;;  %s2901_s10 = smov 88  }
  0xf8   : > { %2441 = vmatprep.subr.bf16.mxu0 %v2730_v47  ;;  %v489_v52 = vld [vmem:[#allocation2 + $0x10] sm:$0xff]  ;;  %s2902_s13 = smov 120   ;;  %vm704_vm3 = vcmask 523264   ;;  %s2903_s14 = smov 64   ;;  %vm903_vm4 = vcmask 1043456  }
  0xf9   : > { %v487_v49 = vld [vmem:[#allocation2] sm:$0xff]  ;;  %2442 = vmatpush3.bf16.msra.mxu0 %v2730_v47  ;;  %s2904_s15 = smov 80   ;;  %s2905_s17 = smov 112  }
  0xfa   : > { %v490_v53 = vld [vmem:[#allocation2 + $0x18] sm:$0xff]  ;;  %2443 = vmatprep.subr.bf16.mxu0 %v2731_v48  ;;  %v493_v58 = vld [vmem:[#allocation2 + $0x30] sm:$0xff]  ;;  %s2906_s9 = smov 56   ;;  %s2907_s18 = smov 72  }
  0xfb   : > { %v488_v50 = vld [vmem:[#allocation2 + $0x8] sm:$0xff]  ;;  %v491_v54 = vld [vmem:[#allocation2 + $0x20] sm:$0xff]  ;;  %v496_v56 = vpack.c.bf16 %v490_v53, %v489_v52  ;;  %s2908_s19 = smov 104   ;;  %s2909_s21 = smov 48  }
  0xfc   : > { %v495_v51 = vpack.c.bf16 %v488_v50, %v487_v49  ;;  %v494_v59 = vld [vmem:[#allocation2 + $0x38] sm:$0xff]  ;;  %s2910_s22 = smov 40   ;;  %p2326_p8 = scmp.ne.s32.totalorder %s2882_s24, 1 }
  0xfd   : > { %v492_v55 = vld [vmem:[#allocation2 + $0x28] sm:$0xff]  ;;  %2444 = vmatpush3.bf16.msra.mxu0 %v2731_v48  ;;  %v498_v60 = vpack.c.bf16 %v494_v59, %v493_v58 }
  0xfe   : > { %2445 = vmatprep.mubr.msk.bf16.mxu0 %vm515_vm1, %v495_v51  ;;  %v497_v57 = vpack.c.bf16 %v492_v55, %v491_v54 }
 0x100   : > { %2446 = vmatmul.mubr.msk.bf16.vlgmr.msra.gmra.mrb[0].mxu0 %vm515_vm1, %v496_v56 }
 0x101   : > { %2449 = vmatprep.mubr.msk.bf16.mxu0 %vm515_vm1, %v497_v57 }
 0x108   : > { %2450 = vmatmul.mubr.msk.bf16.gmra.mrb[4].mxu0 %vm515_vm1, %v498_v60 }
 0x1d3   : > { %v2447_v61 = vpop.f32.mrb[0].mxu0 }
 0x1d4   : > { %v562_v62 = vpop.f32.mrb[1].mxu0 }
 0x1d5   : > { %v2448_v63 = vpop.f32.mrb[2].mxu0 }
 0x1d6   : > { %v3073_v0 = vpack.c.bf16 %v2448_v63, %v2447_v61  ;;  %v565_v1 = vpop.f32.mrb[3].mxu0 }
 0x1d7   : > { %v3075_v2 = vpack.c.bf16 %v565_v1, %v562_v62 }
 0x1d9   : > { %606 = vrot.lane.b32.xlu0 %v3075_v2, %s2900_s16  ;;  %2461 = vmatprep.mubr.msk.bf16.mxu1 %vm614_vm2, %v3075_v2 }
 0x1db   : > { %v2451_v3 = vpop.f32.mrb[4].mxu0 }
 0x1dc   : > { %v578_v4 = vpop.f32.mrb[5].mxu0 }
 0x1dd   : > { %608 = vrot.lane.b32.xlu0 %v3073_v0, %s2900_s16  ;;  %v2452_v5 = vpop.f32.mrb[6].mxu0 }
 0x1de   : > { %v3081_v6 = vpack.c.bf16 %v2452_v5, %v2451_v3  ;;  %v581_v7 = vpop.f32.mrb[7].mxu0 }
 0x1df   : > { %v3083_v8 = vpack.c.bf16 %v581_v7, %v578_v4 }
 0x1e1   : > { %994 = vrot.lane.b32.xlu0 %v3075_v2, %s2901_s10  ;;  %610 = vrot.lane.b32.xlu1 %v3083_v8, %s2900_s16 }
 0x1e5   : > { %998 = vrot.lane.b32.xlu0 %v3083_v8, %s2901_s10  ;;  %612 = vrot.lane.b32.xlu1 %v3081_v6, %s2900_s16 }
 0x1e9   : > { %986 = vrot.lane.b32.xlu0 %v3075_v2, %s2902_s13  ;;  %996 = vrot.lane.b32.xlu1 %v3073_v0, %s2901_s10 }
 0x1ed   : > { %990 = vrot.lane.b32.xlu0 %v3083_v8, %s2902_s13  ;;  %1000 = vrot.lane.b32.xlu1 %v3081_v6, %s2901_s10 }
 0x1f1   : > { %988 = vrot.lane.b32.xlu1 %v3073_v0, %s2902_s13 }
 0x1f5   : > { %992 = vrot.lane.b32.xlu1 %v3081_v6, %s2902_s13 }
 0x24b   : > { %v607_v9 = vpop.permute.xlu0 %606 }
 0x24c   : > { %2657 = vmatprep.subr.msk.bf16.mxu1 %vm614_vm2, %v607_v9  ;;  %v628_v10 = vsel %vm614_vm2, %v607_v9, 0 }
 0x24d   : > { %2454 = vmatpush3.bf16.xpose.msra.mxu1 %v628_v10 }
 0x24f   : > { %v609_v11 = vpop.permute.xlu0 %608 }
 0x250   : > { %2658 = vmatprep.subr.msk.bf16.mxu1 %vm614_vm2, %v609_v11  ;;  %v631_v12 = vsel %vm614_vm2, %v609_v11, 0 }
 0x253   : > { %v611_v13 = vpop.permute.xlu1 %610  ;;  %v995_v17 = vpop.permute.xlu0 %994 }
 0x254   : > { %v634_v14 = vsel %vm614_vm2, %v611_v13, 0  ;;  %v1015_v18 = vsel %vm614_vm2, %v995_v17, 0 }
 0x255   : > { %2456 = vmatpush3.bf16.xpose.msra.mxu1 %v631_v12 }
 0x256   : > { %2659 = vmatprep.subr.msk.bf16.mxu1 %vm614_vm2, %v611_v13 }
 0x257   : > { %v613_v15 = vpop.permute.xlu1 %612  ;;  %v999_v20 = vpop.permute.xlu0 %998 }
 0x258   : > { %v637_v16 = vsel %vm614_vm2, %v613_v15, 0  ;;  %v1021_v23 = vsel %vm614_vm2, %v999_v20, 0 }
 0x25b   : > { %v997_v19 = vpop.permute.xlu1 %996  ;;  %v987_v21 = vpop.permute.xlu0 %986 }
 0x25c   : > { %v1018_v22 = vsel %vm614_vm2, %v997_v19, 0 }
 0x25d   : > { %2458 = vmatpush3.bf16.xpose.msra.mxu1 %v634_v14 }
 0x25e   : > { %2660 = vmatprep.subr.msk.bf16.mxu1 %vm614_vm2, %v613_v15 }
 0x25f   : > { %v1001_v24 = vpop.permute.xlu1 %1000  ;;  %v991_v27 = vpop.permute.xlu0 %990 }
 0x260   : > { %v1024_v25 = vsel %vm614_vm2, %v1001_v24, 0 }
 0x263   : > { %v989_v26 = vpop.permute.xlu1 %988 }
 0x265   : > { %2460 = vmatpush3.bf16.xpose.msra.mxu1 %v637_v16 }
 0x266   : > { %2662 = vmatprep.subr.msk.bf16.mxu1 %vm614_vm2, %v995_v17 }
 0x267   : > { %v993_v28 = vpop.permute.xlu1 %992 }
 0x26c   : > { %2462 = vmatmul.mubr.msk.bf16.vlgmr.msra.gmra.mrb[0].mxu1 %vm614_vm2, %v3073_v0 }
 0x26d   : > { %2465 = vmatprep.mubr.msk.bf16.mxu1 %vm614_vm2, %v3083_v8  ;;  %2496 = vmatpush3.bf16.xpose.msra.mxu1 %v1015_v18 }
 0x26e   : > { %2663 = vmatprep.subr.msk.bf16.mxu1 %vm614_vm2, %v997_v19 }
 0x274   : > { %2466 = vmatmul.mubr.msk.bf16.gmra.mrb[4].mxu1 %vm614_vm2, %v3081_v6 }
 0x275   : > { %2498 = vmatpush3.bf16.xpose.msra.mxu1 %v1018_v22  ;;  %2503 = vmatprep.mubr.msk.bf16.mxu1 %vm614_vm2, %v987_v21 }
 0x276   : > { %2664 = vmatprep.subr.msk.bf16.mxu1 %vm614_vm2, %v999_v20 }
 0x27d   : > { %2500 = vmatpush3.bf16.xpose.msra.mxu1 %v1021_v23 }
 0x27e   : > { %2665 = vmatprep.subr.msk.bf16.mxu1 %vm614_vm2, %v1001_v24 }
 0x285   : > { %2502 = vmatpush3.bf16.xpose.msra.mxu1 %v1024_v25 }
 0x28c   : > { %2504 = vmatmul.mubr.msk.bf16.vlgmr.msra.gmra.mrb[8].mxu1 %vm614_vm2, %v989_v26 }
 0x28d   : > { %2507 = vmatprep.mubr.msk.bf16.mxu1 %vm614_vm2, %v991_v27 }
 0x294   : > { %2508 = vmatmul.mubr.msk.bf16.gmra.mrb[12].mxu1 %vm614_vm2, %v993_v28 }
 0x33f   : > { %v2463_v29 = vpop.f32.mrb[0].mxu1 }
 0x340   : > { %v673_v30 = vpop.f32.mrb[1].mxu1  ;;  %v711_v35 = vsel %vm704_vm3, %v2463_v29, -inf }
 0x341   : > { %v2464_v31 = vpop.f32.mrb[2].mxu1  ;;  %v705_v32 = vsel %vm704_vm3, %v673_v30, -inf }
 0x342   : > { %706 = vmax.xlane.f32.xlu0 %v705_v32  ;;  %v676_v33 = vpop.f32.mrb[3].mxu1  ;;  %v714_v39 = vsel %vm704_vm3, %v2464_v31, -inf }
 0x343   : > { %v708_v34 = vsel %vm704_vm3, %v676_v33, -inf }
 0x344   : > { %709 = vmax.xlane.f32.xlu1 %v708_v34 }
 0x346   : > { %712 = vmax.xlane.f32.xlu0 %v711_v35 }
 0x347   : > { %v2467_v36 = vpop.f32.mrb[4].mxu1 }
 0x348   : > { %v689_v37 = vpop.f32.mrb[5].mxu1  ;;  %v723_v42 = vsel %vm704_vm3, %v2467_v36, -inf }
 0x349   : > { %v2468_v38 = vpop.f32.mrb[6].mxu1  ;;  %v717_v40 = vsel %vm704_vm3, %v689_v37, -inf }
 0x34a   : > { %715 = vmax.xlane.f32.xlu0 %v714_v39  ;;  %718 = vmax.xlane.f32.xlu1 %v717_v40  ;;  %v692_v41 = vpop.f32.mrb[7].mxu1  ;;  %v726_v44 = vsel %vm704_vm3, %v2468_v38, -inf }
 0x34b   : > { %v720_v43 = vsel %vm704_vm3, %v692_v41, -inf }
 0x34e   : > { %724 = vmax.xlane.f32.xlu1 %v723_v42  ;;  %721 = vmax.xlane.f32.xlu0 %v720_v43 }
 0x352   : > { %727 = vmax.xlane.f32.xlu0 %v726_v44 }
 0x35f   : > { %797 = vrot.lane.b32.xlu1 %v3075_v2, %s2903_s14  ;;  %v3131_v45 = vpop.f32.mrb[8].mxu1 }
 0x360   : > { %v3133_v46 = vpop.f32.mrb[9].mxu1 }
 0x361   : > { %v3135_v47 = vpop.f32.mrb[10].mxu1  ;;  %v1091_v34 = vsel %vm704_vm3, %v3133_v46, -inf }
 0x362   : > { %v3137_v48 = vpop.f32.mrb[11].mxu1 }
 0x363   : > { %v1094_v35 = vsel %vm704_vm3, %v3137_v48, -inf }
 0x367   : > { %v3139_v49 = vpop.f32.mrb[12].mxu1 }
 0x368   : > { %v3141_v50 = vpop.f32.mrb[13].mxu1  ;;  %v1109_v39 = vsel %vm704_vm3, %v3139_v49, -inf }
 0x369   : > { %v3143_v51 = vpop.f32.mrb[14].mxu1 }
 0x36a   : > { %v3145_v52 = vpop.f32.mrb[15].mxu1 }
 0x36b   : > { %v1106_v40 = vsel %vm704_vm3, %v3145_v52, -inf }
 0x3cf   : > { %v707_v53 = vpop.xlane.xlu0 %706 }
 0x3d0   : > { %v729_v54 = vsub.f32 %v673_v30, %v707_v53 }
 0x3d1   : > { %v710_v55 = vpop.xlane.xlu1 %709 }
 0x3d2   : > { %v737_v58 = vmul.f32 1.442695, %v729_v54  ;;  %v730_v59 = vsub.f32 %v676_v33, %v710_v55 }
 0x3d3   : > { %v713_v56 = vpop.xlane.xlu0 %712 }
 0x3d4   : > { %v731_v57 = vsub.f32 %v2463_v29, %v713_v56  ;;  %v739_v1 = vmul.f32 1.442695, %v730_v59 }
 0x3d6   : > { %v741_v60 = vmul.f32 1.442695, %v731_v57 }
 0x3d7   : > { %v716_v61 = vpop.xlane.xlu0 %715  ;;  %v719_v62 = vpop.xlane.xlu1 %718 }
 0x3d8   : > { %2732 = vpow2.f32 %v741_v60  ;;  %v732_v63 = vsub.f32 %v2464_v31, %v716_v61  ;;  %v733_v4 = vsub.f32 %v689_v37, %v719_v62  ;;  %v1103_v37 = vsel %vm704_vm3, %v3141_v50, -inf }
 0x3d9   : > { %2734 = vpow2.f32 %v737_v58 }
 0x3da   : > { %v743_v3 = vmul.f32 1.442695, %v732_v63  ;;  %v745_v12 = vmul.f32 1.442695, %v733_v4 }
 0x3db   : > { %v722_v5 = vpop.xlane.xlu0 %721  ;;  %v725_v7 = vpop.xlane.xlu1 %724 }
 0x3dc   : > { %2736 = vpow2.f32 %v743_v3  ;;  %v735_v9 = vsub.f32 %v2467_v36, %v725_v7  ;;  %v734_v10 = vsub.f32 %v692_v41, %v722_v5  ;;  %v1097_v36 = vsel %vm704_vm3, %v3131_v45, -inf  ;;  %v593_v7 = vld [vmem:[%s3002_s20] sm:$0xff] }
 0x3dd   : > { %2738 = vpow2.f32 %v739_v1  ;;  %v1112_v41 = vsel %vm704_vm3, %v3143_v51, -inf }
 0x3de   : > { %v749_v11 = vmul.f32 1.442695, %v735_v9  ;;  %v747_v17 = vmul.f32 1.442695, %v734_v10 }
 0x3df   : > { %v728_v13 = vpop.xlane.xlu0 %727  ;;  %v798_v14 = vpop.permute.xlu1 %797 }
 0x3e0   : > { %v736_v15 = vsub.f32 %v2468_v38, %v728_v13  ;;  %2469 = vmatprep.subr.bf16.mxu0 %v798_v14  ;;  %2740 = vpow2.f32 %v749_v11  ;;  %v1100_v38 = vsel %vm704_vm3, %v3135_v47, -inf }
 0x3e1   : > { %2470 = vmatpush3.bf16.msra.mxu0 %v798_v14  ;;  %2742 = vpow2.f32 %v745_v12 }
 0x3e2   : > { %v3147_v16 = vpop.eup %2732  ;;  %v751_v18 = vmul.f32 1.442695, %v736_v15  ;;  %v890_v15 = vpack.c.bf16 %v593_v7, %v593_v7 }
 0x3e3   : > { %v759_v19 = vsel %vm704_vm3, %v3147_v16, 0.0  ;;  %v3151_v20 = vpop.eup %2734 }
 0x3e4   : > { %2744 = vpow2.f32 %v751_v18  ;;  %760 = vadd.xlane.f32.xlu1 %v759_v19  ;;  %v753_v22 = vsel %vm704_vm3, %v3151_v20, 0.0 }
 0x3e5   : > { %2746 = vpow2.f32 %v747_v17 }
 0x3e6   : > { %v3153_v21 = vpop.eup %2736 }
 0x3e7   : > { %v762_v23 = vsel %vm704_vm3, %v3153_v21, 0.0  ;;  %v3159_v24 = vpop.eup %2738 }
 0x3e8   : > { %754 = vadd.xlane.f32.xlu1 %v753_v22  ;;  %763 = vadd.xlane.f32.xlu0 %v762_v23  ;;  %v756_v26 = vsel %vm704_vm3, %v3159_v24, 0.0 }
 0x3ea   : > { %v3161_v25 = vpop.eup %2740 }
 0x3eb   : > { %v771_v27 = vsel %vm704_vm3, %v3161_v25, 0.0  ;;  %v3167_v28 = vpop.eup %2742 }
 0x3ec   : > { %757 = vadd.xlane.f32.xlu0 %v756_v26  ;;  %772 = vadd.xlane.f32.xlu1 %v771_v27  ;;  %v765_v32 = vsel %vm704_vm3, %v3167_v28, 0.0 }
 0x3ee   : > { %v3169_v29 = vpop.eup %2744 }
 0x3ef   : > { %v774_v30 = vsel %vm704_vm3, %v3169_v29, 0.0  ;;  %v3173_v31 = vpop.eup %2746 }
 0x3f0   : > { %775 = vadd.xlane.f32.xlu0 %v774_v30  ;;  %766 = vadd.xlane.f32.xlu1 %v765_v32  ;;  %v768_v33 = vsel %vm704_vm3, %v3173_v31, 0.0 }
 0x3f4   : > { %769 = vadd.xlane.f32.xlu0 %v768_v33 }
 0x401   : > { %801 = vrot.lane.b32.xlu1 %v3083_v8, %s2903_s14 }
 0x405   : > { %803 = vrot.lane.b32.xlu1 %v3081_v6, %s2903_s14 }
 0x409   : > { %1375 = vrot.lane.b32.xlu1 %v3073_v0, %s2904_s15 }
 0x40a   : > { %799 = vrot.lane.b32.xlu0 %v3073_v0, %s2903_s14 }
 0x40d   : > { %1379 = vrot.lane.b32.xlu1 %v3081_v6, %s2904_s15 }
 0x40e   : > { %1373 = vrot.lane.b32.xlu0 %v3075_v2, %s2904_s15 }
 0x411   : > { %1367 = vrot.lane.b32.xlu1 %v3073_v0, %s2905_s17 }
 0x412   : > { %1377 = vrot.lane.b32.xlu0 %v3083_v8, %s2904_s15 }
 0x415   : > { %1371 = vrot.lane.b32.xlu1 %v3081_v6, %s2905_s17 }
 0x416   : > { %1365 = vrot.lane.b32.xlu0 %v3075_v2, %s2905_s17 }
 0x41a   : > { %1369 = vrot.lane.b32.xlu0 %v3083_v8, %s2905_s17 }
 0x439   : > { %1092 = vmax.xlane.f32.xlu0 %v1091_v34  ;;  %1095 = vmax.xlane.f32.xlu1 %v1094_v35 }
 0x43d   : > { %1098 = vmax.xlane.f32.xlu0 %v1097_v36  ;;  %1104 = vmax.xlane.f32.xlu1 %v1103_v37 }
 0x441   : > { %1101 = vmax.xlane.f32.xlu0 %v1100_v38  ;;  %1110 = vmax.xlane.f32.xlu1 %v1109_v39 }
 0x445   : > { %1107 = vmax.xlane.f32.xlu0 %v1106_v40 }
 0x449   : > { %1113 = vmax.xlane.f32.xlu0 %v1112_v41 }
 0x452   : > { %1183 = vrot.lane.b32.xlu1 %v3075_v2, %s2906_s9 }
 0x471   : > { %v761_v42 = vpop.xlane.xlu1 %760 }
 0x475   : > { %v764_v43 = vpop.xlane.xlu0 %763  ;;  %v755_v44 = vpop.xlane.xlu1 %754 }
 0x476   : > { %2748 = vrcp.f32 %v755_v44 }
 0x479   : > { %v758_v53 = vpop.xlane.xlu0 %757  ;;  %v773_v54 = vpop.xlane.xlu1 %772 }
 0x47a   : > { %2750 = vrcp.f32 %v758_v53 }
 0x47b   : > { %2752 = vrcp.f32 %v764_v43 }
 0x47c   : > { %2754 = vrcp.f32 %v761_v42 }
 0x47d   : > { %v776_v55 = vpop.xlane.xlu0 %775  ;;  %v767_v56 = vpop.xlane.xlu1 %766 }
 0x47e   : > { %2756 = vrcp.f32 %v767_v56 }
 0x480   : > { %v2749_v58 = vpop.eup %2748 }
 0x481   : > { %v770_v57 = vpop.xlane.xlu0 %769  ;;  %v802_v59 = vpop.permute.xlu1 %801  ;;  %v785_v62 = vmul.f32 %v2749_v58, %v3151_v20 }
 0x482   : > { %2758 = vrcp.f32 %v770_v57 }
 0x483   : > { %2760 = vrcp.f32 %v776_v55 }
 0x484   : > { %v2751_v60 = vpop.eup %2750  ;;  %2762 = vrcp.f32 %v773_v54 }
 0x485   : > { %v800_v61 = vpop.permute.xlu0 %799  ;;  %v786_v63 = vmul.f32 %v2751_v60, %v3159_v24  ;;  %v804_v1 = vpop.permute.xlu1 %803 }
 0x486   : > { %2471 = vmatprep.subr.bf16.mxu0 %v800_v61  ;;  %v2753_v4 = vpop.eup %2752 }
 0x487   : > { %2472 = vmatpush3.bf16.msra.mxu0 %v800_v61  ;;  %v793_v3 = vpack.c.bf16 %v786_v63, %v785_v62  ;;  %v2755_v9 = vpop.eup %2754  ;;  %v788_v14 = vmul.f32 %v2753_v4, %v3153_v21  ;;  %v905_v21 = vsel %vm903_vm4, %v890_v15, 0 }
 0x488   : > { %2473 = vmatprep.subr.bf16.mxu0 %v802_v59  ;;  %v2757_v11 = vpop.eup %2756  ;;  %v787_v19 = vmul.f32 %v2755_v9, %v3147_v16 }
 0x489   : > { %v1374_v5 = vpop.permute.xlu0 %1373  ;;  %2477 = vmatprep.mubr.msk.bf16.mxu0 %vm704_vm3, %v793_v3  ;;  %v1376_v12 = vpop.permute.xlu1 %1375  ;;  %v789_v20 = vmul.f32 %v2757_v11, %v3167_v28 }
 0x48a   : > { %v1394_v10 = vsel %vm614_vm2, %v1374_v5, 0  ;;  %2667 = vmatprep.subr.msk.bf16.mxu1 %vm614_vm2, %v1374_v5  ;;  %v794_v22 = vpack.c.bf16 %v788_v14, %v787_v19  ;;  %v1397_v27 = vsel %vm614_vm2, %v1376_v12, 0 }
 0x48b   : > { %2474 = vmatpush3.bf16.msra.mxu0 %v802_v59  ;;  %2538 = vmatpush3.bf16.xpose.msra.mxu1 %v1394_v10 }
 0x48c   : > { %v2759_v13 = vpop.eup %2758  ;;  %2475 = vmatprep.subr.bf16.mxu0 %v804_v1  ;;  %2668 = vmatprep.subr.msk.bf16.mxu1 %vm614_vm2, %v1376_v12 }
 0x48d   : > { %v1378_v17 = vpop.permute.xlu0 %1377  ;;  %v790_v18 = vmul.f32 %v2759_v13, %v3173_v31  ;;  %v2761_v23 = vpop.eup %2760 }
 0x48e   : > { %v2763_v30 = vpop.eup %2762  ;;  %v792_v16 = vmul.f32 %v2761_v23, %v3169_v29  ;;  %v1400_v32 = vsel %vm614_vm2, %v1378_v17, 0  ;;  %v1380_v33 = vpop.permute.xlu1 %1379 }
 0x48f   : > { %2476 = vmatpush3.bf16.msra.mxu0 %v804_v1  ;;  %v795_v26 = vpack.c.bf16 %v790_v18, %v789_v20  ;;  %v791_v28 = vmul.f32 %v2763_v30, %v3161_v25  ;;  %v1403_v34 = vsel %vm614_vm2, %v1380_v33, 0 }
 0x490   : > { %2661 = vmatprep.subr.msk.bf16.mxu0 %vm903_vm4, %v890_v15 }
 0x491   : > { %v1366_v24 = vpop.permute.xlu0 %1365  ;;  %v796_v31 = vpack.c.bf16 %v792_v16, %v791_v28 }
 0x492   : > { %2478 = vmatmul.mubr.msk.bf16.vlgmr.msra.gmra.mrb[8].mxu0 %vm704_vm3, %v794_v22  ;;  %2545 = vmatprep.mubr.msk.bf16.mxu1 %vm614_vm2, %v1366_v24  ;;  %v1368_v35 = vpop.permute.xlu1 %1367 }
 0x493   : > { %2481 = vmatprep.mubr.msk.bf16.mxu0 %vm704_vm3, %v795_v26  ;;  %2540 = vmatpush3.bf16.xpose.msra.mxu1 %v1397_v27 }
 0x494   : > { %2669 = vmatprep.subr.msk.bf16.mxu1 %vm614_vm2, %v1378_v17  ;;  %2486 = vmatpush3.bf16.msra.mxu0 %v905_v21 }
 0x495   : > { %v1370_v36 = vpop.permute.xlu0 %1369 }
 0x496   : > { %v1372_v29 = vpop.permute.xlu1 %1371 }
 0x49a   : > { %2482 = vmatmul.mubr.msk.bf16.gmra.mrb[12].mxu0 %vm704_vm3, %v796_v31 }
 0x49b   : > { %2542 = vmatpush3.bf16.xpose.msra.mxu1 %v1400_v32 }
 0x49c   : > { %2670 = vmatprep.subr.msk.bf16.mxu1 %vm614_vm2, %v1380_v33 }
 0x4a3   : > { %2544 = vmatpush3.bf16.xpose.msra.mxu1 %v1403_v34 }
 0x4aa   : > { %2546 = vmatmul.mubr.msk.bf16.vlgmr.msra.gmra.mrb[16].mxu1 %vm614_vm2, %v1368_v35 }
 0x4ab   : > { %2549 = vmatprep.mubr.msk.bf16.mxu1 %vm614_vm2, %v1370_v36 }
 0x4b2   : > { %2550 = vmatmul.mubr.msk.bf16.gmra.mrb[20].mxu1 %vm614_vm2, %v1372_v29 }
 0x4c6   : > { %v1093_v25 = vpop.xlane.xlu0 %1092  ;;  %v1096_v37 = vpop.xlane.xlu1 %1095 }
 0x4c7   : > { %v1115_v38 = vsub.f32 %v3133_v46, %v1093_v25  ;;  %v1116_v42 = vsub.f32 %v3137_v48, %v1096_v37 }
 0x4c9   : > { %v1123_v43 = vmul.f32 1.442695, %v1115_v38  ;;  %v1125_v56 = vmul.f32 1.442695, %v1116_v42 }
 0x4ca   : > { %v1099_v39 = vpop.xlane.xlu0 %1098  ;;  %v1105_v41 = vpop.xlane.xlu1 %1104 }
 0x4cb   : > { %v1117_v40 = vsub.f32 %v3131_v45, %v1099_v39  ;;  %v1119_v58 = vsub.f32 %v3141_v50, %v1105_v41 }
 0x4cd   : > { %v1127_v44 = vmul.f32 1.442695, %v1117_v40  ;;  %v1131_v48 = vmul.f32 1.442695, %v1119_v58 }
 0x4ce   : > { %v1102_v53 = vpop.xlane.xlu0 %1101  ;;  %v1111_v55 = vpop.xlane.xlu1 %1110 }
 0x4cf   : > { %2764 = vpow2.f32 %v1127_v44  ;;  %v1118_v54 = vsub.f32 %v3135_v47, %v1102_v53  ;;  %v1121_v57 = vsub.f32 %v3139_v49, %v1111_v55 }
 0x4d0   : > { %2766 = vpow2.f32 %v1123_v43 }
 0x4d1   : > { %v1129_v46 = vmul.f32 1.442695, %v1118_v54  ;;  %v1135_v59 = vmul.f32 1.442695, %v1121_v57 }
 0x4d2   : > { %v1108_v60 = vpop.xlane.xlu0 %1107  ;;  %v1184_v45 = vpop.permute.xlu1 %1183 }
 0x4d3   : > { %2768 = vpow2.f32 %v1129_v46  ;;  %2511 = vmatprep.subr.bf16.mxu0 %v1184_v45  ;;  %v1120_v61 = vsub.f32 %v3145_v52, %v1108_v60 }
 0x4d4   : > { %2770 = vpow2.f32 %v1125_v56 }
 0x4d5   : > { %2772 = vpow2.f32 %v1135_v59  ;;  %v1133_v49 = vmul.f32 1.442695, %v1120_v61 }
 0x4d6   : > { %v1114_v62 = vpop.xlane.xlu0 %1113  ;;  %2774 = vpow2.f32 %v1131_v48 }
 0x4d7   : > { %v1122_v47 = vsub.f32 %v3143_v51, %v1114_v62 }
 0x4d9   : > { %v3246_v63 = vpop.eup %2764  ;;  %v1137_v1 = vmul.f32 1.442695, %v1122_v47 }
 0x4da   : > { %v1145_v50 = vsel %vm704_vm3, %v3246_v63, 0.0  ;;  %v3250_v3 = vpop.eup %2766 }
 0x4db   : > { %2776 = vpow2.f32 %v1137_v1  ;;  %1146 = vadd.xlane.f32.xlu1 %v1145_v50  ;;  %v1139_v52 = vsel %vm704_vm3, %v3250_v3, 0.0 }
 0x4dc   : > { %2778 = vpow2.f32 %v1133_v49 }
 0x4dd   : > { %v3252_v4 = vpop.eup %2768 }
 0x4de   : > { %v3254_v5 = vpop.eup %2770  ;;  %v1148_v51 = vsel %vm704_vm3, %v3252_v4, 0.0 }
 0x4df   : > { %v3260_v7 = vpop.eup %2772  ;;  %1149 = vadd.xlane.f32.xlu0 %v1148_v51  ;;  %1140 = vadd.xlane.f32.xlu1 %v1139_v52  ;;  %v1142_v9 = vsel %vm704_vm3, %v3254_v5, 0.0 }
 0x4e0   : > { %v1157_v10 = vsel %vm704_vm3, %v3260_v7, 0.0  ;;  %v3266_v11 = vpop.eup %2774 }
 0x4e1   : > { %v1151_v14 = vsel %vm704_vm3, %v3266_v11, 0.0 }
 0x4e3   : > { %1143 = vadd.xlane.f32.xlu0 %v1142_v9  ;;  %1158 = vadd.xlane.f32.xlu1 %v1157_v10 }
 0x4e5   : > { %v3268_v12 = vpop.eup %2776 }
 0x4e6   : > { %v1160_v13 = vsel %vm704_vm3, %v3268_v12, 0.0  ;;  %v3274_v15 = vpop.eup %2778 }
 0x4e7   : > { %1161 = vadd.xlane.f32.xlu0 %v1160_v13  ;;  %1152 = vadd.xlane.f32.xlu1 %v1151_v14  ;;  %v1154_v17 = vsel %vm704_vm3, %v3274_v15, 0.0 }
 0x4eb   : > { %1155 = vadd.xlane.f32.xlu0 %v1154_v17 }
 0x4f8   : > { %1187 = vrot.lane.b32.xlu1 %v3083_v8, %s2906_s9 }
 0x4fc   : > { %1189 = vrot.lane.b32.xlu1 %v3081_v6, %s2906_s9 }
 0x500   : > { %1754 = vrot.lane.b32.xlu1 %v3073_v0, %s2907_s18 }
 0x501   : > { %1185 = vrot.lane.b32.xlu0 %v3073_v0, %s2906_s9 }
 0x504   : > { %1758 = vrot.lane.b32.xlu1 %v3081_v6, %s2907_s18 }
 0x505   : > { %1752 = vrot.lane.b32.xlu0 %v3075_v2, %s2907_s18 }
 0x508   : > { %1746 = vrot.lane.b32.xlu1 %v3073_v0, %s2908_s19 }
 0x509   : > { %1756 = vrot.lane.b32.xlu0 %v3083_v8, %s2907_s18 }
 0x50c   : > { %1750 = vrot.lane.b32.xlu1 %v3081_v6, %s2908_s19 }
 0x50d   : > { %1744 = vrot.lane.b32.xlu0 %v3075_v2, %s2908_s19 }
 0x511   : > { %1748 = vrot.lane.b32.xlu0 %v3083_v8, %s2908_s19 }
 0x565   : > { %v2479_v18 = vpop.f32.mrb[8].mxu0 }
 0x566   : > { %v855_v19 = vpop.f32.mrb[9].mxu0 }
 0x567   : > { %v2480_v20 = vpop.f32.mrb[10].mxu0 }
 0x568   : > { %v887_v22 = vpack.c.bf16 %v2480_v20, %v2479_v18  ;;  %v858_v23 = vpop.f32.mrb[11].mxu0  ;;  %v1147_v24 = vpop.xlane.xlu1 %1146 }
 0x569   : > { %v886_v26 = vpack.c.bf16 %v858_v23, %v855_v19 }
 0x56b   : > { %2487 = vmatprep.mubr.msk.bf16.mxu0 %vm614_vm2, %v886_v26 }
 0x56c   : > { %v1150_v21 = vpop.xlane.xlu0 %1149  ;;  %2488 = vmatmul.mubr.msk.bf16.vlgmr.msra.gmra.mrb[16].mxu0 %vm614_vm2, %v887_v22  ;;  %v1141_v27 = vpop.xlane.xlu1 %1140 }
 0x56d   : > { %2512 = vmatpush3.bf16.msra.mxu0 %v1184_v45  ;;  %v2483_v30 = vpop.f32.mrb[12].mxu0  ;;  %2780 = vrcp.f32 %v1141_v27 }
 0x56e   : > { %v871_v16 = vpop.f32.mrb[13].mxu0 }
 0x56f   : > { %v2484_v28 = vpop.f32.mrb[14].mxu0 }
 0x570   : > { %v889_v31 = vpack.c.bf16 %v2484_v28, %v2483_v30  ;;  %v874_v32 = vpop.f32.mrb[15].mxu0  ;;  %v1144_v33 = vpop.xlane.xlu0 %1143 }
 0x571   : > { %v888_v34 = vpack.c.bf16 %v874_v32, %v871_v16  ;;  %2782 = vrcp.f32 %v1144_v33  ;;  %v1159_v35 = vpop.xlane.xlu1 %1158  ;;  %v594_v16 = vld [vmem:[%s3002_s20 + $0x8] sm:$0xff] }
 0x572   : > { %2784 = vrcp.f32 %v1150_v21 }
 0x573   : > { %2491 = vmatprep.mubr.msk.bf16.mxu0 %vm614_vm2, %v888_v34  ;;  %2786 = vrcp.f32 %v1147_v24 }
 0x574   : > { %2492 = vmatmul.mubr.msk.bf16.gmra.mrb[20].mxu0 %vm614_vm2, %v889_v31  ;;  %v1162_v36 = vpop.xlane.xlu0 %1161 }
 0x575   : > { %v1153_v29 = vpop.xlane.xlu1 %1152 }
 0x577   : > { %v2781_v37 = vpop.eup %2780 }
 0x578   : > { %v1156_v25 = vpop.xlane.xlu0 %1155  ;;  %v1171_v41 = vmul.f32 %v2781_v37, %v3250_v3 }
 0x579   : > { %2788 = vrcp.f32 %v1156_v25  ;;  %v1188_v38 = vpop.permute.xlu1 %1187 }
 0x57a   : > { %2790 = vrcp.f32 %v1153_v29 }
 0x57b   : > { %v2783_v39 = vpop.eup %2782  ;;  %2792 = vrcp.f32 %v1162_v36 }
 0x57c   : > { %v1186_v40 = vpop.permute.xlu0 %1185  ;;  %v1172_v42 = vmul.f32 %v2783_v39, %v3254_v5  ;;  %v2785_v46 = vpop.eup %2784  ;;  %2794 = vrcp.f32 %v1159_v35 }
 0x57d   : > { %v1190_v43 = vpop.permute.xlu1 %1189  ;;  %2513 = vmatprep.subr.bf16.mxu0 %v1186_v40  ;;  %v3298_v44 = vpop.f32.mrb[16].mxu1  ;;  %v1174_v49 = vmul.f32 %v2785_v46, %v3252_v4 }
 0x57e   : > { %2514 = vmatpush3.bf16.msra.mxu0 %v1186_v40  ;;  %v3300_v53 = vpop.f32.mrb[17].mxu1  ;;  %v1179_v54 = vpack.c.bf16 %v1172_v42, %v1171_v41  ;;  %v2787_v45 = vpop.eup %2786  ;;  %v1476_v62 = vsel %vm704_vm3, %v3298_v44, -inf }
 0x57f   : > { %2515 = vmatprep.subr.bf16.mxu0 %v1188_v38  ;;  %v3302_v55 = vpop.f32.mrb[18].mxu1  ;;  %v1470_v56 = vsel %vm704_vm3, %v3300_v53, -inf  ;;  %v1173_v5 = vmul.f32 %v2787_v45, %v3246_v63 }
 0x580   : > { %v3306_v57 = vpop.f32.mrb[19].mxu1  ;;  %1471 = vmax.xlane.f32.xlu0 %v1470_v56  ;;  %v1753_v58 = vpop.permute.xlu0 %1752  ;;  %2519 = vmatprep.mubr.msk.bf16.mxu0 %vm704_vm3, %v1179_v54  ;;  %v1479_v9 = vsel %vm704_vm3, %v3302_v55, -inf }
 0x581   : > { %v1773_v59 = vsel %vm614_vm2, %v1753_v58, 0  ;;  %2672 = vmatprep.subr.msk.bf16.mxu1 %vm614_vm2, %v1753_v58  ;;  %v1473_v60 = vsel %vm704_vm3, %v3306_v57, -inf  ;;  %v1755_v48 = vpop.permute.xlu1 %1754  ;;  %v1180_v13 = vpack.c.bf16 %v1174_v49, %v1173_v5 }
 0x582   : > { %2580 = vmatpush3.bf16.xpose.msra.mxu1 %v1773_v59  ;;  %1474 = vmax.xlane.f32.xlu1 %v1473_v60  ;;  %v1776_v17 = vsel %vm614_vm2, %v1755_v48, 0 }
 0x583   : > { %v2789_v61 = vpop.eup %2788  ;;  %2516 = vmatpush3.bf16.msra.mxu0 %v1188_v38  ;;  %2673 = vmatprep.subr.msk.bf16.mxu1 %vm614_vm2, %v1755_v48 }
 0x584   : > { %v2791_v47 = vpop.eup %2790  ;;  %2517 = vmatprep.subr.bf16.mxu0 %v1190_v43  ;;  %1477 = vmax.xlane.f32.xlu0 %v1476_v62  ;;  %v1757_v1 = vpop.permute.xlu0 %1756  ;;  %v1176_v3 = vmul.f32 %v2789_v61, %v3274_v15 }
 0x585   : > { %v3317_v50 = vpop.f32.mrb[20].mxu1  ;;  %v1175_v10 = vmul.f32 %v2791_v47, %v3266_v11  ;;  %v2793_v63 = vpop.eup %2792  ;;  %v1779_v21 = vsel %vm614_vm2, %v1757_v1, 0 }
 0x586   : > { %v3321_v51 = vpop.f32.mrb[21].mxu1  ;;  %v2795_v19 = vpop.eup %2794  ;;  %v1488_v20 = vsel %vm704_vm3, %v3317_v50, -inf  ;;  %v1178_v22 = vmul.f32 %v2793_v63, %v3268_v12  ;;  %v1276_v12 = vpack.c.bf16 %v594_v16, %v594_v16 }
 0x587   : > { %2518 = vmatpush3.bf16.msra.mxu0 %v1190_v43  ;;  %v3323_v52 = vpop.f32.mrb[22].mxu1  ;;  %v1482_v4 = vsel %vm704_vm3, %v3321_v51, -inf  ;;  %v1181_v18 = vpack.c.bf16 %v1176_v3, %v1175_v10  ;;  %v1177_v23 = vmul.f32 %v2795_v19, %v3260_v7  ;;  %v1759_v27 = vpop.permute.xlu1 %1758 }
 0x588   : > { %v3330_v14 = vpop.f32.mrb[23].mxu1  ;;  %1480 = vmax.xlane.f32.xlu0 %v1479_v9  ;;  %v1745_v15 = vpop.permute.xlu0 %1744  ;;  %1483 = vmax.xlane.f32.xlu1 %v1482_v4  ;;  %v1491_v24 = vsel %vm704_vm3, %v3323_v52, -inf  ;;  %v1782_v30 = vsel %vm614_vm2, %v1759_v27, 0  ;;  %v1290_v7 = vsel %vm903_vm4, %v1276_v12, 0 }
 0x589   : > { %2587 = vmatprep.mubr.msk.bf16.mxu1 %vm614_vm2, %v1745_v15  ;;  %v1485_v11 = vsel %vm704_vm3, %v3330_v14, -inf  ;;  %v1182_v26 = vpack.c.bf16 %v1178_v22, %v1177_v23  ;;  %2666 = vmatprep.subr.msk.bf16.mxu0 %vm903_vm4, %v1276_v12 }
 0x58a   : > { %2520 = vmatmul.mubr.msk.bf16.vlgmr.msra.gmra.mrb[24].mxu0 %vm704_vm3, %v1180_v13  ;;  %2582 = vmatpush3.bf16.xpose.msra.mxu1 %v1776_v17 }
 0x58b   : > { %2523 = vmatprep.mubr.msk.bf16.mxu0 %vm704_vm3, %v1181_v18  ;;  %2674 = vmatprep.subr.msk.bf16.mxu1 %vm614_vm2, %v1757_v1  ;;  %v1747_v28 = vpop.permute.xlu1 %1746 }
 0x58c   : > { %1486 = vmax.xlane.f32.xlu0 %v1485_v11  ;;  %1489 = vmax.xlane.f32.xlu1 %v1488_v20  ;;  %v1749_v31 = vpop.permute.xlu0 %1748 }
 0x58d   : > { %2528 = vmatpush3.bf16.msra.mxu0 %v1290_v7 }
 0x58f   : > { %v1751_v32 = vpop.permute.xlu1 %1750 }
 0x590   : > { %1492 = vmax.xlane.f32.xlu0 %v1491_v24 }
 0x592   : > { %2524 = vmatmul.mubr.msk.bf16.gmra.mrb[28].mxu0 %vm704_vm3, %v1182_v26  ;;  %2584 = vmatpush3.bf16.xpose.msra.mxu1 %v1779_v21 }
 0x593   : > { %2675 = vmatprep.subr.msk.bf16.mxu1 %vm614_vm2, %v1759_v27 }
 0x59a   : > { %2586 = vmatpush3.bf16.xpose.msra.mxu1 %v1782_v30 }
 0x59d   : > { %1562 = vrot.lane.b32.xlu1 %v3075_v2, %s2909_s21 }
 0x5a1   : > { %2588 = vmatmul.mubr.msk.bf16.vlgmr.msra.gmra.mrb[24].mxu1 %vm614_vm2, %v1747_v28 }
 0x5a2   : > { %2591 = vmatprep.mubr.msk.bf16.mxu1 %vm614_vm2, %v1749_v31 }
 0x5a9   : > { %2592 = vmatmul.mubr.msk.bf16.gmra.mrb[28].mxu1 %vm614_vm2, %v1751_v32 }
 0x60d   : > { %v1472_v33 = vpop.xlane.xlu0 %1471 }
 0x60e   : > { %v1494_v34 = vsub.f32 %v3300_v53, %v1472_v33 }
 0x60f   : > { %v1475_v35 = vpop.xlane.xlu1 %1474 }
 0x610   : > { %v1502_v25 = vmul.f32 1.442695, %v1494_v34  ;;  %v1495_v37 = vsub.f32 %v3306_v57, %v1475_v35 }
 0x611   : > { %v1478_v36 = vpop.xlane.xlu0 %1477 }
 0x612   : > { %v1496_v29 = vsub.f32 %v3298_v44, %v1478_v36  ;;  %v1504_v42 = vmul.f32 1.442695, %v1495_v37 }
 0x614   : > { %v1506_v38 = vmul.f32 1.442695, %v1496_v29 }
 0x615   : > { %v1481_v39 = vpop.xlane.xlu0 %1480  ;;  %v1484_v40 = vpop.xlane.xlu1 %1483 }
 0x616   : > { %2796 = vpow2.f32 %v1506_v38  ;;  %v1497_v41 = vsub.f32 %v3302_v55, %v1481_v39  ;;  %v1498_v54 = vsub.f32 %v3321_v51, %v1484_v40 }
 0x617   : > { %2798 = vpow2.f32 %v1502_v25 }
 0x618   : > { %v1508_v43 = vmul.f32 1.442695, %v1497_v41  ;;  %v1510_v46 = vmul.f32 1.442695, %v1498_v54 }
 0x619   : > { %v1487_v56 = vpop.xlane.xlu0 %1486  ;;  %v1490_v53 = vpop.xlane.xlu1 %1489 }
 0x61a   : > { %2800 = vpow2.f32 %v1508_v43  ;;  %v1500_v58 = vsub.f32 %v3317_v50, %v1490_v53  ;;  %v1499_v44 = vsub.f32 %v3330_v14, %v1487_v56 }
 0x61b   : > { %2802 = vpow2.f32 %v1504_v42 }
 0x61c   : > { %v1514_v57 = vmul.f32 1.442695, %v1500_v58  ;;  %v1512_v48 = vmul.f32 1.442695, %v1499_v44 }
 0x61d   : > { %v1493_v59 = vpop.xlane.xlu0 %1492  ;;  %v1563_v60 = vpop.permute.xlu1 %1562 }
 0x61e   : > { %v1501_v45 = vsub.f32 %v3323_v52, %v1493_v59  ;;  %2553 = vmatprep.subr.bf16.mxu0 %v1563_v60  ;;  %2804 = vpow2.f32 %v1514_v57 }
 0x61f   : > { %2806 = vpow2.f32 %v1510_v46 }
 0x620   : > { %v3365_v55 = vpop.eup %2796  ;;  %v1516_v61 = vmul.f32 1.442695, %v1501_v45 }
 0x621   : > { %v1524_v62 = vsel %vm704_vm3, %v3365_v55, 0.0  ;;  %v3369_v47 = vpop.eup %2798 }
 0x622   : > { %2808 = vpow2.f32 %v1516_v61  ;;  %1525 = vadd.xlane.f32.xlu1 %v1524_v62  ;;  %v1518_v50 = vsel %vm704_vm3, %v3369_v47, 0.0  ;;  %v595_v61 = vld [vmem:[%s3002_s20 + $0x10] sm:$0xff] }
 0x623   : > { %2810 = vpow2.f32 %v1512_v48 }
 0x624   : > { %v3371_v49 = vpop.eup %2800 }
 0x625   : > { %v1527_v1 = vsel %vm704_vm3, %v3371_v49, 0.0  ;;  %v3377_v3 = vpop.eup %2802 }
 0x626   : > { %1528 = vadd.xlane.f32.xlu0 %v1527_v1  ;;  %1519 = vadd.xlane.f32.xlu1 %v1518_v50  ;;  %v1521_v51 = vsel %vm704_vm3, %v3377_v3, 0.0 }
 0x628   : > { %v3379_v5 = vpop.eup %2804 }
 0x629   : > { %v1536_v52 = vsel %vm704_vm3, %v3379_v5, 0.0  ;;  %v3385_v9 = vpop.eup %2806 }
 0x62a   : > { %1522 = vadd.xlane.f32.xlu0 %v1521_v51  ;;  %1537 = vadd.xlane.f32.xlu1 %v1536_v52  ;;  %v1530_v14 = vsel %vm704_vm3, %v3385_v9, 0.0 }
 0x62c   : > { %v3387_v4 = vpop.eup %2808 }
 0x62d   : > { %v1539_v10 = vsel %vm704_vm3, %v3387_v4, 0.0  ;;  %v3391_v13 = vpop.eup %2810 }
 0x62e   : > { %1540 = vadd.xlane.f32.xlu0 %v1539_v10  ;;  %1531 = vadd.xlane.f32.xlu1 %v1530_v14  ;;  %v1533_v15 = vsel %vm704_vm3, %v3391_v13, 0.0 }
 0x632   : > { %1534 = vadd.xlane.f32.xlu0 %v1533_v15 }
 0x63f   : > { %1566 = vrot.lane.b32.xlu1 %v3083_v8, %s2909_s21 }
 0x643   : > { %1568 = vrot.lane.b32.xlu1 %v3081_v6, %s2909_s21 }
 0x648   : > { %1564 = vrot.lane.b32.xlu0 %v3073_v0, %s2909_s21 }
 0x65d   : > { %v2521_v63 = vpop.f32.mrb[24].mxu0 }
 0x65e   : > { %v1241_v17 = vpop.f32.mrb[25].mxu0 }
 0x65f   : > { %v2522_v18 = vpop.f32.mrb[26].mxu0 }
 0x660   : > { %v1273_v19 = vpack.c.bf16 %v2522_v18, %v2521_v63  ;;  %v1244_v11 = vpop.f32.mrb[27].mxu0 }
 0x661   : > { %v1272_v20 = vpack.c.bf16 %v1244_v11, %v1241_v17 }
 0x663   : > { %2529 = vmatprep.mubr.msk.bf16.mxu0 %vm614_vm2, %v1272_v20 }
 0x664   : > { %2530 = vmatmul.mubr.msk.bf16.vlgmr.msra.gmra.mrb[16].mxu0 %vm614_vm2, %v1273_v19 }
 0x665   : > { %2554 = vmatpush3.bf16.msra.mxu0 %v1563_v60  ;;  %v2525_v22 = vpop.f32.mrb[28].mxu0 }
 0x666   : > { %v1257_v23 = vpop.f32.mrb[29].mxu0 }
 0x667   : > { %v2526_v24 = vpop.f32.mrb[30].mxu0 }
 0x668   : > { %v1275_v26 = vpack.c.bf16 %v2526_v24, %v2525_v22  ;;  %v1260_v21 = vpop.f32.mrb[31].mxu0 }
 0x669   : > { %v1274_v27 = vpack.c.bf16 %v1260_v21, %v1257_v23 }
 0x66b   : > { %2533 = vmatprep.mubr.msk.bf16.mxu0 %vm614_vm2, %v1274_v27 }
 0x66c   : > { %2534 = vmatmul.mubr.msk.bf16.gmra.mrb[20].mxu0 %vm614_vm2, %v1275_v26 }
 0x674   : > { %v3407_v30 = vpop.f32.mrb[24].mxu1 }
 0x675   : > { %v3409_v16 = vpop.f32.mrb[25].mxu1  ;;  %v1855_v32 = vsel %vm704_vm3, %v3407_v30, -inf }
 0x676   : > { %v3411_v12 = vpop.f32.mrb[26].mxu1  ;;  %v1849_v7 = vsel %vm704_vm3, %v3409_v16, -inf }
 0x677   : > { %v3415_v28 = vpop.f32.mrb[27].mxu1  ;;  %1850 = vmax.xlane.f32.xlu0 %v1849_v7  ;;  %v1858_v36 = vsel %vm704_vm3, %v3411_v12, -inf }
 0x678   : > { %v1852_v31 = vsel %vm704_vm3, %v3415_v28, -inf }
 0x679   : > { %1853 = vmax.xlane.f32.xlu1 %v1852_v31 }
 0x67b   : > { %1856 = vmax.xlane.f32.xlu0 %v1855_v32 }
 0x67c   : > { %v3421_v33 = vpop.f32.mrb[28].mxu1 }
 0x67d   : > { %v3423_v34 = vpop.f32.mrb[29].mxu1  ;;  %v1867_v38 = vsel %vm704_vm3, %v3421_v33, -inf }
 0x67e   : > { %v3425_v35 = vpop.f32.mrb[30].mxu1  ;;  %v1861_v29 = vsel %vm704_vm3, %v3423_v34, -inf }
 0x67f   : > { %v3431_v25 = vpop.f32.mrb[31].mxu1  ;;  %1859 = vmax.xlane.f32.xlu0 %v1858_v36  ;;  %1862 = vmax.xlane.f32.xlu1 %v1861_v29  ;;  %v1870_v39 = vsel %vm704_vm3, %v3425_v35, -inf }
 0x680   : > { %v1864_v37 = vsel %vm704_vm3, %v3431_v25, -inf }
 0x683   : > { %1865 = vmax.xlane.f32.xlu0 %v1864_v37  ;;  %1868 = vmax.xlane.f32.xlu1 %v1867_v38 }
 0x687   : > { %1871 = vmax.xlane.f32.xlu0 %v1870_v39 }
 0x694   : > { %1941 = vrot.lane.b32.xlu1 %v3075_v2, %s2910_s22 }
 0x6af   : > { %v1526_v40 = vpop.xlane.xlu1 %1525 }
 0x6b3   : > { %v1529_v41 = vpop.xlane.xlu0 %1528  ;;  %v1520_v42 = vpop.xlane.xlu1 %1519 }
 0x6b4   : > { %2812 = vrcp.f32 %v1520_v42 }
 0x6b7   : > { %v1523_v43 = vpop.xlane.xlu0 %1522  ;;  %v1538_v54 = vpop.xlane.xlu1 %1537 }
 0x6b8   : > { %2814 = vrcp.f32 %v1523_v43 }
 0x6b9   : > { %2816 = vrcp.f32 %v1529_v41 }
 0x6ba   : > { %2818 = vrcp.f32 %v1526_v40 }
 0x6bb   : > { %v1541_v56 = vpop.xlane.xlu0 %1540  ;;  %v1532_v53 = vpop.xlane.xlu1 %1531 }
 0x6bc   : > { %2820 = vrcp.f32 %v1532_v53 }
 0x6be   : > { %v2813_v44 = vpop.eup %2812 }
 0x6bf   : > { %v1535_v58 = vpop.xlane.xlu0 %1534  ;;  %v1567_v46 = vpop.permute.xlu1 %1566  ;;  %v1550_v2 = vmul.f32 %v2813_v44, %v3369_v47  ;;  %v1655_v47 = vpack.c.bf16 %v595_v61, %v595_v61 }
 0x6c0   : > { %2822 = vrcp.f32 %v1535_v58 }
 0x6c1   : > { %2824 = vrcp.f32 %v1541_v56  ;;  %v1669_v63 = vsel %vm903_vm4, %v1655_v47, 0 }
 0x6c2   : > { %v2815_v57 = vpop.eup %2814  ;;  %2826 = vrcp.f32 %v1538_v54 }
 0x6c3   : > { %v1565_v59 = vpop.permute.xlu0 %1564  ;;  %v1551_v60 = vmul.f32 %v2815_v57, %v3377_v3  ;;  %v2817_v48 = vpop.eup %2816 }
 0x6c4   : > { %2555 = vmatprep.subr.bf16.mxu0 %v1565_v59  ;;  %v2819_v62 = vpop.eup %2818  ;;  %v1569_v50 = vpop.permute.xlu1 %1568  ;;  %v1553_v52 = vmul.f32 %v2817_v48, %v3371_v49 }
 0x6c5   : > { %2556 = vmatpush3.bf16.msra.mxu0 %v1565_v59  ;;  %v1558_v45 = vpack.c.bf16 %v1551_v60, %v1550_v2  ;;  %v1552_v10 = vmul.f32 %v2819_v62, %v3365_v55 }
 0x6c6   : > { %2557 = vmatprep.subr.bf16.mxu0 %v1567_v46  ;;  %v2821_v1 = vpop.eup %2820 }
 0x6c7   : > { %2561 = vmatprep.mubr.msk.bf16.mxu0 %vm704_vm3, %v1558_v45  ;;  %v1554_v14 = vmul.f32 %v2821_v1, %v3385_v9  ;;  %v1559_v15 = vpack.c.bf16 %v1553_v52, %v1552_v10 }
 0x6c9   : > { %2558 = vmatpush3.bf16.msra.mxu0 %v1567_v46 }
 0x6ca   : > { %v2823_v51 = vpop.eup %2822  ;;  %2559 = vmatprep.subr.bf16.mxu0 %v1569_v50 }
 0x6cb   : > { %v1555_v3 = vmul.f32 %v2823_v51, %v3391_v13  ;;  %v2825_v17 = vpop.eup %2824 }
 0x6cc   : > { %v2827_v19 = vpop.eup %2826  ;;  %v1557_v49 = vmul.f32 %v2825_v17, %v3387_v4 }
 0x6cd   : > { %2560 = vmatpush3.bf16.msra.mxu0 %v1569_v50  ;;  %v1560_v18 = vpack.c.bf16 %v1555_v3, %v1554_v14  ;;  %v1556_v55 = vmul.f32 %v2827_v19, %v3379_v5 }
 0x6ce   : > { %2671 = vmatprep.subr.msk.bf16.mxu0 %vm903_vm4, %v1655_v47 }
 0x6cf   : > { %v1561_v13 = vpack.c.bf16 %v1557_v49, %v1556_v55 }
 0x6d0   : > { %2562 = vmatmul.mubr.msk.bf16.vlgmr.msra.gmra.mrb[32].mxu0 %vm704_vm3, %v1559_v15 }
 0x6d1   : > { %2565 = vmatprep.mubr.msk.bf16.mxu0 %vm704_vm3, %v1560_v18  ;;  %2570 = vmatpush3.bf16.msra.mxu0 %v1669_v63 }
 0x6d8   : > { %2566 = vmatmul.mubr.msk.bf16.gmra.mrb[36].mxu0 %vm704_vm3, %v1561_v13 }
 0x704   : > { %v1851_v9 = vpop.xlane.xlu0 %1850 }
 0x705   : > { %v1873_v11 = vsub.f32 %v3409_v16, %v1851_v9 }
 0x706   : > { %v1854_v20 = vpop.xlane.xlu1 %1853 }
 0x707   : > { %v1881_v24 = vmul.f32 1.442695, %v1873_v11  ;;  %v1874_v26 = vsub.f32 %v3415_v28, %v1854_v20 }
 0x708   : > { %v1857_v22 = vpop.xlane.xlu0 %1856 }
 0x709   : > { %v1875_v23 = vsub.f32 %v3407_v30, %v1857_v22  ;;  %v1883_v5 = vmul.f32 1.442695, %v1874_v26 }
 0x70b   : > { %v1885_v21 = vmul.f32 1.442695, %v1875_v23 }
 0x70c   : > { %v1860_v27 = vpop.xlane.xlu0 %1859  ;;  %v1863_v7 = vpop.xlane.xlu1 %1862 }
 0x70d   : > { %2828 = vpow2.f32 %v1885_v21  ;;  %v1876_v4 = vsub.f32 %v3411_v12, %v1860_v27  ;;  %v1877_v32 = vsub.f32 %v3423_v34, %v1863_v7 }
 0x70e   : > { %2830 = vpow2.f32 %v1881_v24  ;;  %v596_v24 = vld [vmem:[%s3002_s20 + $0x18] sm:$0xff] }
 0x70f   : > { %v1887_v31 = vmul.f32 1.442695, %v1876_v4  ;;  %v1889_v37 = vmul.f32 1.442695, %v1877_v32 }
 0x710   : > { %v1866_v36 = vpop.xlane.xlu0 %1865  ;;  %v1869_v16 = vpop.xlane.xlu1 %1868 }
 0x711   : > { %2832 = vpow2.f32 %v1887_v31  ;;  %v1879_v29 = vsub.f32 %v3421_v33, %v1869_v16  ;;  %v1878_v30 = vsub.f32 %v3431_v25, %v1866_v36 }
 0x712   : > { %2834 = vpow2.f32 %v1883_v5  ;;  %v2034_v5 = vpack.c.bf16 %v596_v24, %v596_v24 }
 0x713   : > { %v1893_v28 = vmul.f32 1.442695, %v1879_v29  ;;  %v1891_v41 = vmul.f32 1.442695, %v1878_v30 }
 0x714   : > { %v1872_v38 = vpop.xlane.xlu0 %1871  ;;  %v1942_v39 = vpop.permute.xlu1 %1941  ;;  %v2048_v29 = vsel %vm903_vm4, %v2034_v5, 0 }
 0x715   : > { %v1880_v40 = vsub.f32 %v3425_v35, %v1872_v38  ;;  %2595 = vmatprep.subr.bf16.mxu0 %v1942_v39  ;;  %2836 = vpow2.f32 %v1893_v28 }
 0x716   : > { %2838 = vpow2.f32 %v1889_v37 }
 0x717   : > { %v3464_v12 = vpop.eup %2828  ;;  %v1895_v34 = vmul.f32 1.442695, %v1880_v40 }
 0x718   : > { %v1903_v42 = vsel %vm704_vm3, %v3464_v12, 0.0  ;;  %v2831_v33 = vpop.eup %2830 }
 0x719   : > { %2840 = vpow2.f32 %v1895_v34  ;;  %1904 = vadd.xlane.f32.xlu1 %v1903_v42  ;;  %v1897_v35 = vsel %vm704_vm3, %v2831_v33, 0.0 }
 0x71a   : > { %2842 = vpow2.f32 %v1891_v41 }
 0x71b   : > { %v3468_v25 = vpop.eup %2832 }
 0x71c   : > { %v1906_v43 = vsel %vm704_vm3, %v3468_v25, 0.0  ;;  %v2835_v54 = vpop.eup %2834 }
 0x71d   : > { %1907 = vadd.xlane.f32.xlu0 %v1906_v43  ;;  %1898 = vadd.xlane.f32.xlu1 %v1897_v35  ;;  %v1900_v53 = vsel %vm704_vm3, %v2835_v54, 0.0 }
 0x71f   : > { %v3473_v56 = vpop.eup %2836 }
 0x720   : > { %v1915_v58 = vsel %vm704_vm3, %v3473_v56, 0.0  ;;  %v3478_v44 = vpop.eup %2838 }
 0x721   : > { %1901 = vadd.xlane.f32.xlu0 %v1900_v53  ;;  %1916 = vadd.xlane.f32.xlu1 %v1915_v58  ;;  %v1909_v2 = vsel %vm704_vm3, %v3478_v44, 0.0 }
 0x723   : > { %v3480_v57 = vpop.eup %2840 }
 0x724   : > { %v1918_v46 = vsel %vm704_vm3, %v3480_v57, 0.0  ;;  %v3484_v59 = vpop.eup %2842 }
 0x725   : > { %1919 = vadd.xlane.f32.xlu0 %v1918_v46  ;;  %1910 = vadd.xlane.f32.xlu1 %v1909_v2  ;;  %v1912_v60 = vsel %vm704_vm3, %v3484_v59, 0.0 }
 0x729   : > { %1913 = vadd.xlane.f32.xlu0 %v1912_v60 }
 0x736   : > { %1945 = vrot.lane.b32.xlu1 %v3083_v8, %s2910_s22 }
 0x73a   : > { %1947 = vrot.lane.b32.xlu1 %v3081_v6, %s2910_s22 }
 0x73f   : > { %1943 = vrot.lane.b32.xlu0 %v3073_v0, %s2910_s22 }
 0x7a3   : > { %v2563_v45 = vpop.f32.mrb[32].mxu0 }
 0x7a4   : > { %v1620_v48 = vpop.f32.mrb[33].mxu0 }
 0x7a5   : > { %v2564_v61 = vpop.f32.mrb[34].mxu0 }
 0x7a6   : > { %v1652_v62 = vpack.c.bf16 %v2564_v61, %v2563_v45  ;;  %v1623_v1 = vpop.f32.mrb[35].mxu0  ;;  %v1905_v50 = vpop.xlane.xlu1 %1904 }
 0x7a7   : > { %v1651_v51 = vpack.c.bf16 %v1623_v1, %v1620_v48 }
 0x7a9   : > { %2571 = vmatprep.mubr.msk.bf16.mxu0 %vm614_vm2, %v1651_v51 }
 0x7aa   : > { %v1908_v52 = vpop.xlane.xlu0 %1907  ;;  %2572 = vmatmul.mubr.msk.bf16.vlgmr.msra.gmra.mrb[16].mxu0 %vm614_vm2, %v1652_v62  ;;  %v1899_v47 = vpop.xlane.xlu1 %1898 }
 0x7ab   : > { %2596 = vmatpush3.bf16.msra.mxu0 %v1942_v39  ;;  %v2567_v8 = vpop.f32.mrb[36].mxu0  ;;  %2844 = vrcp.f32 %v1899_v47 }
 0x7ac   : > { %v1636_v3 = vpop.f32.mrb[37].mxu0 }
 0x7ad   : > { %v2568_v6 = vpop.f32.mrb[38].mxu0 }
 0x7ae   : > { %v1654_v10 = vpack.c.bf16 %v2568_v6, %v2567_v8  ;;  %v1639_v0 = vpop.f32.mrb[39].mxu0  ;;  %v1902_v14 = vpop.xlane.xlu0 %1901 }
 0x7af   : > { %v1653_v15 = vpack.c.bf16 %v1639_v0, %v1636_v3  ;;  %2846 = vrcp.f32 %v1902_v14  ;;  %v1917_v63 = vpop.xlane.xlu1 %1916 }
 0x7b0   : > { %2848 = vrcp.f32 %v1908_v52 }
 0x7b1   : > { %2575 = vmatprep.mubr.msk.bf16.mxu0 %vm614_vm2, %v1653_v15  ;;  %2850 = vrcp.f32 %v1905_v50 }
 0x7b2   : > { %2576 = vmatmul.mubr.msk.bf16.gmra.mrb[20].mxu0 %vm614_vm2, %v1654_v10  ;;  %v1920_v17 = vpop.xlane.xlu0 %1919 }
 0x7b3   : > { %v1911_v18 = vpop.xlane.xlu1 %1910 }
 0x7b4   : > { %2852 = vrcp.f32 %v1911_v18 }
 0x7b5   : > { %v2845_v49 = vpop.eup %2844 }
 0x7b6   : > { %v1914_v19 = vpop.xlane.xlu0 %1913  ;;  %v1929_v11 = vmul.f32 %v2845_v49, %v2831_v33 }
 0x7b7   : > { %2854 = vrcp.f32 %v1914_v19  ;;  %v1946_v13 = vpop.permute.xlu1 %1945 }
 0x7b8   : > { %2856 = vrcp.f32 %v1920_v17 }
 0x7b9   : > { %v2847_v55 = vpop.eup %2846  ;;  %2858 = vrcp.f32 %v1917_v63 }
 0x7ba   : > { %v1944_v9 = vpop.permute.xlu0 %1943  ;;  %v1930_v20 = vmul.f32 %v2847_v55, %v2835_v54  ;;  %v2849_v23 = vpop.eup %2848 }
 0x7bb   : > { %2597 = vmatprep.subr.bf16.mxu0 %v1944_v9  ;;  %v2851_v26 = vpop.eup %2850  ;;  %v1948_v27 = vpop.permute.xlu1 %1947  ;;  %v1932_v4 = vmul.f32 %v2849_v23, %v3468_v25 }
 0x7bc   : > { %2598 = vmatpush3.bf16.msra.mxu0 %v1944_v9  ;;  %v1937_v22 = vpack.c.bf16 %v1930_v20, %v1929_v11  ;;  %v1931_v32 = vmul.f32 %v2851_v26, %v3464_v12 }
 0x7bd   : > { %2599 = vmatprep.subr.bf16.mxu0 %v1946_v13 }
 0x7be   : > { %2603 = vmatprep.mubr.msk.bf16.mxu0 %vm704_vm3, %v1937_v22  ;;  %v2853_v21 = vpop.eup %2852  ;;  %v1938_v16 = vpack.c.bf16 %v1932_v4, %v1931_v32 }
 0x7bf   : > { %v1933_v36 = vmul.f32 %v2853_v21, %v3478_v44  ;;  %v2289_v44 = vld [vmem:[%s339_s23] ss:$0 sm:$0xff] }
 0x7c0   : > { %2600 = vmatpush3.bf16.msra.mxu0 %v1946_v13 }
 0x7c1   : > { %v2855_v7 = vpop.eup %2854  ;;  %2601 = vmatprep.subr.bf16.mxu0 %v1948_v27 }
 0x7c2   : > { %v1934_v31 = vmul.f32 %v2855_v7, %v3484_v59  ;;  %v2857_v30 = vpop.eup %2856 }
 0x7c3   : > { %v2859_v37 = vpop.eup %2858  ;;  %v1936_v38 = vmul.f32 %v2857_v30, %v3480_v57 }
 0x7c4   : > { %2602 = vmatpush3.bf16.msra.mxu0 %v1948_v27  ;;  %v1939_v28 = vpack.c.bf16 %v1934_v31, %v1933_v36  ;;  %v1935_v39 = vmul.f32 %v2859_v37, %v3473_v56 }
 0x7c5   : > { %2676 = vmatprep.subr.msk.bf16.mxu0 %vm903_vm4, %v2034_v5 }
 0x7c6   : > { %v1940_v40 = vpack.c.bf16 %v1936_v38, %v1935_v39 }
 0x7c7   : > { %2604 = vmatmul.mubr.msk.bf16.vlgmr.msra.gmra.mrb[40].mxu0 %vm704_vm3, %v1938_v16 }
 0x7c8   : > { %2607 = vmatprep.mubr.msk.bf16.mxu0 %vm704_vm3, %v1939_v28  ;;  %2612 = vmatpush3.bf16.msra.mxu0 %v2048_v29 }
 0x7cf   : > { %2608 = vmatmul.mubr.msk.bf16.gmra.mrb[44].mxu0 %vm704_vm3, %v1940_v40 }
 0x89a   : > { %v2605_v12 = vpop.f32.mrb[40].mxu0 }
 0x89b   : > { %v1999_v41 = vpop.f32.mrb[41].mxu0 }
 0x89c   : > { %v2606_v34 = vpop.f32.mrb[42].mxu0 }
 0x89d   : > { %v2031_v42 = vpack.c.bf16 %v2606_v34, %v2605_v12  ;;  %v2002_v33 = vpop.f32.mrb[43].mxu0 }
 0x89e   : > { %v2030_v25 = vpack.c.bf16 %v2002_v33, %v1999_v41 }
 0x8a0   : > { %2613 = vmatprep.mubr.msk.bf16.mxu0 %vm614_vm2, %v2030_v25 }
 0x8a1   : > { %2614 = vmatmul.mubr.msk.bf16.vlgmr.msra.gmra.mrb[16].mxu0 %vm614_vm2, %v2031_v42 }
 0x8a2   : > { %v2609_v43 = vpop.f32.mrb[44].mxu0 }
 0x8a3   : > { %v2015_v35 = vpop.f32.mrb[45].mxu0 }
 0x8a4   : > { %v2610_v54 = vpop.f32.mrb[46].mxu0 }
 0x8a5   : > { %v2033_v53 = vpack.c.bf16 %v2610_v54, %v2609_v43  ;;  %v2018_v58 = vpop.f32.mrb[47].mxu0 }
 0x8a6   : > { %v2032_v56 = vpack.c.bf16 %v2018_v58, %v2015_v35 }
 0x8a8   : > { %2617 = vmatprep.mubr.msk.bf16.mxu0 %vm614_vm2, %v2032_v56 }
 0x8a9   : > { %2618 = vmatmul.mubr.msk.bf16.gmra.mrb[20].mxu0 %vm614_vm2, %v2033_v53 }
 0x974   : > { %v2615_v57 = vpop.f32.mrb[16].mxu0 }
 0x975   : > { %v2625_v46 = vadd.f32 %v2615_v57, %v2289_v44  ;;  %v2084_v59 = vpop.f32.mrb[17].mxu0 }
 0x976   : > { %v2626_v2 = vadd.f32 %v2289_v44, %v2084_v59  ;;  %v2616_v60 = vpop.f32.mrb[18].mxu0 }
 0x977   : > { %2125 = vst.msk [vmem:[#allocation2 + $0x10] sm:$0xff] %vm515_vm1, %v2625_v46  ;;  %v2627_v45 = vadd.f32 %v2616_v60, %v2289_v44  ;;  %v2087_v48 = vpop.f32.mrb[19].mxu0 }
 0x978   : > { %2123 = vst.msk [vmem:[#allocation2] sm:$0xff] %vm515_vm1, %v2626_v2  ;;  %v2628_v61 = vadd.f32 %v2289_v44, %v2087_v48 }
 0x979   : > { %2126 = vst.msk [vmem:[#allocation2 + $0x18] sm:$0xff] %vm515_vm1, %v2627_v45 }
 0x97a   : > { %2124 = vst.msk [vmem:[#allocation2 + $0x8] sm:$0xff] %vm515_vm1, %v2628_v61 }
 0x97c   : > { %v2619_v62 = vpop.f32.mrb[20].mxu0  ;;  %2134 = sbr.rel (%p2326_p8) target bundleno = 2443 (0x98b), region = 56 }
 0x97d   : > { %v2629_v1 = vadd.f32 %v2619_v62, %v2289_v44  ;;  %v2100_v50 = vpop.f32.mrb[21].mxu0 }
 0x97e   : > { %v2630_v51 = vadd.f32 %v2289_v44, %v2100_v50  ;;  %v2620_v52 = vpop.f32.mrb[22].mxu0  ;;  %v2137_v0 = vld [vmem:[#allocation2 + $0x10] sm:$0xff] (!%p2326_p8) }
 0x97f   : > { %2129 = vst.msk [vmem:[#allocation2 + $0x30] sm:$0xff] %vm515_vm1, %v2629_v1  ;;  %v2631_v47 = vadd.f32 %v2620_v52, %v2289_v44  ;;  %v2103_v8 = vpop.f32.mrb[23].mxu0  ;;  %v2135_v6 = vld [vmem:[#allocation2] sm:$0xff] (!%p2326_p8)  ;;  %2145 = vst.msk [vmem:[%s3011_s11 + $0x10] sm:$0xff] (!%p2326_p8), %vm515_vm1, %v2137_v0 }
 0x980   : > { %2127 = vst.msk [vmem:[#allocation2 + $0x20] sm:$0xff] %vm515_vm1, %v2630_v51  ;;  %v2632_v3 = vadd.f32 %v2289_v44, %v2103_v8  ;;  %2143 = vst.msk [vmem:[%s3011_s11] sm:$0xff] (!%p2326_p8), %vm515_vm1, %v2135_v6  ;;  %v2138_v14 = vld [vmem:[#allocation2 + $0x18] sm:$0xff] (!%p2326_p8) }
 0x981   : > { %2130 = vst.msk [vmem:[#allocation2 + $0x38] sm:$0xff] %vm515_vm1, %v2631_v47  ;;  %v2136_v10 = vld [vmem:[#allocation2 + $0x8] sm:$0xff] (!%p2326_p8)  ;;  %2146 = vst.msk [vmem:[%s3011_s11 + $0x18] sm:$0xff] (!%p2326_p8), %vm515_vm1, %v2138_v14 }
 0x982   : > { %2128 = vst.msk [vmem:[#allocation2 + $0x28] sm:$0xff] %vm515_vm1, %v2632_v3  ;;  %2144 = vst.msk [vmem:[%s3011_s11 + $0x8] sm:$0xff] (!%p2326_p8), %vm515_vm1, %v2136_v10 }
 0x986   : > { %v2141_v17 = vld [vmem:[#allocation2 + $0x30] sm:$0xff] }
 0x987   : > { %v2139_v15 = vld [vmem:[#allocation2 + $0x20] sm:$0xff]  ;;  %2149 = vst.msk [vmem:[%s3011_s11 + $0x30] sm:$0xff] %vm515_vm1, %v2141_v17 }
 0x988   : > { %2147 = vst.msk [vmem:[%s3011_s11 + $0x20] sm:$0xff] %vm515_vm1, %v2139_v15  ;;  %v2142_v18 = vld [vmem:[#allocation2 + $0x38] sm:$0xff] }
 0x989   : > { %v2140_v63 = vld [vmem:[#allocation2 + $0x28] sm:$0xff]  ;;  %2150 = vst.msk [vmem:[%s3011_s11 + $0x38] sm:$0xff] %vm515_vm1, %v2142_v18 }
 0x98a   : > { %2148 = vst.msk [vmem:[%s3011_s11 + $0x28] sm:$0xff] %vm515_vm1, %v2140_v63 }
 0x98b PF: > { %s17_s28 = sadd.s32 1, %s2898_s28   ;;  %s3570_s24 = smov %s2890_s26 }
 0x98c   : > { %p14_p9 = scmp.ge.s32.totalorder %s17_s28, 6   ;;  %s3571_s25 = smov %s2894_s27 }
 0x98d   : > { %s3572_s26 = smov %s3575_s29  ;;  %s3573_s27 = smov %s3579_s30 }
 0x98e   :  { %16 = sbr.rel (!%p14_p9) target bundleno = 3 (0x3), region = 95 }

// kernel: transformer_unet_forward.3
= control target key start
LH: loop header
LB: loop body
LE: loop exit
PB: predicated region body
PF: predicated region fallthrough
CT: control target
= control target key end

     0   :  { %vm91_vm0 = vcmask 1046528   ;;  %vm665_vm1 = vcmask 261120   ;;  %s1221_s1 = inlined_call_operand.vmem [shape: bf16[512,32], index: 1, kind: input, shape index: {}]   ;;  %s1222_s0 = inlined_call_operand.vmem [shape: f32[2,9,9,128], index: 0, kind: input, shape index: {}]   ;;  %s1223_s2 = inlined_call_operand.vmem [shape: f32[1,32], index: 2, kind: input, shape index: {}]   ;;  %s1224_s3 = inlined_call_operand.vmem [shape: f32[128,32], index: 3, kind: output, shape index: {}]  }
   0x1   :  { %v847_v0 = vld [vmem:[%s1221_s1 + $0x40] sm:$0xff]   ;;  %v851_v4 = vld [vmem:[%s1221_s1 + $0x48] sm:$0xff]   ;;  %v855_v8 = vld [vmem:[%s1221_s1 + $0x50] sm:$0xff]  }
   0x2   :  { %v848_v1 = vld [vmem:[%s1221_s1 + $0xc0] sm:$0xff]   ;;  %719 = vmatprep.subr.bf16.mxu0 %v847_v0  ;;  %v852_v5 = vld [vmem:[%s1221_s1 + $0xc8] sm:$0xff]   ;;  %v856_v9 = vld [vmem:[%s1221_s1 + $0xd0] sm:$0xff]  }
   0x3   :  { %v849_v2 = vld [vmem:[%s1221_s1] sm:$0xff]   ;;  %783 = vmatprep.subr.bf16.mxu1 %v848_v1  ;;  %v853_v6 = vld [vmem:[%s1221_s1 + $0x8] sm:$0xff]   ;;  %v857_v10 = vld [vmem:[%s1221_s1 + $0x10] sm:$0xff]  }
   0x4   :  { %v850_v3 = vld [vmem:[%s1221_s1 + $0x80] sm:$0xff]   ;;  %720 = vmatpush3.bf16.msra.mxu0 %v849_v2  ;;  %v854_v7 = vld [vmem:[%s1221_s1 + $0x88] sm:$0xff]   ;;  %v858_v11 = vld [vmem:[%s1221_s1 + $0x90] sm:$0xff]  }
   0x5   :  { %784 = vmatpush3.bf16.msra.mxu1 %v850_v3  ;;  %721 = vmatprep.subr.bf16.mxu0 %v851_v4  ;;  %v859_v12 = vld [vmem:[%s1221_s1 + $0x58] sm:$0xff]   ;;  %v863_v16 = vld [vmem:[%s1221_s1 + $0x60] sm:$0xff]   ;;  %v867_v20 = vld [vmem:[%s1221_s1 + $0x68] sm:$0xff]  }
   0x6   :  { %785 = vmatprep.subr.bf16.mxu1 %v852_v5  ;;  %v860_v13 = vld [vmem:[%s1221_s1 + $0xd8] sm:$0xff]   ;;  %v864_v17 = vld [vmem:[%s1221_s1 + $0xe0] sm:$0xff]   ;;  %v868_v21 = vld [vmem:[%s1221_s1 + $0xe8] sm:$0xff]  }
   0x7   :  { %v861_v14 = vld [vmem:[%s1221_s1 + $0x18] sm:$0xff]   ;;  %v865_v18 = vld [vmem:[%s1221_s1 + $0x20] sm:$0xff]   ;;  %v869_v22 = vld [vmem:[%s1221_s1 + $0x28] sm:$0xff]  }
   0x8   :  { %722 = vmatpush3.bf16.msra.mxu0 %v853_v6  ;;  %v862_v15 = vld [vmem:[%s1221_s1 + $0x98] sm:$0xff]   ;;  %v866_v19 = vld [vmem:[%s1221_s1 + $0xa0] sm:$0xff]   ;;  %v870_v23 = vld [vmem:[%s1221_s1 + $0xa8] sm:$0xff]  }
   0x9   :  { %786 = vmatpush3.bf16.msra.mxu1 %v854_v7  ;;  %723 = vmatprep.subr.bf16.mxu0 %v855_v8  ;;  %v871_v24 = vld [vmem:[%s1221_s1 + $0x70] sm:$0xff]   ;;  %v875_v28 = vld [vmem:[%s1221_s1 + $0x78] sm:$0xff]   ;;  %v15_v32 = vld [vmem:[%s1222_s0] sm:$0xff] }
   0xa   :  { %787 = vmatprep.subr.bf16.mxu1 %v856_v9  ;;  %v872_v25 = vld [vmem:[%s1221_s1 + $0xf0] sm:$0xff]   ;;  %v876_v29 = vld [vmem:[%s1221_s1 + $0xf8] sm:$0xff]   ;;  %v16_v33 = vld [vmem:[%s1222_s0 + $0x8] sm:$0x1]  ;;  %v92_v36 = vrot.slane %v15_v32, 1 }
   0xb   :  { %v873_v26 = vld [vmem:[%s1221_s1 + $0x30] sm:$0xff]   ;;  %v877_v30 = vld [vmem:[%s1221_s1 + $0x38] sm:$0xff]   ;;  %v93_v37 = vrot.slane %v16_v33, 1  ;;  %v19_v39 = vld [vmem:[%s1222_s0 + $0x20] sm:$0xff] }
   0xc   :  { %724 = vmatpush3.bf16.msra.mxu0 %v857_v10  ;;  %v874_v27 = vld [vmem:[%s1221_s1 + $0xb0] sm:$0xff]   ;;  %v878_v31 = vld [vmem:[%s1221_s1 + $0xb8] sm:$0xff]   ;;  %v20_v41 = vld [vmem:[%s1222_s0 + $0x28] sm:$0x1]  ;;  %v98_v46 = vrot.slane %v19_v39, 1 }
   0xd   :  { %788 = vmatpush3.bf16.msra.mxu1 %v858_v11  ;;  %725 = vmatprep.subr.bf16.mxu0 %v859_v12  ;;  %v17_v34 = vld [vmem:[%s1222_s0 + $0x10] sm:$0xff]  ;;  %v18_v35 = vld [vmem:[%s1222_s0 + $0x18] sm:$0x1]  ;;  %v94_v45 = vsel %vm91_vm0, %v92_v36, %v93_v37  ;;  %v99_v47 = vrot.slane %v20_v41, 1  ;;  %v1023_v49 = vld [vmem:[%s1222_s0 + $0x40] sm:$0xff] }
   0xe   :  { %789 = vmatprep.subr.bf16.mxu1 %v860_v13  ;;  %v95_v38 = vrot.slane %v17_v34, 1  ;;  %v96_v40 = vrot.slane %v18_v35, 1  ;;  %v21_v42 = vld [vmem:[%s1222_s0 + $0x30] sm:$0xff]  ;;  %v22_v43 = vld [vmem:[%s1222_s0 + $0x38] sm:$0x1]  ;;  %v51_v44 = vpack.c.bf16 %v17_v34, %v15_v32  ;;  %v104_v53 = vrot.slane %v1023_v49, 1 }
   0xf   :  { %v101_v48 = vrot.slane %v21_v42, 1  ;;  %v24_v50 = vld [vmem:[%s1222_s0 + $0x48] sm:$0x1]  ;;  %v102_v52 = vrot.slane %v22_v43, 1  ;;  %v25_v55 = vld [vmem:[%s1222_s0 + $0x50] sm:$0xff]  ;;  %v100_v58 = vsel %vm91_vm0, %v98_v46, %v99_v47  ;;  %v164_v59 = vpack.c.bf16 %v19_v39, %v17_v34  ;;  %v1040_v60 = vld [vmem:[%s1222_s0 + $0x60] sm:$0xff] }
  0x10   :  { %726 = vmatpush3.bf16.msra.mxu0 %v861_v14  ;;  %v97_v51 = vsel %vm91_vm0, %v95_v38, %v96_v40  ;;  %v105_v54 = vrot.slane %v24_v50, 1  ;;  %v26_v56 = vld [vmem:[%s1222_s0 + $0x58] sm:$0x1]  ;;  %v28_v61 = vld [vmem:[%s1222_s0 + $0x68] sm:$0x1]  ;;  %v107_v1 = vrot.slane %v25_v55, 1  ;;  %v52_v11 = vpack.c.bf16 %v21_v42, %v19_v39 }
  0x11   :  { %790 = vmatpush3.bf16.msra.mxu1 %v862_v15  ;;  %727 = vmatprep.subr.bf16.mxu0 %v863_v16  ;;  %v156_v57 = vpack.c.bf16 %v97_v51, %v94_v45  ;;  %v103_v62 = vsel %vm91_vm0, %v101_v48, %v102_v52  ;;  %v184_v63 = vpack.c.bf16 %v100_v58, %v97_v51  ;;  %v108_v4 = vrot.slane %v26_v56, 1  ;;  %v29_v9 = vld [vmem:[%s1222_s0 + $0x70] sm:$0xff]  ;;  %v30_v10 = vld [vmem:[%s1222_s0 + $0x78] sm:$0x1]  ;;  %v31_v12 = vld [vmem:[%s1222_s0 + $0x80] sm:$0xff] }
  0x12   :  { %791 = vmatprep.subr.bf16.mxu1 %v864_v17  ;;  %v106_v0 = vsel %vm91_vm0, %v104_v53, %v105_v54  ;;  %v157_v2 = vpack.c.bf16 %v103_v62, %v100_v58  ;;  %v110_v5 = vrot.slane %v1040_v60, 1  ;;  %v111_v6 = vrot.slane %v28_v61, 1  ;;  %v32_v13 = vld [vmem:[%s1222_s0 + $0x88] sm:$0x1]  ;;  %v41_v45 = vld [vmem:[%s1222_s0 + $0xd0] sm:$0xff]  ;;  %v43_v56 = vld [vmem:[%s1222_s0 + $0xe0] sm:$0xff] }
  0x13   :  { %487 = vmatprep.mubr.bf16.mxu0 %v156_v57  ;;  %v185_v3 = vpack.c.bf16 %v106_v0, %v103_v62  ;;  %584 = vmatprep.mubr.bf16.mxu1 %v184_v63  ;;  %v109_v7 = vsel %vm91_vm0, %v107_v1, %v108_v4  ;;  %v165_v14 = vpack.c.bf16 %v1023_v49, %v21_v42  ;;  %v113_v17 = vrot.slane %v29_v9, 1  ;;  %v39_v42 = vld [vmem:[%s1222_s0 + $0xc0] sm:$0xff]  ;;  %v40_v43 = vld [vmem:[%s1222_s0 + $0xc8] sm:$0x1]  ;;  %v42_v46 = vld [vmem:[%s1222_s0 + $0xd8] sm:$0x1] }
  0x14   :  { %728 = vmatpush3.bf16.msra.mxu0 %v865_v18  ;;  %v112_v8 = vsel %vm91_vm0, %v110_v5, %v111_v6  ;;  %v158_v15 = vpack.c.bf16 %v109_v7, %v106_v0  ;;  %v114_v18 = vrot.slane %v30_v10, 1  ;;  %v167_v47 = vpack.c.bf16 %v31_v12, %v29_v9  ;;  %v44_v57 = vld [vmem:[%s1222_s0 + $0xe8] sm:$0x1]  ;;  %v47_v6 = vld [vmem:[%s1222_s0 + $0x100] sm:$0xff]  ;;  %v50_v10 = vld [vmem:[%s1222_s0 + $0x118] sm:$0x1] }
  0x15   :  { %792 = vmatpush3.bf16.msra.mxu1 %v866_v19  ;;  %729 = vmatprep.subr.bf16.mxu0 %v867_v20  ;;  %v186_v16 = vpack.c.bf16 %v112_v8, %v109_v7  ;;  %v176_v19 = vrot.slane %v31_v12, 1  ;;  %v177_v20 = vrot.slane %v32_v13, 1  ;;  %v125_v50 = vrot.slane %v39_v42, 1  ;;  %v48_v7 = vld [vmem:[%s1222_s0 + $0x108] sm:$0x1] }
  0x16   :  { %793 = vmatprep.subr.bf16.mxu1 %v868_v21  ;;  %v115_v21 = vsel %vm91_vm0, %v113_v17, %v114_v18  ;;  %v126_v51 = vrot.slane %v40_v43, 1  ;;  %v128_v52 = vrot.slane %v41_v45, 1  ;;  %v129_v53 = vrot.slane %v42_v46, 1 }
  0x17   :  { %v131_v0 = vrot.slane %v43_v56, 1  ;;  %v132_v1 = vrot.slane %v44_v57, 1  ;;  %v180_v17 = vrot.slane %v50_v10, 1 }
  0x18   :  { %730 = vmatpush3.bf16.msra.mxu0 %v869_v22  ;;  %v33_v22 = vld [vmem:[%s1222_s0 + $0x90] sm:$0xff]  ;;  %v127_v54 = vsel %vm91_vm0, %v125_v50, %v126_v51 }
  0x19   :  { %794 = vmatpush3.bf16.msra.mxu1 %v870_v23  ;;  %731 = vmatprep.subr.bf16.mxu0 %v871_v24  ;;  %v178_v23 = vsel %vm91_vm0, %v176_v19, %v177_v20  ;;  %v34_v24 = vld [vmem:[%s1222_s0 + $0x98] sm:$0x1]  ;;  %v116_v32 = vrot.slane %v33_v22, 1  ;;  %v133_v4 = vsel %vm91_vm0, %v131_v0, %v132_v1  ;;  %v57_v20 = vpack.c.bf16 %v43_v56, %v41_v45 }
  0x1a   :  { %795 = vmatprep.subr.bf16.mxu1 %v872_v25  ;;  %v35_v25 = vld [vmem:[%s1222_s0 + $0xa0] sm:$0xff]  ;;  %v187_v33 = vpack.c.bf16 %v178_v23, %v115_v21  ;;  %v117_v34 = vrot.slane %v34_v24, 1 }
  0x1b   :  { %v119_v35 = vrot.slane %v35_v25, 1  ;;  %v55_v58 = vpack.c.bf16 %v35_v25, %v33_v22 }
  0x1c   :  { %732 = vmatpush3.bf16.msra.mxu0 %v873_v26  ;;  %v36_v26 = vld [vmem:[%s1222_s0 + $0xa8] sm:$0x1]  ;;  %v118_v39 = vsel %vm91_vm0, %v116_v32, %v117_v34 }
  0x1d   :  { %796 = vmatpush3.bf16.msra.mxu1 %v874_v27  ;;  %733 = vmatprep.subr.bf16.mxu0 %v875_v28  ;;  %v53_v27 = vpack.c.bf16 %v25_v55, %v1023_v49  ;;  %v1081_v28 = vld [vmem:[%s1222_s0 + $0xb0] sm:$0xff]  ;;  %v120_v36 = vrot.slane %v36_v26, 1 }
  0x1e   :  { %797 = vmatprep.subr.bf16.mxu1 %v876_v29  ;;  %v38_v29 = vld [vmem:[%s1222_s0 + $0xb8] sm:$0x1]  ;;  %v122_v37 = vrot.slane %v1081_v28, 1  ;;  %v168_v61 = vpack.c.bf16 %v1081_v28, %v35_v25 }
  0x1f   :  { %v123_v38 = vrot.slane %v38_v29, 1  ;;  %v121_v40 = vsel %vm91_vm0, %v119_v35, %v120_v36 }
  0x20   :  { %734 = vmatpush3.bf16.msra.mxu0 %v877_v30  ;;  %v166_v30 = vpack.c.bf16 %v1040_v60, %v25_v55  ;;  %v160_v48 = vpack.c.bf16 %v121_v40, %v118_v39  ;;  %v130_v55 = vsel %vm91_vm0, %v128_v52, %v129_v53 }
  0x21   :  { %798 = vmatpush3.bf16.msra.mxu1 %v878_v31  ;;  %v159_v31 = vpack.c.bf16 %v115_v21, %v112_v8  ;;  %v124_v41 = vsel %vm91_vm0, %v122_v37, %v123_v38  ;;  %v189_v63 = vpack.c.bf16 %v130_v55, %v127_v54  ;;  %v56_v8 = vpack.c.bf16 %v39_v42, %v1081_v28  ;;  %v1139_v28 = vld [vmem:[%s1223_s2] ss:$0 sm:$0xff] }
  0x22   :  { %v188_v49 = vpack.c.bf16 %v124_v41, %v121_v40  ;;  %v161_v62 = vpack.c.bf16 %v127_v54, %v124_v41  ;;  %v162_v12 = vpack.c.bf16 %v133_v4, %v130_v55 }
  0x23   :  { %488 = vmatmul.mubr.bf16.vlgmr.msra.gmra.mrb[0].mxu0 %v51_v44  ;;  %v54_v44 = vpack.c.bf16 %v29_v9, %v1040_v60  ;;  %v46_v60 = vld [vmem:[%s1222_s0 + $0xf8] sm:$0x1]  ;;  %v49_v9 = vld [vmem:[%s1222_s0 + $0x110] sm:$0xff] }
  0x24   :  { %585 = vmatmul.mubr.bf16.vlgmr.msra.gmra.mrb[0].mxu1 %v164_v59  ;;  %495 = vmatprep.mubr.bf16.mxu0 %v157_v2  ;;  %v45_v59 = vld [vmem:[%s1222_s0 + $0xf0] sm:$0xff]  ;;  %v171_v25 = vpack.c.bf16 %v49_v9, %v47_v6 }
  0x25   :  { %592 = vmatprep.mubr.bf16.mxu1 %v185_v3  ;;  %v134_v2 = vrot.slane %v45_v59, 1  ;;  %v135_v3 = vrot.slane %v46_v60, 1  ;;  %v170_v21 = vpack.c.bf16 %v45_v59, %v43_v56  ;;  %v58_v24 = vpack.c.bf16 %v47_v6, %v45_v59 }
  0x27   :  { %v136_v5 = vsel %vm91_vm0, %v134_v2, %v135_v3 }
  0x28   :  { %v190_v13 = vpack.c.bf16 %v136_v5, %v133_v4 }
  0x2b   :  { %496 = vmatmul.mubr.bf16.gmra.mrb[4].mxu0 %v52_v11  ;;  %v169_v11 = vpack.c.bf16 %v41_v45, %v39_v42 }
  0x2c   :  { %593 = vmatmul.mubr.bf16.gmra.mrb[4].mxu1 %v165_v14  ;;  %503 = vmatprep.mubr.bf16.mxu0 %v158_v15  ;;  %v137_v14 = vrot.slane %v47_v6, 1  ;;  %v138_v15 = vrot.slane %v48_v7, 1 }
  0x2d   :  { %600 = vmatprep.mubr.bf16.mxu1 %v186_v16  ;;  %v179_v16 = vrot.slane %v49_v9, 1 }
  0x2e   :  { %v139_v18 = vsel %vm91_vm0, %v137_v14, %v138_v15 }
  0x2f   :  { %v181_v19 = vsel %vm91_vm0, %v179_v16, %v180_v17  ;;  %v163_v22 = vpack.c.bf16 %v139_v18, %v136_v5 }
  0x30   :  { %v191_v23 = vpack.c.bf16 %v181_v19, %v139_v18 }
  0x33   :  { %504 = vmatmul.mubr.bf16.gmra.mrb[8].mxu0 %v53_v27 }
  0x34   :  { %601 = vmatmul.mubr.bf16.gmra.mrb[8].mxu1 %v166_v30  ;;  %511 = vmatprep.mubr.bf16.mxu0 %v159_v31 }
  0x35   :  { %608 = vmatprep.mubr.bf16.mxu1 %v187_v33 }
  0x3b   :  { %512 = vmatmul.mubr.bf16.gmra.mrb[12].mxu0 %v54_v44 }
  0x3c   :  { %609 = vmatmul.mubr.bf16.gmra.mrb[12].mxu1 %v167_v47  ;;  %519 = vmatprep.mubr.bf16.mxu0 %v160_v48 }
  0x3d   :  { %616 = vmatprep.mubr.bf16.mxu1 %v188_v49 }
  0x43   :  { %520 = vmatmul.mubr.bf16.gmra.mrb[16].mxu0 %v55_v58 }
  0x44   :  { %617 = vmatmul.mubr.bf16.gmra.mrb[16].mxu1 %v168_v61  ;;  %527 = vmatprep.mubr.bf16.mxu0 %v161_v62 }
  0x45   :  { %624 = vmatprep.mubr.bf16.mxu1 %v189_v63 }
  0x4b   :  { %528 = vmatmul.mubr.bf16.gmra.mrb[20].mxu0 %v56_v8 }
  0x4c   :  { %625 = vmatmul.mubr.bf16.gmra.mrb[20].mxu1 %v169_v11  ;;  %535 = vmatprep.mubr.bf16.mxu0 %v162_v12 }
  0x4d   :  { %632 = vmatprep.mubr.bf16.mxu1 %v190_v13 }
  0x53   :  { %536 = vmatmul.mubr.bf16.gmra.mrb[24].mxu0 %v57_v20 }
  0x54   :  { %633 = vmatmul.mubr.bf16.gmra.mrb[24].mxu1 %v170_v21  ;;  %543 = vmatprep.mubr.bf16.mxu0 %v163_v22 }
  0x55   :  { %640 = vmatprep.mubr.bf16.mxu1 %v191_v23 }
  0x5b   :  { %544 = vmatmul.mubr.bf16.gmra.mrb[28].mxu0 %v58_v24 }
  0x5c   :  { %641 = vmatmul.mubr.bf16.gmra.mrb[28].mxu1 %v171_v25 }
  0xf6   :  { %v735_v26 = vpop.f32.mrb[0].mxu0 }
  0xf7   :  { %v799_v27 = vpop.f32.mrb[0].mxu1  ;;  %v736_v29 = vpop.f32.mrb[1].mxu0 }
  0xf8   :  { %v737_v30 = vadd.f32 %v736_v29, %v735_v26  ;;  %v800_v31 = vpop.f32.mrb[1].mxu1  ;;  %v738_v32 = vpop.f32.mrb[2].mxu0 }
  0xf9   :  { %v801_v33 = vadd.f32 %v800_v31, %v799_v27  ;;  %v802_v34 = vpop.f32.mrb[2].mxu1  ;;  %v739_v35 = vpop.f32.mrb[3].mxu0 }
  0xfa   :  { %v490_v36 = vadd.f32 %v737_v30, %v1139_v28  ;;  %v740_v37 = vadd.f32 %v739_v35, %v738_v32  ;;  %v803_v38 = vpop.f32.mrb[3].mxu1 }
  0xfb   :  { %v804_v39 = vadd.f32 %v803_v38, %v802_v34 }
  0xfc   :  { %v587_v40 = vadd.f32 %v801_v33, %v490_v36  ;;  %v493_v41 = vadd.f32 %v740_v37, %v1139_v28 }
  0xfe   :  { %v649_v42 = vmax.f32 %v587_v40, 0.0  ;;  %v590_v43 = vadd.f32 %v804_v39, %v493_v41  ;;  %v741_v44 = vpop.f32.mrb[4].mxu0 }
  0xff   :  { %v805_v45 = vpop.f32.mrb[4].mxu1  ;;  %v742_v46 = vpop.f32.mrb[5].mxu0 }
 0x100   :  { %666 = vst.msk [vmem:[%s1224_s3] sm:$0xff] %vm665_vm1, %v649_v42  ;;  %v650_v47 = vmax.f32 %v590_v43, 0.0  ;;  %v743_v48 = vadd.f32 %v742_v46, %v741_v44  ;;  %v806_v49 = vpop.f32.mrb[5].mxu1  ;;  %v744_v50 = vpop.f32.mrb[6].mxu0 }
 0x101   :  { %v807_v51 = vadd.f32 %v806_v49, %v805_v45  ;;  %v808_v52 = vpop.f32.mrb[6].mxu1  ;;  %v745_v53 = vpop.f32.mrb[7].mxu0 }
 0x102   :  { %667 = vst.msk [vmem:[%s1224_s3 + $0x8] sm:$0xff] %vm665_vm1, %v650_v47  ;;  %v498_v54 = vadd.f32 %v743_v48, %v1139_v28  ;;  %v746_v55 = vadd.f32 %v745_v53, %v744_v50  ;;  %v809_v56 = vpop.f32.mrb[7].mxu1 }
 0x103   :  { %v810_v57 = vadd.f32 %v809_v56, %v808_v52 }
 0x104   :  { %v595_v58 = vadd.f32 %v807_v51, %v498_v54  ;;  %v501_v59 = vadd.f32 %v746_v55, %v1139_v28 }
 0x106   :  { %v651_v60 = vmax.f32 %v595_v58, 0.0  ;;  %v598_v61 = vadd.f32 %v810_v57, %v501_v59  ;;  %v747_v62 = vpop.f32.mrb[8].mxu0 }
 0x107   :  { %v811_v63 = vpop.f32.mrb[8].mxu1  ;;  %v748_v0 = vpop.f32.mrb[9].mxu0 }
 0x108   :  { %668 = vst.msk [vmem:[%s1224_s3 + $0x10] sm:$0xff] %vm665_vm1, %v651_v60  ;;  %v652_v1 = vmax.f32 %v598_v61, 0.0  ;;  %v749_v2 = vadd.f32 %v748_v0, %v747_v62  ;;  %v812_v3 = vpop.f32.mrb[9].mxu1  ;;  %v750_v4 = vpop.f32.mrb[10].mxu0 }
 0x109   :  { %v813_v5 = vadd.f32 %v812_v3, %v811_v63  ;;  %v814_v6 = vpop.f32.mrb[10].mxu1  ;;  %v751_v7 = vpop.f32.mrb[11].mxu0 }
 0x10a   :  { %669 = vst.msk [vmem:[%s1224_s3 + $0x18] sm:$0xff] %vm665_vm1, %v652_v1  ;;  %v506_v8 = vadd.f32 %v749_v2, %v1139_v28  ;;  %v752_v9 = vadd.f32 %v751_v7, %v750_v4  ;;  %v815_v10 = vpop.f32.mrb[11].mxu1 }
 0x10b   :  { %v816_v11 = vadd.f32 %v815_v10, %v814_v6 }
 0x10c   :  { %v603_v12 = vadd.f32 %v813_v5, %v506_v8  ;;  %v509_v13 = vadd.f32 %v752_v9, %v1139_v28 }
 0x10e   :  { %v653_v14 = vmax.f32 %v603_v12, 0.0  ;;  %v606_v15 = vadd.f32 %v816_v11, %v509_v13  ;;  %v753_v16 = vpop.f32.mrb[12].mxu0 }
 0x10f   :  { %v817_v17 = vpop.f32.mrb[12].mxu1  ;;  %v754_v18 = vpop.f32.mrb[13].mxu0 }
 0x110   :  { %670 = vst.msk [vmem:[%s1224_s3 + $0x20] sm:$0xff] %vm665_vm1, %v653_v14  ;;  %v654_v19 = vmax.f32 %v606_v15, 0.0  ;;  %v755_v20 = vadd.f32 %v754_v18, %v753_v16  ;;  %v818_v21 = vpop.f32.mrb[13].mxu1  ;;  %v756_v22 = vpop.f32.mrb[14].mxu0 }
 0x111   :  { %v819_v23 = vadd.f32 %v818_v21, %v817_v17  ;;  %v820_v24 = vpop.f32.mrb[14].mxu1  ;;  %v757_v25 = vpop.f32.mrb[15].mxu0 }
 0x112   :  { %671 = vst.msk [vmem:[%s1224_s3 + $0x28] sm:$0xff] %vm665_vm1, %v654_v19  ;;  %v514_v26 = vadd.f32 %v755_v20, %v1139_v28  ;;  %v758_v27 = vadd.f32 %v757_v25, %v756_v22  ;;  %v821_v29 = vpop.f32.mrb[15].mxu1 }
 0x113   :  { %v822_v30 = vadd.f32 %v821_v29, %v820_v24 }
 0x114   :  { %v611_v31 = vadd.f32 %v819_v23, %v514_v26  ;;  %v517_v32 = vadd.f32 %v758_v27, %v1139_v28 }
 0x116   :  { %v655_v33 = vmax.f32 %v611_v31, 0.0  ;;  %v614_v34 = vadd.f32 %v822_v30, %v517_v32  ;;  %v759_v35 = vpop.f32.mrb[16].mxu0 }
 0x117   :  { %v823_v36 = vpop.f32.mrb[16].mxu1  ;;  %v760_v37 = vpop.f32.mrb[17].mxu0 }
 0x118   :  { %672 = vst.msk [vmem:[%s1224_s3 + $0x30] sm:$0xff] %vm665_vm1, %v655_v33  ;;  %v656_v38 = vmax.f32 %v614_v34, 0.0  ;;  %v761_v39 = vadd.f32 %v760_v37, %v759_v35  ;;  %v824_v40 = vpop.f32.mrb[17].mxu1  ;;  %v762_v41 = vpop.f32.mrb[18].mxu0 }
 0x119   :  { %v825_v42 = vadd.f32 %v824_v40, %v823_v36  ;;  %v826_v43 = vpop.f32.mrb[18].mxu1  ;;  %v763_v44 = vpop.f32.mrb[19].mxu0 }
 0x11a   :  { %673 = vst.msk [vmem:[%s1224_s3 + $0x38] sm:$0xff] %vm665_vm1, %v656_v38  ;;  %v522_v45 = vadd.f32 %v761_v39, %v1139_v28  ;;  %v764_v46 = vadd.f32 %v763_v44, %v762_v41  ;;  %v827_v47 = vpop.f32.mrb[19].mxu1 }
 0x11b   :  { %v828_v48 = vadd.f32 %v827_v47, %v826_v43 }
 0x11c   :  { %v619_v49 = vadd.f32 %v825_v42, %v522_v45  ;;  %v525_v50 = vadd.f32 %v764_v46, %v1139_v28 }
 0x11e   :  { %v657_v51 = vmax.f32 %v619_v49, 0.0  ;;  %v622_v52 = vadd.f32 %v828_v48, %v525_v50  ;;  %v765_v53 = vpop.f32.mrb[20].mxu0 }
 0x11f   :  { %v829_v54 = vpop.f32.mrb[20].mxu1  ;;  %v766_v55 = vpop.f32.mrb[21].mxu0 }
 0x120   :  { %674 = vst.msk [vmem:[%s1224_s3 + $0x40] sm:$0xff] %vm665_vm1, %v657_v51  ;;  %v658_v56 = vmax.f32 %v622_v52, 0.0  ;;  %v767_v57 = vadd.f32 %v766_v55, %v765_v53  ;;  %v830_v58 = vpop.f32.mrb[21].mxu1  ;;  %v768_v59 = vpop.f32.mrb[22].mxu0 }
 0x121   :  { %v831_v60 = vadd.f32 %v830_v58, %v829_v54  ;;  %v832_v61 = vpop.f32.mrb[22].mxu1  ;;  %v769_v62 = vpop.f32.mrb[23].mxu0 }
 0x122   :  { %675 = vst.msk [vmem:[%s1224_s3 + $0x48] sm:$0xff] %vm665_vm1, %v658_v56  ;;  %v530_v63 = vadd.f32 %v767_v57, %v1139_v28  ;;  %v770_v0 = vadd.f32 %v769_v62, %v768_v59  ;;  %v833_v1 = vpop.f32.mrb[23].mxu1 }
 0x123   :  { %v834_v2 = vadd.f32 %v833_v1, %v832_v61 }
 0x124   :  { %v627_v3 = vadd.f32 %v831_v60, %v530_v63  ;;  %v533_v4 = vadd.f32 %v770_v0, %v1139_v28 }
 0x126   :  { %v659_v5 = vmax.f32 %v627_v3, 0.0  ;;  %v630_v6 = vadd.f32 %v834_v2, %v533_v4  ;;  %v771_v7 = vpop.f32.mrb[24].mxu0 }
 0x127   :  { %v835_v8 = vpop.f32.mrb[24].mxu1  ;;  %v772_v9 = vpop.f32.mrb[25].mxu0 }
 0x128   :  { %676 = vst.msk [vmem:[%s1224_s3 + $0x50] sm:$0xff] %vm665_vm1, %v659_v5  ;;  %v660_v10 = vmax.f32 %v630_v6, 0.0  ;;  %v773_v11 = vadd.f32 %v772_v9, %v771_v7  ;;  %v836_v12 = vpop.f32.mrb[25].mxu1  ;;  %v774_v13 = vpop.f32.mrb[26].mxu0 }
 0x129   :  { %v837_v14 = vadd.f32 %v836_v12, %v835_v8  ;;  %v838_v15 = vpop.f32.mrb[26].mxu1  ;;  %v775_v16 = vpop.f32.mrb[27].mxu0 }
 0x12a   :  { %677 = vst.msk [vmem:[%s1224_s3 + $0x58] sm:$0xff] %vm665_vm1, %v660_v10  ;;  %v538_v17 = vadd.f32 %v773_v11, %v1139_v28  ;;  %v776_v18 = vadd.f32 %v775_v16, %v774_v13  ;;  %v839_v19 = vpop.f32.mrb[27].mxu1 }
 0x12b   :  { %v840_v20 = vadd.f32 %v839_v19, %v838_v15 }
 0x12c   :  { %v635_v21 = vadd.f32 %v837_v14, %v538_v17  ;;  %v541_v22 = vadd.f32 %v776_v18, %v1139_v28 }
 0x12e   :  { %v661_v23 = vmax.f32 %v635_v21, 0.0  ;;  %v638_v24 = vadd.f32 %v840_v20, %v541_v22  ;;  %v777_v25 = vpop.f32.mrb[28].mxu0 }
 0x12f   :  { %v841_v26 = vpop.f32.mrb[28].mxu1  ;;  %v778_v27 = vpop.f32.mrb[29].mxu0 }
 0x130   :  { %678 = vst.msk [vmem:[%s1224_s3 + $0x60] sm:$0xff] %vm665_vm1, %v661_v23  ;;  %v662_v29 = vmax.f32 %v638_v24, 0.0  ;;  %v779_v30 = vadd.f32 %v778_v27, %v777_v25  ;;  %v842_v31 = vpop.f32.mrb[29].mxu1  ;;  %v780_v32 = vpop.f32.mrb[30].mxu0 }
 0x131   :  { %v843_v33 = vadd.f32 %v842_v31, %v841_v26  ;;  %v844_v34 = vpop.f32.mrb[30].mxu1  ;;  %v781_v35 = vpop.f32.mrb[31].mxu0 }
 0x132   :  { %679 = vst.msk [vmem:[%s1224_s3 + $0x68] sm:$0xff] %vm665_vm1, %v662_v29  ;;  %v546_v36 = vadd.f32 %v779_v30, %v1139_v28  ;;  %v782_v37 = vadd.f32 %v781_v35, %v780_v32  ;;  %v845_v38 = vpop.f32.mrb[31].mxu1 }
 0x133   :  { %v846_v39 = vadd.f32 %v845_v38, %v844_v34 }
 0x134   :  { %v643_v40 = vadd.f32 %v843_v33, %v546_v36  ;;  %v549_v41 = vadd.f32 %v782_v37, %v1139_v28 }
 0x136   :  { %v663_v42 = vmax.f32 %v643_v40, 0.0  ;;  %v646_v43 = vadd.f32 %v846_v39, %v549_v41 }
 0x138   :  { %680 = vst.msk [vmem:[%s1224_s3 + $0x70] sm:$0xff] %vm665_vm1, %v663_v42  ;;  %v664_v44 = vmax.f32 %v646_v43, 0.0 }
 0x13a   :  { %681 = vst.msk [vmem:[%s1224_s3 + $0x78] sm:$0xff] %vm665_vm1, %v664_v44 }

// kernel: transformer_unet_forward.5
= control target key start
LH: loop header
LB: loop body
LE: loop exit
PB: predicated region body
PF: predicated region fallthrough
CT: control target
= control target key end

     0   :  { %vm322_vm0 = vcmask 261120   ;;  %vm1201_vm1 = vcmask 1046528   ;;  %s16660_s0 = inlined_call_operand.vmem [shape: f32[2,18,18,32], index: 0, kind: input, shape index: {}]   ;;  %s16661_s1 = inlined_call_operand.vmem [shape: f32[2,18,18,32], index: 1, kind: input, shape index: {}]   ;;  %s16662_s2 = inlined_call_operand.vmem [shape: bf16[9,32,32], index: 2, kind: input, shape index: {}]   ;;  %s16663_s3 = inlined_call_operand.vmem [shape: bf16[9,32,32], index: 3, kind: input, shape index: {}]   ;;  %s16664_s4 = inlined_call_operand.vmem [shape: f32[1,32], index: 4, kind: input, shape index: {}]   ;;  %s16665_s5 = inlined_call_operand.hbm [shape: f32[512,32], index: 5, kind: output, shape index: {}]  }
   0x1   :  { %v12678_v0 = vld [vmem:[%s16663_s3] sm:$0xff]   ;;  %v12680_v2 = vld [vmem:[%s16663_s3 + $0x8] sm:$0xff]   ;;  %v12901_v6 = vld [vmem:[%s16661_s1 + $0x18] sm:$0xff] }
   0x2   :  { %v12679_v1 = vld [vmem:[%s16663_s3 + $0x40] sm:$0xff]   ;;  %10363 = vmatprep.subr.bf16.mxu1 %v12678_v0  ;;  %v12681_v3 = vld [vmem:[%s16663_s3 + $0x48] sm:$0xff]   ;;  %v1527_v10 = vrot.slane %v12901_v6, 1  ;;  %v12929_v17 = vld [vmem:[%s16661_s1 + $0x30] sm:$0xff] }
   0x3   :  { %10975 = vmatprep.subr.bf16.mxu0 %v12679_v1  ;;  %10364 = vmatpush3.bf16.msra.mxu1 %v12678_v0  ;;  %v130_v4 = vld [vmem:[%s16661_s1] sm:$0xff]  ;;  %v131_v5 = vld [vmem:[%s16661_s1 + $0x8] sm:$0xff]  ;;  %v12934_v18 = vld [vmem:[%s16661_s1 + $0x38] sm:$0xff]  ;;  %v1532_v21 = vrot.slane %v12929_v17, 1 }
   0x4   :  { %10976 = vmatpush3.bf16.msra.mxu0 %v12679_v1  ;;  %10365 = vmatprep.subr.bf16.mxu1 %v12680_v2  ;;  %v274_v7 = vpack.c.bf16 %v131_v5, %v130_v4  ;;  %v12906_v8 = vld [vmem:[%s16661_s1 + $0x20] sm:$0xff]  ;;  %v12911_v9 = vld [vmem:[%s16661_s1 + $0x28] sm:$0x3]  ;;  %v1533_v22 = vrot.slane %v12934_v18, 1  ;;  %v12683_v24 = vld [vmem:[%s16662_s2 + $0x50] sm:$0xff]   ;;  %v12953_v25 = vpack.c.bf16 %v12934_v18, %v12929_v17 }
   0x5   :  { %10977 = vmatprep.subr.bf16.mxu0 %v12681_v3  ;;  %v1528_v11 = vrot.slane %v12906_v8, 1  ;;  %v1530_v12 = vrot.slane %v12911_v9, 1  ;;  %v12919_v13 = vpack.c.bf16 %v12906_v8, %v12901_v6  ;;  %v12682_v14 = vld [vmem:[%s16662_s2] sm:$0xff]   ;;  %v139_v26 = vld [vmem:[%s16661_s1 + $0x48] sm:$0xff]  ;;  %v140_v29 = vld [vmem:[%s16661_s1 + $0x50] sm:$0xff] }
   0x6   :  { %10367 = vmatprep.mubr.msk.bf16.mxu1 %vm322_vm0, %v274_v7  ;;  %v12939_v19 = vld [vmem:[%s16661_s1 + $0x40] sm:$0x3]  ;;  %17020 = vst [vmem:[#allocation7_spill] sm:$0xff] %v12953_v25  ;;  %v1534_v27 = vsel %vm1201_vm1, %v1532_v21, %v1533_v22  ;;  %v141_v30 = vld [vmem:[%s16661_s1 + $0x58] sm:$0x3]  ;;  %v1537_v31 = vrot.slane %v139_v26, 1  ;;  %v12975_v36 = vpack.c.bf16 %v140_v29, %v139_v26 }
   0x7   :  { %10366 = vmatpush3.bf16.msra.mxu1 %v12680_v2  ;;  %17018 = vst [vmem:[#allocation5_spill] sm:$0xff] %v12919_v13  ;;  %v1529_v15 = vsel %vm1201_vm1, %v1527_v10, %v1528_v11  ;;  %v1531_v16 = vsel %vm1201_vm1, %v1528_v11, %v1530_v12  ;;  %v1535_v23 = vrot.slane %v12939_v19, 1  ;;  %v142_v32 = vld [vmem:[%s16661_s1 + $0x60] sm:$0xff]  ;;  %v1538_v34 = vrot.slane %v140_v29, 1  ;;  %v143_v37 = vld [vmem:[%s16661_s1 + $0x68] sm:$0xff]  ;;  %v145_v39 = vld [vmem:[%s16661_s1 + $0x78] sm:$0xff] }
   0x8   :  { %10978 = vmatpush3.bf16.msra.mxu0 %v12681_v3  ;;  %v12941_v20 = vpack.c.bf16 %v1531_v16, %v1529_v15  ;;  %10431 = vmatprep.subr.bf16.mxu1 %v12682_v14  ;;  %v1540_v35 = vrot.slane %v141_v30, 1  ;;  %17022 = vst [vmem:[#allocation9_spill] sm:$0xff] %v12975_v36  ;;  %v144_v38 = vld [vmem:[%s16661_s1 + $0x70] sm:$0x3]  ;;  %v1542_v40 = vrot.slane %v142_v32, 1  ;;  %v1543_v41 = vrot.slane %v143_v37, 1 }
   0x9   :  { %v1536_v28 = vsel %vm1201_vm1, %v1533_v22, %v1535_v23  ;;  %11043 = vmatprep.subr.bf16.mxu0 %v12683_v24  ;;  %v1545_v42 = vrot.slane %v144_v38, 1  ;;  %v12986_v43 = vpack.c.bf16 %v143_v37, %v142_v32  ;;  %v146_v44 = vld [vmem:[%s16661_s1 + $0x80] sm:$0xff]  ;;  %v147_v45 = vld [vmem:[%s16661_s1 + $0x88] sm:$0x3]  ;;  %v1539_v46 = vsel %vm1201_vm1, %v1537_v31, %v1538_v34  ;;  %v148_v55 = vld [vmem:[%s16661_s1 + $0x90] sm:$0xff] }
   0xa   :  { %17019 = vst [vmem:[#allocation6_spill] sm:$0xff] %v12941_v20  ;;  %10368 = vmatmul.mubr.msk.bf16.vlgmr.msra.gmra.mrb[0].mxu1 %vm322_vm0, %v12919_v13  ;;  %10979 = vmatprep.mubr.msk.bf16.mxu0 %vm322_vm0, %v12941_v20  ;;  %v12971_v33 = vpack.c.bf16 %v1536_v28, %v1534_v27  ;;  %v1541_v47 = vsel %vm1201_vm1, %v1538_v34, %v1540_v35  ;;  %v1547_v48 = vrot.slane %v145_v39, 1  ;;  %v1548_v49 = vrot.slane %v146_v44, 1  ;;  %v149_v56 = vld [vmem:[%s16661_s1 + $0x98] sm:$0xff]  ;;  %v150_v57 = vld [vmem:[%s16661_s1 + $0xa0] sm:$0x3] }
   0xb   :  { %10432 = vmatpush3.bf16.msra.mxu1 %v12682_v14  ;;  %10371 = vmatprep.mubr.msk.bf16.mxu1 %vm322_vm0, %v12953_v25  ;;  %17023 = vst [vmem:[#allocation10_spill] sm:$0xff] %v12986_v43  ;;  %v12998_v50 = vpack.c.bf16 %v1541_v47, %v1539_v46  ;;  %v1544_v51 = vsel %vm1201_vm1, %v1542_v40, %v1543_v41  ;;  %v1550_v53 = vrot.slane %v147_v45, 1  ;;  %v151_v59 = vld [vmem:[%s16661_s1 + $0xa8] sm:$0xff]  ;;  %v152_v60 = vld [vmem:[%s16661_s1 + $0xb0] sm:$0xff]  ;;  %v153_v61 = vld [vmem:[%s16661_s1 + $0xb8] sm:$0x3] }
   0xc   :  { %17021 = vst [vmem:[#allocation8_spill] sm:$0xff] %v12971_v33  ;;  %10980 = vmatmul.mubr.msk.bf16.vlgmr.msra.gmra.mrb[0].mxu0 %vm322_vm0, %v12971_v33  ;;  %v1546_v52 = vsel %vm1201_vm1, %v1543_v41, %v1545_v42  ;;  %v1549_v54 = vsel %vm1201_vm1, %v1547_v48, %v1548_v49  ;;  %v1552_v0 = vrot.slane %v148_v55, 1  ;;  %v1553_v1 = vrot.slane %v149_v56, 1  ;;  %v154_v16 = vld [vmem:[%s16661_s1 + $0xc0] sm:$0xff]  ;;  %v155_v21 = vld [vmem:[%s16661_s1 + $0xc8] sm:$0xff]  ;;  %v157_v23 = vld [vmem:[%s16661_s1 + $0xd8] sm:$0xff] }
   0xd   :  { %11044 = vmatpush3.bf16.msra.mxu0 %v12683_v24  ;;  %17024 = vst [vmem:[#allocation11_spill] sm:$0xff] %v12998_v50  ;;  %10983 = vmatprep.mubr.msk.bf16.mxu0 %vm322_vm0, %v12998_v50  ;;  %v1551_v58 = vsel %vm1201_vm1, %v1548_v49, %v1550_v53  ;;  %v13026_v62 = vpack.c.bf16 %v1546_v52, %v1544_v51  ;;  %v1555_v2 = vrot.slane %v150_v57, 1  ;;  %v1557_v3 = vrot.slane %v151_v59, 1  ;;  %v156_v22 = vld [vmem:[%s16661_s1 + $0xd0] sm:$0x3]  ;;  %v158_v24 = vld [vmem:[%s16661_s1 + $0xe0] sm:$0xff] }
   0xe   :  { %v13030_v63 = vpack.c.bf16 %v1551_v58, %v1549_v54  ;;  %v1558_v4 = vrot.slane %v152_v60, 1  ;;  %v1560_v5 = vrot.slane %v153_v61, 1  ;;  %v13034_v7 = vpack.c.bf16 %v146_v44, %v145_v39  ;;  %v159_v26 = vld [vmem:[%s16661_s1 + $0xe8] sm:$0x3]  ;;  %v12685_v38 = vld [vmem:[%s16662_s2 + $0x58] sm:$0xff]   ;;  %v160_v46 = vld [vmem:[%s16661_s1 + $0xf0] sm:$0xff] }
   0xf   :  { %17025 = vst [vmem:[#allocation12_spill] sm:$0xff] %v13026_v62  ;;  %v1554_v10 = vsel %vm1201_vm1, %v1552_v0, %v1553_v1  ;;  %v1556_v11 = vsel %vm1201_vm1, %v1553_v1, %v1555_v2  ;;  %v13040_v12 = vpack.c.bf16 %v149_v56, %v148_v55  ;;  %v12684_v28 = vld [vmem:[%s16662_s2 + $0x8] sm:$0xff]   ;;  %v1562_v30 = vrot.slane %v154_v16, 1  ;;  %11045 = vmatprep.subr.bf16.mxu0 %v12685_v38  ;;  %v161_v47 = vld [vmem:[%s16661_s1 + $0xf8] sm:$0xff]  ;;  %v162_v48 = vld [vmem:[%s16661_s1 + $0x100] sm:$0x3] }
  0x10   :  { %17026 = vst [vmem:[#allocation13_spill] sm:$0xff] %v13030_v63  ;;  %17027 = vst [vmem:[#allocation14_spill] sm:$0xff] %v13034_v7  ;;  %v1559_v14 = vsel %vm1201_vm1, %v1557_v3, %v1558_v4  ;;  %v1561_v15 = vsel %vm1201_vm1, %v1558_v4, %v1560_v5  ;;  %v13064_v27 = vpack.c.bf16 %v1556_v11, %v1554_v10  ;;  %v1563_v31 = vrot.slane %v155_v21, 1  ;;  %v163_v49 = vld [vmem:[%s16661_s1 + $0x108] sm:$0xff]  ;;  %v164_v51 = vld [vmem:[%s16661_s1 + $0x110] sm:$0xff] }
  0x11   :  { %17028 = vst [vmem:[#allocation15_spill] sm:$0xff] %v13040_v12  ;;  %v13071_v29 = vpack.c.bf16 %v1561_v15, %v1559_v14  ;;  %v1565_v32 = vrot.slane %v156_v22, 1  ;;  %v1567_v34 = vrot.slane %v157_v23, 1  ;;  %v1568_v35 = vrot.slane %v158_v24, 1  ;;  %10433 = vmatprep.subr.bf16.mxu1 %v12684_v28  ;;  %11046 = vmatpush3.bf16.msra.mxu0 %v12685_v38  ;;  %v165_v52 = vld [vmem:[%s16661_s1 + $0x118] sm:$0x3] }
  0x12   :  { %10372 = vmatmul.mubr.msk.bf16.gmra.mrb[4].mxu1 %vm322_vm0, %v12975_v36  ;;  %17029 = vst [vmem:[#allocation16_spill] sm:$0xff] %v13064_v27  ;;  %v1570_v37 = vrot.slane %v159_v26, 1  ;;  %v13078_v39 = vpack.c.bf16 %v152_v60, %v151_v59  ;;  %v1564_v40 = vsel %vm1201_vm1, %v1562_v30, %v1563_v31  ;;  %v13084_v42 = vpack.c.bf16 %v155_v21, %v154_v16  ;;  %v166_v5 = vld [vmem:[%s16661_s1 + $0x120] sm:$0xff]  ;;  %v167_v10 = vld [vmem:[%s16661_s1 + $0x128] sm:$0xff]  ;;  %v168_v11 = vld [vmem:[%s16661_s1 + $0x130] sm:$0x3] }
  0x13   :  { %10375 = vmatprep.mubr.msk.bf16.mxu1 %vm322_vm0, %v12986_v43  ;;  %17030 = vst [vmem:[#allocation17_spill] sm:$0xff] %v13071_v29  ;;  %10434 = vmatpush3.bf16.msra.mxu1 %v12684_v28  ;;  %v1566_v41 = vsel %vm1201_vm1, %v1563_v31, %v1565_v32  ;;  %v1569_v44 = vsel %vm1201_vm1, %v1567_v34, %v1568_v35  ;;  %v1572_v55 = vrot.slane %v160_v46, 1  ;;  %v1573_v56 = vrot.slane %v161_v47, 1  ;;  %v169_v14 = vld [vmem:[%s16661_s1 + $0x138] sm:$0xff]  ;;  %v170_v15 = vld [vmem:[%s16661_s1 + $0x140] sm:$0xff]  ;;  %v172_v34 = vld [vmem:[%s16661_s1 + $0x150] sm:$0xff] }
  0x14   :  { %10984 = vmatmul.mubr.msk.bf16.gmra.mrb[4].mxu0 %vm322_vm0, %v13026_v62  ;;  %17031 = vst [vmem:[#allocation18_spill] sm:$0xff] %v13078_v39  ;;  %17032 = vst [vmem:[#allocation19_spill] sm:$0xff] %v13084_v42  ;;  %v1571_v45 = vsel %vm1201_vm1, %v1568_v35, %v1570_v37  ;;  %v13108_v53 = vpack.c.bf16 %v1566_v41, %v1564_v40  ;;  %v1575_v57 = vrot.slane %v162_v48, 1  ;;  %v1577_v58 = vrot.slane %v163_v49, 1  ;;  %v171_v16 = vld [vmem:[%s16661_s1 + $0x148] sm:$0x3] }
  0x15   :  { %10987 = vmatprep.mubr.msk.bf16.mxu0 %vm322_vm0, %v13030_v63  ;;  %v13112_v54 = vpack.c.bf16 %v1571_v45, %v1569_v44  ;;  %v1578_v59 = vrot.slane %v164_v51, 1  ;;  %v1580_v60 = vrot.slane %v165_v52, 1  ;;  %v13116_v61 = vpack.c.bf16 %v158_v24, %v157_v23  ;;  %v173_v40 = vld [vmem:[%s16661_s1 + $0x158] sm:$0xff]  ;;  %v174_v41 = vld [vmem:[%s16661_s1 + $0x160] sm:$0x3]  ;;  %v13174_v44 = vld [vmem:[%s16662_s2 + $0x10] sm:$0xff]  }
  0x16   :  { %17033 = vst [vmem:[#allocation20_spill] sm:$0xff] %v13108_v53  ;;  %v1574_v0 = vsel %vm1201_vm1, %v1572_v55, %v1573_v56  ;;  %v1576_v1 = vsel %vm1201_vm1, %v1573_v56, %v1575_v57  ;;  %v13122_v2 = vpack.c.bf16 %v161_v47, %v160_v46  ;;  %v1582_v23 = vrot.slane %v166_v5, 1  ;;  %v175_v47 = vld [vmem:[%s16661_s1 + $0x168] sm:$0xff]  ;;  %v13184_v48 = vld [vmem:[%s16663_s3 + $0x50] sm:$0xff]   ;;  %10499 = vmatprep.subr.bf16.mxu1 %v13174_v44 }
  0x17   :  { %17034 = vst [vmem:[#allocation21_spill] sm:$0xff] %v13112_v54  ;;  %17035 = vst [vmem:[#allocation22_spill] sm:$0xff] %v13116_v61  ;;  %v1579_v3 = vsel %vm1201_vm1, %v1577_v58, %v1578_v59  ;;  %v1581_v4 = vsel %vm1201_vm1, %v1578_v59, %v1580_v60  ;;  %v13146_v21 = vpack.c.bf16 %v1576_v1, %v1574_v0  ;;  %v1583_v24 = vrot.slane %v167_v10, 1 }
  0x18   :  { %17036 = vst [vmem:[#allocation23_spill] sm:$0xff] %v13122_v2  ;;  %v13150_v22 = vpack.c.bf16 %v1581_v4, %v1579_v3  ;;  %v1585_v26 = vrot.slane %v168_v11, 1  ;;  %v1587_v28 = vrot.slane %v169_v14, 1  ;;  %v1588_v30 = vrot.slane %v170_v15, 1  ;;  %11111 = vmatprep.subr.bf16.mxu0 %v13184_v48 }
  0x19   :  { %17037 = vst [vmem:[#allocation24_spill] sm:$0xff] %v13146_v21  ;;  %v1590_v31 = vrot.slane %v171_v16, 1  ;;  %v13154_v32 = vpack.c.bf16 %v164_v51, %v163_v49  ;;  %v1584_v35 = vsel %vm1201_vm1, %v1582_v23, %v1583_v24  ;;  %v13163_v38 = vpack.c.bf16 %v167_v10, %v166_v5  ;;  %v176_v49 = vld [vmem:[%s16661_s1 + $0x170] sm:$0xff]  ;;  %v177_v51 = vld [vmem:[%s16661_s1 + $0x178] sm:$0x3]  ;;  %v178_v16 = vld [vmem:[%s16661_s1 + $0x180] sm:$0xff] }
  0x1a   :  { %10376 = vmatmul.mubr.msk.bf16.gmra.mrb[8].mxu1 %vm322_vm0, %v13034_v7  ;;  %17038 = vst [vmem:[#allocation25_spill] sm:$0xff] %v13150_v22  ;;  %v1586_v37 = vsel %vm1201_vm1, %v1583_v24, %v1585_v26  ;;  %v1589_v45 = vsel %vm1201_vm1, %v1587_v28, %v1588_v30  ;;  %v1592_v56 = vrot.slane %v172_v34, 1  ;;  %v1593_v57 = vrot.slane %v173_v40, 1  ;;  %v187_v23 = vld [vmem:[%s16661_s1 + $0x1c8] sm:$0xff]  ;;  %v188_v24 = vld [vmem:[%s16661_s1 + $0x1d0] sm:$0xff] }
  0x1b   :  { %10379 = vmatprep.mubr.msk.bf16.mxu1 %vm322_vm0, %v13040_v12  ;;  %17039 = vst [vmem:[#allocation26_spill] sm:$0xff] %v13154_v32  ;;  %17040 = vst [vmem:[#allocation27_spill] sm:$0xff] %v13163_v38  ;;  %v1591_v46 = vsel %vm1201_vm1, %v1588_v30, %v1590_v31  ;;  %v13195_v52 = vpack.c.bf16 %v1586_v37, %v1584_v35  ;;  %v1595_v58 = vrot.slane %v174_v41, 1  ;;  %v1597_v59 = vrot.slane %v175_v47, 1  ;;  %v189_v26 = vld [vmem:[%s16661_s1 + $0x1d8] sm:$0x3] }
  0x1c   :  { %10988 = vmatmul.mubr.msk.bf16.gmra.mrb[8].mxu0 %vm322_vm0, %v13064_v27  ;;  %v13200_v55 = vpack.c.bf16 %v1591_v46, %v1589_v45  ;;  %v1598_v60 = vrot.slane %v176_v49, 1  ;;  %v1600_v0 = vrot.slane %v177_v51, 1  ;;  %v13204_v1 = vpack.c.bf16 %v170_v15, %v169_v14  ;;  %v179_v14 = vld [vmem:[%s16661_s1 + $0x188] sm:$0xff]  ;;  %v180_v15 = vld [vmem:[%s16661_s1 + $0x190] sm:$0x3] }
  0x1d   :  { %10991 = vmatprep.mubr.msk.bf16.mxu0 %vm322_vm0, %v13071_v29  ;;  %17041 = vst [vmem:[#allocation28_spill] sm:$0xff] %v13195_v52  ;;  %v1594_v3 = vsel %vm1201_vm1, %v1592_v56, %v1593_v57  ;;  %v1596_v4 = vsel %vm1201_vm1, %v1593_v57, %v1595_v58  ;;  %v13210_v5 = vpack.c.bf16 %v173_v40, %v172_v34  ;;  %v4969_v31 = vrot.slane %v178_v16, 1  ;;  %v184_v37 = vld [vmem:[%s16661_s1 + $0x1b0] sm:$0xff]  ;;  %v185_v40 = vld [vmem:[%s16661_s1 + $0x1b8] sm:$0xff] }
  0x1e   :  { %17042 = vst [vmem:[#allocation29_spill] sm:$0xff] %v13200_v55  ;;  %17043 = vst [vmem:[#allocation30_spill] sm:$0xff] %v13204_v1  ;;  %v1599_v10 = vsel %vm1201_vm1, %v1597_v59, %v1598_v60  ;;  %v1601_v11 = vsel %vm1201_vm1, %v1598_v60, %v1600_v0  ;;  %v13234_v28 = vpack.c.bf16 %v1596_v4, %v1594_v3  ;;  %v4970_v34 = vrot.slane %v179_v14, 1  ;;  %v190_v59 = vld [vmem:[%s16661_s1 + $0x1e0] sm:$0xff]  ;;  %v193_v3 = vld [vmem:[%s16661_s1 + $0x1f8] sm:$0xff] }
  0x1f   :  { %17044 = vst [vmem:[#allocation31_spill] sm:$0xff] %v13210_v5  ;;  %v13238_v30 = vpack.c.bf16 %v1601_v11, %v1599_v10  ;;  %v4972_v35 = vrot.slane %v180_v15, 1  ;;  %v1607_v41 = vrot.slane %v187_v23, 1  ;;  %v1608_v45 = vrot.slane %v188_v24, 1  ;;  %v194_v4 = vld [vmem:[%s16661_s1 + $0x200] sm:$0xff] }
  0x20   :  { %17045 = vst [vmem:[#allocation32_spill] sm:$0xff] %v13234_v28  ;;  %v1610_v46 = vrot.slane %v189_v26, 1  ;;  %v13248_v51 = vpack.c.bf16 %v176_v49, %v175_v47  ;;  %v4971_v56 = vsel %vm1201_vm1, %v4969_v31, %v4970_v34  ;;  %v290_v58 = vpack.c.bf16 %v185_v40, %v184_v37  ;;  %v191_v47 = vld [vmem:[%s16661_s1 + $0x1e8] sm:$0xff]  ;;  %v192_v49 = vld [vmem:[%s16661_s1 + $0x1f0] sm:$0x3] }
  0x21   :  { %17046 = vst [vmem:[#allocation33_spill] sm:$0xff] %v13238_v30  ;;  %v4973_v57 = vsel %vm1201_vm1, %v4970_v34, %v4972_v35  ;;  %v1609_v60 = vsel %vm1201_vm1, %v1607_v41, %v1608_v45  ;;  %v195_v10 = vld [vmem:[%s16661_s1 + $0x208] sm:$0x3]  ;;  %v1612_v14 = vrot.slane %v190_v59, 1  ;;  %v1613_v15 = vrot.slane %v191_v47, 1 }
  0x22   :  { %10380 = vmatmul.mubr.msk.bf16.gmra.mrb[12].mxu1 %vm322_vm0, %v13078_v39  ;;  %17047 = vst [vmem:[#allocation34_spill] sm:$0xff] %v13248_v51  ;;  %v1611_v0 = vsel %vm1201_vm1, %v1608_v45, %v1610_v46  ;;  %v13276_v11 = vpack.c.bf16 %v4973_v57, %v4971_v56  ;;  %v1615_v26 = vrot.slane %v192_v49, 1  ;;  %v1617_v31 = vrot.slane %v193_v3, 1  ;;  %v196_v46 = vld [vmem:[%s16661_s1 + $0x210] sm:$0xff]  ;;  %v197_v56 = vld [vmem:[%s16661_s1 + $0x218] sm:$0xff] }
  0x23   :  { %10383 = vmatprep.mubr.msk.bf16.mxu1 %vm322_vm0, %v13084_v42  ;;  %v13279_v16 = vpack.c.bf16 %v1611_v0, %v1609_v60  ;;  %v1618_v34 = vrot.slane %v194_v4, 1  ;;  %v1620_v35 = vrot.slane %v195_v10, 1  ;;  %v13283_v37 = vpack.c.bf16 %v188_v24, %v187_v23  ;;  %v198_v57 = vld [vmem:[%s16661_s1 + $0x220] sm:$0x3]  ;;  %v201_v60 = vld [vmem:[%s16661_s1 + $0x238] sm:$0x3] }
  0x24   :  { %10992 = vmatmul.mubr.msk.bf16.gmra.mrb[12].mxu0 %vm322_vm0, %v13108_v53  ;;  %17048 = vst [vmem:[#allocation35_spill] sm:$0xff] %v13276_v11  ;;  %v1614_v40 = vsel %vm1201_vm1, %v1612_v14, %v1613_v15  ;;  %v1616_v41 = vsel %vm1201_vm1, %v1613_v15, %v1615_v26  ;;  %v13289_v45 = vpack.c.bf16 %v191_v47, %v190_v59  ;;  %v200_v59 = vld [vmem:[%s16661_s1 + $0x230] sm:$0xff]  ;;  %v1622_v47 = vrot.slane %v196_v46, 1 }
  0x25   :  { %10995 = vmatprep.mubr.msk.bf16.mxu0 %vm322_vm0, %v13112_v54  ;;  %17049 = vst [vmem:[#allocation36_spill] sm:$0xff] %v13279_v16  ;;  %17050 = vst [vmem:[#allocation37_spill] sm:$0xff] %v13283_v37  ;;  %v1619_v23 = vsel %vm1201_vm1, %v1617_v31, %v1618_v34  ;;  %v1621_v24 = vsel %vm1201_vm1, %v1618_v34, %v1620_v35  ;;  %v13313_v0 = vpack.c.bf16 %v1616_v41, %v1614_v40 }
  0x26   :  { %17051 = vst [vmem:[#allocation38_spill] sm:$0xff] %v13289_v45  ;;  %v1623_v49 = vrot.slane %v197_v56, 1  ;;  %v13317_v10 = vpack.c.bf16 %v1621_v24, %v1619_v23  ;;  %v1625_v14 = vrot.slane %v198_v57, 1  ;;  %v1628_v26 = vrot.slane %v200_v59, 1  ;;  %v202_v23 = vld [vmem:[%s16661_s1 + $0x240] sm:$0xff]  ;;  %v203_v24 = vld [vmem:[%s16661_s1 + $0x248] sm:$0xff] }
  0x27   :  { %17052 = vst [vmem:[#allocation39_spill] sm:$0xff] %v13313_v0  ;;  %v1630_v31 = vrot.slane %v201_v60, 1  ;;  %v13321_v34 = vpack.c.bf16 %v194_v4, %v193_v3  ;;  %v13327_v41 = vpack.c.bf16 %v197_v56, %v196_v46  ;;  %v204_v57 = vld [vmem:[%s16661_s1 + $0x250] sm:$0x3]  ;;  %v205_v46 = vld [vmem:[%s16661_s1 + $0x258] sm:$0xff]  ;;  %v206_v56 = vld [vmem:[%s16661_s1 + $0x260] sm:$0xff] }
  0x28   :  { %17053 = vst [vmem:[#allocation40_spill] sm:$0xff] %v13317_v10  ;;  %v1624_v35 = vsel %vm1201_vm1, %v1622_v47, %v1623_v49  ;;  %v1626_v40 = vsel %vm1201_vm1, %v1623_v49, %v1625_v14  ;;  %v207_v60 = vld [vmem:[%s16661_s1 + $0x268] sm:$0x3]  ;;  %v1632_v49 = vrot.slane %v202_v23, 1  ;;  %v1633_v14 = vrot.slane %v203_v24, 1 }
  0x29   :  { %17054 = vst [vmem:[#allocation41_spill] sm:$0xff] %v13321_v34  ;;  %17055 = vst [vmem:[#allocation42_spill] sm:$0xff] %v13327_v41  ;;  %v1631_v4 = vsel %vm1201_vm1, %v1628_v26, %v1630_v31  ;;  %v13351_v47 = vpack.c.bf16 %v1626_v40, %v1624_v35  ;;  %v1637_v31 = vrot.slane %v205_v46, 1  ;;  %v1640_v13 = vrot.slane %v207_v60, 1  ;;  %v213_v60 = vld [vmem:[%s16661_s1 + $0x298] sm:$0x3] }
  0x2a   :  { %10384 = vmatmul.mubr.msk.bf16.gmra.mrb[16].mxu1 %vm322_vm0, %v13116_v61  ;;  %v1634_v35 = vsel %vm1201_vm1, %v1632_v49, %v1633_v14 }
  0x2b   :  { %10387 = vmatprep.mubr.msk.bf16.mxu1 %vm322_vm0, %v13122_v2  ;;  %17056 = vst [vmem:[#allocation43_spill] sm:$0xff] %v13351_v47 }
  0x2c   :  { %10996 = vmatmul.mubr.msk.bf16.gmra.mrb[16].mxu0 %vm322_vm0, %v13146_v21 }
  0x2d   :  { %10999 = vmatprep.mubr.msk.bf16.mxu0 %vm322_vm0, %v13150_v22 }
  0x32   :  { %10388 = vmatmul.mubr.msk.bf16.gmra.mrb[20].mxu1 %vm322_vm0, %v13154_v32 }
  0x33   :  { %10391 = vmatprep.mubr.msk.bf16.mxu1 %vm322_vm0, %v13163_v38 }
  0x34   :  { %11000 = vmatmul.mubr.msk.bf16.gmra.mrb[20].mxu0 %vm322_vm0, %v13195_v52 }
  0x35   :  { %11003 = vmatprep.mubr.msk.bf16.mxu0 %vm322_vm0, %v13200_v55 }
  0x3a   :  { %10392 = vmatmul.mubr.msk.bf16.gmra.mrb[24].mxu1 %vm322_vm0, %v13204_v1 }
  0x3b   :  { %10395 = vmatprep.mubr.msk.bf16.mxu1 %vm322_vm0, %v13210_v5 }
  0x3c   :  { %11004 = vmatmul.mubr.msk.bf16.gmra.mrb[24].mxu0 %vm322_vm0, %v13234_v28 }
  0x3d   :  { %11007 = vmatprep.mubr.msk.bf16.mxu0 %vm322_vm0, %v13238_v30 }
  0x42   :  { %10396 = vmatmul.mubr.msk.bf16.gmra.mrb[28].mxu1 %vm322_vm0, %v13248_v51  ;;  %v13397_v51 = vpack.c.bf16 %v206_v56, %v205_v46 }
  0x43   :  { %10399 = vmatprep.mubr.msk.bf16.mxu1 %vm322_vm0, %v290_v58  ;;  %v199_v58 = vld [vmem:[%s16661_s1 + $0x228] sm:$0xff] }
  0x44   :  { %11008 = vmatmul.mubr.msk.bf16.gmra.mrb[28].mxu0 %vm322_vm0, %v13276_v11  ;;  %v1627_v15 = vrot.slane %v199_v58, 1  ;;  %v13359_v11 = vpack.c.bf16 %v200_v59, %v199_v58  ;;  %17062 = vst [vmem:[#allocation49_spill] sm:$0xff] %v13397_v51 }
  0x45   :  { %11011 = vmatprep.mubr.msk.bf16.mxu0 %vm322_vm0, %v13279_v16 }
  0x46   :  { %v1629_v3 = vsel %vm1201_vm1, %v1627_v15, %v1628_v26  ;;  %v1635_v26 = vrot.slane %v204_v57, 1  ;;  %17058 = vst [vmem:[#allocation45_spill] sm:$0xff] %v13359_v11  ;;  %v210_v57 = vld [vmem:[%s16661_s1 + $0x280] sm:$0x3] }
  0x47   :  { %v13355_v15 = vpack.c.bf16 %v1631_v4, %v1629_v3  ;;  %v208_v3 = vld [vmem:[%s16661_s1 + $0x270] sm:$0xff]  ;;  %v209_v4 = vld [vmem:[%s16661_s1 + $0x278] sm:$0xff] }
  0x48   :  { %v1636_v40 = vsel %vm1201_vm1, %v1633_v14, %v1635_v26  ;;  %v1643_v14 = vrot.slane %v209_v4, 1  ;;  %v1645_v26 = vrot.slane %v210_v57, 1  ;;  %v216_v57 = vld [vmem:[%s16661_s1 + $0x2b0] sm:$0x3] }
  0x49   :  { %17057 = vst [vmem:[#allocation44_spill] sm:$0xff] %v13355_v15 }
  0x4a   :  { %10400 = vmatmul.mubr.msk.bf16.gmra.mrb[32].mxu1 %vm322_vm0, %v13283_v37  ;;  %v1638_v37 = vrot.slane %v206_v56, 1 }
  0x4b   :  { %10403 = vmatprep.mubr.msk.bf16.mxu1 %vm322_vm0, %v13289_v45  ;;  %v1650_v45 = vrot.slane %v213_v60, 1  ;;  %v219_v60 = vld [vmem:[%s16661_s1 + $0x2c8] sm:$0x3] }
  0x4c   :  { %11012 = vmatmul.mubr.msk.bf16.gmra.mrb[32].mxu0 %vm322_vm0, %v13313_v0  ;;  %v1639_v58 = vsel %vm1201_vm1, %v1637_v31, %v1638_v37  ;;  %v1641_v59 = vsel %vm1201_vm1, %v1638_v37, %v1640_v13  ;;  %v13389_v13 = vpack.c.bf16 %v1636_v40, %v1634_v35  ;;  %v1642_v37 = vrot.slane %v208_v3, 1 }
  0x4d   :  { %11015 = vmatprep.mubr.msk.bf16.mxu0 %vm322_vm0, %v13317_v10  ;;  %v13393_v49 = vpack.c.bf16 %v1641_v59, %v1639_v58  ;;  %v1646_v40 = vsel %vm1201_vm1, %v1643_v14, %v1645_v26  ;;  %v214_v58 = vld [vmem:[%s16661_s1 + $0x2a0] sm:$0xff]  ;;  %v215_v59 = vld [vmem:[%s16661_s1 + $0x2a8] sm:$0xff]  ;;  %v1655_v26 = vrot.slane %v216_v57, 1  ;;  %v1660_v5 = vrot.slane %v219_v60, 1  ;;  %v221_v57 = vld [vmem:[%s16661_s1 + $0x2d8] sm:$0xff] }
  0x4e   :  { %17060 = vst [vmem:[#allocation47_spill] sm:$0xff] %v13389_v13  ;;  %v1644_v35 = vsel %vm1201_vm1, %v1642_v37, %v1643_v14  ;;  %v1653_v37 = vrot.slane %v215_v59, 1  ;;  %v222_v60 = vld [vmem:[%s16661_s1 + $0x2e0] sm:$0x3] }
  0x4f   :  { %17061 = vst [vmem:[#allocation48_spill] sm:$0xff] %v13393_v49 }
  0x52   :  { %10404 = vmatmul.mubr.msk.bf16.gmra.mrb[36].mxu1 %vm322_vm0, %v13321_v34  ;;  %v13365_v34 = vpack.c.bf16 %v203_v24, %v202_v23  ;;  %v211_v23 = vld [vmem:[%s16661_s1 + $0x288] sm:$0xff]  ;;  %v212_v24 = vld [vmem:[%s16661_s1 + $0x290] sm:$0xff] }
  0x53   :  { %10407 = vmatprep.mubr.msk.bf16.mxu1 %vm322_vm0, %v13327_v41  ;;  %v1647_v31 = vrot.slane %v211_v23, 1  ;;  %v1648_v41 = vrot.slane %v212_v24, 1  ;;  %v13435_v1 = vpack.c.bf16 %v212_v24, %v211_v23 }
  0x54   :  { %11016 = vmatmul.mubr.msk.bf16.gmra.mrb[36].mxu0 %vm322_vm0, %v13351_v47  ;;  %17059 = vst [vmem:[#allocation46_spill] sm:$0xff] %v13365_v34 }
  0x55   :  { %11019 = vmatprep.mubr.msk.bf16.mxu0 %vm322_vm0, %v13355_v15  ;;  %v1649_v46 = vsel %vm1201_vm1, %v1647_v31, %v1648_v41  ;;  %v1651_v56 = vsel %vm1201_vm1, %v1648_v41, %v1650_v45  ;;  %v13427_v45 = vpack.c.bf16 %v1646_v40, %v1644_v35  ;;  %v1652_v41 = vrot.slane %v214_v58, 1  ;;  %17066 = vst [vmem:[#allocation53_spill] sm:$0xff] %v13435_v1  ;;  %v220_v35 = vld [vmem:[%s16661_s1 + $0x2d0] sm:$0xff] }
  0x56   :  { %v13431_v14 = vpack.c.bf16 %v1651_v56, %v1649_v46  ;;  %v1656_v46 = vsel %vm1201_vm1, %v1653_v37, %v1655_v26  ;;  %v13444_v56 = vpack.c.bf16 %v215_v59, %v214_v58  ;;  %v224_v58 = vld [vmem:[%s16661_s1 + $0x2f0] sm:$0xff]  ;;  %v225_v59 = vld [vmem:[%s16661_s1 + $0x2f8] sm:$0x3] }
  0x57   :  { %17064 = vst [vmem:[#allocation51_spill] sm:$0xff] %v13427_v45  ;;  %v1654_v40 = vsel %vm1201_vm1, %v1652_v41, %v1653_v37  ;;  %v223_v41 = vld [vmem:[%s16661_s1 + $0x2e8] sm:$0xff]  ;;  %v1663_v37 = vrot.slane %v221_v57, 1  ;;  %v1670_v38 = vrot.slane %v225_v59, 1 }
  0x58   :  { %17065 = vst [vmem:[#allocation52_spill] sm:$0xff] %v13431_v14  ;;  %17067 = vst [vmem:[#allocation54_spill] sm:$0xff] %v13444_v56 }
  0x5a   :  { %10408 = vmatmul.mubr.msk.bf16.gmra.mrb[40].mxu1 %vm322_vm0, %v13359_v11 }
  0x5b   :  { %10411 = vmatprep.mubr.msk.bf16.mxu1 %vm322_vm0, %v13365_v34  ;;  %v13403_v34 = vpack.c.bf16 %v209_v4, %v208_v3  ;;  %v217_v3 = vld [vmem:[%s16661_s1 + $0x2b8] sm:$0xff]  ;;  %v218_v4 = vld [vmem:[%s16661_s1 + $0x2c0] sm:$0xff] }
  0x5c   :  { %11020 = vmatmul.mubr.msk.bf16.gmra.mrb[40].mxu0 %vm322_vm0, %v13389_v13  ;;  %v1657_v31 = vrot.slane %v217_v3, 1  ;;  %v1658_v11 = vrot.slane %v218_v4, 1 }
  0x5d   :  { %11023 = vmatprep.mubr.msk.bf16.mxu0 %vm322_vm0, %v13393_v49  ;;  %17063 = vst [vmem:[#allocation50_spill] sm:$0xff] %v13403_v34 }
  0x5e   :  { %v1659_v23 = vsel %vm1201_vm1, %v1657_v31, %v1658_v11  ;;  %v1661_v24 = vsel %vm1201_vm1, %v1658_v11, %v1660_v5  ;;  %v13465_v5 = vpack.c.bf16 %v1656_v46, %v1654_v40  ;;  %v1662_v11 = vrot.slane %v220_v35, 1 }
  0x5f   :  { %v13469_v26 = vpack.c.bf16 %v1661_v24, %v1659_v23  ;;  %v1665_v31 = vrot.slane %v222_v60, 1 }
  0x60   :  { %17068 = vst [vmem:[#allocation55_spill] sm:$0xff] %v13465_v5 }
  0x61   :  { %17069 = vst [vmem:[#allocation56_spill] sm:$0xff] %v13469_v26 }
  0x62   :  { %10412 = vmatmul.mubr.msk.bf16.gmra.mrb[44].mxu1 %vm322_vm0, %v13397_v51  ;;  %v1668_v51 = vrot.slane %v224_v58, 1 }
  0x63   :  { %10415 = vmatprep.mubr.msk.bf16.mxu1 %vm322_vm0, %v13403_v34  ;;  %v1667_v34 = vrot.slane %v223_v41, 1 }
  0x64   :  { %11024 = vmatmul.mubr.msk.bf16.gmra.mrb[44].mxu0 %vm322_vm0, %v13427_v45 }
  0x65   :  { %11027 = vmatprep.mubr.msk.bf16.mxu0 %vm322_vm0, %v13431_v14 }
  0x6a   :  { %10416 = vmatmul.mubr.msk.bf16.gmra.mrb[48].mxu1 %vm322_vm0, %v13435_v1 }
  0x6b   :  { %10419 = vmatprep.mubr.msk.bf16.mxu1 %vm322_vm0, %v13444_v56 }
  0x6c   :  { %10 = vsyncpa [#allocation3], 0  ;;  %11028 = vmatmul.mubr.msk.bf16.gmra.mrb[48].mxu0 %vm322_vm0, %v13465_v5  ;;  %v13473_v32 = vpack.c.bf16 %v218_v4, %v217_v3  ;;  %v1664_v40 = vsel %vm1201_vm1, %v1662_v11, %v1663_v37  ;;  %v1666_v46 = vsel %vm1201_vm1, %v1663_v37, %v1665_v31  ;;  %v13479_v56 = vpack.c.bf16 %v221_v57, %v220_v35  ;;  %v226_v60 = vld [vmem:[%s16661_s1 + $0x300] sm:$0xff]  ;;  %v227_v3 = vld [vmem:[%s16661_s1 + $0x308] sm:$0xff] }
  0x6d   :  { %11031 = vmatprep.mubr.msk.bf16.mxu0 %vm322_vm0, %v13469_v26  ;;  %v1669_v23 = vsel %vm1201_vm1, %v1667_v34, %v1668_v51  ;;  %v1671_v24 = vsel %vm1201_vm1, %v1668_v51, %v1670_v38  ;;  %v228_v4 = vld [vmem:[%s16661_s1 + $0x310] sm:$0x3]  ;;  %v229_v35 = vld [vmem:[%s16661_s1 + $0x318] sm:$0xff]  ;;  %v230_v38 = vld [vmem:[%s16661_s1 + $0x320] sm:$0xff]  ;;  %v13503_v34 = vpack.c.bf16 %v1666_v46, %v1664_v40  ;;  %v1672_v59 = vrot.slane %v226_v60, 1 }
  0x6e   :  { %17070 = vst [vmem:[#allocation57_spill] sm:$0xff] %v13473_v32  ;;  %17071 = vst [vmem:[#allocation58_spill] sm:$0xff] %v13479_v56  ;;  %v231_v51 = vld [vmem:[%s16661_s1 + $0x328] sm:$0x3]  ;;  %v13507_v57 = vpack.c.bf16 %v1671_v24, %v1669_v23  ;;  %v1673_v11 = vrot.slane %v227_v3, 1  ;;  %v1675_v37 = vrot.slane %v228_v4, 1  ;;  %v13511_v61 = vpack.c.bf16 %v224_v58, %v223_v41 }
  0x6f   :  { %17072 = vst [vmem:[#allocation59_spill] sm:$0xff] %v13503_v34  ;;  %v1677_v31 = vrot.slane %v229_v35, 1  ;;  %v1678_v1 = vrot.slane %v230_v38, 1  ;;  %v1680_v2 = vrot.slane %v231_v51, 1  ;;  %v13517_v23 = vpack.c.bf16 %v227_v3, %v226_v60  ;;  %v232_v51 = vld [vmem:[%s16661_s1 + $0x330] sm:$0xff]  ;;  %v233_v41 = vld [vmem:[%s16661_s1 + $0x338] sm:$0xff] }
  0x70   :  { %17073 = vst [vmem:[#allocation60_spill] sm:$0xff] %v13507_v57  ;;  %17074 = vst [vmem:[#allocation61_spill] sm:$0xff] %v13511_v61  ;;  %v1674_v40 = vsel %vm1201_vm1, %v1672_v59, %v1673_v11  ;;  %v1676_v46 = vsel %vm1201_vm1, %v1673_v11, %v1675_v37  ;;  %v234_v58 = vld [vmem:[%s16661_s1 + $0x340] sm:$0x3]  ;;  %v13533_v60 = vld [vmem:[%s16660_s0 + $0x18] sm:$0xff]  ;;  %v4974_v11 = vrot.slane %v232_v51, 1 }
  0x71   :  { %17075 = vst [vmem:[#allocation62_spill] sm:$0xff] %v13517_v23  ;;  %v1679_v24 = vsel %vm1201_vm1, %v1677_v31, %v1678_v1  ;;  %v1681_v4 = vsel %vm1201_vm1, %v1678_v1, %v1680_v2  ;;  %v13538_v2 = vld [vmem:[%s16660_s0 + $0x20] sm:$0xff]  ;;  %v13543_v1 = vld [vmem:[%s16660_s0 + $0x28] sm:$0x3]  ;;  %v13547_v3 = vpack.c.bf16 %v1676_v46, %v1674_v40  ;;  %v4975_v37 = vrot.slane %v233_v41, 1  ;;  %v13572_v51 = vld [vmem:[%s16660_s0 + $0x30] sm:$0xff] }
  0x72   :  { %10420 = vmatmul.mubr.msk.bf16.gmra.mrb[52].mxu1 %vm322_vm0, %v13473_v32  ;;  %v13551_v59 = vpack.c.bf16 %v1681_v4, %v1679_v24  ;;  %v4977_v31 = vrot.slane %v234_v58, 1  ;;  %v13559_v32 = vld [vmem:[%s16660_s0 + $0x8] sm:$0xff]  ;;  %v2748_v40 = vrot.slane %v13533_v60, 2  ;;  %v2749_v46 = vrot.slane %v13538_v2, 2  ;;  %v13577_v41 = vld [vmem:[%s16660_s0 + $0x38] sm:$0xff] }
  0x73   :  { %10423 = vmatprep.mubr.msk.bf16.mxu1 %vm322_vm0, %v13479_v56  ;;  %17076 = vst [vmem:[#allocation63_spill] sm:$0xff] %v13547_v3  ;;  %v22_v56 = vld [vmem:[%s16660_s0] sm:$0xff]  ;;  %vm2742_vm2 = vcmask 1045504   ;;  %v2972_v24 = vrot.slane %v12901_v6, 2  ;;  %v13567_v4 = vpack.c.bf16 %v230_v38, %v229_v35  ;;  %v2973_v58 = vrot.slane %v12906_v8, 2 }
  0x74   :  { %11032 = vmatmul.mubr.msk.bf16.gmra.mrb[52].mxu0 %vm322_vm0, %v13503_v34  ;;  %17077 = vst [vmem:[#allocation64_spill] sm:$0xff] %v13551_v59  ;;  %v4976_v6 = vsel %vm1201_vm1, %v4974_v11, %v4975_v37  ;;  %v4978_v35 = vsel %vm1201_vm1, %v4975_v37, %v4977_v31  ;;  %v238_v38 = vpack.c.bf16 %v13559_v32, %v22_v56  ;;  %v2975_v42 = vrot.slane %v12911_v9, 2  ;;  %v13599_v37 = vld [vmem:[%s16660_s0 + $0x48] sm:$0xff]  ;;  %v13604_v31 = vld [vmem:[%s16660_s0 + $0x50] sm:$0xff]  ;;  %v13609_v9 = vld [vmem:[%s16660_s0 + $0x58] sm:$0x3] }
  0x75   :  { %11035 = vmatprep.mubr.msk.bf16.mxu0 %vm322_vm0, %v13507_v57  ;;  %17078 = vst [vmem:[#allocation65_spill] sm:$0xff] %v13567_v4  ;;  %v2977_v39 = vrot.slane %v12929_v17, 2  ;;  %v2750_v8 = vsel %vm2742_vm2, %v2748_v40, %v2749_v46  ;;  %v2753_v7 = vrot.slane %v13572_v51, 2  ;;  %v2754_v11 = vrot.slane %v13577_v41, 2 }
  0x76   :  { %v13613_v17 = vpack.c.bf16 %v4978_v35, %v4976_v6  ;;  %v1203_v40 = vrot.slane %v13559_v32, 1  ;;  %v1207_v43 = vrot.slane %v13533_v60, 1  ;;  %v1208_v36 = vrot.slane %v13538_v2, 1 }
  0x77   :  { %v1210_v25 = vrot.slane %v13543_v1, 1  ;;  %v2758_v6 = vrot.slane %v13599_v37, 2  ;;  %v2761_v32 = vrot.slane %v13609_v9, 2  ;;  %v2980_v35 = vrot.slane %v12939_v19, 2 }
  0x78   :  { %17079 = vst [vmem:[#allocation66_spill] sm:$0xff] %v13613_v17 }
  0x7a   :  { %10424 = vmatmul.mubr.msk.bf16.gmra.mrb[56].mxu1 %vm322_vm0, %v13511_v61  ;;  %v13588_v61 = vld [vmem:[%s16660_s0 + $0x40] sm:$0x3] }
  0x7b   :  { %10427 = vmatprep.mubr.msk.bf16.mxu1 %vm322_vm0, %v13517_v23  ;;  %v2751_v23 = vrot.slane %v13543_v1, 2  ;;  %v24_v1 = vld [vmem:[%s16660_s0 + $0x10] sm:$0x3] }
  0x7c   :  { %11036 = vmatmul.mubr.msk.bf16.gmra.mrb[56].mxu0 %vm322_vm0, %v13547_v3  ;;  %v2978_v3 = vrot.slane %v12934_v18, 2 }
  0x7d   :  { %11039 = vmatprep.mubr.msk.bf16.mxu0 %vm322_vm0, %v13551_v59  ;;  %v2752_v12 = vsel %vm2742_vm2, %v2749_v46, %v2751_v23  ;;  %v1202_v23 = vrot.slane %v22_v56, 1  ;;  %v2756_v46 = vrot.slane %v13588_v61, 2  ;;  %v2759_v56 = vrot.slane %v13604_v31, 2 }
  0x7e   :  { %v13621_v59 = vpack.c.bf16 %v2752_v12, %v2750_v8  ;;  %v13635_v12 = vpack.c.bf16 %v13577_v41, %v13572_v51  ;;  %v1205_v8 = vrot.slane %v24_v1, 1 }
  0x7f   :  { %v2757_v18 = vsel %vm2742_vm2, %v2754_v11, %v2756_v46  ;;  %v13644_v19 = vsel %vm1201_vm1, %v1202_v23, %v1203_v40  ;;  %v1209_v46 = vsel %vm1201_vm1, %v1207_v43, %v1208_v36  ;;  %v1211_v23 = vsel %vm1201_vm1, %v1208_v36, %v1210_v25  ;;  %v12688_v43 = vld [vmem:[%s16662_s2 + $0x18] sm:$0xff]  }
  0x80   :  { %17080 = vst [vmem:[#allocation67_spill] sm:$0xff] %v13621_v59  ;;  %17082 = vst [vmem:[#allocation69_spill] sm:$0xff] %v13635_v12  ;;  %v13674_v1 = vpack.c.bf16 %v1211_v23, %v1209_v46  ;;  %v13681_v36 = vld [vmem:[%s16660_s0 + $0x78] sm:$0xff] }
  0x82   :  { %10428 = vmatmul.mubr.msk.bf16.gmra.mrb[60].mxu1 %vm322_vm0, %v13567_v4  ;;  %v2755_v4 = vsel %vm2742_vm2, %v2753_v7, %v2754_v11  ;;  %v2976_v7 = vsel %vm2742_vm2, %v2973_v58, %v2975_v42  ;;  %v13664_v42 = vld [vmem:[%s16660_s0 + $0x68] sm:$0xff]  ;;  %17083 = vst [vmem:[#allocation70_spill] sm:$0xff] %v13674_v1 }
  0x83   :  { %10435 = vmatprep.mubr.msk.bf16.mxu1 %vm322_vm0, %v238_v38  ;;  %v13630_v38 = vpack.c.bf16 %v13538_v2, %v13533_v60  ;;  %v2974_v60 = vsel %vm2742_vm2, %v2972_v24, %v2973_v58  ;;  %v13653_v2 = vld [vmem:[%s16660_s0 + $0x60] sm:$0xff]  ;;  %v2762_v24 = vsel %vm2742_vm2, %v2759_v56, %v2761_v32  ;;  %v13669_v58 = vld [vmem:[%s16660_s0 + $0x70] sm:$0x3]  ;;  %v13676_v25 = vpack.c.bf16 %v2757_v18, %v2755_v4 }
  0x84   :  { %11040 = vmatmul.mubr.msk.bf16.gmra.mrb[60].mxu0 %vm322_vm0, %v13613_v17  ;;  %v13655_v11 = vpack.c.bf16 %v2976_v7, %v2974_v60  ;;  %v2760_v17 = vsel %vm2742_vm2, %v2758_v6, %v2759_v56  ;;  %v13686_v6 = vld [vmem:[%s16660_s0 + $0x80] sm:$0xff]  ;;  %v13691_v56 = vld [vmem:[%s16660_s0 + $0x88] sm:$0x3]  ;;  %v13694_v32 = vsel %vm1201_vm1, %v1203_v40, %v1205_v8  ;;  %v2763_v4 = vrot.slane %v13653_v2, 2 }
  0x85   :  { %17081 = vst [vmem:[#allocation68_spill] sm:$0xff] %v13630_v38  ;;  %11047 = vmatprep.mubr.msk.bf16.mxu0 %vm322_vm0, %v13621_v59  ;;  %17084 = vst [vmem:[#allocation71_spill] sm:$0xff] %v13676_v25  ;;  %v2979_v60 = vsel %vm2742_vm2, %v2977_v39, %v2978_v3  ;;  %v2981_v7 = vsel %vm2742_vm2, %v2978_v3, %v2980_v35  ;;  %v13706_v46 = vpack.c.bf16 %v2762_v24, %v2760_v17  ;;  %v13721_v3 = vld [vmem:[%s16663_s3 + $0x10] sm:$0xff]  }
  0x86   :  { %v2764_v40 = vrot.slane %v13664_v42, 2  ;;  %v2766_v8 = vrot.slane %v13669_v58, 2  ;;  %v13710_v23 = vpack.c.bf16 %v2981_v7, %v2979_v60  ;;  %v2769_v18 = vrot.slane %v13686_v6, 2  ;;  %v13741_v7 = vld [vmem:[%s16660_s0 + $0x90] sm:$0xff] }
  0x87   :  { %17085 = vst [vmem:[#allocation72_spill] sm:$0xff] %v13706_v46  ;;  %v2771_v39 = vrot.slane %v13691_v56, 2  ;;  %v13727_v17 = vpack.c.bf16 %v13604_v31, %v13599_v37  ;;  %v13736_v60 = vpack.c.bf16 %v13664_v42, %v13653_v2  ;;  %v2773_v59 = vrot.slane %v13741_v7, 2 }
  0x88   :  { %v2765_v35 = vsel %vm2742_vm2, %v2763_v4, %v2764_v40  ;;  %v2767_v24 = vsel %vm2742_vm2, %v2764_v40, %v2766_v8  ;;  %v13753_v4 = vld [vmem:[%s16660_s0 + $0xa0] sm:$0x3]  ;;  %v13773_v8 = vld [vmem:[%s16660_s0 + $0xb8] sm:$0x3] }
  0x89   :  { %17086 = vst [vmem:[#allocation73_spill] sm:$0xff] %v13727_v17  ;;  %17087 = vst [vmem:[#allocation74_spill] sm:$0xff] %v13736_v60  ;;  %v13758_v40 = vld [vmem:[%s16662_s2 + $0x60] sm:$0xff]   ;;  %v2776_v34 = vrot.slane %v13753_v4, 2  ;;  %v2781_v14 = vrot.slane %v13773_v8, 2 }
  0x8a   :  { %10436 = vmatmul.mubr.msk.bf16.vlgmr.msra.gmra.mrb[0].mxu1 %vm322_vm0, %v13630_v38  ;;  %v2768_v38 = vrot.slane %v13681_v36, 2 }
  0x8b   :  { %10500 = vmatpush3.bf16.msra.mxu1 %v13174_v44  ;;  %10439 = vmatprep.mubr.msk.bf16.mxu1 %vm322_vm0, %v13635_v12  ;;  %v12689_v44 = vld [vmem:[%s16663_s3 + $0x58] sm:$0xff]  }
  0x8c   :  { %10501 = vmatprep.subr.bf16.mxu1 %v12688_v43  ;;  %11048 = vmatmul.mubr.msk.bf16.vlgmr.msra.gmra.mrb[0].mxu0 %vm322_vm0, %v13676_v25  ;;  %v2770_v25 = vsel %vm2742_vm2, %v2768_v38, %v2769_v18  ;;  %v13763_v38 = vld [vmem:[%s16660_s0 + $0xa8] sm:$0xff] }
  0x8d   :  { %11112 = vmatpush3.bf16.msra.mxu0 %v13184_v48  ;;  %11051 = vmatprep.mubr.msk.bf16.mxu0 %vm322_vm0, %v13706_v46  ;;  %v2772_v48 = vsel %vm2742_vm2, %v2769_v18, %v2771_v39  ;;  %v13748_v46 = vld [vmem:[%s16660_s0 + $0x98] sm:$0xff]  ;;  %v13768_v18 = vld [vmem:[%s16660_s0 + $0xb0] sm:$0xff]  ;;  %v2778_v26 = vrot.slane %v13763_v38, 2 }
  0x8e   :  { %11113 = vmatprep.subr.bf16.mxu0 %v12689_v44  ;;  %v13782_v39 = vpack.c.bf16 %v2772_v48, %v2770_v25  ;;  %v2774_v57 = vrot.slane %v13748_v46, 2  ;;  %v2779_v5 = vrot.slane %v13768_v18, 2  ;;  %v13795_v25 = vpack.c.bf16 %v13686_v6, %v13681_v36 }
  0x8f   :  { %10502 = vmatpush3.bf16.msra.mxu1 %v12688_v43  ;;  %v13778_v43 = vpack.c.bf16 %v2767_v24, %v2765_v35  ;;  %v13803_v24 = vpack.c.bf16 %v13748_v46, %v13741_v7 }
  0x90   :  { %10567 = vmatprep.subr.bf16.mxu1 %v13721_v3  ;;  %17089 = vst [vmem:[#allocation76_spill] sm:$0xff] %v13782_v39  ;;  %17090 = vst [vmem:[#allocation77_spill] sm:$0xff] %v13795_v25  ;;  %v2777_v35 = vsel %vm2742_vm2, %v2774_v57, %v2776_v34  ;;  %v2780_v48 = vsel %vm2742_vm2, %v2778_v26, %v2779_v5  ;;  %v2782_v45 = vsel %vm2742_vm2, %v2779_v5, %v2781_v14  ;;  %v13820_v34 = vld [vmem:[%s16660_s0 + $0xd0] sm:$0x3]  ;;  %v13825_v26 = vld [vmem:[%s16660_s0 + $0xd8] sm:$0xff] }
  0x91   :  { %17088 = vst [vmem:[#allocation75_spill] sm:$0xff] %v13778_v43  ;;  %11114 = vmatpush3.bf16.msra.mxu0 %v12689_v44  ;;  %v2775_v44 = vsel %vm2742_vm2, %v2773_v59, %v2774_v57  ;;  %17091 = vst [vmem:[#allocation78_spill] sm:$0xff] %v13803_v24  ;;  %v13830_v14 = vld [vmem:[%s16660_s0 + $0xe0] sm:$0xff]  ;;  %v13835_v5 = vld [vmem:[%s16660_s0 + $0xe8] sm:$0x3]  ;;  %v13843_v59 = vpack.c.bf16 %v2782_v45, %v2780_v48  ;;  %v2786_v15 = vrot.slane %v13820_v34, 2 }
  0x92   :  { %10440 = vmatmul.mubr.msk.bf16.gmra.mrb[4].mxu1 %vm322_vm0, %v13727_v17  ;;  %11179 = vmatprep.subr.bf16.mxu0 %v13758_v40  ;;  %v13839_v57 = vpack.c.bf16 %v2777_v35, %v2775_v44  ;;  %v2788_v47 = vrot.slane %v13825_v26, 2  ;;  %v2789_v10 = vrot.slane %v13830_v14, 2  ;;  %v2791_v0 = vrot.slane %v13835_v5, 2 }
  0x93   :  { %10443 = vmatprep.mubr.msk.bf16.mxu1 %vm322_vm0, %v13736_v60  ;;  %17093 = vst [vmem:[#allocation80_spill] sm:$0xff] %v13843_v59  ;;  %v13855_v44 = vpack.c.bf16 %v13768_v18, %v13763_v38 }
  0x94   :  { %11052 = vmatmul.mubr.msk.bf16.gmra.mrb[4].mxu0 %vm322_vm0, %v13778_v43  ;;  %v13810_v43 = vld [vmem:[%s16660_s0 + $0xc0] sm:$0xff]  ;;  %17092 = vst [vmem:[#allocation79_spill] sm:$0xff] %v13839_v57  ;;  %v2790_v16 = vsel %vm2742_vm2, %v2788_v47, %v2789_v10  ;;  %v2792_v30 = vsel %vm2742_vm2, %v2789_v10, %v2791_v0  ;;  %v13885_v47 = vld [vmem:[%s16660_s0 + $0x108] sm:$0xff]  ;;  %v13890_v0 = vld [vmem:[%s16660_s0 + $0x110] sm:$0xff] }
  0x95   :  { %11055 = vmatprep.mubr.msk.bf16.mxu0 %vm322_vm0, %v13782_v39  ;;  %v13815_v39 = vld [vmem:[%s16660_s0 + $0xc8] sm:$0xff]  ;;  %v2783_v49 = vrot.slane %v13810_v43, 2  ;;  %17094 = vst [vmem:[#allocation81_spill] sm:$0xff] %v13855_v44  ;;  %v13895_v10 = vld [vmem:[%s16660_s0 + $0x118] sm:$0x3]  ;;  %v2798_v22 = vrot.slane %v13885_v47, 2 }
  0x96   :  { %v2784_v13 = vrot.slane %v13815_v39, 2  ;;  %v13863_v48 = vpack.c.bf16 %v13815_v39, %v13810_v43  ;;  %v2799_v21 = vrot.slane %v13890_v0, 2  ;;  %v2801_v54 = vrot.slane %v13895_v10, 2 }
  0x98   :  { %v2785_v45 = vsel %vm2742_vm2, %v2783_v49, %v2784_v13  ;;  %v2787_v35 = vsel %vm2742_vm2, %v2784_v13, %v2786_v15  ;;  %17095 = vst [vmem:[#allocation82_spill] sm:$0xff] %v13863_v48  ;;  %v13880_v15 = vld [vmem:[%s16660_s0 + $0x100] sm:$0x3]  ;;  %v13903_v49 = vpack.c.bf16 %v2792_v30, %v2790_v16  ;;  %v2800_v53 = vsel %vm2742_vm2, %v2798_v22, %v2799_v21  ;;  %v13945_v22 = vld [vmem:[%s16660_s0 + $0x138] sm:$0xff] }
  0x99   :  { %v13899_v13 = vpack.c.bf16 %v2787_v35, %v2785_v45  ;;  %v2796_v52 = vrot.slane %v13880_v15, 2  ;;  %v13915_v45 = vpack.c.bf16 %v13830_v14, %v13825_v26  ;;  %v2802_v29 = vsel %vm2742_vm2, %v2799_v21, %v2801_v54  ;;  %17101 = vst [vmem:[#allocation88_spill] sm:$0xff] %v13945_v22  ;;  %v13950_v54 = vld [vmem:[%s16660_s0 + $0x140] sm:$0xff]  ;;  %v13955_v21 = vld [vmem:[%s16660_s0 + $0x148] sm:$0x3] }
  0x9a   :  { %10444 = vmatmul.mubr.msk.bf16.gmra.mrb[8].mxu1 %vm322_vm0, %v13795_v25  ;;  %17097 = vst [vmem:[#allocation84_spill] sm:$0xff] %v13903_v49  ;;  %17102 = vst [vmem:[#allocation89_spill] sm:$0xff] %v13950_v54  ;;  %v2808_v63 = vrot.slane %v13945_v22, 2  ;;  %v2811_v25 = vrot.slane %v13955_v21, 2 }
  0x9b   :  { %10447 = vmatprep.mubr.msk.bf16.mxu1 %vm322_vm0, %v13803_v24  ;;  %17096 = vst [vmem:[#allocation83_spill] sm:$0xff] %v13899_v13  ;;  %17098 = vst [vmem:[#allocation85_spill] sm:$0xff] %v13915_v45  ;;  %v2809_v24 = vrot.slane %v13950_v54, 2 }
  0x9c   :  { %11056 = vmatmul.mubr.msk.bf16.gmra.mrb[8].mxu0 %vm322_vm0, %v13839_v57  ;;  %v13870_v57 = vld [vmem:[%s16660_s0 + $0xf0] sm:$0xff]  ;;  %17103 = vst [vmem:[#allocation90_spill] sm:$0xff] %v13955_v21 }
  0x9d   :  { %11059 = vmatprep.mubr.msk.bf16.mxu0 %vm322_vm0, %v13843_v59  ;;  %v13875_v59 = vld [vmem:[%s16660_s0 + $0xf8] sm:$0xff]  ;;  %v2793_v28 = vrot.slane %v13870_v57, 2 }
  0x9e   :  { %v2794_v55 = vrot.slane %v13875_v59, 2  ;;  %v13923_v35 = vpack.c.bf16 %v13875_v59, %v13870_v57 }
  0xa0   :  { %v2795_v30 = vsel %vm2742_vm2, %v2793_v28, %v2794_v55  ;;  %v2797_v16 = vsel %vm2742_vm2, %v2794_v55, %v2796_v52  ;;  %17099 = vst [vmem:[#allocation86_spill] sm:$0xff] %v13923_v35  ;;  %v13940_v52 = vld [vmem:[%s16660_s0 + $0x130] sm:$0x3]  ;;  %v13963_v28 = vpack.c.bf16 %v2802_v29, %v2800_v53 }
  0xa1   :  { %17100 = vst [vmem:[#allocation87_spill] sm:$0xff] %v13940_v52  ;;  %v13959_v55 = vpack.c.bf16 %v2797_v16, %v2795_v30  ;;  %v2806_v27 = vrot.slane %v13940_v52, 2  ;;  %v13975_v30 = vpack.c.bf16 %v13890_v0, %v13885_v47 }
  0xa2   :  { %10448 = vmatmul.mubr.msk.bf16.gmra.mrb[12].mxu1 %vm322_vm0, %v13855_v44  ;;  %17105 = vst [vmem:[#allocation92_spill] sm:$0xff] %v13963_v28 }
  0xa3   :  { %10451 = vmatprep.mubr.msk.bf16.mxu1 %vm322_vm0, %v13863_v48  ;;  %17104 = vst [vmem:[#allocation91_spill] sm:$0xff] %v13959_v55  ;;  %17106 = vst [vmem:[#allocation93_spill] sm:$0xff] %v13975_v30 }
  0xa4   :  { %11060 = vmatmul.mubr.msk.bf16.gmra.mrb[12].mxu0 %vm322_vm0, %v13899_v13  ;;  %v13930_v13 = vld [vmem:[%s16660_s0 + $0x120] sm:$0xff] }
  0xa5   :  { %11063 = vmatprep.mubr.msk.bf16.mxu0 %vm322_vm0, %v13903_v49  ;;  %v13935_v49 = vld [vmem:[%s16660_s0 + $0x128] sm:$0xff]  ;;  %v2803_v48 = vrot.slane %v13930_v13, 2 }
  0xa6   :  { %v2804_v44 = vrot.slane %v13935_v49, 2  ;;  %v13983_v16 = vpack.c.bf16 %v13935_v49, %v13930_v13 }
  0xa8   :  { %v2805_v29 = vsel %vm2742_vm2, %v2803_v48, %v2804_v44  ;;  %v2807_v53 = vsel %vm2742_vm2, %v2804_v44, %v2806_v27  ;;  %17107 = vst [vmem:[#allocation94_spill] sm:$0xff] %v13983_v16  ;;  %v14000_v27 = vld [vmem:[%s16660_s0 + $0x160] sm:$0x3] }
  0xa9   :  { %17110 = vst [vmem:[#allocation97_spill] sm:$0xff] %v14000_v27  ;;  %v14019_v44 = vpack.c.bf16 %v2807_v53, %v2805_v29  ;;  %v2816_v60 = vrot.slane %v14000_v27, 2  ;;  %v14035_v29 = vpack.c.bf16 %v13950_v54, %v13945_v22 }
  0xaa   :  { %10452 = vmatmul.mubr.msk.bf16.gmra.mrb[16].mxu1 %vm322_vm0, %v13915_v45  ;;  %v2812_v45 = vsel %vm2742_vm2, %v2809_v24, %v2811_v25  ;;  %v14010_v25 = vld [vmem:[%s16660_s0 + $0x170] sm:$0xff] }
  0xab   :  { %10455 = vmatprep.mubr.msk.bf16.mxu1 %vm322_vm0, %v13923_v35  ;;  %v2810_v35 = vsel %vm2742_vm2, %v2808_v63, %v2809_v24  ;;  %v14005_v63 = vld [vmem:[%s16660_s0 + $0x168] sm:$0xff]  ;;  %17112 = vst [vmem:[#allocation99_spill] sm:$0xff] %v14010_v25  ;;  %v14015_v24 = vld [vmem:[%s16660_s0 + $0x178] sm:$0x3]  ;;  %17114 = vst [vmem:[#allocation101_spill] sm:$0xff] %v14019_v44  ;;  %v2819_v33 = vrot.slane %v14010_v25, 2 }
  0xac   :  { %11064 = vmatmul.mubr.msk.bf16.gmra.mrb[16].mxu0 %vm322_vm0, %v13959_v55  ;;  %v13990_v55 = vld [vmem:[%s16660_s0 + $0x150] sm:$0xff]  ;;  %17111 = vst [vmem:[#allocation98_spill] sm:$0xff] %v14005_v63  ;;  %17113 = vst [vmem:[#allocation100_spill] sm:$0xff] %v14015_v24  ;;  %v14023_v48 = vpack.c.bf16 %v2812_v45, %v2810_v35  ;;  %v2818_v17 = vrot.slane %v14005_v63, 2  ;;  %v2821_v20 = vrot.slane %v14015_v24, 2 }
  0xad   :  { %11067 = vmatprep.mubr.msk.bf16.mxu0 %vm322_vm0, %v13963_v28  ;;  %17108 = vst [vmem:[#allocation95_spill] sm:$0xff] %v13990_v55  ;;  %v13995_v28 = vld [vmem:[%s16660_s0 + $0x158] sm:$0xff]  ;;  %v2813_v62 = vrot.slane %v13990_v55, 2  ;;  %17116 = vst [vmem:[#allocation103_spill] sm:$0xff] %v14035_v29 }
  0xae   :  { %17109 = vst [vmem:[#allocation96_spill] sm:$0xff] %v13995_v28  ;;  %17115 = vst [vmem:[#allocation102_spill] sm:$0xff] %v14023_v48  ;;  %v2814_v50 = vrot.slane %v13995_v28, 2  ;;  %v14043_v53 = vpack.c.bf16 %v13995_v28, %v13990_v55  ;;  %v76_v28 = vld [vmem:[%s16660_s0 + $0x1b0] sm:$0xff]  ;;  %v77_v55 = vld [vmem:[%s16660_s0 + $0x1b8] sm:$0xff] }
  0xb0   :  { %v2815_v45 = vsel %vm2742_vm2, %v2813_v62, %v2814_v50  ;;  %v2817_v35 = vsel %vm2742_vm2, %v2814_v50, %v2816_v60  ;;  %17117 = vst [vmem:[#allocation104_spill] sm:$0xff] %v14043_v53  ;;  %v72_v50 = vld [vmem:[%s16660_s0 + $0x190] sm:$0x3]  ;;  %v14059_v62 = vld [vmem:[%s16660_s0 + $0x1c8] sm:$0xff] }
  0xb1   :  { %v5742_v27 = vrot.slane %v72_v50, 2 }
  0xb2   :  { %10456 = vmatmul.mubr.msk.bf16.gmra.mrb[20].mxu1 %vm322_vm0, %v13975_v30  ;;  %v2822_v30 = vsel %vm2742_vm2, %v2819_v33, %v2821_v20  ;;  %v14064_v20 = vld [vmem:[%s16660_s0 + $0x1d0] sm:$0xff] }
  0xb3   :  { %10459 = vmatprep.mubr.msk.bf16.mxu1 %vm322_vm0, %v13983_v16  ;;  %v2820_v16 = vsel %vm2742_vm2, %v2818_v17, %v2819_v33  ;;  %v14069_v33 = vld [vmem:[%s16660_s0 + $0x1d8] sm:$0x3]  ;;  %v14073_v17 = vpack.c.bf16 %v2817_v35, %v2815_v45  ;;  %v2829_v45 = vrot.slane %v14064_v20, 2 }
  0xb4   :  { %11068 = vmatmul.mubr.msk.bf16.gmra.mrb[20].mxu0 %vm322_vm0, %v14019_v44  ;;  %v70_v44 = vld [vmem:[%s16660_s0 + $0x180] sm:$0xff]  ;;  %17118 = vst [vmem:[#allocation105_spill] sm:$0xff] %v14069_v33  ;;  %v14077_v60 = vpack.c.bf16 %v2822_v30, %v2820_v16  ;;  %v2831_v35 = vrot.slane %v14069_v33, 2  ;;  %v14092_v30 = vpack.c.bf16 %v14010_v25, %v14005_v63  ;;  %v14108_v33 = vld [vmem:[%s16660_s0 + $0x1e8] sm:$0xff] }
  0xb5   :  { %11071 = vmatprep.mubr.msk.bf16.mxu0 %vm322_vm0, %v14023_v48  ;;  %v71_v48 = vld [vmem:[%s16660_s0 + $0x188] sm:$0xff]  ;;  %17119 = vst [vmem:[#allocation106_spill] sm:$0xff] %v14073_v17  ;;  %v5739_v12 = vrot.slane %v70_v44, 2  ;;  %17123 = vst [vmem:[#allocation110_spill] sm:$0xff] %v14108_v33  ;;  %v2834_v21 = vrot.slane %v14108_v33, 2 }
  0xb6   :  { %17120 = vst [vmem:[#allocation107_spill] sm:$0xff] %v14077_v60  ;;  %v5740_v24 = vrot.slane %v71_v48, 2  ;;  %17121 = vst [vmem:[#allocation108_spill] sm:$0xff] %v14092_v30  ;;  %v254_v48 = vpack.c.bf16 %v77_v55, %v76_v28 }
  0xb8   :  { %v5741_v16 = vsel %vm2742_vm2, %v5739_v12, %v5740_v24  ;;  %v5743_v44 = vsel %vm2742_vm2, %v5740_v24, %v5742_v27  ;;  %v14113_v12 = vld [vmem:[%s16660_s0 + $0x1f0] sm:$0x3]  ;;  %v14118_v27 = vld [vmem:[%s16660_s0 + $0x1f8] sm:$0xff]  ;;  %v14123_v24 = vld [vmem:[%s16660_s0 + $0x200] sm:$0xff] }
  0xb9   :  { %17124 = vst [vmem:[#allocation111_spill] sm:$0xff] %v14113_v12  ;;  %17125 = vst [vmem:[#allocation112_spill] sm:$0xff] %v14118_v27  ;;  %v2836_v54 = vrot.slane %v14113_v12, 2  ;;  %v2838_v22 = vrot.slane %v14118_v27, 2  ;;  %v2839_v52 = vrot.slane %v14123_v24, 2 }
  0xba   :  { %10460 = vmatmul.mubr.msk.bf16.gmra.mrb[24].mxu1 %vm322_vm0, %v14035_v29  ;;  %v2828_v29 = vrot.slane %v14059_v62, 2  ;;  %17126 = vst [vmem:[#allocation113_spill] sm:$0xff] %v14123_v24 }
  0xbb   :  { %10463 = vmatprep.mubr.msk.bf16.mxu1 %vm322_vm0, %v14043_v53  ;;  %v2832_v53 = vsel %vm2742_vm2, %v2829_v45, %v2831_v35  ;;  %v1282_v35 = vrot.slane %v76_v28, 1  ;;  %v78_v28 = vld [vmem:[%s16660_s0 + $0x1c0] sm:$0x3] }
  0xbc   :  { %11072 = vmatmul.mubr.msk.bf16.gmra.mrb[24].mxu0 %vm322_vm0, %v14073_v17  ;;  %v2830_v50 = vsel %vm2742_vm2, %v2828_v29, %v2829_v45  ;;  %v14103_v17 = vld [vmem:[%s16660_s0 + $0x1e0] sm:$0xff]  ;;  %v14128_v29 = vld [vmem:[%s16660_s0 + $0x208] sm:$0x3]  ;;  %v14132_v45 = vpack.c.bf16 %v5743_v44, %v5741_v16  ;;  %v2837_v44 = vsel %vm2742_vm2, %v2834_v21, %v2836_v54 }
  0xbd   :  { %11075 = vmatprep.mubr.msk.bf16.mxu0 %vm322_vm0, %v14077_v60  ;;  %17122 = vst [vmem:[#allocation109_spill] sm:$0xff] %v14103_v17  ;;  %17127 = vst [vmem:[#allocation114_spill] sm:$0xff] %v14128_v29  ;;  %v1283_v60 = vrot.slane %v77_v55, 1  ;;  %v14135_v25 = vpack.c.bf16 %v2832_v53, %v2830_v50  ;;  %v2833_v63 = vrot.slane %v14103_v17, 2  ;;  %v14147_v55 = vpack.c.bf16 %v14064_v20, %v14059_v62  ;;  %v14178_v54 = vld [vmem:[%s16660_s0 + $0x220] sm:$0x3] }
  0xbe   :  { %17128 = vst [vmem:[#allocation115_spill] sm:$0xff] %v14132_v45  ;;  %v1285_v50 = vrot.slane %v78_v28, 1  ;;  %17135 = vst [vmem:[#allocation122_spill] sm:$0xff] %v14178_v54 }
  0xbf   :  { %17129 = vst [vmem:[#allocation116_spill] sm:$0xff] %v14135_v25  ;;  %17130 = vst [vmem:[#allocation117_spill] sm:$0xff] %v14147_v55  ;;  %v14153_v53 = vsel %vm1201_vm1, %v1282_v35, %v1283_v60  ;;  %v2835_v16 = vsel %vm2742_vm2, %v2833_v63, %v2834_v21  ;;  %v14168_v35 = vld [vmem:[%s16660_s0 + $0x210] sm:$0xff]  ;;  %v14173_v63 = vld [vmem:[%s16660_s0 + $0x218] sm:$0xff] }
  0xc0   :  { %17131 = vst [vmem:[#allocation118_spill] sm:$0xff] %v14153_v53  ;;  %17133 = vst [vmem:[#allocation120_spill] sm:$0xff] %v14168_v35  ;;  %v14193_v21 = vld [vmem:[%s16660_s0 + $0x238] sm:$0x3]  ;;  %v14200_v28 = vpack.c.bf16 %v2837_v44, %v2835_v16  ;;  %v14218_v44 = vpack.c.bf16 %v14123_v24, %v14118_v27 }
  0xc1   :  { %17134 = vst [vmem:[#allocation121_spill] sm:$0xff] %v14173_v63  ;;  %17138 = vst [vmem:[#allocation125_spill] sm:$0xff] %v14193_v21  ;;  %v2851_v16 = vrot.slane %v14193_v21, 2 }
  0xc2   :  { %10464 = vmatmul.mubr.msk.bf16.gmra.mrb[28].mxu1 %vm322_vm0, %v14092_v30  ;;  %v2841_v30 = vrot.slane %v14128_v29, 2  ;;  %17139 = vst [vmem:[#allocation126_spill] sm:$0xff] %v14200_v28  ;;  %17141 = vst [vmem:[#allocation128_spill] sm:$0xff] %v14218_v44 }
  0xc3   :  { %10467 = vmatprep.mubr.msk.bf16.mxu1 %vm322_vm0, %v254_v48  ;;  %v14161_v48 = vpack.c.bf16 %v14108_v33, %v14103_v17  ;;  %v2843_v33 = vrot.slane %v14168_v35, 2  ;;  %v2844_v17 = vrot.slane %v14173_v63, 2 }
  0xc4   :  { %11076 = vmatmul.mubr.msk.bf16.gmra.mrb[28].mxu0 %vm322_vm0, %v14132_v45  ;;  %v2840_v45 = vsel %vm2742_vm2, %v2838_v22, %v2839_v52  ;;  %v2842_v29 = vsel %vm2742_vm2, %v2839_v52, %v2841_v30  ;;  %v14183_v22 = vld [vmem:[%s16660_s0 + $0x228] sm:$0xff]  ;;  %v14188_v52 = vld [vmem:[%s16660_s0 + $0x230] sm:$0xff]  ;;  %v14196_v30 = vsel %vm1201_vm1, %v1283_v60, %v1285_v50  ;;  %v2846_v60 = vrot.slane %v14178_v54, 2 }
  0xc5   :  { %11079 = vmatprep.mubr.msk.bf16.mxu0 %vm322_vm0, %v14135_v25  ;;  %17132 = vst [vmem:[#allocation119_spill] sm:$0xff] %v14161_v48  ;;  %17136 = vst [vmem:[#allocation123_spill] sm:$0xff] %v14183_v22  ;;  %v14206_v12 = vpack.c.bf16 %v2842_v29, %v2840_v45  ;;  %v2848_v50 = vrot.slane %v14183_v22, 2  ;;  %v2845_v29 = vsel %vm2742_vm2, %v2843_v33, %v2844_v17  ;;  %v14243_v33 = vld [vmem:[%s16660_s0 + $0x250] sm:$0x3] }
  0xc6   :  { %17137 = vst [vmem:[#allocation124_spill] sm:$0xff] %v14188_v52  ;;  %v2847_v45 = vsel %vm2742_vm2, %v2844_v17, %v2846_v60  ;;  %v14226_v25 = vpack.c.bf16 %v14173_v63, %v14168_v35  ;;  %17145 = vst [vmem:[#allocation132_spill] sm:$0xff] %v14243_v33  ;;  %v14248_v17 = vld [vmem:[%s16660_s0 + $0x258] sm:$0xff]  ;;  %v14258_v60 = vld [vmem:[%s16660_s0 + $0x268] sm:$0x3]  ;;  %v2856_v35 = vrot.slane %v14243_v33, 2 }
  0xc7   :  { %17140 = vst [vmem:[#allocation127_spill] sm:$0xff] %v14206_v12  ;;  %17146 = vst [vmem:[#allocation133_spill] sm:$0xff] %v14248_v17  ;;  %v2858_v24 = vrot.slane %v14248_v17, 2  ;;  %v2861_v53 = vrot.slane %v14258_v60, 2 }
  0xc8   :  { %17142 = vst [vmem:[#allocation129_spill] sm:$0xff] %v14226_v25  ;;  %17148 = vst [vmem:[#allocation135_spill] sm:$0xff] %v14258_v60 }
  0xca   :  { %10468 = vmatmul.mubr.msk.bf16.gmra.mrb[32].mxu1 %vm322_vm0, %v14147_v55  ;;  %v2849_v55 = vrot.slane %v14188_v52, 2 }
  0xcb   :  { %10471 = vmatprep.mubr.msk.bf16.mxu1 %vm322_vm0, %v14161_v48 }
  0xcc   :  { %11080 = vmatmul.mubr.msk.bf16.gmra.mrb[32].mxu0 %vm322_vm0, %v14200_v28  ;;  %v2850_v48 = vsel %vm2742_vm2, %v2848_v50, %v2849_v55  ;;  %v2852_v21 = vsel %vm2742_vm2, %v2849_v55, %v2851_v16  ;;  %v14233_v28 = vld [vmem:[%s16660_s0 + $0x240] sm:$0xff]  ;;  %v14262_v50 = vpack.c.bf16 %v2847_v45, %v2845_v29  ;;  %v14278_v29 = vpack.c.bf16 %v14188_v52, %v14183_v22 }
  0xcd   :  { %11083 = vmatprep.mubr.msk.bf16.mxu0 %vm322_vm0, %v14206_v12  ;;  %17143 = vst [vmem:[#allocation130_spill] sm:$0xff] %v14233_v28  ;;  %v14238_v12 = vld [vmem:[%s16660_s0 + $0x248] sm:$0xff]  ;;  %v14253_v55 = vld [vmem:[%s16660_s0 + $0x260] sm:$0xff]  ;;  %v14266_v16 = vpack.c.bf16 %v2852_v21, %v2850_v48  ;;  %v2853_v54 = vrot.slane %v14233_v28, 2 }
  0xce   :  { %17144 = vst [vmem:[#allocation131_spill] sm:$0xff] %v14238_v12  ;;  %17147 = vst [vmem:[#allocation134_spill] sm:$0xff] %v14253_v55  ;;  %v2854_v63 = vrot.slane %v14238_v12, 2  ;;  %v2859_v27 = vrot.slane %v14253_v55, 2  ;;  %v14286_v45 = vpack.c.bf16 %v14238_v12, %v14233_v28 }
  0xcf   :  { %17149 = vst [vmem:[#allocation136_spill] sm:$0xff] %v14262_v50  ;;  %17150 = vst [vmem:[#allocation137_spill] sm:$0xff] %v14266_v16 }
  0xd0   :  { %17151 = vst [vmem:[#allocation138_spill] sm:$0xff] %v14278_v29  ;;  %v2855_v48 = vsel %vm2742_vm2, %v2853_v54, %v2854_v63  ;;  %v2857_v21 = vsel %vm2742_vm2, %v2854_v63, %v2856_v35  ;;  %17152 = vst [vmem:[#allocation139_spill] sm:$0xff] %v14286_v45  ;;  %v14303_v35 = vld [vmem:[%s16660_s0 + $0x280] sm:$0x3] }
  0xd1   :  { %17155 = vst [vmem:[#allocation142_spill] sm:$0xff] %v14303_v35  ;;  %v14322_v63 = vpack.c.bf16 %v2857_v21, %v2855_v48  ;;  %v2866_v12 = vrot.slane %v14303_v35, 2  ;;  %v14338_v48 = vpack.c.bf16 %v14253_v55, %v14248_v17 }
  0xd2   :  { %10472 = vmatmul.mubr.msk.bf16.gmra.mrb[36].mxu1 %vm322_vm0, %v14218_v44  ;;  %v2862_v44 = vsel %vm2742_vm2, %v2859_v27, %v2861_v53  ;;  %v14318_v53 = vld [vmem:[%s16660_s0 + $0x298] sm:$0x3] }
  0xd3   :  { %10475 = vmatprep.mubr.msk.bf16.mxu1 %vm322_vm0, %v14226_v25  ;;  %v2860_v25 = vsel %vm2742_vm2, %v2858_v24, %v2859_v27  ;;  %v14308_v24 = vld [vmem:[%s16660_s0 + $0x288] sm:$0xff]  ;;  %v14313_v27 = vld [vmem:[%s16660_s0 + $0x290] sm:$0xff]  ;;  %17158 = vst [vmem:[#allocation145_spill] sm:$0xff] %v14318_v53  ;;  %17159 = vst [vmem:[#allocation146_spill] sm:$0xff] %v14322_v63  ;;  %v2871_v22 = vrot.slane %v14318_v53, 2 }
  0xd4   :  { %11084 = vmatmul.mubr.msk.bf16.gmra.mrb[36].mxu0 %vm322_vm0, %v14262_v50  ;;  %v14293_v50 = vld [vmem:[%s16660_s0 + $0x270] sm:$0xff]  ;;  %17156 = vst [vmem:[#allocation143_spill] sm:$0xff] %v14308_v24  ;;  %17157 = vst [vmem:[#allocation144_spill] sm:$0xff] %v14313_v27  ;;  %v14326_v54 = vpack.c.bf16 %v2862_v44, %v2860_v25  ;;  %v2868_v28 = vrot.slane %v14308_v24, 2  ;;  %v2869_v52 = vrot.slane %v14313_v27, 2 }
  0xd5   :  { %11087 = vmatprep.mubr.msk.bf16.mxu0 %vm322_vm0, %v14266_v16  ;;  %17153 = vst [vmem:[#allocation140_spill] sm:$0xff] %v14293_v50  ;;  %v14298_v16 = vld [vmem:[%s16660_s0 + $0x278] sm:$0xff]  ;;  %v2863_v60 = vrot.slane %v14293_v50, 2  ;;  %17161 = vst [vmem:[#allocation148_spill] sm:$0xff] %v14338_v48 }
  0xd6   :  { %17154 = vst [vmem:[#allocation141_spill] sm:$0xff] %v14298_v16  ;;  %17160 = vst [vmem:[#allocation147_spill] sm:$0xff] %v14326_v54  ;;  %v2864_v33 = vrot.slane %v14298_v16, 2  ;;  %v14346_v21 = vpack.c.bf16 %v14298_v16, %v14293_v50 }
  0xd8   :  { %v2865_v25 = vsel %vm2742_vm2, %v2863_v60, %v2864_v33  ;;  %v2867_v44 = vsel %vm2742_vm2, %v2864_v33, %v2866_v12  ;;  %17162 = vst [vmem:[#allocation149_spill] sm:$0xff] %v14346_v21  ;;  %v14363_v12 = vld [vmem:[%s16660_s0 + $0x2b0] sm:$0x3] }
  0xd9   :  { %17165 = vst [vmem:[#allocation152_spill] sm:$0xff] %v14363_v12  ;;  %v14382_v33 = vpack.c.bf16 %v2867_v44, %v2865_v25  ;;  %v2876_v16 = vrot.slane %v14363_v12, 2  ;;  %v14398_v25 = vpack.c.bf16 %v14313_v27, %v14308_v24 }
  0xda   :  { %10476 = vmatmul.mubr.msk.bf16.gmra.mrb[40].mxu1 %vm322_vm0, %v14278_v29  ;;  %v2872_v29 = vsel %vm2742_vm2, %v2869_v52, %v2871_v22  ;;  %v14373_v22 = vld [vmem:[%s16660_s0 + $0x2c0] sm:$0xff] }
  0xdb   :  { %10479 = vmatprep.mubr.msk.bf16.mxu1 %vm322_vm0, %v14286_v45  ;;  %v2870_v45 = vsel %vm2742_vm2, %v2868_v28, %v2869_v52  ;;  %v14368_v28 = vld [vmem:[%s16660_s0 + $0x2b8] sm:$0xff]  ;;  %17167 = vst [vmem:[#allocation154_spill] sm:$0xff] %v14373_v22  ;;  %v14378_v52 = vld [vmem:[%s16660_s0 + $0x2c8] sm:$0x3]  ;;  %17169 = vst [vmem:[#allocation156_spill] sm:$0xff] %v14382_v33  ;;  %v2879_v55 = vrot.slane %v14373_v22, 2 }
  0xdc   :  { %11088 = vmatmul.mubr.msk.bf16.gmra.mrb[40].mxu0 %vm322_vm0, %v14322_v63  ;;  %v14353_v63 = vld [vmem:[%s16660_s0 + $0x2a0] sm:$0xff]  ;;  %17166 = vst [vmem:[#allocation153_spill] sm:$0xff] %v14368_v28  ;;  %17168 = vst [vmem:[#allocation155_spill] sm:$0xff] %v14378_v52  ;;  %v14386_v60 = vpack.c.bf16 %v2872_v29, %v2870_v45  ;;  %v2878_v50 = vrot.slane %v14368_v28, 2  ;;  %v2881_v17 = vrot.slane %v14378_v52, 2 }
  0xdd   :  { %11091 = vmatprep.mubr.msk.bf16.mxu0 %vm322_vm0, %v14326_v54  ;;  %17163 = vst [vmem:[#allocation150_spill] sm:$0xff] %v14353_v63  ;;  %v14358_v54 = vld [vmem:[%s16660_s0 + $0x2a8] sm:$0xff]  ;;  %v2873_v53 = vrot.slane %v14353_v63, 2  ;;  %17171 = vst [vmem:[#allocation158_spill] sm:$0xff] %v14398_v25 }
  0xde   :  { %17164 = vst [vmem:[#allocation151_spill] sm:$0xff] %v14358_v54  ;;  %17170 = vst [vmem:[#allocation157_spill] sm:$0xff] %v14386_v60  ;;  %v2874_v35 = vrot.slane %v14358_v54, 2  ;;  %v14406_v44 = vpack.c.bf16 %v14358_v54, %v14353_v63 }
  0xe0   :  { %v2875_v29 = vsel %vm2742_vm2, %v2873_v53, %v2874_v35  ;;  %v2877_v45 = vsel %vm2742_vm2, %v2874_v35, %v2876_v16  ;;  %17172 = vst [vmem:[#allocation159_spill] sm:$0xff] %v14406_v44  ;;  %v14423_v16 = vld [vmem:[%s16660_s0 + $0x2e0] sm:$0x3] }
  0xe1   :  { %17175 = vst [vmem:[#allocation162_spill] sm:$0xff] %v14423_v16  ;;  %v14442_v35 = vpack.c.bf16 %v2877_v45, %v2875_v29  ;;  %v2886_v54 = vrot.slane %v14423_v16, 2  ;;  %v14458_v29 = vpack.c.bf16 %v14373_v22, %v14368_v28 }
  0xe2   :  { %10480 = vmatmul.mubr.msk.bf16.gmra.mrb[44].mxu1 %vm322_vm0, %v14338_v48  ;;  %v2882_v48 = vsel %vm2742_vm2, %v2879_v55, %v2881_v17  ;;  %v14433_v17 = vld [vmem:[%s16660_s0 + $0x2f0] sm:$0xff] }
  0xe3   :  { %10483 = vmatprep.mubr.msk.bf16.mxu1 %vm322_vm0, %v14346_v21  ;;  %v2880_v21 = vsel %vm2742_vm2, %v2878_v50, %v2879_v55  ;;  %v14428_v50 = vld [vmem:[%s16660_s0 + $0x2e8] sm:$0xff]  ;;  %v14438_v55 = vld [vmem:[%s16660_s0 + $0x2f8] sm:$0x3]  ;;  %17177 = vst [vmem:[#allocation164_spill] sm:$0xff] %v14442_v35  ;;  %v2889_v27 = vrot.slane %v14433_v17, 2  ;;  %17179 = vst [vmem:[#allocation166_spill] sm:$0xff] %v14458_v29 }
  0xe4   :  { %11092 = vmatmul.mubr.msk.bf16.gmra.mrb[44].mxu0 %vm322_vm0, %v14382_v33  ;;  %v14413_v33 = vld [vmem:[%s16660_s0 + $0x2d0] sm:$0xff]  ;;  %17176 = vst [vmem:[#allocation163_spill] sm:$0xff] %v14438_v55  ;;  %v14446_v53 = vpack.c.bf16 %v2882_v48, %v2880_v21  ;;  %v2888_v63 = vrot.slane %v14428_v50, 2  ;;  %v2891_v24 = vrot.slane %v14438_v55, 2 }
  0xe5   :  { %11095 = vmatprep.mubr.msk.bf16.mxu0 %vm322_vm0, %v14386_v60  ;;  %17173 = vst [vmem:[#allocation160_spill] sm:$0xff] %v14413_v33  ;;  %v14418_v60 = vld [vmem:[%s16660_s0 + $0x2d8] sm:$0xff]  ;;  %v2883_v52 = vrot.slane %v14413_v33, 2 }
  0xe6   :  { %17174 = vst [vmem:[#allocation161_spill] sm:$0xff] %v14418_v60  ;;  %17178 = vst [vmem:[#allocation165_spill] sm:$0xff] %v14446_v53  ;;  %v2884_v12 = vrot.slane %v14418_v60, 2  ;;  %v14466_v45 = vpack.c.bf16 %v14418_v60, %v14413_v33 }
  0xe8   :  { %v2885_v48 = vsel %vm2742_vm2, %v2883_v52, %v2884_v12  ;;  %v2887_v21 = vsel %vm2742_vm2, %v2884_v12, %v2886_v54  ;;  %17180 = vst [vmem:[#allocation167_spill] sm:$0xff] %v14466_v45  ;;  %v14483_v54 = vld [vmem:[%s16660_s0 + $0x310] sm:$0x3] }
  0xe9   :  { %v14502_v12 = vpack.c.bf16 %v2887_v21, %v2885_v48  ;;  %v2896_v60 = vrot.slane %v14483_v54, 2  ;;  %v14518_v48 = vpack.c.bf16 %v14433_v17, %v14428_v50 }
  0xea   :  { %10484 = vmatmul.mubr.msk.bf16.gmra.mrb[48].mxu1 %vm322_vm0, %v14398_v25  ;;  %v2892_v25 = vsel %vm2742_vm2, %v2889_v27, %v2891_v24  ;;  %v14493_v24 = vld [vmem:[%s16660_s0 + $0x320] sm:$0xff] }
  0xeb   :  { %10487 = vmatprep.mubr.msk.bf16.mxu1 %vm322_vm0, %v14406_v44  ;;  %v2890_v44 = vsel %vm2742_vm2, %v2888_v63, %v2889_v27  ;;  %v14488_v63 = vld [vmem:[%s16660_s0 + $0x318] sm:$0xff]  ;;  %v14498_v27 = vld [vmem:[%s16660_s0 + $0x328] sm:$0x3]  ;;  %17182 = vst [vmem:[#allocation169_spill] sm:$0xff] %v14502_v12  ;;  %v2899_v22 = vrot.slane %v14493_v24, 2  ;;  %17184 = vst [vmem:[#allocation171_spill] sm:$0xff] %v14518_v48 }
  0xec   :  { %11096 = vmatmul.mubr.msk.bf16.gmra.mrb[48].mxu0 %vm322_vm0, %v14442_v35  ;;  %v14473_v35 = vld [vmem:[%s16660_s0 + $0x300] sm:$0xff]  ;;  %17181 = vst [vmem:[#allocation168_spill] sm:$0xff] %v14498_v27  ;;  %v14506_v52 = vpack.c.bf16 %v2892_v25, %v2890_v44  ;;  %v2898_v33 = vrot.slane %v14488_v63, 2  ;;  %v2901_v28 = vrot.slane %v14498_v27, 2  ;;  %v14551_v27 = vpack.c.bf16 %v14493_v24, %v14488_v63 }
  0xed   :  { %11099 = vmatprep.mubr.msk.bf16.mxu0 %vm322_vm0, %v14446_v53  ;;  %v14478_v53 = vld [vmem:[%s16660_s0 + $0x308] sm:$0xff]  ;;  %v2893_v55 = vrot.slane %v14473_v35, 2 }
  0xee   :  { %17183 = vst [vmem:[#allocation170_spill] sm:$0xff] %v14506_v52  ;;  %v2894_v16 = vrot.slane %v14478_v53, 2  ;;  %v14526_v21 = vpack.c.bf16 %v14478_v53, %v14473_v35  ;;  %17188 = vst [vmem:[#allocation175_spill] sm:$0xff] %v14551_v27 }
  0xf0   :  { %v2895_v25 = vsel %vm2742_vm2, %v2893_v55, %v2894_v16  ;;  %v2897_v44 = vsel %vm2742_vm2, %v2894_v16, %v2896_v60  ;;  %17185 = vst [vmem:[#allocation172_spill] sm:$0xff] %v14526_v21  ;;  %v126_v60 = vld [vmem:[%s16660_s0 + $0x340] sm:$0x3] }
  0xf1   :  { %v14541_v16 = vpack.c.bf16 %v2897_v44, %v2895_v25  ;;  %v5747_v55 = vrot.slane %v126_v60, 2 }
  0xf2   :  { %10488 = vmatmul.mubr.msk.bf16.gmra.mrb[52].mxu1 %vm322_vm0, %v14458_v29  ;;  %v2902_v29 = vsel %vm2742_vm2, %v2899_v22, %v2901_v28 }
  0xf3   :  { %10491 = vmatprep.mubr.msk.bf16.mxu1 %vm322_vm0, %v14466_v45  ;;  %v2900_v45 = vsel %vm2742_vm2, %v2898_v33, %v2899_v22  ;;  %17186 = vst [vmem:[#allocation173_spill] sm:$0xff] %v14541_v16 }
  0xf4   :  { %11100 = vmatmul.mubr.msk.bf16.gmra.mrb[52].mxu0 %vm322_vm0, %v14502_v12  ;;  %v124_v12 = vld [vmem:[%s16660_s0 + $0x330] sm:$0xff]  ;;  %v14545_v28 = vpack.c.bf16 %v2902_v29, %v2900_v45  ;;  %v1212_v29 = vrot.slane %v13572_v51, 1  ;;  %v1213_v45 = vrot.slane %v13577_v41, 1  ;;  %v17190_v51 = vpack.c.bf16 %v13694_v32, %v13644_v19  ;;  %v12718_v19 = vld [vmem:[%s16661_s1 + $0x58] sm:$0x3] }
  0xf5   :  { %11103 = vmatprep.mubr.msk.bf16.mxu0 %vm322_vm0, %v14506_v52  ;;  %v125_v52 = vld [vmem:[%s16660_s0 + $0x338] sm:$0xff]  ;;  %v5744_v22 = vrot.slane %v124_v12, 2  ;;  %v1215_v12 = vrot.slane %v13588_v61, 1  ;;  %v12716_v61 = vld [vmem:[%s16661_s1 + $0x48] sm:$0xff]  ;;  %v2985_v32 = vrot.slane %v12718_v19, 2  ;;  %v1225_v19 = vrot.slane %v13669_v58, 1 }
  0xf6   :  { %17187 = vst [vmem:[#allocation174_spill] sm:$0xff] %v14545_v28  ;;  %v5745_v33 = vrot.slane %v125_v52, 2  ;;  %v12714_v52 = vld [vmem:[%s16661_s1] sm:$0xff]  ;;  %v2982_v41 = vrot.slane %v12716_v61, 2  ;;  %v12720_v58 = vld [vmem:[%s16661_s1 + $0x68] sm:$0xff] }
  0xf7   :  { %v1522_v60 = vrot.slane %v12714_v52, 1  ;;  %v1218_v52 = vrot.slane %v13604_v31, 1  ;;  %v1222_v31 = vrot.slane %v13653_v2, 1 }
  0xf8   :  { %v5746_v25 = vsel %vm2742_vm2, %v5744_v22, %v5745_v33  ;;  %v5748_v44 = vsel %vm2742_vm2, %v5745_v33, %v5747_v55  ;;  %v12717_v33 = vld [vmem:[%s16661_s1 + $0x50] sm:$0xff]  ;;  %v1214_v55 = vsel %vm1201_vm1, %v1212_v29, %v1213_v45 }
  0xf9   :  { %v14568_v22 = vpack.c.bf16 %v5748_v44, %v5746_v25  ;;  %v1216_v25 = vsel %vm1201_vm1, %v1213_v45, %v1215_v12  ;;  %v1217_v44 = vrot.slane %v13599_v37, 1  ;;  %v132_v29 = vld [vmem:[%s16661_s1 + $0x10] sm:$0x3] }
  0xfa   :  { %10492 = vmatmul.mubr.msk.bf16.gmra.mrb[56].mxu1 %vm322_vm0, %v14518_v48  ;;  %v14598_v12 = vpack.c.bf16 %v1216_v25, %v1214_v55  ;;  %v12719_v55 = vld [vmem:[%s16661_s1 + $0x60] sm:$0xff] }
  0xfb   :  { %10495 = vmatprep.mubr.msk.bf16.mxu1 %vm322_vm0, %v14526_v21  ;;  %17189 = vst [vmem:[#allocation176_spill] sm:$0xff] %v14568_v22  ;;  %v2987_v25 = vrot.slane %v12719_v55, 2  ;;  %v1219_v2 = vsel %vm1201_vm1, %v1217_v44, %v1218_v52  ;;  %v12721_v44 = vld [vmem:[%s16661_s1 + $0x70] sm:$0x3] }
  0xfc   :  { %11104 = vmatmul.mubr.msk.bf16.gmra.mrb[56].mxu0 %vm322_vm0, %v14541_v16  ;;  %v12715_v16 = vld [vmem:[%s16661_s1 + $0x8] sm:$0xff] }
  0xfd   :  { %11107 = vmatprep.mubr.msk.bf16.mxu0 %vm322_vm0, %v14545_v28  ;;  %v1523_v28 = vrot.slane %v12715_v16, 1  ;;  %v2983_v16 = vrot.slane %v12717_v33, 2  ;;  %v1525_v33 = vrot.slane %v132_v29, 1 }
  0xff   :  { %v14594_v45 = vsel %vm1201_vm1, %v1522_v60, %v1523_v28  ;;  %v2984_v61 = vsel %vm2742_vm2, %v2982_v41, %v2983_v16  ;;  %v2986_v37 = vsel %vm2742_vm2, %v2983_v16, %v2985_v32  ;;  %v12692_v60 = vld [vmem:[%s16663_s3 + $0x18] sm:$0xff]   ;;  %v14612_v41 = vsel %vm1201_vm1, %v1523_v28, %v1525_v33  ;;  %v12723_v33 = vld [vmem:[%s16661_s1 + $0x80] sm:$0xff] }
 0x100   :  { %v2988_v16 = vrot.slane %v12720_v58, 2  ;;  %v14626_v28 = vpack.c.bf16 %v2986_v37, %v2984_v61  ;;  %v12724_v37 = vld [vmem:[%s16661_s1 + $0x88] sm:$0x3] }
 0x101   :  { %v2995_v58 = vrot.slane %v12724_v37, 2  ;;  %v1230_v37 = vrot.slane %v13691_v56, 1  ;;  %v14672_v56 = vld [vmem:[%s16663_s3 + $0x60] sm:$0xff]  }
 0x102   :  { %10496 = vmatmul.mubr.msk.bf16.gmra.mrb[60].mxu1 %vm322_vm0, %v14551_v27 }
 0x103   :  { %10503 = vmatprep.mubr.msk.bf16.mxu1 %vm322_vm0, %v17190_v51  ;;  %v1220_v51 = vrot.slane %v13609_v9, 1  ;;  %v1223_v9 = vrot.slane %v13664_v42, 1 }
 0x104   :  { %11108 = vmatmul.mubr.msk.bf16.gmra.mrb[60].mxu0 %vm322_vm0, %v14568_v22 }
 0x105   :  { %11115 = vmatprep.mubr.msk.bf16.mxu0 %vm322_vm0, %v13655_v11  ;;  %v1221_v42 = vsel %vm1201_vm1, %v1218_v52, %v1220_v51  ;;  %v2990_v52 = vrot.slane %v12721_v44, 2  ;;  %v12722_v51 = vld [vmem:[%s16661_s1 + $0x78] sm:$0xff]  ;;  %v1224_v55 = vsel %vm1201_vm1, %v1222_v31, %v1223_v9  ;;  %v1226_v61 = vsel %vm1201_vm1, %v1223_v9, %v1225_v19  ;;  %v12693_v44 = vld [vmem:[%s16662_s2 + $0x68] sm:$0xff]  }
 0x106   :  { %v2992_v29 = vrot.slane %v12722_v51, 2  ;;  %v14645_v51 = vpack.c.bf16 %v1221_v42, %v1219_v2  ;;  %v2989_v31 = vsel %vm2742_vm2, %v2987_v25, %v2988_v16  ;;  %v1227_v9 = vrot.slane %v13681_v36, 1 }
 0x107   :  { %v1228_v19 = vrot.slane %v13686_v6, 1  ;;  %v2991_v2 = vsel %vm2742_vm2, %v2988_v16, %v2990_v52  ;;  %v14662_v42 = vpack.c.bf16 %v1226_v61, %v1224_v55  ;;  %v1232_v25 = vrot.slane %v13741_v7, 1  ;;  %v12726_v7 = vld [vmem:[%s16661_s1 + $0x98] sm:$0xff]  ;;  %v12728_v61 = vld [vmem:[%s16661_s1 + $0xa8] sm:$0xff] }
 0x108   :  { %v1233_v36 = vrot.slane %v13748_v46, 1  ;;  %v1235_v6 = vrot.slane %v13753_v4, 1  ;;  %v2998_v52 = vrot.slane %v12726_v7, 2  ;;  %v14683_v46 = vpack.c.bf16 %v2991_v2, %v2989_v31  ;;  %v12729_v31 = vld [vmem:[%s16661_s1 + $0xb0] sm:$0xff] }
 0x109   :  { %v1229_v4 = vsel %vm1201_vm1, %v1227_v9, %v1228_v19  ;;  %v3003_v9 = vrot.slane %v12729_v31, 2 }
 0x10a   :  { %10504 = vmatmul.mubr.msk.bf16.vlgmr.msra.gmra.mrb[0].mxu1 %vm322_vm0, %v13674_v1  ;;  %v1234_v2 = vsel %vm1201_vm1, %v1232_v25, %v1233_v36 }
 0x10b   :  { %10568 = vmatpush3.bf16.msra.mxu1 %v13721_v3  ;;  %10507 = vmatprep.mubr.msk.bf16.mxu1 %vm322_vm0, %v14598_v12  ;;  %v2993_v3 = vrot.slane %v12723_v33, 2  ;;  %v14650_v33 = vld [vmem:[%s16662_s2 + $0x20] sm:$0xff]  }
 0x10c   :  { %10569 = vmatprep.subr.bf16.mxu1 %v12692_v60  ;;  %11116 = vmatmul.mubr.msk.bf16.vlgmr.msra.gmra.mrb[0].mxu0 %vm322_vm0, %v13710_v23 }
 0x10d   :  { %11180 = vmatpush3.bf16.msra.mxu0 %v13758_v40  ;;  %11119 = vmatprep.mubr.msk.bf16.mxu0 %vm322_vm0, %v14626_v28  ;;  %v2994_v32 = vsel %vm2742_vm2, %v2992_v29, %v2993_v3  ;;  %v2996_v1 = vsel %vm2742_vm2, %v2993_v3, %v2995_v58  ;;  %v12725_v40 = vld [vmem:[%s16661_s1 + $0x90] sm:$0xff]  ;;  %v12727_v29 = vld [vmem:[%s16661_s1 + $0xa0] sm:$0x3]  ;;  %v3002_v58 = vrot.slane %v12728_v61, 2  ;;  %v1238_v61 = vrot.slane %v13768_v18, 1 }
 0x10e   :  { %11181 = vmatprep.subr.bf16.mxu0 %v12693_v44  ;;  %v2997_v16 = vrot.slane %v12725_v40, 2  ;;  %v3000_v3 = vrot.slane %v12727_v29, 2  ;;  %v14692_v55 = vpack.c.bf16 %v2996_v1, %v2994_v32  ;;  %v1236_v1 = vsel %vm1201_vm1, %v1233_v36, %v1235_v6 }
 0x10f   :  { %10570 = vmatpush3.bf16.msra.mxu1 %v12692_v60  ;;  %v1231_v60 = vsel %vm1201_vm1, %v1228_v19, %v1230_v37  ;;  %v12730_v19 = vld [vmem:[%s16661_s1 + $0xb8] sm:$0x3]  ;;  %v1237_v29 = vrot.slane %v13763_v38, 1  ;;  %v14717_v25 = vpack.c.bf16 %v1236_v1, %v1234_v2  ;;  %v3004_v36 = vsel %vm2742_vm2, %v3002_v58, %v3003_v9  ;;  %v12733_v58 = vld [vmem:[%s16661_s1 + $0xd0] sm:$0x3] }
 0x110   :  { %10635 = vmatprep.subr.bf16.mxu1 %v14650_v33  ;;  %v3005_v37 = vrot.slane %v12730_v19, 2  ;;  %v14706_v32 = vpack.c.bf16 %v1231_v60, %v1229_v4  ;;  %v2999_v40 = vsel %vm2742_vm2, %v2997_v16, %v2998_v52  ;;  %v3001_v7 = vsel %vm2742_vm2, %v2998_v52, %v3000_v3  ;;  %v12731_v3 = vld [vmem:[%s16661_s1 + $0xc0] sm:$0xff] }
 0x111   :  { %11182 = vmatpush3.bf16.msra.mxu0 %v12693_v44  ;;  %v1240_v44 = vrot.slane %v13773_v8, 1  ;;  %v1242_v16 = vrot.slane %v13810_v43, 1  ;;  %v1243_v4 = vrot.slane %v13815_v39, 1  ;;  %v1245_v52 = vrot.slane %v13820_v34, 1  ;;  %v12732_v39 = vld [vmem:[%s16661_s1 + $0xc8] sm:$0xff] }
 0x112   :  { %10508 = vmatmul.mubr.msk.bf16.gmra.mrb[4].mxu1 %vm322_vm0, %v14645_v51  ;;  %11247 = vmatprep.subr.bf16.mxu0 %v14672_v56  ;;  %v3006_v6 = vsel %vm2742_vm2, %v3003_v9, %v3005_v37  ;;  %v14724_v38 = vpack.c.bf16 %v3001_v7, %v2999_v40  ;;  %v1239_v8 = vsel %vm1201_vm1, %v1237_v29, %v1238_v61  ;;  %v3007_v43 = vrot.slane %v12731_v3, 2  ;;  %v12734_v9 = vld [vmem:[%s16661_s1 + $0xd8] sm:$0xff]  ;;  %v12735_v37 = vld [vmem:[%s16661_s1 + $0xe0] sm:$0xff]  ;;  %v12736_v7 = vld [vmem:[%s16661_s1 + $0xe8] sm:$0x3] }
 0x113   :  { %10511 = vmatprep.mubr.msk.bf16.mxu1 %vm322_vm0, %v14662_v42  ;;  %v14728_v18 = vpack.c.bf16 %v3006_v6, %v3004_v36  ;;  %v1241_v60 = vsel %vm1201_vm1, %v1238_v61, %v1240_v44  ;;  %v3008_v34 = vrot.slane %v12732_v39, 2  ;;  %v3010_v31 = vrot.slane %v12733_v58, 2 }
 0x114   :  { %11120 = vmatmul.mubr.msk.bf16.gmra.mrb[4].mxu0 %vm322_vm0, %v14683_v46  ;;  %v3012_v19 = vrot.slane %v12734_v9, 2  ;;  %v3013_v2 = vrot.slane %v12735_v37, 2  ;;  %v1244_v1 = vsel %vm1201_vm1, %v1242_v16, %v1243_v4  ;;  %v1246_v40 = vsel %vm1201_vm1, %v1243_v4, %v1245_v52 }
 0x115   :  { %11123 = vmatprep.mubr.msk.bf16.mxu0 %vm322_vm0, %v14692_v55  ;;  %v3015_v29 = vrot.slane %v12736_v7, 2  ;;  %v14756_v61 = vpack.c.bf16 %v1241_v60, %v1239_v8  ;;  %v1247_v44 = vrot.slane %v13825_v26, 1  ;;  %v1248_v36 = vrot.slane %v13830_v14, 1 }
 0x116   :  { %v1250_v6 = vrot.slane %v13835_v5, 1  ;;  %v3009_v16 = vsel %vm2742_vm2, %v3007_v43, %v3008_v34  ;;  %v3011_v4 = vsel %vm2742_vm2, %v3008_v34, %v3010_v31  ;;  %v14765_v52 = vpack.c.bf16 %v1246_v40, %v1244_v1  ;;  %v12737_v5 = vld [vmem:[%s16661_s1 + $0xf0] sm:$0xff]  ;;  %v12738_v43 = vld [vmem:[%s16661_s1 + $0xf8] sm:$0xff] }
 0x117   :  { %v3014_v3 = vsel %vm2742_vm2, %v3012_v19, %v3013_v2  ;;  %v3016_v8 = vsel %vm2742_vm2, %v3013_v2, %v3015_v29  ;;  %v1252_v60 = vrot.slane %v13870_v57, 1  ;;  %v1253_v26 = vrot.slane %v13875_v59, 1  ;;  %v12740_v19 = vld [vmem:[%s16661_s1 + $0x108] sm:$0xff]  ;;  %v12741_v2 = vld [vmem:[%s16661_s1 + $0x110] sm:$0xff]  ;;  %v12742_v40 = vld [vmem:[%s16661_s1 + $0x118] sm:$0x3] }
 0x118   :  { %v1255_v14 = vrot.slane %v13880_v15, 1  ;;  %v3017_v39 = vrot.slane %v12737_v5, 2  ;;  %v3018_v34 = vrot.slane %v12738_v43, 2  ;;  %v14780_v58 = vpack.c.bf16 %v3011_v4, %v3009_v16  ;;  %v12739_v15 = vld [vmem:[%s16661_s1 + $0x100] sm:$0x3]  ;;  %v17192_v43 = vld [vmem:[#allocation87_spill] sm:$0xff] }
 0x119   :  { %v1249_v57 = vsel %vm1201_vm1, %v1247_v44, %v1248_v36  ;;  %v1251_v59 = vsel %vm1201_vm1, %v1248_v36, %v1250_v6  ;;  %v3020_v31 = vrot.slane %v12739_v15, 2  ;;  %v14789_v9 = vpack.c.bf16 %v3016_v8, %v3014_v3 }
 0x11a   :  { %10512 = vmatmul.mubr.msk.bf16.gmra.mrb[8].mxu1 %vm322_vm0, %v14706_v32  ;;  %v3022_v37 = vrot.slane %v12740_v19, 2  ;;  %v3023_v1 = vrot.slane %v12741_v2, 2  ;;  %v3025_v7 = vrot.slane %v12742_v40, 2  ;;  %v1254_v29 = vsel %vm1201_vm1, %v1252_v60, %v1253_v26 }
 0x11b   :  { %10515 = vmatprep.mubr.msk.bf16.mxu1 %vm322_vm0, %v14717_v25  ;;  %v1256_v44 = vsel %vm1201_vm1, %v1253_v26, %v1255_v14  ;;  %v14802_v36 = vpack.c.bf16 %v1251_v59, %v1249_v57  ;;  %v3019_v6 = vsel %vm2742_vm2, %v3017_v39, %v3018_v34  ;;  %v3021_v16 = vsel %vm2742_vm2, %v3018_v34, %v3020_v31  ;;  %v12743_v59 = vld [vmem:[%s16661_s1 + $0x120] sm:$0xff]  ;;  %v12745_v31 = vld [vmem:[%s16661_s1 + $0x130] sm:$0x3] }
 0x11c   :  { %11124 = vmatmul.mubr.msk.bf16.gmra.mrb[8].mxu0 %vm322_vm0, %v14724_v38  ;;  %v1257_v4 = vrot.slane %v13885_v47, 1  ;;  %v1258_v3 = vrot.slane %v13890_v0, 1  ;;  %v1260_v8 = vrot.slane %v13895_v10, 1  ;;  %v14813_v60 = vpack.c.bf16 %v1256_v44, %v1254_v29  ;;  %v12748_v44 = vld [vmem:[%s16661_s1 + $0x148] sm:$0x3] }
 0x11d   :  { %11127 = vmatprep.mubr.msk.bf16.mxu0 %vm322_vm0, %v14728_v18  ;;  %v3024_v26 = vsel %vm2742_vm2, %v3022_v37, %v3023_v1  ;;  %v3026_v14 = vsel %vm2742_vm2, %v3023_v1, %v3025_v7  ;;  %v1262_v5 = vrot.slane %v13930_v13, 1  ;;  %v1263_v39 = vrot.slane %v13935_v49, 1  ;;  %v12744_v49 = vld [vmem:[%s16661_s1 + $0x128] sm:$0xff]  ;;  %v12746_v37 = vld [vmem:[%s16661_s1 + $0x138] sm:$0xff]  ;;  %v12747_v1 = vld [vmem:[%s16661_s1 + $0x140] sm:$0xff] }
 0x11e   :  { %17191 = vst [vmem:[#allocation177_spill] sm:$0xff] %v14813_v60  ;;  %v1265_v34 = vrot.slane %v17192_v43, 1  ;;  %v14820_v47 = vpack.c.bf16 %v3021_v16, %v3019_v6  ;;  %v14824_v0 = vpack.c.bf16 %v3026_v14, %v3024_v26  ;;  %v1259_v10 = vsel %vm1201_vm1, %v1257_v4, %v1258_v3  ;;  %v17196_v4 = vld [vmem:[#allocation88_spill] sm:$0xff]  ;;  %v17198_v14 = vld [vmem:[#allocation90_spill] sm:$0xff] }
 0x11f   :  { %v1261_v57 = vsel %vm1201_vm1, %v1258_v3, %v1260_v8  ;;  %v3027_v13 = vrot.slane %v12743_v59, 2  ;;  %v3028_v15 = vrot.slane %v12744_v49, 2  ;;  %v3030_v19 = vrot.slane %v12745_v31, 2  ;;  %v17197_v8 = vld [vmem:[#allocation89_spill] sm:$0xff]  ;;  %v17201_v31 = vld [vmem:[#allocation96_spill] sm:$0xff] }
 0x120   :  { %17193 = vst [vmem:[#allocation87_spill] sm:$0xff] %v14820_v47  ;;  %17194 = vst [vmem:[#allocation178_spill] sm:$0xff] %v14824_v0  ;;  %v3032_v2 = vrot.slane %v12746_v37, 2  ;;  %v3033_v40 = vrot.slane %v12747_v1, 2  ;;  %v1264_v7 = vsel %vm1201_vm1, %v1262_v5, %v1263_v39  ;;  %v1266_v29 = vsel %vm1201_vm1, %v1263_v39, %v1265_v34  ;;  %v17202_v1 = vld [vmem:[#allocation97_spill] sm:$0xff] }
 0x121   :  { %v3035_v6 = vrot.slane %v12748_v44, 2  ;;  %v14852_v16 = vpack.c.bf16 %v1261_v57, %v1259_v10  ;;  %v1267_v3 = vrot.slane %v17196_v4, 1  ;;  %v1268_v26 = vrot.slane %v17197_v8, 1  ;;  %v17200_v57 = vld [vmem:[#allocation95_spill] sm:$0xff] }
 0x122   :  { %10516 = vmatmul.mubr.msk.bf16.gmra.mrb[12].mxu1 %vm322_vm0, %v14756_v61  ;;  %v1270_v43 = vrot.slane %v17198_v14, 1  ;;  %v3029_v5 = vsel %vm2742_vm2, %v3027_v13, %v3028_v15  ;;  %v3031_v39 = vsel %vm2742_vm2, %v3028_v15, %v3030_v19  ;;  %v14861_v34 = vpack.c.bf16 %v1266_v29, %v1264_v7  ;;  %v12749_v4 = vld [vmem:[%s16661_s1 + $0x150] sm:$0xff]  ;;  %v12750_v13 = vld [vmem:[%s16661_s1 + $0x158] sm:$0xff]  ;;  %v12751_v7 = vld [vmem:[%s16661_s1 + $0x160] sm:$0x3] }
 0x123   :  { %10519 = vmatprep.mubr.msk.bf16.mxu1 %vm322_vm0, %v14765_v52  ;;  %17195 = vst [vmem:[#allocation179_spill] sm:$0xff] %v14852_v16  ;;  %v3034_v59 = vsel %vm2742_vm2, %v3032_v2, %v3033_v40  ;;  %v3036_v10 = vsel %vm2742_vm2, %v3033_v40, %v3035_v6  ;;  %v1272_v49 = vrot.slane %v17200_v57, 1  ;;  %v1273_v37 = vrot.slane %v17201_v31, 1  ;;  %v12752_v14 = vld [vmem:[%s16661_s1 + $0x168] sm:$0xff] }
 0x124   :  { %11128 = vmatmul.mubr.msk.bf16.gmra.mrb[12].mxu0 %vm322_vm0, %v14780_v58  ;;  %17199 = vst [vmem:[#allocation88_spill] sm:$0xff] %v14861_v34  ;;  %v1275_v44 = vrot.slane %v17202_v1, 1  ;;  %v3037_v8 = vrot.slane %v12749_v4, 2  ;;  %v3038_v15 = vrot.slane %v12750_v13, 2  ;;  %v14876_v19 = vpack.c.bf16 %v3031_v39, %v3029_v5  ;;  %v17206_v4 = vld [vmem:[#allocation98_spill] sm:$0xff] }
 0x125   :  { %11131 = vmatprep.mubr.msk.bf16.mxu0 %vm322_vm0, %v14789_v9  ;;  %v1269_v2 = vsel %vm1201_vm1, %v1267_v3, %v1268_v26  ;;  %v1271_v40 = vsel %vm1201_vm1, %v1268_v26, %v1270_v43  ;;  %v3040_v29 = vrot.slane %v12751_v7, 2  ;;  %v14885_v6 = vpack.c.bf16 %v3036_v10, %v3034_v59  ;;  %v12753_v3 = vld [vmem:[%s16661_s1 + $0x170] sm:$0xff]  ;;  %v12754_v43 = vld [vmem:[%s16661_s1 + $0x178] sm:$0x3] }
 0x126   :  { %17203 = vst [vmem:[#allocation89_spill] sm:$0xff] %v14876_v19  ;;  %v3042_v5 = vrot.slane %v12752_v14, 2  ;;  %v3043_v26 = vrot.slane %v12753_v3, 2  ;;  %v3045_v39 = vrot.slane %v12754_v43, 2  ;;  %v1274_v57 = vsel %vm1201_vm1, %v1272_v49, %v1273_v37  ;;  %v17207_v7 = vld [vmem:[#allocation99_spill] sm:$0xff]  ;;  %v17208_v3 = vld [vmem:[#allocation100_spill] sm:$0xff] }
 0x127   :  { %17204 = vst [vmem:[#allocation90_spill] sm:$0xff] %v14885_v6  ;;  %v1276_v59 = vsel %vm1201_vm1, %v1273_v37, %v1275_v44  ;;  %v14898_v10 = vpack.c.bf16 %v1271_v40, %v1269_v2  ;;  %v3039_v31 = vsel %vm2742_vm2, %v3037_v8, %v3038_v15  ;;  %v3041_v1 = vsel %vm2742_vm2, %v3038_v15, %v3040_v29  ;;  %v14924_v29 = vld [vmem:[%s16661_s1 + $0x180] sm:$0xff] }
 0x128   :  { %v1277_v13 = vrot.slane %v17206_v4, 1  ;;  %v1278_v14 = vrot.slane %v17207_v7, 1  ;;  %v1280_v22 = vrot.slane %v17208_v3, 1  ;;  %v14909_v49 = vpack.c.bf16 %v1276_v59, %v1274_v57  ;;  %v12758_v57 = vld [vmem:[%s16661_s1 + $0x1c8] sm:$0xff]  ;;  %v12760_v4 = vld [vmem:[%s16661_s1 + $0x1d8] sm:$0x3] }
 0x129   :  { %17205 = vst [vmem:[#allocation95_spill] sm:$0xff] %v14898_v10  ;;  %v3044_v37 = vsel %vm2742_vm2, %v3042_v5, %v3043_v26  ;;  %v3046_v44 = vsel %vm2742_vm2, %v3043_v26, %v3045_v39  ;;  %v14913_v8 = vpack.c.bf16 %v3041_v1, %v3039_v31  ;;  %v5753_v5 = vrot.slane %v14924_v29, 2  ;;  %v14932_v26 = vld [vmem:[%s16661_s1 + $0x188] sm:$0xff]  ;;  %v12759_v31 = vld [vmem:[%s16661_s1 + $0x1d0] sm:$0xff] }
 0x12a   :  { %10520 = vmatmul.mubr.msk.bf16.gmra.mrb[16].mxu1 %vm322_vm0, %v14802_v36  ;;  %17209 = vst [vmem:[#allocation96_spill] sm:$0xff] %v14909_v49  ;;  %v14917_v15 = vpack.c.bf16 %v3046_v44, %v3044_v37  ;;  %v1279_v2 = vsel %vm1201_vm1, %v1277_v13, %v1278_v14  ;;  %v1281_v40 = vsel %vm1201_vm1, %v1278_v14, %v1280_v22  ;;  %v5754_v43 = vrot.slane %v14932_v26, 2  ;;  %v12757_v22 = vld [vmem:[%s16661_s1 + $0x190] sm:$0x3]  ;;  %v17213_v37 = vld [vmem:[#allocation105_spill] sm:$0xff] }
 0x12b   :  { %10523 = vmatprep.mubr.msk.bf16.mxu1 %vm322_vm0, %v14813_v60  ;;  %17210 = vst [vmem:[#allocation97_spill] sm:$0xff] %v14913_v8  ;;  %v5756_v39 = vrot.slane %v12757_v22, 2  ;;  %v3052_v59 = vrot.slane %v12758_v57, 2  ;;  %v3053_v1 = vrot.slane %v12759_v31, 2  ;;  %v3055_v13 = vrot.slane %v12760_v4, 2 }
 0x12c   :  { %11132 = vmatmul.mubr.msk.bf16.gmra.mrb[16].mxu0 %vm322_vm0, %v14820_v47  ;;  %17211 = vst [vmem:[#allocation98_spill] sm:$0xff] %v14917_v15  ;;  %v14949_v7 = vpack.c.bf16 %v1281_v40, %v1279_v2  ;;  %v1287_v14 = vrot.slane %v14059_v62, 1  ;;  %v1288_v3 = vrot.slane %v14064_v20, 1  ;;  %v1290_v44 = vrot.slane %v17213_v37, 1  ;;  %v17215_v40 = vld [vmem:[#allocation110_spill] sm:$0xff]  ;;  %v17216_v62 = vld [vmem:[#allocation111_spill] sm:$0xff] }
 0x12d   :  { %11135 = vmatprep.mubr.msk.bf16.mxu0 %vm322_vm0, %v14824_v0  ;;  %v5755_v22 = vsel %vm2742_vm2, %v5753_v5, %v5754_v43  ;;  %v5757_v57 = vsel %vm2742_vm2, %v5754_v43, %v5756_v39  ;;  %v3054_v31 = vsel %vm2742_vm2, %v3052_v59, %v3053_v1  ;;  %v3056_v4 = vsel %vm2742_vm2, %v3053_v1, %v3055_v13  ;;  %v14966_v20 = vld [vmem:[%s16661_s1 + $0x1b0] sm:$0xff]  ;;  %v12762_v5 = vld [vmem:[%s16661_s1 + $0x1e0] sm:$0xff]  ;;  %v17224_v0 = vld [vmem:[#allocation114_spill] sm:$0xff] }
 0x12e   :  { %17212 = vst [vmem:[#allocation99_spill] sm:$0xff] %v14949_v7  ;;  %v1602_v37 = vrot.slane %v14966_v20, 1  ;;  %v3057_v43 = vrot.slane %v12762_v5, 2  ;;  %v14977_v59 = vpack.c.bf16 %v5757_v57, %v5755_v22  ;;  %v1289_v1 = vsel %vm1201_vm1, %v1287_v14, %v1288_v3  ;;  %v14987_v5 = vld [vmem:[%s16661_s1 + $0x1b8] sm:$0xff]  ;;  %v12767_v57 = vld [vmem:[%s16661_s1 + $0x200] sm:$0xff] }
 0x12f   :  { %v1291_v13 = vsel %vm1201_vm1, %v1288_v3, %v1290_v44  ;;  %v14994_v14 = vpack.c.bf16 %v3056_v4, %v3054_v31  ;;  %v12766_v3 = vld [vmem:[%s16661_s1 + $0x1f8] sm:$0xff] }
 0x130   :  { %17217 = vst [vmem:[#allocation100_spill] sm:$0xff] %v14977_v59  ;;  %v3062_v44 = vrot.slane %v12766_v3, 2  ;;  %v15007_v31 = vpack.c.bf16 %v1291_v13, %v1289_v1  ;;  %v17222_v3 = vld [vmem:[#allocation112_spill] sm:$0xff] }
 0x131   :  { %17220 = vst [vmem:[#allocation105_spill] sm:$0xff] %v14994_v14 }
 0x132   :  { %10524 = vmatmul.mubr.msk.bf16.gmra.mrb[20].mxu1 %vm322_vm0, %v14852_v16 }
 0x133   :  { %10527 = vmatprep.mubr.msk.bf16.mxu1 %vm322_vm0, %v14861_v34 }
 0x134   :  { %11136 = vmatmul.mubr.msk.bf16.gmra.mrb[20].mxu0 %vm322_vm0, %v14876_v19  ;;  %v17223_v19 = vld [vmem:[#allocation113_spill] sm:$0xff] }
 0x135   :  { %11139 = vmatprep.mubr.msk.bf16.mxu0 %vm322_vm0, %v14885_v6  ;;  %v1293_v6 = vrot.slane %v17215_v40, 1  ;;  %v12764_v40 = vld [vmem:[%s16661_s1 + $0x1f0] sm:$0x3] }
 0x13a   :  { %10528 = vmatmul.mubr.msk.bf16.gmra.mrb[24].mxu1 %vm322_vm0, %v14898_v10 }
 0x13b   :  { %10531 = vmatprep.mubr.msk.bf16.mxu1 %vm322_vm0, %v14909_v49  ;;  %v1295_v49 = vrot.slane %v17216_v62, 1  ;;  %v3060_v62 = vrot.slane %v12764_v40, 2  ;;  %v3063_v40 = vrot.slane %v12767_v57, 2  ;;  %v1297_v57 = vrot.slane %v17222_v3, 1 }
 0x13c   :  { %11140 = vmatmul.mubr.msk.bf16.gmra.mrb[24].mxu0 %vm322_vm0, %v14913_v8  ;;  %v17214_v8 = vld [vmem:[#allocation109_spill] sm:$0xff] }
 0x13d   :  { %11143 = vmatprep.mubr.msk.bf16.mxu0 %vm322_vm0, %v14917_v15  ;;  %v1292_v2 = vrot.slane %v17214_v8, 1  ;;  %v12763_v8 = vld [vmem:[%s16661_s1 + $0x1e8] sm:$0xff]  ;;  %v1296_v10 = vsel %vm1201_vm1, %v1293_v6, %v1295_v49  ;;  %17221 = vst [vmem:[#allocation109_spill] sm:$0xff] %v15007_v31  ;;  %v15019_v49 = vld [vmem:[%s16661_s1 + $0x1c0] sm:$0x3]  ;;  %v3064_v1 = vsel %vm2742_vm2, %v3062_v44, %v3063_v40 }
 0x13e   :  { %v3058_v39 = vrot.slane %v12763_v8, 2  ;;  %v1603_v8 = vrot.slane %v14987_v5, 1  ;;  %v17218_v15 = vld [vmem:[#allocation118_spill] sm:$0xff]  ;;  %v1605_v13 = vrot.slane %v15019_v49, 1 }
 0x13f   :  { %v17219_v22 = vpack.c.bf16 %v14196_v30, %v17218_v15  ;;  %v12768_v30 = vld [vmem:[%s16661_s1 + $0x208] sm:$0x3] }
 0x140   :  { %v3065_v15 = vrot.slane %v12768_v30, 2  ;;  %v3059_v4 = vsel %vm2742_vm2, %v3057_v43, %v3058_v39  ;;  %v17227_v30 = vld [vmem:[#allocation121_spill] sm:$0xff] }
 0x141   :  { %v1303_v3 = vrot.slane %v17227_v30, 1  ;;  %v12774_v30 = vld [vmem:[%s16661_s1 + $0x238] sm:$0x3] }
 0x142   :  { %10532 = vmatmul.mubr.msk.bf16.gmra.mrb[28].mxu1 %vm322_vm0, %v14949_v7  ;;  %v1294_v7 = vsel %vm1201_vm1, %v1292_v2, %v1293_v6  ;;  %v1298_v2 = vrot.slane %v17223_v19, 1  ;;  %v1300_v6 = vrot.slane %v17224_v0, 1  ;;  %v3066_v19 = vsel %vm2742_vm2, %v3063_v40, %v3065_v15  ;;  %v17226_v0 = vld [vmem:[#allocation120_spill] sm:$0xff] }
 0x143   :  { %10535 = vmatprep.mubr.msk.bf16.mxu1 %vm322_vm0, %v17219_v22  ;;  %v3061_v22 = vsel %vm2742_vm2, %v3058_v39, %v3060_v62  ;;  %v15023_v43 = vpack.c.bf16 %v1296_v10, %v1294_v7  ;;  %v15027_v39 = vsel %vm1201_vm1, %v1602_v37, %v1603_v8  ;;  %v1302_v62 = vrot.slane %v17226_v0, 1  ;;  %v12769_v10 = vld [vmem:[%s16661_s1 + $0x210] sm:$0xff]  ;;  %v12770_v37 = vld [vmem:[%s16661_s1 + $0x218] sm:$0xff] }
 0x144   :  { %11144 = vmatmul.mubr.msk.bf16.gmra.mrb[28].mxu0 %vm322_vm0, %v14977_v59  ;;  %v17228_v59 = vld [vmem:[#allocation122_spill] sm:$0xff]  ;;  %v15034_v16 = vpack.c.bf16 %v3061_v22, %v3059_v4  ;;  %v3067_v7 = vrot.slane %v12769_v10, 2  ;;  %v3068_v44 = vrot.slane %v12770_v37, 2  ;;  %v15043_v40 = vsel %vm1201_vm1, %v1603_v8, %v1605_v13  ;;  %v12771_v4 = vld [vmem:[%s16661_s1 + $0x220] sm:$0x3]  ;;  %v17232_v0 = vld [vmem:[#allocation123_spill] sm:$0xff] }
 0x145   :  { %11147 = vmatprep.mubr.msk.bf16.mxu0 %vm322_vm0, %v14994_v14  ;;  %17225 = vst [vmem:[#allocation110_spill] sm:$0xff] %v15023_v43  ;;  %v1305_v34 = vrot.slane %v17228_v59, 1  ;;  %v1299_v59 = vsel %vm1201_vm1, %v1297_v57, %v1298_v2  ;;  %v1301_v15 = vsel %vm1201_vm1, %v1298_v2, %v1300_v6  ;;  %v3070_v22 = vrot.slane %v12771_v4, 2  ;;  %v12772_v13 = vld [vmem:[%s16661_s1 + $0x228] sm:$0xff]  ;;  %v12773_v2 = vld [vmem:[%s16661_s1 + $0x230] sm:$0xff] }
 0x146   :  { %17229 = vst [vmem:[#allocation111_spill] sm:$0xff] %v15034_v16  ;;  %v15056_v8 = vpack.c.bf16 %v3066_v19, %v3064_v1  ;;  %v3072_v57 = vrot.slane %v12772_v13, 2  ;;  %v3073_v6 = vrot.slane %v12773_v2, 2  ;;  %v3075_v10 = vrot.slane %v12774_v30, 2 }
 0x147   :  { %v1304_v37 = vsel %vm1201_vm1, %v1302_v62, %v1303_v3  ;;  %v1306_v1 = vsel %vm1201_vm1, %v1303_v3, %v1305_v34  ;;  %v15069_v19 = vpack.c.bf16 %v1301_v15, %v1299_v59  ;;  %v3069_v4 = vsel %vm2742_vm2, %v3067_v7, %v3068_v44  ;;  %v17236_v7 = vld [vmem:[#allocation130_spill] sm:$0xff]  ;;  %v17237_v15 = vld [vmem:[#allocation131_spill] sm:$0xff] }
 0x148   :  { %17230 = vst [vmem:[#allocation118_spill] sm:$0xff] %v15056_v8  ;;  %v3071_v13 = vsel %vm2742_vm2, %v3068_v44, %v3070_v22  ;;  %v1307_v2 = vrot.slane %v17232_v0, 1  ;;  %v15080_v62 = vpack.c.bf16 %v1306_v1, %v1304_v37  ;;  %v3074_v34 = vsel %vm2742_vm2, %v3072_v57, %v3073_v6  ;;  %v17238_v44 = vld [vmem:[#allocation132_spill] sm:$0xff]  ;;  %v12775_v57 = vld [vmem:[%s16661_s1 + $0x240] sm:$0xff] }
 0x149   :  { %17231 = vst [vmem:[#allocation112_spill] sm:$0xff] %v15069_v19  ;;  %v3076_v3 = vsel %vm2742_vm2, %v3073_v6, %v3075_v10  ;;  %v1312_v59 = vrot.slane %v17236_v7, 1  ;;  %v1313_v30 = vrot.slane %v17237_v15, 1  ;;  %v1315_v22 = vrot.slane %v17238_v44, 1  ;;  %v12776_v10 = vld [vmem:[%s16661_s1 + $0x248] sm:$0xff] }
 0x14a   :  { %10536 = vmatmul.mubr.msk.bf16.gmra.mrb[32].mxu1 %vm322_vm0, %v15007_v31  ;;  %v17233_v31 = vld [vmem:[#allocation124_spill] sm:$0xff]  ;;  %17235 = vst [vmem:[#allocation113_spill] sm:$0xff] %v15080_v62  ;;  %v15087_v0 = vpack.c.bf16 %v3071_v13, %v3069_v4  ;;  %v3077_v6 = vrot.slane %v12775_v57, 2  ;;  %v3078_v1 = vrot.slane %v12776_v10, 2  ;;  %v12777_v4 = vld [vmem:[%s16661_s1 + $0x250] sm:$0x3] }
 0x14b   :  { %10539 = vmatprep.mubr.msk.bf16.mxu1 %vm322_vm0, %v15023_v43  ;;  %v1308_v14 = vrot.slane %v17233_v31, 1  ;;  %v17234_v43 = vld [vmem:[#allocation125_spill] sm:$0xff]  ;;  %v15091_v31 = vpack.c.bf16 %v3076_v3, %v3074_v34  ;;  %v3080_v13 = vrot.slane %v12777_v4, 2  ;;  %v1314_v3 = vsel %vm1201_vm1, %v1312_v59, %v1313_v30  ;;  %v12780_v15 = vld [vmem:[%s16661_s1 + $0x268] sm:$0x3] }
 0x14c   :  { %11148 = vmatmul.mubr.msk.bf16.gmra.mrb[32].mxu0 %vm322_vm0, %v15034_v16  ;;  %v1310_v47 = vrot.slane %v17234_v43, 1  ;;  %17239 = vst [vmem:[#allocation114_spill] sm:$0xff] %v15087_v0  ;;  %v1316_v7 = vsel %vm1201_vm1, %v1313_v30, %v1315_v22  ;;  %v3085_v44 = vrot.slane %v12780_v15, 2  ;;  %v17242_v10 = vld [vmem:[#allocation133_spill] sm:$0xff]  ;;  %v3079_v59 = vsel %vm2742_vm2, %v3077_v6, %v3078_v1  ;;  %v12782_v6 = vld [vmem:[%s16661_s1 + $0x278] sm:$0xff] }
 0x14d   :  { %11151 = vmatprep.mubr.msk.bf16.mxu0 %vm322_vm0, %v15056_v8  ;;  %17240 = vst [vmem:[#allocation120_spill] sm:$0xff] %v15091_v31  ;;  %v1309_v43 = vsel %vm1201_vm1, %v1307_v2, %v1308_v14  ;;  %v12779_v2 = vld [vmem:[%s16661_s1 + $0x260] sm:$0xff]  ;;  %v1317_v4 = vrot.slane %v17242_v10, 1  ;;  %v3081_v30 = vsel %vm2742_vm2, %v3078_v1, %v3080_v13  ;;  %v15128_v22 = vpack.c.bf16 %v1316_v7, %v1314_v3 }
 0x14e   :  { %v1311_v37 = vsel %vm1201_vm1, %v1308_v14, %v1310_v47  ;;  %v12778_v47 = vld [vmem:[%s16661_s1 + $0x258] sm:$0xff]  ;;  %v3083_v34 = vrot.slane %v12779_v2, 2  ;;  %v17247_v10 = vld [vmem:[#allocation141_spill] sm:$0xff]  ;;  %v3088_v1 = vrot.slane %v12782_v6, 2  ;;  %v15143_v13 = vpack.c.bf16 %v3081_v30, %v3079_v59  ;;  %v17252_v6 = vld [vmem:[#allocation143_spill] sm:$0xff] }
 0x14f   :  { %v3082_v14 = vrot.slane %v12778_v47, 2  ;;  %v15119_v57 = vpack.c.bf16 %v1311_v37, %v1309_v43  ;;  %v17243_v47 = vld [vmem:[#allocation134_spill] sm:$0xff]  ;;  %17245 = vst [vmem:[#allocation122_spill] sm:$0xff] %v15128_v22  ;;  %v17246_v37 = vld [vmem:[#allocation140_spill] sm:$0xff]  ;;  %v12783_v3 = vld [vmem:[%s16661_s1 + $0x280] sm:$0x3] }
 0x150   :  { %v1318_v8 = vrot.slane %v17243_v47, 1  ;;  %v3086_v43 = vsel %vm2742_vm2, %v3083_v34, %v3085_v44  ;;  %v17248_v47 = vld [vmem:[#allocation142_spill] sm:$0xff]  ;;  %17249 = vst [vmem:[#allocation123_spill] sm:$0xff] %v15143_v13  ;;  %v3090_v7 = vrot.slane %v12783_v3, 2  ;;  %v1327_v3 = vrot.slane %v17252_v6, 1 }
 0x151   :  { %17241 = vst [vmem:[#allocation121_spill] sm:$0xff] %v15119_v57  ;;  %v3084_v15 = vsel %vm2742_vm2, %v3082_v14, %v3083_v34  ;;  %v1325_v16 = vrot.slane %v17248_v47, 1 }
 0x152   :  { %10540 = vmatmul.mubr.msk.bf16.gmra.mrb[36].mxu1 %vm322_vm0, %v15069_v19  ;;  %v1323_v19 = vrot.slane %v17247_v10, 1  ;;  %v1319_v14 = vsel %vm1201_vm1, %v1317_v4, %v1318_v8  ;;  %v15152_v44 = vpack.c.bf16 %v3086_v43, %v3084_v15  ;;  %v12785_v4 = vld [vmem:[%s16661_s1 + $0x290] sm:$0xff] }
 0x153   :  { %10543 = vmatprep.mubr.msk.bf16.mxu1 %vm322_vm0, %v15080_v62  ;;  %v17244_v62 = vld [vmem:[#allocation135_spill] sm:$0xff] }
 0x154   :  { %11152 = vmatmul.mubr.msk.bf16.gmra.mrb[36].mxu0 %vm322_vm0, %v15087_v0  ;;  %v1320_v2 = vrot.slane %v17244_v62, 1  ;;  %v1322_v0 = vrot.slane %v17246_v37, 1  ;;  %v12781_v62 = vld [vmem:[%s16661_s1 + $0x270] sm:$0xff]  ;;  %17250 = vst [vmem:[#allocation124_spill] sm:$0xff] %v15152_v44  ;;  %v12784_v37 = vld [vmem:[%s16661_s1 + $0x288] sm:$0xff]  ;;  %v1326_v15 = vsel %vm1201_vm1, %v1323_v19, %v1325_v16 }
 0x155   :  { %11155 = vmatprep.mubr.msk.bf16.mxu0 %vm322_vm0, %v15091_v31  ;;  %v3087_v31 = vrot.slane %v12781_v62, 2  ;;  %v3092_v59 = vrot.slane %v12784_v37, 2  ;;  %v3091_v62 = vsel %vm2742_vm2, %v3088_v1, %v3090_v7  ;;  %v17253_v37 = vld [vmem:[#allocation144_spill] sm:$0xff] }
 0x156   :  { %v1321_v34 = vsel %vm1201_vm1, %v1318_v8, %v1320_v2  ;;  %v3093_v8 = vrot.slane %v12785_v4, 2  ;;  %v12786_v2 = vld [vmem:[%s16661_s1 + $0x298] sm:$0x3]  ;;  %v1324_v10 = vsel %vm1201_vm1, %v1322_v0, %v1323_v19  ;;  %v1328_v4 = vrot.slane %v17253_v37, 1 }
 0x157   :  { %v3095_v30 = vrot.slane %v12786_v2, 2  ;;  %v15165_v43 = vpack.c.bf16 %v1321_v34, %v1319_v14  ;;  %v3089_v47 = vsel %vm2742_vm2, %v3087_v31, %v3088_v1  ;;  %v15176_v0 = vpack.c.bf16 %v1326_v15, %v1324_v10  ;;  %v17256_v31 = vld [vmem:[#allocation150_spill] sm:$0xff]  ;;  %v17257_v34 = vld [vmem:[#allocation151_spill] sm:$0xff]  ;;  %v17258_v1 = vld [vmem:[#allocation152_spill] sm:$0xff] }
 0x158   :  { %v3094_v16 = vsel %vm2742_vm2, %v3092_v59, %v3093_v8  ;;  %v1332_v14 = vrot.slane %v17256_v31, 1  ;;  %v1333_v2 = vrot.slane %v17257_v34, 1  ;;  %v1335_v7 = vrot.slane %v17258_v1, 1  ;;  %v12787_v59 = vld [vmem:[%s16661_s1 + $0x2a0] sm:$0xff]  ;;  %v12792_v34 = vld [vmem:[%s16661_s1 + $0x2c8] sm:$0x3] }
 0x159   :  { %17251 = vst [vmem:[#allocation125_spill] sm:$0xff] %v15165_v43  ;;  %17255 = vst [vmem:[#allocation130_spill] sm:$0xff] %v15176_v0  ;;  %v3096_v19 = vsel %vm2742_vm2, %v3093_v8, %v3095_v30  ;;  %v15183_v6 = vpack.c.bf16 %v3091_v62, %v3089_v47  ;;  %v1329_v10 = vsel %vm1201_vm1, %v1327_v3, %v1328_v4  ;;  %v3097_v8 = vrot.slane %v12787_v59, 2  ;;  %v12788_v30 = vld [vmem:[%s16661_s1 + $0x2a8] sm:$0xff]  ;;  %v12789_v62 = vld [vmem:[%s16661_s1 + $0x2b0] sm:$0x3] }
 0x15a   :  { %10544 = vmatmul.mubr.msk.bf16.gmra.mrb[40].mxu1 %vm322_vm0, %v15119_v57  ;;  %v3098_v47 = vrot.slane %v12788_v30, 2  ;;  %v3100_v3 = vrot.slane %v12789_v62, 2  ;;  %v1336_v31 = vsel %vm1201_vm1, %v1333_v2, %v1335_v7  ;;  %v3105_v1 = vrot.slane %v12792_v34, 2  ;;  %v17262_v30 = vld [vmem:[#allocation153_spill] sm:$0xff] }
 0x15b   :  { %10547 = vmatprep.mubr.msk.bf16.mxu1 %vm322_vm0, %v15128_v22  ;;  %v17254_v22 = vld [vmem:[#allocation145_spill] sm:$0xff]  ;;  %17259 = vst [vmem:[#allocation131_spill] sm:$0xff] %v15183_v6  ;;  %v1337_v62 = vrot.slane %v17262_v30, 1 }
 0x15c   :  { %11156 = vmatmul.mubr.msk.bf16.gmra.mrb[40].mxu0 %vm322_vm0, %v15143_v13  ;;  %v1330_v57 = vrot.slane %v17254_v22, 1  ;;  %v15187_v22 = vpack.c.bf16 %v3096_v19, %v3094_v16  ;;  %v1334_v19 = vsel %vm1201_vm1, %v1332_v14, %v1333_v2  ;;  %v3099_v14 = vsel %vm2742_vm2, %v3097_v8, %v3098_v47  ;;  %v17267_v30 = vld [vmem:[#allocation161_spill] sm:$0xff]  ;;  %v12794_v8 = vld [vmem:[%s16661_s1 + $0x2d8] sm:$0xff] }
 0x15d   :  { %11159 = vmatprep.mubr.msk.bf16.mxu0 %vm322_vm0, %v15152_v44  ;;  %v3101_v2 = vsel %vm2742_vm2, %v3098_v47, %v3100_v3  ;;  %v15224_v7 = vpack.c.bf16 %v1336_v31, %v1334_v19  ;;  %v3108_v47 = vrot.slane %v12794_v8, 2  ;;  %v12795_v19 = vld [vmem:[%s16661_s1 + $0x2e0] sm:$0x3]  ;;  %v1347_v8 = vrot.slane %v14428_v50, 1 }
 0x15e   :  { %17260 = vst [vmem:[#allocation132_spill] sm:$0xff] %v15187_v22  ;;  %v1331_v15 = vsel %vm1201_vm1, %v1328_v4, %v1330_v57  ;;  %v12790_v57 = vld [vmem:[%s16661_s1 + $0x2b8] sm:$0xff]  ;;  %v12791_v4 = vld [vmem:[%s16661_s1 + $0x2c0] sm:$0xff]  ;;  %v15239_v3 = vpack.c.bf16 %v3101_v2, %v3099_v14  ;;  %v3110_v31 = vrot.slane %v12795_v19, 2  ;;  %v17271_v19 = vld [vmem:[#allocation163_spill] sm:$0xff] }
 0x15f   :  { %v3102_v37 = vrot.slane %v12790_v57, 2  ;;  %v3103_v16 = vrot.slane %v12791_v4, 2  ;;  %v15215_v59 = vpack.c.bf16 %v1331_v15, %v1329_v10  ;;  %v17263_v57 = vld [vmem:[#allocation154_spill] sm:$0xff]  ;;  %17265 = vst [vmem:[#allocation134_spill] sm:$0xff] %v15224_v7  ;;  %v17266_v15 = vld [vmem:[#allocation160_spill] sm:$0xff] }
 0x160   :  { %v1338_v44 = vrot.slane %v17263_v57, 1  ;;  %v17268_v57 = vld [vmem:[#allocation162_spill] sm:$0xff]  ;;  %17269 = vst [vmem:[#allocation135_spill] sm:$0xff] %v15239_v3 }
 0x161   :  { %17261 = vst [vmem:[#allocation133_spill] sm:$0xff] %v15215_v59  ;;  %v3104_v34 = vsel %vm2742_vm2, %v3102_v37, %v3103_v16  ;;  %v3106_v10 = vsel %vm2742_vm2, %v3103_v16, %v3105_v1  ;;  %v1345_v13 = vrot.slane %v17268_v57, 1 }
 0x162   :  { %10548 = vmatmul.mubr.msk.bf16.gmra.mrb[44].mxu1 %vm322_vm0, %v15165_v43  ;;  %v1343_v43 = vrot.slane %v17267_v30, 1  ;;  %v1339_v37 = vsel %vm1201_vm1, %v1337_v62, %v1338_v44  ;;  %v15248_v1 = vpack.c.bf16 %v3106_v10, %v3104_v34  ;;  %v12797_v62 = vld [vmem:[%s16661_s1 + $0x2f0] sm:$0xff]  ;;  %v12798_v30 = vld [vmem:[%s16661_s1 + $0x2f8] sm:$0x3] }
 0x163   :  { %10551 = vmatprep.mubr.msk.bf16.mxu1 %vm322_vm0, %v15176_v0  ;;  %v17264_v0 = vld [vmem:[#allocation155_spill] sm:$0xff]  ;;  %v3115_v34 = vrot.slane %v12798_v30, 2 }
 0x164   :  { %11160 = vmatmul.mubr.msk.bf16.gmra.mrb[44].mxu0 %vm322_vm0, %v15183_v6  ;;  %v1340_v4 = vrot.slane %v17264_v0, 1  ;;  %v1342_v6 = vrot.slane %v17266_v15, 1  ;;  %v12793_v0 = vld [vmem:[%s16661_s1 + $0x2d0] sm:$0xff]  ;;  %17270 = vst [vmem:[#allocation140_spill] sm:$0xff] %v15248_v1  ;;  %v12796_v15 = vld [vmem:[%s16661_s1 + $0x2e8] sm:$0xff]  ;;  %v1346_v2 = vsel %vm1201_vm1, %v1343_v43, %v1345_v13  ;;  %v1350_v13 = vrot.slane %v17271_v19, 1 }
 0x165   :  { %11163 = vmatprep.mubr.msk.bf16.mxu0 %vm322_vm0, %v15187_v22  ;;  %v3107_v22 = vrot.slane %v12793_v0, 2  ;;  %v3112_v14 = vrot.slane %v12796_v15, 2  ;;  %v3111_v0 = vsel %vm2742_vm2, %v3108_v47, %v3110_v31  ;;  %v1353_v15 = vrot.slane %v14478_v53, 1 }
 0x166   :  { %v1341_v16 = vsel %vm1201_vm1, %v1338_v44, %v1340_v4  ;;  %v3113_v44 = vrot.slane %v12797_v62, 2  ;;  %v1344_v4 = vsel %vm1201_vm1, %v1342_v6, %v1343_v43  ;;  %v1348_v6 = vrot.slane %v14433_v17, 1  ;;  %v12799_v17 = vld [vmem:[%s16661_s1 + $0x300] sm:$0xff] }
 0x167   :  { %v15261_v10 = vpack.c.bf16 %v1341_v16, %v1339_v37  ;;  %v3109_v57 = vsel %vm2742_vm2, %v3107_v22, %v3108_v47  ;;  %v15272_v43 = vpack.c.bf16 %v1346_v2, %v1344_v4  ;;  %v1352_v16 = vrot.slane %v14473_v35, 1  ;;  %v12800_v35 = vld [vmem:[%s16661_s1 + $0x308] sm:$0xff]  ;;  %v12802_v2 = vld [vmem:[%s16661_s1 + $0x318] sm:$0xff] }
 0x168   :  { %v3114_v37 = vsel %vm2742_vm2, %v3112_v14, %v3113_v44  ;;  %v3116_v22 = vsel %vm2742_vm2, %v3113_v44, %v3115_v34  ;;  %v1355_v47 = vrot.slane %v14483_v54, 1  ;;  %v15279_v50 = vpack.c.bf16 %v3111_v0, %v3109_v57  ;;  %v12801_v54 = vld [vmem:[%s16661_s1 + $0x310] sm:$0x3]  ;;  %v12803_v34 = vld [vmem:[%s16661_s1 + $0x320] sm:$0xff]  ;;  %v12804_v0 = vld [vmem:[%s16661_s1 + $0x328] sm:$0x3] }
 0x169   :  { %17272 = vst [vmem:[#allocation141_spill] sm:$0xff] %v15272_v43  ;;  %v3117_v31 = vrot.slane %v12799_v17, 2  ;;  %v1349_v14 = vsel %vm1201_vm1, %v1347_v8, %v1348_v6  ;;  %v1351_v62 = vsel %vm1201_vm1, %v1348_v6, %v1350_v13  ;;  %v3118_v53 = vrot.slane %v12800_v35, 2 }
 0x16a   :  { %10552 = vmatmul.mubr.msk.bf16.gmra.mrb[48].mxu1 %vm322_vm0, %v15215_v59  ;;  %v3120_v44 = vrot.slane %v12801_v54, 2  ;;  %v15296_v4 = vpack.c.bf16 %v3116_v22, %v3114_v37  ;;  %v3122_v30 = vrot.slane %v12802_v2, 2  ;;  %v3123_v57 = vrot.slane %v12803_v34, 2  ;;  %v15343_v2 = vld [vmem:[%s16661_s1 + $0x338] sm:$0xff]  ;;  %v12807_v34 = vld [vmem:[%s16661_s1 + $0x340] sm:$0x3] }
 0x16b   :  { %10555 = vmatprep.mubr.msk.bf16.mxu1 %vm322_vm0, %v15224_v7  ;;  %v3125_v8 = vrot.slane %v12804_v0, 2  ;;  %v1354_v6 = vsel %vm1201_vm1, %v1352_v16, %v1353_v15  ;;  %v1356_v19 = vsel %vm1201_vm1, %v1353_v15, %v1355_v47  ;;  %v15309_v13 = vpack.c.bf16 %v1351_v62, %v1349_v14  ;;  %v17273_v47 = vld [vmem:[#allocation168_spill] sm:$0xff] }
 0x16c   :  { %11164 = vmatmul.mubr.msk.bf16.gmra.mrb[48].mxu0 %vm322_vm0, %v15239_v3  ;;  %v3119_v37 = vsel %vm2742_vm2, %v3117_v31, %v3118_v53  ;;  %v3121_v22 = vsel %vm2742_vm2, %v3118_v53, %v3120_v44  ;;  %v1357_v17 = vrot.slane %v14488_v63, 1  ;;  %v1358_v35 = vrot.slane %v14493_v24, 1  ;;  %v15333_v63 = vld [vmem:[%s16661_s1 + $0x330] sm:$0xff] }
 0x16d   :  { %11167 = vmatprep.mubr.msk.bf16.mxu0 %vm322_vm0, %v15248_v1  ;;  %v15319_v54 = vpack.c.bf16 %v1356_v19, %v1354_v6  ;;  %v3124_v16 = vsel %vm2742_vm2, %v3122_v30, %v3123_v57  ;;  %v3126_v15 = vsel %vm2742_vm2, %v3123_v57, %v3125_v8  ;;  %v1360_v14 = vrot.slane %v17273_v47, 1 }
 0x16e   :  { %v15326_v31 = vpack.c.bf16 %v3121_v22, %v3119_v37  ;;  %v15328_v62 = vpack.c.bf16 %v3126_v15, %v3124_v16  ;;  %v5758_v24 = vrot.slane %v15333_v63, 2  ;;  %v1359_v53 = vsel %vm1201_vm1, %v1357_v17, %v1358_v35  ;;  %v12808_v37 = vld [vmem:[%s16660_s0] sm:$0xff]  ;;  %v12809_v17 = vld [vmem:[%s16660_s0 + $0x8] sm:$0xff] }
 0x16f   :  { %v1361_v44 = vsel %vm1201_vm1, %v1358_v35, %v1360_v14  ;;  %v5759_v30 = vrot.slane %v15343_v2, 2  ;;  %v5761_v57 = vrot.slane %v12807_v34, 2  ;;  %v2743_v22 = vrot.slane %v12808_v37, 2  ;;  %v17277_v15 = vld [vmem:[#allocation69_spill] sm:$0xff]  ;;  %v12810_v14 = vld [vmem:[%s16660_s0 + $0x10] sm:$0x3] }
 0x170   :  { %v15351_v0 = vpack.c.bf16 %v1361_v44, %v1359_v53  ;;  %v2744_v35 = vrot.slane %v12809_v17, 2  ;;  %v17276_v16 = vpack.c.bf16 %v14612_v41, %v14594_v45  ;;  %v12696_v45 = vld [vmem:[%s16662_s2 + $0x28] sm:$0xff]   ;;  %v17282_v37 = vld [vmem:[#allocation11_spill] sm:$0xff] }
 0x171   :  { %v5760_v8 = vsel %vm2742_vm2, %v5758_v24, %v5759_v30  ;;  %v5762_v6 = vsel %vm2742_vm2, %v5759_v30, %v5761_v57  ;;  %v2746_v24 = vrot.slane %v12810_v14, 2  ;;  %v17278_v53 = vld [vmem:[#allocation6_spill] sm:$0xff]  ;;  %v17279_v30 = vld [vmem:[#allocation8_spill] sm:$0xff]  ;;  %v15400_v57 = vld [vmem:[%s16663_s3 + $0x20] sm:$0xff]  }
 0x172   :  { %10556 = vmatmul.mubr.msk.bf16.gmra.mrb[52].mxu1 %vm322_vm0, %v15261_v10  ;;  %17274 = vst [vmem:[#allocation142_spill] sm:$0xff] %v15351_v0  ;;  %v15359_v19 = vpack.c.bf16 %v5762_v6, %v5760_v8  ;;  %v15376_v47 = vsel %vm2742_vm2, %v2743_v22, %v2744_v35  ;;  %v12697_v34 = vld [vmem:[%s16663_s3 + $0x68] sm:$0xff]   ;;  %v17280_v8 = vld [vmem:[#allocation73_spill] sm:$0xff]  ;;  %v17283_v22 = vld [vmem:[#allocation12_spill] sm:$0xff] }
 0x173   :  { %10559 = vmatprep.mubr.msk.bf16.mxu1 %vm322_vm0, %v15272_v43  ;;  %v15385_v41 = vsel %vm2742_vm2, %v2744_v35, %v2746_v24  ;;  %v17281_v6 = vld [vmem:[#allocation74_spill] sm:$0xff]  ;;  %v17286_v35 = vld [vmem:[#allocation13_spill] sm:$0xff] }
 0x174   :  { %11168 = vmatmul.mubr.msk.bf16.gmra.mrb[52].mxu0 %vm322_vm0, %v15279_v50  ;;  %17275 = vst [vmem:[#allocation143_spill] sm:$0xff] %v15359_v19  ;;  %v17285_v17 = vld [vmem:[#allocation78_spill] sm:$0xff]  ;;  %v17288_v14 = vld [vmem:[#allocation81_spill] sm:$0xff] }
 0x175   :  { %11171 = vmatprep.mubr.msk.bf16.mxu0 %vm322_vm0, %v15296_v4  ;;  %v17289_v24 = vld [vmem:[#allocation82_spill] sm:$0xff] }
 0x176   :  { %v17293_v44 = vld [vmem:[#allocation86_spill] sm:$0xff] }
 0x17a   :  { %10560 = vmatmul.mubr.msk.bf16.gmra.mrb[56].mxu1 %vm322_vm0, %v15309_v13 }
 0x17b   :  { %10563 = vmatprep.mubr.msk.bf16.mxu1 %vm322_vm0, %v15319_v54 }
 0x17c   :  { %11172 = vmatmul.mubr.msk.bf16.gmra.mrb[56].mxu0 %vm322_vm0, %v15326_v31 }
 0x17d   :  { %11175 = vmatprep.mubr.msk.bf16.mxu0 %vm322_vm0, %v15328_v62 }
 0x182   :  { %10564 = vmatmul.mubr.msk.bf16.gmra.mrb[60].mxu1 %vm322_vm0, %v15351_v0 }
 0x183   :  { %10571 = vmatprep.mubr.msk.bf16.mxu1 %vm322_vm0, %v17276_v16  ;;  %v17287_v16 = vld [vmem:[#allocation16_spill] sm:$0xff] }
 0x184   :  { %11176 = vmatmul.mubr.msk.bf16.gmra.mrb[60].mxu0 %vm322_vm0, %v15359_v19  ;;  %v17294_v19 = vld [vmem:[#allocation21_spill] sm:$0xff] }
 0x185   :  { %11183 = vmatprep.mubr.msk.bf16.mxu0 %vm322_vm0, %v17277_v15 }
 0x18a   :  { %10572 = vmatmul.mubr.msk.bf16.vlgmr.msra.gmra.mrb[0].mxu1 %vm322_vm0, %v17278_v53  ;;  %v17291_v53 = vld [vmem:[#allocation20_spill] sm:$0xff] }
 0x18b   :  { %10636 = vmatpush3.bf16.msra.mxu1 %v14650_v33  ;;  %10575 = vmatprep.mubr.msk.bf16.mxu1 %vm322_vm0, %v17279_v30  ;;  %v15410_v33 = vld [vmem:[%s16662_s2 + $0x70] sm:$0xff]  }
 0x18c   :  { %10637 = vmatprep.subr.bf16.mxu1 %v12696_v45  ;;  %11184 = vmatmul.mubr.msk.bf16.vlgmr.msra.gmra.mrb[0].mxu0 %vm322_vm0, %v17280_v8 }
 0x18d   :  { %11248 = vmatpush3.bf16.msra.mxu0 %v14672_v56  ;;  %11187 = vmatprep.mubr.msk.bf16.mxu0 %vm322_vm0, %v17281_v6  ;;  %v17284_v56 = vld [vmem:[#allocation77_spill] sm:$0xff] }
 0x18e   :  { %11249 = vmatprep.subr.bf16.mxu0 %v12697_v34 }
 0x18f   :  { %10638 = vmatpush3.bf16.msra.mxu1 %v12696_v45  ;;  %v17290_v45 = vld [vmem:[#allocation17_spill] sm:$0xff] }
 0x190   :  { %10703 = vmatprep.subr.bf16.mxu1 %v15400_v57 }
 0x191   :  { %11250 = vmatpush3.bf16.msra.mxu0 %v12697_v34  ;;  %v17292_v34 = vld [vmem:[#allocation85_spill] sm:$0xff] }
 0x192   :  { %10576 = vmatmul.mubr.msk.bf16.gmra.mrb[4].mxu1 %vm322_vm0, %v17282_v37  ;;  %11315 = vmatprep.subr.bf16.mxu0 %v15410_v33  ;;  %v17310_v37 = vld [vmem:[#allocation36_spill] sm:$0xff] }
 0x193   :  { %10579 = vmatprep.mubr.msk.bf16.mxu1 %vm322_vm0, %v17283_v22 }
 0x194   :  { %11188 = vmatmul.mubr.msk.bf16.gmra.mrb[4].mxu0 %vm322_vm0, %v17284_v56  ;;  %v17308_v56 = vpack.c.bf16 %v15043_v40, %v15027_v39  ;;  %v17311_v40 = vld [vmem:[#allocation39_spill] sm:$0xff] }
 0x195   :  { %11191 = vmatprep.mubr.msk.bf16.mxu0 %vm322_vm0, %v17285_v17  ;;  %v17295_v17 = vld [vmem:[#allocation24_spill] sm:$0xff]  ;;  %v17319_v39 = vld [vmem:[#allocation47_spill] sm:$0xff] }
 0x19a   :  { %10580 = vmatmul.mubr.msk.bf16.gmra.mrb[8].mxu1 %vm322_vm0, %v17286_v35 }
 0x19b   :  { %10583 = vmatprep.mubr.msk.bf16.mxu1 %vm322_vm0, %v17287_v16  ;;  %v12814_v16 = vld [vmem:[%s16660_s0 + $0x1b8] sm:$0xff] }
 0x19c   :  { %11192 = vmatmul.mubr.msk.bf16.gmra.mrb[8].mxu0 %vm322_vm0, %v17288_v14  ;;  %v17296_v14 = vld [vmem:[#allocation93_spill] sm:$0xff]  ;;  %v2824_v35 = vrot.slane %v12814_v16, 2 }
 0x19d   :  { %11195 = vmatprep.mubr.msk.bf16.mxu0 %vm322_vm0, %v17289_v24  ;;  %v17297_v24 = vld [vmem:[#allocation94_spill] sm:$0xff] }
 0x1a2   :  { %10584 = vmatmul.mubr.msk.bf16.gmra.mrb[12].mxu1 %vm322_vm0, %v17290_v45  ;;  %v17298_v45 = vld [vmem:[#allocation25_spill] sm:$0xff] }
 0x1a3   :  { %10587 = vmatprep.mubr.msk.bf16.mxu1 %vm322_vm0, %v17291_v53  ;;  %v17299_v53 = vld [vmem:[#allocation28_spill] sm:$0xff] }
 0x1a4   :  { %11196 = vmatmul.mubr.msk.bf16.gmra.mrb[12].mxu0 %vm322_vm0, %v17292_v34  ;;  %v17300_v34 = vld [vmem:[#allocation103_spill] sm:$0xff] }
 0x1a5   :  { %11199 = vmatprep.mubr.msk.bf16.mxu0 %vm322_vm0, %v17293_v44  ;;  %v17301_v44 = vld [vmem:[#allocation104_spill] sm:$0xff] }
 0x1aa   :  { %10588 = vmatmul.mubr.msk.bf16.gmra.mrb[16].mxu1 %vm322_vm0, %v17294_v19  ;;  %v17302_v19 = vld [vmem:[#allocation29_spill] sm:$0xff] }
 0x1ab   :  { %10591 = vmatprep.mubr.msk.bf16.mxu1 %vm322_vm0, %v17295_v17  ;;  %v17303_v17 = vld [vmem:[#allocation32_spill] sm:$0xff] }
 0x1ac   :  { %11200 = vmatmul.mubr.msk.bf16.gmra.mrb[16].mxu0 %vm322_vm0, %v17296_v14 }
 0x1ad   :  { %11203 = vmatprep.mubr.msk.bf16.mxu0 %vm322_vm0, %v17297_v24  ;;  %v15461_v24 = vld [vmem:[%s16660_s0 + $0x180] sm:$0xff] }
 0x1b2   :  { %10592 = vmatmul.mubr.msk.bf16.gmra.mrb[20].mxu1 %vm322_vm0, %v17298_v45  ;;  %v17307_v45 = vld [vmem:[#allocation33_spill] sm:$0xff] }
 0x1b3   :  { %10595 = vmatprep.mubr.msk.bf16.mxu1 %vm322_vm0, %v17299_v53  ;;  %v15466_v53 = vld [vmem:[%s16660_s0 + $0x188] sm:$0xff] }
 0x1b4   :  { %11204 = vmatmul.mubr.msk.bf16.gmra.mrb[20].mxu0 %vm322_vm0, %v17300_v34  ;;  %v15470_v34 = vpack.c.bf16 %v15466_v53, %v15461_v24 }
 0x1b5   :  { %11207 = vmatprep.mubr.msk.bf16.mxu0 %vm322_vm0, %v17301_v44  ;;  %v17305_v44 = vld [vmem:[#allocation108_spill] sm:$0xff] }
 0x1b6   :  { %17304 = vst [vmem:[#allocation144_spill] sm:$0xff] %v15470_v34 }
 0x1ba   :  { %10596 = vmatmul.mubr.msk.bf16.gmra.mrb[24].mxu1 %vm322_vm0, %v17302_v19  ;;  %v15484_v19 = vld [vmem:[%s16660_s0 + $0x1a0] sm:$0xff] }
 0x1bb   :  { %10599 = vmatprep.mubr.msk.bf16.mxu1 %vm322_vm0, %v17303_v17  ;;  %v15479_v17 = vld [vmem:[%s16660_s0 + $0x198] sm:$0xff]  ;;  %17306 = vst [vmem:[#allocation145_spill] sm:$0xff] %v15484_v19 }
 0x1bc   :  { %11208 = vmatmul.mubr.msk.bf16.gmra.mrb[24].mxu0 %vm322_vm0, %v17305_v44  ;;  %v6523_v14 = vpack.c.bf16 %v15484_v19, %v15479_v17 }
 0x1bd   :  { %11211 = vmatprep.mubr.msk.bf16.mxu0 %vm322_vm0, %v15470_v34  ;;  %v12813_v34 = vld [vmem:[%s16660_s0 + $0x1b0] sm:$0xff] }
 0x1be   :  { %v2823_v44 = vrot.slane %v12813_v34, 2  ;;  %v12815_v34 = vld [vmem:[%s16660_s0 + $0x1c0] sm:$0x3] }
 0x1bf   :  { %v2826_v22 = vrot.slane %v12815_v34, 2  ;;  %v17318_v34 = vld [vmem:[#allocation44_spill] sm:$0xff] }
 0x1c0   :  { %v15504_v6 = vsel %vm2742_vm2, %v2823_v44, %v2824_v35  ;;  %v17313_v44 = vld [vmem:[#allocation129_spill] sm:$0xff] }
 0x1c1   :  { %v15510_v16 = vsel %vm2742_vm2, %v2824_v35, %v2826_v22  ;;  %v17315_v22 = vld [vmem:[#allocation43_spill] sm:$0xff]  ;;  %v17316_v35 = vld [vmem:[#allocation138_spill] sm:$0xff] }
 0x1c2   :  { %10600 = vmatmul.mubr.msk.bf16.gmra.mrb[28].mxu1 %vm322_vm0, %v17307_v45  ;;  %v17309_v45 = vld [vmem:[#allocation119_spill] sm:$0xff] }
 0x1c3   :  { %10603 = vmatprep.mubr.msk.bf16.mxu1 %vm322_vm0, %v17308_v56  ;;  %v17312_v56 = vld [vmem:[#allocation128_spill] sm:$0xff] }
 0x1c4   :  { %11212 = vmatmul.mubr.msk.bf16.gmra.mrb[28].mxu0 %vm322_vm0, %v6523_v14  ;;  %v17314_v14 = vld [vmem:[#allocation40_spill] sm:$0xff] }
 0x1c5   :  { %11215 = vmatprep.mubr.msk.bf16.mxu0 %vm322_vm0, %v17309_v45 }
 0x1ca   :  { %10604 = vmatmul.mubr.msk.bf16.gmra.mrb[32].mxu1 %vm322_vm0, %v17310_v37  ;;  %v17317_v37 = vld [vmem:[#allocation139_spill] sm:$0xff] }
 0x1cb   :  { %10607 = vmatprep.mubr.msk.bf16.mxu1 %vm322_vm0, %v17311_v40 }
 0x1cc   :  { %11216 = vmatmul.mubr.msk.bf16.gmra.mrb[32].mxu0 %vm322_vm0, %v17312_v56  ;;  %v17320_v56 = vld [vmem:[#allocation148_spill] sm:$0xff] }
 0x1cd   :  { %11219 = vmatprep.mubr.msk.bf16.mxu0 %vm322_vm0, %v17313_v44  ;;  %v17321_v44 = vld [vmem:[#allocation149_spill] sm:$0xff] }
 0x1d2   :  { %10608 = vmatmul.mubr.msk.bf16.gmra.mrb[36].mxu1 %vm322_vm0, %v17314_v14  ;;  %v17322_v14 = vld [vmem:[#allocation48_spill] sm:$0xff] }
 0x1d3   :  { %10611 = vmatprep.mubr.msk.bf16.mxu1 %vm322_vm0, %v17315_v22  ;;  %v17323_v22 = vld [vmem:[#allocation51_spill] sm:$0xff] }
 0x1d4   :  { %11220 = vmatmul.mubr.msk.bf16.gmra.mrb[36].mxu0 %vm322_vm0, %v17316_v35  ;;  %v17324_v35 = vld [vmem:[#allocation158_spill] sm:$0xff] }
 0x1d5   :  { %11223 = vmatprep.mubr.msk.bf16.mxu0 %vm322_vm0, %v17317_v37  ;;  %v17325_v37 = vld [vmem:[#allocation159_spill] sm:$0xff] }
 0x1da   :  { %10612 = vmatmul.mubr.msk.bf16.gmra.mrb[40].mxu1 %vm322_vm0, %v17318_v34  ;;  %v17326_v34 = vld [vmem:[#allocation52_spill] sm:$0xff] }
 0x1db   :  { %10615 = vmatprep.mubr.msk.bf16.mxu1 %vm322_vm0, %v17319_v39  ;;  %v17327_v39 = vld [vmem:[#allocation55_spill] sm:$0xff] }
 0x1dc   :  { %11224 = vmatmul.mubr.msk.bf16.gmra.mrb[40].mxu0 %vm322_vm0, %v17320_v56  ;;  %v17328_v56 = vld [vmem:[#allocation166_spill] sm:$0xff] }
 0x1dd   :  { %11227 = vmatprep.mubr.msk.bf16.mxu0 %vm322_vm0, %v17321_v44  ;;  %v17329_v44 = vld [vmem:[#allocation167_spill] sm:$0xff] }
 0x1e2   :  { %10616 = vmatmul.mubr.msk.bf16.gmra.mrb[44].mxu1 %vm322_vm0, %v17322_v14  ;;  %v17330_v14 = vld [vmem:[#allocation56_spill] sm:$0xff] }
 0x1e3   :  { %10619 = vmatprep.mubr.msk.bf16.mxu1 %vm322_vm0, %v17323_v22  ;;  %v17331_v22 = vld [vmem:[#allocation59_spill] sm:$0xff] }
 0x1e4   :  { %11228 = vmatmul.mubr.msk.bf16.gmra.mrb[44].mxu0 %vm322_vm0, %v17324_v35  ;;  %v17336_v35 = vpack.c.bf16 %v15385_v41, %v15376_v47  ;;  %v17338_v41 = vld [vmem:[#allocation67_spill] sm:$0xff] }
 0x1e5   :  { %11231 = vmatprep.mubr.msk.bf16.mxu0 %vm322_vm0, %v17325_v37  ;;  %v17332_v37 = vld [vmem:[#allocation60_spill] sm:$0xff] }
 0x1ea   :  { %10620 = vmatmul.mubr.msk.bf16.gmra.mrb[48].mxu1 %vm322_vm0, %v17326_v34 }
 0x1eb   :  { %10623 = vmatprep.mubr.msk.bf16.mxu1 %vm322_vm0, %v17327_v39  ;;  %v17333_v39 = vld [vmem:[#allocation63_spill] sm:$0xff] }
 0x1ec   :  { %11232 = vmatmul.mubr.msk.bf16.gmra.mrb[48].mxu0 %vm322_vm0, %v17328_v56  ;;  %v12819_v56 = vld [vmem:[%s16661_s1 + $0x8] sm:$0xff] }
 0x1ed   :  { %11235 = vmatprep.mubr.msk.bf16.mxu0 %vm322_vm0, %v17329_v44  ;;  %v15569_v44 = vld [vmem:[%s16660_s0 + $0x330] sm:$0xff]  ;;  %v2968_v34 = vrot.slane %v12819_v56, 2  ;;  %v12700_v56 = vld [vmem:[%s16663_s3 + $0x28] sm:$0xff]  }
 0x1f2   :  { %10624 = vmatmul.mubr.msk.bf16.gmra.mrb[52].mxu1 %vm322_vm0, %v17330_v14 }
 0x1f3   :  { %10627 = vmatprep.mubr.msk.bf16.mxu1 %vm322_vm0, %v17331_v22  ;;  %v15574_v22 = vld [vmem:[%s16660_s0 + $0x338] sm:$0xff] }
 0x1f4   :  { %11236 = vmatmul.mubr.msk.bf16.gmra.mrb[52].mxu0 %vm322_vm0, %v14518_v48  ;;  %v15578_v48 = vpack.c.bf16 %v15574_v22, %v15569_v44 }
 0x1f5   :  { %11239 = vmatprep.mubr.msk.bf16.mxu0 %vm322_vm0, %v14526_v21  ;;  %v15587_v21 = vld [vmem:[%s16660_s0 + $0x348] sm:$0xff] }
 0x1f6   :  { %17334 = vst [vmem:[#allocation150_spill] sm:$0xff] %v15578_v48 }
 0x1fa   :  { %10628 = vmatmul.mubr.msk.bf16.gmra.mrb[56].mxu1 %vm322_vm0, %v17332_v37  ;;  %v17335_v37 = vld [vmem:[#allocation64_spill] sm:$0xff] }
 0x1fb   :  { %10631 = vmatprep.mubr.msk.bf16.mxu1 %vm322_vm0, %v17333_v39  ;;  %v15592_v39 = vld [vmem:[%s16660_s0 + $0x350] sm:$0xff] }
 0x1fc   :  { %11240 = vmatmul.mubr.msk.bf16.gmra.mrb[56].mxu0 %vm322_vm0, %v14551_v27  ;;  %v6524_v14 = vpack.c.bf16 %v15592_v39, %v15587_v21 }
 0x1fd   :  { %11243 = vmatprep.mubr.msk.bf16.mxu0 %vm322_vm0, %v15578_v48  ;;  %v12818_v48 = vld [vmem:[%s16661_s1] sm:$0xff] }
 0x1fe   :  { %v2967_v27 = vrot.slane %v12818_v48, 2  ;;  %v12820_v48 = vld [vmem:[%s16661_s1 + $0x10] sm:$0x3] }
 0x1ff   :  { %v2970_v40 = vrot.slane %v12820_v48, 2  ;;  %v17341_v48 = vld [vmem:[#allocation10_spill] sm:$0xff] }
 0x200   :  { %v15612_v45 = vsel %vm2742_vm2, %v2967_v27, %v2968_v34  ;;  %v17339_v27 = vld [vmem:[#allocation71_spill] sm:$0xff] }
 0x201   :  { %v15621_v47 = vsel %vm2742_vm2, %v2968_v34, %v2970_v40  ;;  %v15636_v40 = vld [vmem:[%s16662_s2 + $0x30] sm:$0xff]   ;;  %v17340_v34 = vld [vmem:[#allocation9_spill] sm:$0xff] }
 0x202   :  { %10632 = vmatmul.mubr.msk.bf16.gmra.mrb[60].mxu1 %vm322_vm0, %v17335_v37  ;;  %v17337_v37 = vld [vmem:[#allocation7_spill] sm:$0xff] }
 0x203   :  { %10639 = vmatprep.mubr.msk.bf16.mxu1 %vm322_vm0, %v17336_v35  ;;  %v12701_v35 = vld [vmem:[%s16662_s2 + $0x78] sm:$0xff]  }
 0x204   :  { %11244 = vmatmul.mubr.msk.bf16.gmra.mrb[60].mxu0 %vm322_vm0, %v6524_v14  ;;  %v17343_v14 = vld [vmem:[#allocation75_spill] sm:$0xff] }
 0x205   :  { %11251 = vmatprep.mubr.msk.bf16.mxu0 %vm322_vm0, %v17337_v37  ;;  %v17348_v37 = vld [vmem:[#allocation18_spill] sm:$0xff] }
 0x20a   :  { %10640 = vmatmul.mubr.msk.bf16.vlgmr.msra.gmra.mrb[0].mxu1 %vm322_vm0, %v17338_v41  ;;  %v17342_v41 = vld [vmem:[#allocation72_spill] sm:$0xff] }
 0x20b   :  { %10704 = vmatpush3.bf16.msra.mxu1 %v15400_v57  ;;  %10643 = vmatprep.mubr.msk.bf16.mxu1 %vm322_vm0, %v17339_v27  ;;  %v15646_v57 = vld [vmem:[%s16663_s3 + $0x70] sm:$0xff]  }
 0x20c   :  { %10705 = vmatprep.subr.bf16.mxu1 %v12700_v56  ;;  %11252 = vmatmul.mubr.msk.bf16.vlgmr.msra.gmra.mrb[0].mxu0 %vm322_vm0, %v17340_v34  ;;  %v17347_v34 = vld [vmem:[#allocation79_spill] sm:$0xff] }
 0x20d   :  { %11316 = vmatpush3.bf16.msra.mxu0 %v15410_v33  ;;  %11255 = vmatprep.mubr.msk.bf16.mxu0 %vm322_vm0, %v17341_v48  ;;  %v17344_v33 = vld [vmem:[#allocation14_spill] sm:$0xff]  ;;  %v17346_v48 = vld [vmem:[#allocation76_spill] sm:$0xff] }
 0x20e   :  { %11317 = vmatprep.subr.bf16.mxu0 %v12701_v35 }
 0x20f   :  { %10706 = vmatpush3.bf16.msra.mxu1 %v12700_v56  ;;  %v17345_v56 = vld [vmem:[#allocation15_spill] sm:$0xff] }
 0x210   :  { %10771 = vmatprep.subr.bf16.mxu1 %v15636_v40 }
 0x211   :  { %11318 = vmatpush3.bf16.msra.mxu0 %v12701_v35  ;;  %v17350_v35 = vld [vmem:[#allocation80_spill] sm:$0xff] }
 0x212   :  { %10644 = vmatmul.mubr.msk.bf16.gmra.mrb[4].mxu1 %vm322_vm0, %v17342_v41  ;;  %11383 = vmatprep.subr.bf16.mxu0 %v15646_v57  ;;  %v17349_v41 = vld [vmem:[#allocation19_spill] sm:$0xff] }
 0x213   :  { %10647 = vmatprep.mubr.msk.bf16.mxu1 %vm322_vm0, %v17343_v14  ;;  %v17351_v14 = vld [vmem:[#allocation83_spill] sm:$0xff] }
 0x214   :  { %11256 = vmatmul.mubr.msk.bf16.gmra.mrb[4].mxu0 %vm322_vm0, %v17344_v33  ;;  %v17352_v33 = vld [vmem:[#allocation22_spill] sm:$0xff] }
 0x215   :  { %11259 = vmatprep.mubr.msk.bf16.mxu0 %vm322_vm0, %v17345_v56  ;;  %v17353_v56 = vld [vmem:[#allocation23_spill] sm:$0xff] }
 0x21a   :  { %10648 = vmatmul.mubr.msk.bf16.gmra.mrb[8].mxu1 %vm322_vm0, %v17346_v48  ;;  %v17354_v48 = vld [vmem:[#allocation84_spill] sm:$0xff] }
 0x21b   :  { %10651 = vmatprep.mubr.msk.bf16.mxu1 %vm322_vm0, %v17347_v34  ;;  %v17355_v34 = vld [vmem:[#allocation91_spill] sm:$0xff] }
 0x21c   :  { %11260 = vmatmul.mubr.msk.bf16.gmra.mrb[8].mxu0 %vm322_vm0, %v17348_v37  ;;  %v17356_v37 = vld [vmem:[#allocation26_spill] sm:$0xff] }
 0x21d   :  { %11263 = vmatprep.mubr.msk.bf16.mxu0 %vm322_vm0, %v17349_v41  ;;  %v17357_v41 = vld [vmem:[#allocation27_spill] sm:$0xff] }
 0x222   :  { %10652 = vmatmul.mubr.msk.bf16.gmra.mrb[12].mxu1 %vm322_vm0, %v17350_v35  ;;  %v17358_v35 = vld [vmem:[#allocation92_spill] sm:$0xff] }
 0x223   :  { %10655 = vmatprep.mubr.msk.bf16.mxu1 %vm322_vm0, %v17351_v14  ;;  %v17359_v14 = vld [vmem:[#allocation101_spill] sm:$0xff] }
 0x224   :  { %11264 = vmatmul.mubr.msk.bf16.gmra.mrb[12].mxu0 %vm322_vm0, %v17352_v33  ;;  %v17360_v33 = vld [vmem:[#allocation30_spill] sm:$0xff] }
 0x225   :  { %11267 = vmatprep.mubr.msk.bf16.mxu0 %vm322_vm0, %v17353_v56  ;;  %v17361_v56 = vld [vmem:[#allocation31_spill] sm:$0xff] }
 0x22a   :  { %10656 = vmatmul.mubr.msk.bf16.gmra.mrb[16].mxu1 %vm322_vm0, %v17354_v48  ;;  %v17362_v48 = vld [vmem:[#allocation102_spill] sm:$0xff] }
 0x22b   :  { %10659 = vmatprep.mubr.msk.bf16.mxu1 %vm322_vm0, %v17355_v34  ;;  %v17363_v34 = vld [vmem:[#allocation106_spill] sm:$0xff] }
 0x22c   :  { %11268 = vmatmul.mubr.msk.bf16.gmra.mrb[16].mxu0 %vm322_vm0, %v17356_v37  ;;  %v17365_v37 = vld [vmem:[#allocation34_spill] sm:$0xff] }
 0x22d   :  { %11271 = vmatprep.mubr.msk.bf16.mxu0 %vm322_vm0, %v17357_v41  ;;  %v15696_v41 = vpack.c.bf16 %v14932_v26, %v14924_v29  ;;  %v15712_v29 = vld [vmem:[%s16661_s1 + $0x1a0] sm:$0xff]  ;;  %v15717_v26 = vld [vmem:[%s16660_s0 + $0x1a8] sm:$0x3] }
 0x22e   :  { %17366 = vst [vmem:[#allocation152_spill] sm:$0xff] %v15717_v26 }
 0x22f   :  { %17364 = vst [vmem:[#allocation151_spill] sm:$0xff] %v15696_v41 }
 0x232   :  { %10660 = vmatmul.mubr.msk.bf16.gmra.mrb[20].mxu1 %vm322_vm0, %v17358_v35  ;;  %v7285_v35 = vrot.slane %v15479_v17, 1 }
 0x233   :  { %10663 = vmatprep.mubr.msk.bf16.mxu1 %vm322_vm0, %v17359_v14  ;;  %v7286_v14 = vrot.slane %v15484_v19, 1  ;;  %v17368_v19 = vpack.c.bf16 %v15510_v16, %v15504_v6  ;;  %v17370_v16 = vld [vmem:[#allocation116_spill] sm:$0xff] }
 0x234   :  { %11272 = vmatmul.mubr.msk.bf16.gmra.mrb[20].mxu0 %vm322_vm0, %v17360_v33 }
 0x235   :  { %11275 = vmatprep.mubr.msk.bf16.mxu0 %vm322_vm0, %v17361_v56  ;;  %v15707_v56 = vld [vmem:[%s16661_s1 + $0x198] sm:$0xff]  ;;  %v15727_v27 = vsel %vm1201_vm1, %v7285_v35, %v7286_v14  ;;  %v17369_v35 = vld [vmem:[#allocation38_spill] sm:$0xff] }
 0x236   :  { %v6901_v33 = vpack.c.bf16 %v15712_v29, %v15707_v56 }
 0x23a   :  { %10664 = vmatmul.mubr.msk.bf16.gmra.mrb[24].mxu1 %vm322_vm0, %v17362_v48  ;;  %v17367_v48 = vld [vmem:[#allocation107_spill] sm:$0xff] }
 0x23b   :  { %10667 = vmatprep.mubr.msk.bf16.mxu1 %vm322_vm0, %v17363_v34  ;;  %v3047_v34 = vrot.slane %v14966_v20, 2  ;;  %v17379_v20 = vld [vmem:[#allocation146_spill] sm:$0xff] }
 0x23c   :  { %11276 = vmatmul.mubr.msk.bf16.gmra.mrb[24].mxu0 %vm322_vm0, %v17365_v37  ;;  %v7288_v37 = vrot.slane %v15717_v26, 1 }
 0x23d   :  { %11279 = vmatprep.mubr.msk.bf16.mxu0 %vm322_vm0, %v15696_v41  ;;  %v3048_v41 = vrot.slane %v14987_v5, 2 }
 0x23e   :  { %v15734_v26 = vsel %vm1201_vm1, %v7286_v14, %v7288_v37  ;;  %v17371_v37 = vld [vmem:[#allocation126_spill] sm:$0xff]  ;;  %v17372_v14 = vld [vmem:[#allocation41_spill] sm:$0xff] }
 0x23f   :  { %v15740_v5 = vsel %vm2742_vm2, %v3047_v34, %v3048_v41  ;;  %v17373_v34 = vld [vmem:[#allocation42_spill] sm:$0xff] }
 0x242   :  { %10668 = vmatmul.mubr.msk.bf16.gmra.mrb[28].mxu1 %vm322_vm0, %v17367_v48  ;;  %v3050_v48 = vrot.slane %v15019_v49, 2  ;;  %v17374_v49 = vld [vmem:[#allocation127_spill] sm:$0xff] }
 0x243   :  { %10671 = vmatprep.mubr.msk.bf16.mxu1 %vm322_vm0, %v17368_v19  ;;  %v17380_v19 = vld [vmem:[#allocation49_spill] sm:$0xff] }
 0x244   :  { %11280 = vmatmul.mubr.msk.bf16.gmra.mrb[28].mxu0 %vm322_vm0, %v6901_v33  ;;  %v15746_v6 = vsel %vm2742_vm2, %v3048_v41, %v3050_v48  ;;  %v17375_v48 = vld [vmem:[#allocation136_spill] sm:$0xff]  ;;  %v17376_v41 = vld [vmem:[#allocation45_spill] sm:$0xff]  ;;  %v17377_v33 = vld [vmem:[#allocation46_spill] sm:$0xff] }
 0x245   :  { %11283 = vmatprep.mubr.msk.bf16.mxu0 %vm322_vm0, %v17369_v35 }
 0x24a   :  { %10672 = vmatmul.mubr.msk.bf16.gmra.mrb[32].mxu1 %vm322_vm0, %v17370_v16  ;;  %v17378_v16 = vld [vmem:[#allocation137_spill] sm:$0xff] }
 0x24b   :  { %10675 = vmatprep.mubr.msk.bf16.mxu1 %vm322_vm0, %v17371_v37 }
 0x24c   :  { %11284 = vmatmul.mubr.msk.bf16.gmra.mrb[32].mxu0 %vm322_vm0, %v17372_v14 }
 0x24d   :  { %11287 = vmatprep.mubr.msk.bf16.mxu0 %vm322_vm0, %v17373_v34  ;;  %v17381_v34 = vld [vmem:[#allocation50_spill] sm:$0xff] }
 0x252   :  { %10676 = vmatmul.mubr.msk.bf16.gmra.mrb[36].mxu1 %vm322_vm0, %v17374_v49  ;;  %v17382_v49 = vld [vmem:[#allocation147_spill] sm:$0xff] }
 0x253   :  { %10679 = vmatprep.mubr.msk.bf16.mxu1 %vm322_vm0, %v17375_v48  ;;  %v17383_v48 = vld [vmem:[#allocation156_spill] sm:$0xff] }
 0x254   :  { %11288 = vmatmul.mubr.msk.bf16.gmra.mrb[36].mxu0 %vm322_vm0, %v17376_v41  ;;  %v17384_v41 = vld [vmem:[#allocation53_spill] sm:$0xff] }
 0x255   :  { %11291 = vmatprep.mubr.msk.bf16.mxu0 %vm322_vm0, %v17377_v33  ;;  %v17385_v33 = vld [vmem:[#allocation54_spill] sm:$0xff] }
 0x25a   :  { %10680 = vmatmul.mubr.msk.bf16.gmra.mrb[40].mxu1 %vm322_vm0, %v17378_v16  ;;  %v17386_v16 = vld [vmem:[#allocation157_spill] sm:$0xff] }
 0x25b   :  { %10683 = vmatprep.mubr.msk.bf16.mxu1 %vm322_vm0, %v17379_v20  ;;  %v17387_v20 = vld [vmem:[#allocation164_spill] sm:$0xff] }
 0x25c   :  { %11292 = vmatmul.mubr.msk.bf16.gmra.mrb[40].mxu0 %vm322_vm0, %v17380_v19  ;;  %v17388_v19 = vld [vmem:[#allocation57_spill] sm:$0xff] }
 0x25d   :  { %11295 = vmatprep.mubr.msk.bf16.mxu0 %vm322_vm0, %v17381_v34  ;;  %v17389_v34 = vld [vmem:[#allocation58_spill] sm:$0xff] }
 0x262   :  { %10684 = vmatmul.mubr.msk.bf16.gmra.mrb[44].mxu1 %vm322_vm0, %v17382_v49  ;;  %v17390_v49 = vld [vmem:[#allocation165_spill] sm:$0xff] }
 0x263   :  { %10687 = vmatprep.mubr.msk.bf16.mxu1 %vm322_vm0, %v17383_v48  ;;  %v17391_v48 = vld [vmem:[#allocation169_spill] sm:$0xff] }
 0x264   :  { %11296 = vmatmul.mubr.msk.bf16.gmra.mrb[44].mxu0 %vm322_vm0, %v17384_v41  ;;  %v17392_v41 = vld [vmem:[#allocation61_spill] sm:$0xff] }
 0x265   :  { %11299 = vmatprep.mubr.msk.bf16.mxu0 %vm322_vm0, %v17385_v33  ;;  %v17393_v33 = vld [vmem:[#allocation62_spill] sm:$0xff] }
 0x26a   :  { %10688 = vmatmul.mubr.msk.bf16.gmra.mrb[48].mxu1 %vm322_vm0, %v17386_v16  ;;  %v17394_v16 = vld [vmem:[#allocation170_spill] sm:$0xff] }
 0x26b   :  { %10691 = vmatprep.mubr.msk.bf16.mxu1 %vm322_vm0, %v17387_v20  ;;  %v17395_v20 = vld [vmem:[#allocation173_spill] sm:$0xff] }
 0x26c   :  { %11300 = vmatmul.mubr.msk.bf16.gmra.mrb[48].mxu0 %vm322_vm0, %v17388_v19  ;;  %v17397_v19 = vld [vmem:[#allocation65_spill] sm:$0xff] }
 0x26d   :  { %11303 = vmatprep.mubr.msk.bf16.mxu0 %vm322_vm0, %v17389_v34  ;;  %v15804_v34 = vpack.c.bf16 %v15343_v2, %v15333_v63  ;;  %v15820_v63 = vld [vmem:[%s16661_s1 + $0x350] sm:$0xff]  ;;  %v15825_v2 = vld [vmem:[%s16660_s0 + $0x358] sm:$0x3] }
 0x26f   :  { %17396 = vst [vmem:[#allocation153_spill] sm:$0xff] %v15804_v34 }
 0x272   :  { %10692 = vmatmul.mubr.msk.bf16.gmra.mrb[52].mxu1 %vm322_vm0, %v17390_v49  ;;  %v7290_v49 = vrot.slane %v15587_v21, 1 }
 0x273   :  { %10695 = vmatprep.mubr.msk.bf16.mxu1 %vm322_vm0, %v17391_v48  ;;  %v7291_v48 = vrot.slane %v15592_v39, 1 }
 0x274   :  { %11304 = vmatmul.mubr.msk.bf16.gmra.mrb[52].mxu0 %vm322_vm0, %v17392_v41  ;;  %v17399_v41 = vpack.c.bf16 %v15621_v47, %v15612_v45  ;;  %v12705_v45 = vld [vmem:[%s16663_s3 + $0x78] sm:$0xff]   ;;  %v15861_v47 = vld [vmem:[%s16663_s3 + $0x30] sm:$0xff]  }
 0x275   :  { %11307 = vmatprep.mubr.msk.bf16.mxu0 %vm322_vm0, %v17393_v33  ;;  %v15815_v33 = vld [vmem:[%s16661_s1 + $0x348] sm:$0xff] }
 0x27a   :  { %10696 = vmatmul.mubr.msk.bf16.gmra.mrb[56].mxu1 %vm322_vm0, %v17394_v16  ;;  %v15833_v16 = vsel %vm1201_vm1, %v7290_v49, %v7291_v48  ;;  %v12704_v49 = vld [vmem:[%s16662_s2 + $0x38] sm:$0xff]  }
 0x27b   :  { %10699 = vmatprep.mubr.msk.bf16.mxu1 %vm322_vm0, %v17395_v20  ;;  %v17398_v20 = vld [vmem:[#allocation174_spill] sm:$0xff] }
 0x27c   :  { %11308 = vmatmul.mubr.msk.bf16.gmra.mrb[56].mxu0 %vm322_vm0, %v17397_v19  ;;  %v7293_v19 = vrot.slane %v15825_v2, 1 }
 0x27d   :  { %11311 = vmatprep.mubr.msk.bf16.mxu0 %vm322_vm0, %v15804_v34  ;;  %v6902_v34 = vpack.c.bf16 %v15820_v63, %v15815_v33 }
 0x27e   :  { %v15840_v14 = vsel %vm1201_vm1, %v7291_v48, %v7293_v19  ;;  %v17402_v19 = vld [vmem:[#allocation88_spill] sm:$0xff]  ;;  %v17404_v48 = vld [vmem:[#allocation89_spill] sm:$0xff] }
 0x282   :  { %10700 = vmatmul.mubr.msk.bf16.gmra.mrb[60].mxu1 %vm322_vm0, %v17398_v20 }
 0x283   :  { %10707 = vmatprep.mubr.msk.bf16.mxu1 %vm322_vm0, %v17399_v41  ;;  %v4949_v41 = vrot.slane %v15461_v24, 1  ;;  %v17408_v24 = vld [vmem:[#allocation97_spill] sm:$0xff] }
 0x284   :  { %11312 = vmatmul.mubr.msk.bf16.gmra.mrb[60].mxu0 %vm322_vm0, %v6902_v34  ;;  %v17403_v34 = vld [vmem:[#allocation178_spill] sm:$0xff] }
 0x285   :  { %11319 = vmatprep.mubr.msk.bf16.mxu0 %vm322_vm0, %v14598_v12 }
 0x28a   :  { %10708 = vmatmul.mubr.msk.bf16.vlgmr.msra.gmra.mrb[0].mxu1 %vm322_vm0, %v13655_v11  ;;  %v15871_v11 = vld [vmem:[%s16662_s2 + $0x80] sm:$0xff]  }
 0x28b   :  { %10772 = vmatpush3.bf16.msra.mxu1 %v15636_v40  ;;  %10711 = vmatprep.mubr.msk.bf16.mxu1 %vm322_vm0, %v13710_v23  ;;  %v17400_v40 = vld [vmem:[#allocation87_spill] sm:$0xff] }
 0x28c   :  { %10773 = vmatprep.subr.bf16.mxu1 %v12704_v49  ;;  %11320 = vmatmul.mubr.msk.bf16.vlgmr.msra.gmra.mrb[0].mxu0 %vm322_vm0, %v14645_v51 }
 0x28d   :  { %11384 = vmatpush3.bf16.msra.mxu0 %v15646_v57  ;;  %11323 = vmatprep.mubr.msk.bf16.mxu0 %vm322_vm0, %v14662_v42  ;;  %v17401_v57 = vld [vmem:[#allocation179_spill] sm:$0xff] }
 0x28e   :  { %11385 = vmatprep.subr.bf16.mxu0 %v12705_v45 }
 0x28f   :  { %10774 = vmatpush3.bf16.msra.mxu1 %v12704_v49  ;;  %v4950_v49 = vrot.slane %v15466_v53, 1 }
 0x290   :  { %10839 = vmatprep.subr.bf16.mxu1 %v15861_v47 }
 0x291   :  { %11386 = vmatpush3.bf16.msra.mxu0 %v12705_v45  ;;  %v12821_v45 = vld [vmem:[%s16660_s0 + $0x190] sm:$0x3] }
 0x292   :  { %10712 = vmatmul.mubr.msk.bf16.gmra.mrb[4].mxu1 %vm322_vm0, %v14626_v28  ;;  %11451 = vmatprep.subr.bf16.mxu0 %v15871_v11  ;;  %v4952_v35 = vrot.slane %v12821_v45, 1  ;;  %v7305_v45 = vrot.slane %v15707_v56, 1 }
 0x293   :  { %10715 = vmatprep.mubr.msk.bf16.mxu1 %vm322_vm0, %v14683_v46 }
 0x294   :  { %11324 = vmatmul.mubr.msk.bf16.gmra.mrb[4].mxu0 %vm322_vm0, %v14706_v32 }
 0x295   :  { %11327 = vmatprep.mubr.msk.bf16.mxu0 %vm322_vm0, %v14717_v25 }
 0x29a   :  { %10716 = vmatmul.mubr.msk.bf16.gmra.mrb[8].mxu1 %vm322_vm0, %v14692_v55 }
 0x29b   :  { %10719 = vmatprep.mubr.msk.bf16.mxu1 %vm322_vm0, %v14724_v38 }
 0x29c   :  { %11328 = vmatmul.mubr.msk.bf16.gmra.mrb[8].mxu0 %vm322_vm0, %v14756_v61 }
 0x29d   :  { %11331 = vmatprep.mubr.msk.bf16.mxu0 %vm322_vm0, %v14765_v52 }
 0x2a2   :  { %10720 = vmatmul.mubr.msk.bf16.gmra.mrb[12].mxu1 %vm322_vm0, %v14728_v18 }
 0x2a3   :  { %10723 = vmatprep.mubr.msk.bf16.mxu1 %vm322_vm0, %v14780_v58 }
 0x2a4   :  { %11332 = vmatmul.mubr.msk.bf16.gmra.mrb[12].mxu0 %vm322_vm0, %v14802_v36 }
 0x2a5   :  { %11335 = vmatprep.mubr.msk.bf16.mxu0 %vm322_vm0, %v14813_v60  ;;  %v17405_v60 = vld [vmem:[#allocation95_spill] sm:$0xff] }
 0x2aa   :  { %10724 = vmatmul.mubr.msk.bf16.gmra.mrb[16].mxu1 %vm322_vm0, %v14789_v9 }
 0x2ab   :  { %10727 = vmatprep.mubr.msk.bf16.mxu1 %vm322_vm0, %v17400_v40  ;;  %v7306_v40 = vrot.slane %v15712_v29, 1 }
 0x2ac   :  { %11336 = vmatmul.mubr.msk.bf16.gmra.mrb[16].mxu0 %vm322_vm0, %v17401_v57  ;;  %v17406_v57 = vld [vmem:[#allocation96_spill] sm:$0xff] }
 0x2ad   :  { %11339 = vmatprep.mubr.msk.bf16.mxu0 %vm322_vm0, %v17402_v19  ;;  %v4951_v19 = vsel %vm1201_vm1, %v4949_v41, %v4950_v49 }
 0x2b2   :  { %10728 = vmatmul.mubr.msk.bf16.gmra.mrb[20].mxu1 %vm322_vm0, %v17403_v34  ;;  %v4953_v34 = vsel %vm1201_vm1, %v4950_v49, %v4952_v35  ;;  %v15937_v35 = vld [vmem:[%s16661_s1 + $0x1a8] sm:$0x3] }
 0x2b3   :  { %10731 = vmatprep.mubr.msk.bf16.mxu1 %vm322_vm0, %v17404_v48  ;;  %v17407_v48 = vld [vmem:[#allocation90_spill] sm:$0xff]  ;;  %v15926_v53 = vpack.c.bf16 %v4953_v34, %v4951_v19  ;;  %v7308_v41 = vrot.slane %v15937_v35, 1  ;;  %v15943_v19 = vsel %vm1201_vm1, %v7305_v45, %v7306_v40  ;;  %v17412_v34 = vpack.c.bf16 %v15746_v6, %v15740_v5  ;;  %v17415_v45 = vld [vmem:[#allocation105_spill] sm:$0xff]  ;;  %v17416_v5 = vld [vmem:[#allocation111_spill] sm:$0xff] }
 0x2b4   :  { %11340 = vmatmul.mubr.msk.bf16.gmra.mrb[20].mxu0 %vm322_vm0, %v17405_v60  ;;  %v17410_v60 = vld [vmem:[#allocation99_spill] sm:$0xff]  ;;  %v17411_v49 = vld [vmem:[#allocation98_spill] sm:$0xff]  ;;  %v17417_v6 = vld [vmem:[#allocation112_spill] sm:$0xff] }
 0x2b5   :  { %11343 = vmatprep.mubr.msk.bf16.mxu0 %vm322_vm0, %v17406_v57  ;;  %17409 = vst [vmem:[#allocation154_spill] sm:$0xff] %v15926_v53  ;;  %v17413_v57 = vpack.c.bf16 %v15734_v26, %v15727_v27  ;;  %v17420_v27 = vld [vmem:[#allocation114_spill] sm:$0xff]  ;;  %v17421_v26 = vld [vmem:[#allocation121_spill] sm:$0xff] }
 0x2ba   :  { %10732 = vmatmul.mubr.msk.bf16.gmra.mrb[24].mxu1 %vm322_vm0, %v17407_v48 }
 0x2bb   :  { %10735 = vmatprep.mubr.msk.bf16.mxu1 %vm322_vm0, %v17408_v24 }
 0x2bc   :  { %11344 = vmatmul.mubr.msk.bf16.gmra.mrb[24].mxu0 %vm322_vm0, %v17410_v60  ;;  %v17425_v60 = vld [vmem:[#allocation125_spill] sm:$0xff] }
 0x2bd   :  { %11347 = vmatprep.mubr.msk.bf16.mxu0 %vm322_vm0, %v15926_v53  ;;  %v15950_v53 = vsel %vm1201_vm1, %v7306_v40, %v7308_v41  ;;  %v17418_v40 = vld [vmem:[#allocation113_spill] sm:$0xff]  ;;  %v17419_v41 = vld [vmem:[#allocation118_spill] sm:$0xff] }
 0x2c2   :  { %10736 = vmatmul.mubr.msk.bf16.gmra.mrb[28].mxu1 %vm322_vm0, %v17411_v49  ;;  %v17414_v49 = vld [vmem:[#allocation110_spill] sm:$0xff] }
 0x2c3   :  { %10739 = vmatprep.mubr.msk.bf16.mxu1 %vm322_vm0, %v17412_v34  ;;  %v17423_v34 = vld [vmem:[#allocation120_spill] sm:$0xff] }
 0x2c4   :  { %11348 = vmatmul.mubr.msk.bf16.gmra.mrb[28].mxu0 %vm322_vm0, %v17413_v57  ;;  %v17422_v57 = vld [vmem:[#allocation122_spill] sm:$0xff] }
 0x2c5   :  { %11351 = vmatprep.mubr.msk.bf16.mxu0 %vm322_vm0, %v17414_v49 }
 0x2ca   :  { %10740 = vmatmul.mubr.msk.bf16.gmra.mrb[32].mxu1 %vm322_vm0, %v17415_v45  ;;  %v17424_v45 = vld [vmem:[#allocation123_spill] sm:$0xff] }
 0x2cb   :  { %10743 = vmatprep.mubr.msk.bf16.mxu1 %vm322_vm0, %v17416_v5 }
 0x2cc   :  { %11352 = vmatmul.mubr.msk.bf16.gmra.mrb[32].mxu0 %vm322_vm0, %v17417_v6 }
 0x2cd   :  { %11355 = vmatprep.mubr.msk.bf16.mxu0 %vm322_vm0, %v17418_v40  ;;  %v17426_v40 = vld [vmem:[#allocation130_spill] sm:$0xff] }
 0x2d2   :  { %10744 = vmatmul.mubr.msk.bf16.gmra.mrb[36].mxu1 %vm322_vm0, %v17419_v41  ;;  %v17427_v41 = vld [vmem:[#allocation124_spill] sm:$0xff] }
 0x2d3   :  { %10747 = vmatprep.mubr.msk.bf16.mxu1 %vm322_vm0, %v17420_v27  ;;  %v17428_v27 = vld [vmem:[#allocation131_spill] sm:$0xff] }
 0x2d4   :  { %11356 = vmatmul.mubr.msk.bf16.gmra.mrb[36].mxu0 %vm322_vm0, %v17421_v26 }
 0x2d5   :  { %11359 = vmatprep.mubr.msk.bf16.mxu0 %vm322_vm0, %v17422_v57  ;;  %v17429_v57 = vld [vmem:[#allocation132_spill] sm:$0xff] }
 0x2da   :  { %10748 = vmatmul.mubr.msk.bf16.gmra.mrb[40].mxu1 %vm322_vm0, %v17423_v34 }
 0x2db   :  { %10751 = vmatprep.mubr.msk.bf16.mxu1 %vm322_vm0, %v17424_v45 }
 0x2dc   :  { %11360 = vmatmul.mubr.msk.bf16.gmra.mrb[40].mxu0 %vm322_vm0, %v17425_v60 }
 0x2dd   :  { %11363 = vmatprep.mubr.msk.bf16.mxu0 %vm322_vm0, %v17426_v40 }
 0x2e2   :  { %10752 = vmatmul.mubr.msk.bf16.gmra.mrb[44].mxu1 %vm322_vm0, %v17427_v41 }
 0x2e3   :  { %10755 = vmatprep.mubr.msk.bf16.mxu1 %vm322_vm0, %v17428_v27 }
 0x2e4   :  { %11364 = vmatmul.mubr.msk.bf16.gmra.mrb[44].mxu0 %vm322_vm0, %v15215_v59  ;;  %v4955_v59 = vrot.slane %v15574_v22, 1  ;;  %v7311_v22 = vrot.slane %v15820_v63, 1 }
 0x2e5   :  { %11367 = vmatprep.mubr.msk.bf16.mxu0 %vm322_vm0, %v15224_v7  ;;  %v4954_v7 = vrot.slane %v15569_v44, 1 }
 0x2ea   :  { %10756 = vmatmul.mubr.msk.bf16.gmra.mrb[48].mxu1 %vm322_vm0, %v17429_v57 }
 0x2eb   :  { %10759 = vmatprep.mubr.msk.bf16.mxu1 %vm322_vm0, %v15239_v3  ;;  %v12822_v3 = vld [vmem:[%s16660_s0 + $0x340] sm:$0x3] }
 0x2ec   :  { %11368 = vmatmul.mubr.msk.bf16.gmra.mrb[48].mxu0 %vm322_vm0, %v15261_v10  ;;  %v4957_v57 = vrot.slane %v12822_v3, 1  ;;  %v7310_v3 = vrot.slane %v15815_v33, 1 }
 0x2ed   :  { %11371 = vmatprep.mubr.msk.bf16.mxu0 %vm322_vm0, %v15272_v43  ;;  %v4956_v43 = vsel %vm1201_vm1, %v4954_v7, %v4955_v59 }
 0x2f2   :  { %10760 = vmatmul.mubr.msk.bf16.gmra.mrb[52].mxu1 %vm322_vm0, %v15248_v1  ;;  %v4958_v1 = vsel %vm1201_vm1, %v4955_v59, %v4957_v57  ;;  %v16030_v59 = vld [vmem:[%s16661_s1 + $0x358] sm:$0x3] }
 0x2f3   :  { %10763 = vmatprep.mubr.msk.bf16.mxu1 %vm322_vm0, %v15279_v50  ;;  %v16019_v44 = vpack.c.bf16 %v4958_v1, %v4956_v43  ;;  %v7313_v7 = vrot.slane %v16030_v59, 1  ;;  %v16036_v1 = vsel %vm1201_vm1, %v7310_v3, %v7311_v22  ;;  %v17431_v43 = vld [vmem:[#allocation68_spill] sm:$0xff] }
 0x2f4   :  { %11372 = vmatmul.mubr.msk.bf16.gmra.mrb[52].mxu0 %vm322_vm0, %v15309_v13  ;;  %v12708_v3 = vld [vmem:[%s16663_s3 + $0x38] sm:$0xff]  }
 0x2f5   :  { %11375 = vmatprep.mubr.msk.bf16.mxu0 %vm322_vm0, %v15319_v54  ;;  %17430 = vst [vmem:[#allocation155_spill] sm:$0xff] %v16019_v44  ;;  %v16041_v57 = vsel %vm1201_vm1, %v7311_v22, %v7313_v7  ;;  %v17438_v22 = vld [vmem:[#allocation16_spill] sm:$0xff]  ;;  %v17439_v7 = vld [vmem:[#allocation78_spill] sm:$0xff] }
 0x2fa   :  { %10764 = vmatmul.mubr.msk.bf16.gmra.mrb[56].mxu1 %vm322_vm0, %v15296_v4 }
 0x2fb   :  { %10767 = vmatprep.mubr.msk.bf16.mxu1 %vm322_vm0, %v15326_v31 }
 0x2fc   :  { %11376 = vmatmul.mubr.msk.bf16.gmra.mrb[56].mxu0 %vm322_vm0, %v15351_v0  ;;  %v17432_v0 = vpack.c.bf16 %v15840_v14, %v15833_v16  ;;  %v17433_v14 = vld [vmem:[#allocation11_spill] sm:$0xff]  ;;  %v17435_v16 = vld [vmem:[#allocation74_spill] sm:$0xff] }
 0x2fd   :  { %11379 = vmatprep.mubr.msk.bf16.mxu0 %vm322_vm0, %v16019_v44  ;;  %v17461_v44 = vld [vmem:[#allocation144_spill] sm:$0xff] }
 0x302   :  { %10768 = vmatmul.mubr.msk.bf16.gmra.mrb[60].mxu1 %vm322_vm0, %v15328_v62 }
 0x303   :  { %10775 = vmatprep.mubr.msk.bf16.mxu1 %vm322_vm0, %v17431_v43  ;;  %v17440_v43 = vld [vmem:[#allocation81_spill] sm:$0xff] }
 0x304   :  { %11380 = vmatmul.mubr.msk.bf16.gmra.mrb[60].mxu0 %vm322_vm0, %v17432_v0  ;;  %v12709_v0 = vld [vmem:[%s16662_s2 + $0x88] sm:$0xff]  }
 0x305   :  { %11387 = vmatprep.mubr.msk.bf16.mxu0 %vm322_vm0, %v17279_v30  ;;  %v16065_v30 = vld [vmem:[%s16662_s2 + $0x40] sm:$0xff]  }
 0x30a   :  { %10776 = vmatmul.mubr.msk.bf16.vlgmr.msra.gmra.mrb[0].mxu1 %vm322_vm0, %v17277_v15  ;;  %v17434_v15 = vld [vmem:[#allocation12_spill] sm:$0xff] }
 0x30b   :  { %10840 = vmatpush3.bf16.msra.mxu1 %v15861_v47  ;;  %10779 = vmatprep.mubr.msk.bf16.mxu1 %vm322_vm0, %v17280_v8  ;;  %v16075_v8 = vld [vmem:[%s16663_s3 + $0x80] sm:$0xff]  }
 0x30c   :  { %10841 = vmatprep.subr.bf16.mxu1 %v12708_v3  ;;  %11388 = vmatmul.mubr.msk.bf16.vlgmr.msra.gmra.mrb[0].mxu0 %vm322_vm0, %v17433_v14  ;;  %v17436_v47 = vld [vmem:[#allocation77_spill] sm:$0xff]  ;;  %v17442_v14 = vld [vmem:[#allocation20_spill] sm:$0xff] }
 0x30d   :  { %11452 = vmatpush3.bf16.msra.mxu0 %v15871_v11  ;;  %11391 = vmatprep.mubr.msk.bf16.mxu0 %vm322_vm0, %v17434_v15  ;;  %v17437_v11 = vld [vmem:[#allocation13_spill] sm:$0xff] }
 0x30e   :  { %11453 = vmatprep.subr.bf16.mxu0 %v12709_v0  ;;  %v17444_v15 = vld [vmem:[#allocation85_spill] sm:$0xff] }
 0x30f   :  { %10842 = vmatpush3.bf16.msra.mxu1 %v12708_v3  ;;  %v17441_v3 = vld [vmem:[#allocation17_spill] sm:$0xff] }
 0x310   :  { %10907 = vmatprep.subr.bf16.mxu1 %v16065_v30 }
 0x311   :  { %11454 = vmatpush3.bf16.msra.mxu0 %v12709_v0  ;;  %v17443_v0 = vld [vmem:[#allocation82_spill] sm:$0xff] }
 0x312   :  { %10780 = vmatmul.mubr.msk.bf16.gmra.mrb[4].mxu1 %vm322_vm0, %v17435_v16  ;;  %11519 = vmatprep.subr.bf16.mxu0 %v16075_v8  ;;  %v17445_v16 = vld [vmem:[#allocation21_spill] sm:$0xff] }
 0x313   :  { %10783 = vmatprep.mubr.msk.bf16.mxu1 %vm322_vm0, %v17436_v47  ;;  %v17446_v47 = vld [vmem:[#allocation24_spill] sm:$0xff] }
 0x314   :  { %11392 = vmatmul.mubr.msk.bf16.gmra.mrb[4].mxu0 %vm322_vm0, %v17437_v11  ;;  %v17447_v11 = vld [vmem:[#allocation86_spill] sm:$0xff] }
 0x315   :  { %11395 = vmatprep.mubr.msk.bf16.mxu0 %vm322_vm0, %v17438_v22  ;;  %v17448_v22 = vld [vmem:[#allocation93_spill] sm:$0xff] }
 0x31a   :  { %10784 = vmatmul.mubr.msk.bf16.gmra.mrb[8].mxu1 %vm322_vm0, %v17439_v7  ;;  %v17449_v7 = vld [vmem:[#allocation25_spill] sm:$0xff] }
 0x31b   :  { %10787 = vmatprep.mubr.msk.bf16.mxu1 %vm322_vm0, %v17440_v43  ;;  %v17450_v43 = vld [vmem:[#allocation28_spill] sm:$0xff] }
 0x31c   :  { %11396 = vmatmul.mubr.msk.bf16.gmra.mrb[8].mxu0 %vm322_vm0, %v17441_v3  ;;  %v17451_v3 = vld [vmem:[#allocation94_spill] sm:$0xff] }
 0x31d   :  { %11399 = vmatprep.mubr.msk.bf16.mxu0 %vm322_vm0, %v17442_v14  ;;  %v17452_v14 = vld [vmem:[#allocation103_spill] sm:$0xff] }
 0x322   :  { %10788 = vmatmul.mubr.msk.bf16.gmra.mrb[12].mxu1 %vm322_vm0, %v17443_v0  ;;  %v17453_v0 = vld [vmem:[#allocation29_spill] sm:$0xff] }
 0x323   :  { %10791 = vmatprep.mubr.msk.bf16.mxu1 %vm322_vm0, %v17444_v15  ;;  %v17454_v15 = vld [vmem:[#allocation32_spill] sm:$0xff] }
 0x324   :  { %11400 = vmatmul.mubr.msk.bf16.gmra.mrb[12].mxu0 %vm322_vm0, %v17445_v16  ;;  %v17455_v16 = vld [vmem:[#allocation104_spill] sm:$0xff] }
 0x325   :  { %11403 = vmatprep.mubr.msk.bf16.mxu0 %vm322_vm0, %v17446_v47  ;;  %v17456_v47 = vld [vmem:[#allocation108_spill] sm:$0xff] }
 0x32a   :  { %10792 = vmatmul.mubr.msk.bf16.gmra.mrb[16].mxu1 %vm322_vm0, %v17447_v11  ;;  %v8075_v11 = vrot.slane %v15479_v17, 2 }
 0x32b   :  { %10795 = vmatprep.mubr.msk.bf16.mxu1 %vm322_vm0, %v17448_v22  ;;  %v17457_v22 = vld [vmem:[#allocation145_spill] sm:$0xff] }
 0x32c   :  { %11404 = vmatmul.mubr.msk.bf16.gmra.mrb[16].mxu0 %vm322_vm0, %v17449_v7  ;;  %v8076_v7 = vrot.slane %v17457_v22, 2  ;;  %v17463_v22 = vpack.c.bf16 %v15950_v53, %v15943_v19  ;;  %v17470_v53 = vld [vmem:[#allocation138_spill] sm:$0xff]  ;;  %v17471_v19 = vld [vmem:[#allocation44_spill] sm:$0xff] }
 0x32d   :  { %11407 = vmatprep.mubr.msk.bf16.mxu0 %vm322_vm0, %v17450_v43  ;;  %v17458_v43 = vld [vmem:[#allocation33_spill] sm:$0xff] }
 0x332   :  { %10796 = vmatmul.mubr.msk.bf16.gmra.mrb[20].mxu1 %vm322_vm0, %v17451_v3  ;;  %v17459_v3 = vld [vmem:[#allocation35_spill] sm:$0xff] }
 0x333   :  { %10799 = vmatprep.mubr.msk.bf16.mxu1 %vm322_vm0, %v17452_v14  ;;  %v17460_v14 = vld [vmem:[#allocation152_spill] sm:$0xff] }
 0x334   :  { %11408 = vmatmul.mubr.msk.bf16.gmra.mrb[20].mxu0 %vm322_vm0, %v17453_v0  ;;  %v8078_v0 = vrot.slane %v17460_v14, 2  ;;  %v17469_v14 = vld [vmem:[#allocation129_spill] sm:$0xff] }
 0x335   :  { %11411 = vmatprep.mubr.msk.bf16.mxu0 %vm322_vm0, %v17454_v15  ;;  %v16133_v15 = vsel %vm2742_vm2, %v8075_v11, %v8076_v7  ;;  %v17466_v11 = vld [vmem:[#allocation128_spill] sm:$0xff] }
 0x336   :  { %v16138_v17 = vsel %vm2742_vm2, %v8076_v7, %v8078_v0  ;;  %v17468_v7 = vld [vmem:[#allocation43_spill] sm:$0xff] }
 0x337   :  { %v17472_v0 = vld [vmem:[#allocation47_spill] sm:$0xff] }
 0x33a   :  { %10800 = vmatmul.mubr.msk.bf16.gmra.mrb[24].mxu1 %vm322_vm0, %v17455_v16  ;;  %v17462_v16 = vld [vmem:[#allocation117_spill] sm:$0xff] }
 0x33b   :  { %10803 = vmatprep.mubr.msk.bf16.mxu1 %vm322_vm0, %v17456_v47  ;;  %v8103_v47 = vpack.c.bf16 %v16138_v17, %v16133_v15  ;;  %v17532_v15 = vld [vmem:[#allocation45_spill] sm:$0xff] }
 0x33c   :  { %11412 = vmatmul.mubr.msk.bf16.gmra.mrb[24].mxu0 %vm322_vm0, %v17458_v43  ;;  %v17464_v43 = vld [vmem:[#allocation39_spill] sm:$0xff]  ;;  %v17533_v17 = vld [vmem:[#allocation137_spill] sm:$0xff] }
 0x33d   :  { %11415 = vmatprep.mubr.msk.bf16.mxu0 %vm322_vm0, %v17459_v3  ;;  %v17467_v3 = vld [vmem:[#allocation40_spill] sm:$0xff] }
 0x342   :  { %10804 = vmatmul.mubr.msk.bf16.gmra.mrb[28].mxu1 %vm322_vm0, %v17461_v44  ;;  %v17465_v44 = vld [vmem:[#allocation119_spill] sm:$0xff] }
 0x343   :  { %10807 = vmatprep.mubr.msk.bf16.mxu1 %vm322_vm0, %v17462_v16  ;;  %v17473_v16 = vld [vmem:[#allocation139_spill] sm:$0xff] }
 0x344   :  { %11416 = vmatmul.mubr.msk.bf16.gmra.mrb[28].mxu0 %vm322_vm0, %v17463_v22  ;;  %v17474_v22 = vld [vmem:[#allocation148_spill] sm:$0xff] }
 0x345   :  { %11419 = vmatprep.mubr.msk.bf16.mxu0 %vm322_vm0, %v17464_v43  ;;  %v17475_v43 = vld [vmem:[#allocation48_spill] sm:$0xff] }
 0x34a   :  { %10808 = vmatmul.mubr.msk.bf16.gmra.mrb[32].mxu1 %vm322_vm0, %v17465_v44  ;;  %v17476_v44 = vld [vmem:[#allocation51_spill] sm:$0xff] }
 0x34b   :  { %10811 = vmatprep.mubr.msk.bf16.mxu1 %vm322_vm0, %v17466_v11  ;;  %v17477_v11 = vld [vmem:[#allocation149_spill] sm:$0xff] }
 0x34c   :  { %11420 = vmatmul.mubr.msk.bf16.gmra.mrb[32].mxu0 %vm322_vm0, %v17467_v3  ;;  %v17478_v3 = vld [vmem:[#allocation158_spill] sm:$0xff] }
 0x34d   :  { %11423 = vmatprep.mubr.msk.bf16.mxu0 %vm322_vm0, %v17468_v7  ;;  %v17479_v7 = vld [vmem:[#allocation52_spill] sm:$0xff] }
 0x352   :  { %10812 = vmatmul.mubr.msk.bf16.gmra.mrb[36].mxu1 %vm322_vm0, %v17469_v14  ;;  %v17480_v14 = vld [vmem:[#allocation55_spill] sm:$0xff] }
 0x353   :  { %10815 = vmatprep.mubr.msk.bf16.mxu1 %vm322_vm0, %v17470_v53  ;;  %v17481_v53 = vld [vmem:[#allocation159_spill] sm:$0xff] }
 0x354   :  { %11424 = vmatmul.mubr.msk.bf16.gmra.mrb[36].mxu0 %vm322_vm0, %v17471_v19  ;;  %v17482_v19 = vld [vmem:[#allocation166_spill] sm:$0xff] }
 0x355   :  { %11427 = vmatprep.mubr.msk.bf16.mxu0 %vm322_vm0, %v17472_v0  ;;  %v17483_v0 = vld [vmem:[#allocation56_spill] sm:$0xff] }
 0x35a   :  { %10816 = vmatmul.mubr.msk.bf16.gmra.mrb[40].mxu1 %vm322_vm0, %v17473_v16  ;;  %v17484_v16 = vld [vmem:[#allocation59_spill] sm:$0xff] }
 0x35b   :  { %10819 = vmatprep.mubr.msk.bf16.mxu1 %vm322_vm0, %v17474_v22  ;;  %v17485_v22 = vld [vmem:[#allocation167_spill] sm:$0xff] }
 0x35c   :  { %11428 = vmatmul.mubr.msk.bf16.gmra.mrb[40].mxu0 %vm322_vm0, %v17475_v43  ;;  %v17486_v43 = vld [vmem:[#allocation171_spill] sm:$0xff] }
 0x35d   :  { %11431 = vmatprep.mubr.msk.bf16.mxu0 %vm322_vm0, %v17476_v44  ;;  %v17487_v44 = vld [vmem:[#allocation60_spill] sm:$0xff] }
 0x362   :  { %10820 = vmatmul.mubr.msk.bf16.gmra.mrb[44].mxu1 %vm322_vm0, %v17477_v11  ;;  %v17488_v11 = vld [vmem:[#allocation63_spill] sm:$0xff] }
 0x363   :  { %10823 = vmatprep.mubr.msk.bf16.mxu1 %vm322_vm0, %v17478_v3  ;;  %v17489_v3 = vld [vmem:[#allocation172_spill] sm:$0xff] }
 0x364   :  { %11432 = vmatmul.mubr.msk.bf16.gmra.mrb[44].mxu0 %vm322_vm0, %v17479_v7  ;;  %v17490_v7 = vld [vmem:[#allocation175_spill] sm:$0xff] }
 0x365   :  { %11435 = vmatprep.mubr.msk.bf16.mxu0 %vm322_vm0, %v17480_v14  ;;  %v8080_v14 = vrot.slane %v15587_v21, 2 }
 0x36a   :  { %10824 = vmatmul.mubr.msk.bf16.gmra.mrb[48].mxu1 %vm322_vm0, %v17481_v53  ;;  %v8081_v53 = vrot.slane %v15592_v39, 2 }
 0x36b   :  { %10827 = vmatprep.mubr.msk.bf16.mxu1 %vm322_vm0, %v17482_v19  ;;  %v17491_v19 = vld [vmem:[#allocation64_spill] sm:$0xff] }
 0x36c   :  { %11436 = vmatmul.mubr.msk.bf16.gmra.mrb[48].mxu0 %vm322_vm0, %v17483_v0  ;;  %v17492_v0 = vld [vmem:[#allocation66_spill] sm:$0xff] }
 0x36d   :  { %11439 = vmatprep.mubr.msk.bf16.mxu0 %vm322_vm0, %v17484_v16  ;;  %v8083_v16 = vrot.slane %v15825_v2, 2  ;;  %v17496_v2 = vld [vmem:[#allocation71_spill] sm:$0xff] }
 0x36f   :  { %v16215_v21 = vsel %vm2742_vm2, %v8081_v53, %v8083_v16  ;;  %v17504_v16 = vld [vmem:[#allocation79_spill] sm:$0xff] }
 0x372   :  { %10828 = vmatmul.mubr.msk.bf16.gmra.mrb[52].mxu1 %vm322_vm0, %v17485_v22  ;;  %v17493_v22 = vld [vmem:[#allocation150_spill] sm:$0xff] }
 0x373   :  { %10831 = vmatprep.mubr.msk.bf16.mxu1 %vm322_vm0, %v17486_v43  ;;  %v16210_v43 = vsel %vm2742_vm2, %v8080_v14, %v8081_v53  ;;  %v17498_v14 = vld [vmem:[#allocation9_spill] sm:$0xff]  ;;  %v17500_v53 = vld [vmem:[#allocation75_spill] sm:$0xff] }
 0x374   :  { %11440 = vmatmul.mubr.msk.bf16.gmra.mrb[52].mxu0 %vm322_vm0, %v17487_v44  ;;  %v17494_v44 = vld [vmem:[#allocation5_spill] sm:$0xff]  ;;  %v8104_v39 = vpack.c.bf16 %v16215_v21, %v16210_v43 }
 0x375   :  { %11443 = vmatprep.mubr.msk.bf16.mxu0 %vm322_vm0, %v17488_v11  ;;  %v17495_v11 = vpack.c.bf16 %v16041_v57, %v16036_v1  ;;  %v12713_v1 = vld [vmem:[%s16663_s3 + $0x88] sm:$0xff]   ;;  %v17499_v57 = vld [vmem:[#allocation72_spill] sm:$0xff] }
 0x37a   :  { %10832 = vmatmul.mubr.msk.bf16.gmra.mrb[56].mxu1 %vm322_vm0, %v17489_v3  ;;  %v12712_v3 = vld [vmem:[%s16662_s2 + $0x48] sm:$0xff]  }
 0x37b   :  { %10835 = vmatprep.mubr.msk.bf16.mxu1 %vm322_vm0, %v17490_v7  ;;  %v17497_v7 = vld [vmem:[#allocation7_spill] sm:$0xff] }
 0x37c   :  { %11444 = vmatmul.mubr.msk.bf16.gmra.mrb[56].mxu0 %vm322_vm0, %v17491_v19  ;;  %v17501_v19 = vld [vmem:[#allocation10_spill] sm:$0xff] }
 0x37d   :  { %11447 = vmatprep.mubr.msk.bf16.mxu0 %vm322_vm0, %v17492_v0  ;;  %v17503_v0 = vld [vmem:[#allocation76_spill] sm:$0xff] }
 0x382   :  { %10836 = vmatmul.mubr.msk.bf16.gmra.mrb[60].mxu1 %vm322_vm0, %v17493_v22  ;;  %v17505_v22 = vld [vmem:[#allocation15_spill] sm:$0xff] }
 0x383   :  { %10843 = vmatprep.mubr.msk.bf16.mxu1 %vm322_vm0, %v17494_v44  ;;  %v17507_v44 = vld [vmem:[#allocation80_spill] sm:$0xff] }
 0x384   :  { %11448 = vmatmul.mubr.msk.bf16.gmra.mrb[60].mxu0 %vm322_vm0, %v17495_v11  ;;  %v17508_v11 = vld [vmem:[#allocation83_spill] sm:$0xff] }
 0x385   :  { %11455 = vmatprep.mubr.msk.bf16.mxu0 %vm322_vm0, %v17496_v2  ;;  %v17509_v2 = vld [vmem:[#allocation19_spill] sm:$0xff] }
 0x38a   :  { %10844 = vmatmul.mubr.msk.bf16.vlgmr.msra.gmra.mrb[0].mxu1 %vm322_vm0, %v17497_v7  ;;  %v17511_v7 = vld [vmem:[#allocation84_spill] sm:$0xff] }
 0x38b   :  { %10908 = vmatpush3.bf16.msra.mxu1 %v16065_v30  ;;  %10847 = vmatprep.mubr.msk.bf16.mxu1 %vm322_vm0, %v17498_v14  ;;  %v17502_v30 = vld [vmem:[#allocation14_spill] sm:$0xff]  ;;  %v17512_v14 = vld [vmem:[#allocation91_spill] sm:$0xff] }
 0x38c   :  { %10909 = vmatprep.subr.bf16.mxu1 %v12712_v3  ;;  %11456 = vmatmul.mubr.msk.bf16.vlgmr.msra.gmra.mrb[0].mxu0 %vm322_vm0, %v17499_v57  ;;  %v17514_v57 = vld [vmem:[#allocation26_spill] sm:$0xff] }
 0x38d   :  { %11520 = vmatpush3.bf16.msra.mxu0 %v16075_v8  ;;  %11459 = vmatprep.mubr.msk.bf16.mxu0 %vm322_vm0, %v17500_v53  ;;  %v17506_v8 = vld [vmem:[#allocation18_spill] sm:$0xff]  ;;  %v17515_v53 = vld [vmem:[#allocation92_spill] sm:$0xff] }
 0x38e   :  { %11521 = vmatprep.subr.bf16.mxu0 %v12713_v1 }
 0x38f   :  { %10910 = vmatpush3.bf16.msra.mxu1 %v12712_v3  ;;  %v17510_v3 = vld [vmem:[#allocation22_spill] sm:$0xff] }
 0x391   :  { %11522 = vmatpush3.bf16.msra.mxu0 %v12713_v1  ;;  %v17513_v1 = vld [vmem:[#allocation23_spill] sm:$0xff] }
 0x392   :  { %10848 = vmatmul.mubr.msk.bf16.gmra.mrb[4].mxu1 %vm322_vm0, %v17501_v19  ;;  %v17516_v19 = vld [vmem:[#allocation101_spill] sm:$0xff] }
 0x393   :  { %10851 = vmatprep.mubr.msk.bf16.mxu1 %vm322_vm0, %v17502_v30  ;;  %v17517_v30 = vld [vmem:[#allocation27_spill] sm:$0xff] }
 0x394   :  { %11460 = vmatmul.mubr.msk.bf16.gmra.mrb[4].mxu0 %vm322_vm0, %v17503_v0  ;;  %v17518_v0 = vld [vmem:[#allocation30_spill] sm:$0xff] }
 0x395   :  { %11463 = vmatprep.mubr.msk.bf16.mxu0 %vm322_vm0, %v17504_v16  ;;  %v17519_v16 = vld [vmem:[#allocation102_spill] sm:$0xff] }
 0x39a   :  { %10852 = vmatmul.mubr.msk.bf16.gmra.mrb[8].mxu1 %vm322_vm0, %v17505_v22  ;;  %v17520_v22 = vld [vmem:[#allocation106_spill] sm:$0xff] }
 0x39b   :  { %10855 = vmatprep.mubr.msk.bf16.mxu1 %vm322_vm0, %v17506_v8  ;;  %v17521_v8 = vld [vmem:[#allocation31_spill] sm:$0xff] }
 0x39c   :  { %11464 = vmatmul.mubr.msk.bf16.gmra.mrb[8].mxu0 %vm322_vm0, %v17507_v44  ;;  %v17522_v44 = vld [vmem:[#allocation34_spill] sm:$0xff] }
 0x39d   :  { %11467 = vmatprep.mubr.msk.bf16.mxu0 %vm322_vm0, %v17508_v11  ;;  %v8089_v11 = vrot.slane %v15707_v56, 2 }
 0x3a2   :  { %10856 = vmatmul.mubr.msk.bf16.gmra.mrb[12].mxu1 %vm322_vm0, %v17509_v2  ;;  %v8090_v2 = vrot.slane %v15712_v29, 2 }
 0x3a3   :  { %10859 = vmatprep.mubr.msk.bf16.mxu1 %vm322_vm0, %v17510_v3  ;;  %v17523_v3 = vld [vmem:[#allocation107_spill] sm:$0xff] }
 0x3a4   :  { %11468 = vmatmul.mubr.msk.bf16.gmra.mrb[12].mxu0 %vm322_vm0, %v17511_v7  ;;  %v17524_v7 = vld [vmem:[#allocation115_spill] sm:$0xff] }
 0x3a5   :  { %11471 = vmatprep.mubr.msk.bf16.mxu0 %vm322_vm0, %v17512_v14  ;;  %v8092_v14 = vrot.slane %v15937_v35, 2  ;;  %v17527_v35 = vld [vmem:[#allocation38_spill] sm:$0xff] }
 0x3a7   :  { %v16300_v56 = vsel %vm2742_vm2, %v8090_v2, %v8092_v14  ;;  %v17543_v14 = vld [vmem:[#allocation54_spill] sm:$0xff] }
 0x3aa   :  { %10860 = vmatmul.mubr.msk.bf16.gmra.mrb[16].mxu1 %vm322_vm0, %v17513_v1  ;;  %v17525_v1 = vld [vmem:[#allocation151_spill] sm:$0xff] }
 0x3ab   :  { %10863 = vmatprep.mubr.msk.bf16.mxu1 %vm322_vm0, %v17514_v57  ;;  %v16295_v57 = vsel %vm2742_vm2, %v8089_v11, %v8090_v2  ;;  %v17539_v11 = vld [vmem:[#allocation50_spill] sm:$0xff]  ;;  %v17540_v2 = vld [vmem:[#allocation53_spill] sm:$0xff] }
 0x3ac   :  { %11472 = vmatmul.mubr.msk.bf16.gmra.mrb[16].mxu0 %vm322_vm0, %v17515_v53  ;;  %v17526_v53 = vld [vmem:[#allocation37_spill] sm:$0xff]  ;;  %v8481_v29 = vpack.c.bf16 %v16300_v56, %v16295_v57 }
 0x3ad   :  { %11475 = vmatprep.mubr.msk.bf16.mxu0 %vm322_vm0, %v17516_v19  ;;  %v17528_v19 = vld [vmem:[#allocation41_spill] sm:$0xff] }
 0x3b2   :  { %10864 = vmatmul.mubr.msk.bf16.gmra.mrb[20].mxu1 %vm322_vm0, %v17517_v30  ;;  %v17529_v30 = vld [vmem:[#allocation127_spill] sm:$0xff] }
 0x3b3   :  { %10867 = vmatprep.mubr.msk.bf16.mxu1 %vm322_vm0, %v17518_v0  ;;  %v17530_v0 = vld [vmem:[#allocation136_spill] sm:$0xff] }
 0x3b4   :  { %11476 = vmatmul.mubr.msk.bf16.gmra.mrb[20].mxu0 %vm322_vm0, %v17519_v16  ;;  %v17531_v16 = vld [vmem:[#allocation42_spill] sm:$0xff] }
 0x3b5   :  { %11479 = vmatprep.mubr.msk.bf16.mxu0 %vm322_vm0, %v17520_v22  ;;  %v17536_v22 = vld [vmem:[#allocation49_spill] sm:$0xff] }
 0x3ba   :  { %10868 = vmatmul.mubr.msk.bf16.gmra.mrb[24].mxu1 %vm322_vm0, %v17521_v8  ;;  %v17537_v8 = vld [vmem:[#allocation147_spill] sm:$0xff] }
 0x3bb   :  { %10871 = vmatprep.mubr.msk.bf16.mxu1 %vm322_vm0, %v17522_v44  ;;  %v17538_v44 = vld [vmem:[#allocation156_spill] sm:$0xff] }
 0x3bc   :  { %11480 = vmatmul.mubr.msk.bf16.gmra.mrb[24].mxu0 %vm322_vm0, %v17523_v3  ;;  %v17541_v3 = vld [vmem:[#allocation157_spill] sm:$0xff] }
 0x3bd   :  { %11483 = vmatprep.mubr.msk.bf16.mxu0 %vm322_vm0, %v17524_v7  ;;  %v17542_v7 = vld [vmem:[#allocation164_spill] sm:$0xff] }
 0x3c2   :  { %10872 = vmatmul.mubr.msk.bf16.gmra.mrb[28].mxu1 %vm322_vm0, %v17525_v1  ;;  %v17544_v1 = vld [vmem:[#allocation57_spill] sm:$0xff] }
 0x3c3   :  { %10875 = vmatprep.mubr.msk.bf16.mxu1 %vm322_vm0, %v17526_v53  ;;  %v17545_v53 = vld [vmem:[#allocation165_spill] sm:$0xff] }
 0x3c4   :  { %11484 = vmatmul.mubr.msk.bf16.gmra.mrb[28].mxu0 %vm322_vm0, %v8103_v47  ;;  %v17535_v47 = vld [vmem:[#allocation46_spill] sm:$0xff] }
 0x3c5   :  { %11487 = vmatprep.mubr.msk.bf16.mxu0 %vm322_vm0, %v17371_v37  ;;  %v17534_v37 = vld [vmem:[#allocation146_spill] sm:$0xff] }
 0x3ca   :  { %10876 = vmatmul.mubr.msk.bf16.gmra.mrb[32].mxu1 %vm322_vm0, %v17527_v35  ;;  %v17546_v35 = vld [vmem:[#allocation169_spill] sm:$0xff] }
 0x3cb   :  { %10879 = vmatprep.mubr.msk.bf16.mxu1 %vm322_vm0, %v17528_v19  ;;  %v17547_v19 = vld [vmem:[#allocation58_spill] sm:$0xff] }
 0x3cc   :  { %11488 = vmatmul.mubr.msk.bf16.gmra.mrb[32].mxu0 %vm322_vm0, %v17529_v30  ;;  %v17548_v30 = vld [vmem:[#allocation61_spill] sm:$0xff] }
 0x3cd   :  { %11491 = vmatprep.mubr.msk.bf16.mxu0 %vm322_vm0, %v17530_v0  ;;  %v17549_v0 = vld [vmem:[#allocation170_spill] sm:$0xff] }
 0x3d2   :  { %10880 = vmatmul.mubr.msk.bf16.gmra.mrb[36].mxu1 %vm322_vm0, %v17531_v16  ;;  %v17550_v16 = vld [vmem:[#allocation173_spill] sm:$0xff] }
 0x3d3   :  { %10883 = vmatprep.mubr.msk.bf16.mxu1 %vm322_vm0, %v17532_v15  ;;  %v17551_v15 = vld [vmem:[#allocation62_spill] sm:$0xff] }
 0x3d4   :  { %11492 = vmatmul.mubr.msk.bf16.gmra.mrb[36].mxu0 %vm322_vm0, %v17533_v17  ;;  %v17552_v17 = vld [vmem:[#allocation65_spill] sm:$0xff] }
 0x3d5   :  { %11495 = vmatprep.mubr.msk.bf16.mxu0 %vm322_vm0, %v17534_v37  ;;  %v8094_v37 = vrot.slane %v15815_v33, 2 }
 0x3da   :  { %10884 = vmatmul.mubr.msk.bf16.gmra.mrb[40].mxu1 %vm322_vm0, %v17535_v47  ;;  %v8095_v47 = vrot.slane %v15820_v63, 2  ;;  %v17572_v63 = vld [vmem:[#allocation122_spill] sm:$0xff] }
 0x3db   :  { %10887 = vmatprep.mubr.msk.bf16.mxu1 %vm322_vm0, %v17536_v22  ;;  %v17553_v22 = vld [vmem:[#allocation176_spill] sm:$0xff] }
 0x3dc   :  { %11496 = vmatmul.mubr.msk.bf16.gmra.mrb[40].mxu0 %vm322_vm0, %v17537_v8  ;;  %v8097_v8 = vrot.slane %v16030_v59, 2 }
 0x3dd   :  { %11499 = vmatprep.mubr.msk.bf16.mxu0 %vm322_vm0, %v17538_v44  ;;  %v17554_v44 = vld [vmem:[#allocation153_spill] sm:$0xff] }
 0x3de   :  { %v16377_v33 = vsel %vm2742_vm2, %v8095_v47, %v8097_v8 }
 0x3e2   :  { %10888 = vmatmul.mubr.msk.bf16.gmra.mrb[44].mxu1 %vm322_vm0, %v17539_v11  ;;  %v16372_v11 = vsel %vm2742_vm2, %v8094_v37, %v8095_v47 }
 0x3e3   :  { %10891 = vmatprep.mubr.msk.bf16.mxu1 %vm322_vm0, %v17540_v2  ;;  %v17555_v2 = vld [vmem:[#allocation70_spill] sm:$0xff] }
 0x3e4   :  { %11500 = vmatmul.mubr.msk.bf16.gmra.mrb[44].mxu0 %vm322_vm0, %v17541_v3 }
 0x3e5   :  { %11503 = vmatprep.mubr.msk.bf16.mxu0 %vm322_vm0, %v17542_v7 }
 0x3ea   :  { %10892 = vmatmul.mubr.msk.bf16.gmra.mrb[48].mxu1 %vm322_vm0, %v17543_v14 }
 0x3eb   :  { %10895 = vmatprep.mubr.msk.bf16.mxu1 %vm322_vm0, %v17544_v1 }
 0x3ec   :  { %11504 = vmatmul.mubr.msk.bf16.gmra.mrb[48].mxu0 %vm322_vm0, %v17545_v53 }
 0x3ed   :  { %11507 = vmatprep.mubr.msk.bf16.mxu0 %vm322_vm0, %v17546_v35 }
 0x3f2   :  { %10896 = vmatmul.mubr.msk.bf16.gmra.mrb[52].mxu1 %vm322_vm0, %v17547_v19 }
 0x3f3   :  { %10899 = vmatprep.mubr.msk.bf16.mxu1 %vm322_vm0, %v17548_v30 }
 0x3f4   :  { %11508 = vmatmul.mubr.msk.bf16.gmra.mrb[52].mxu0 %vm322_vm0, %v17549_v0 }
 0x3f5   :  { %11511 = vmatprep.mubr.msk.bf16.mxu0 %vm322_vm0, %v17550_v16 }
 0x3fa   :  { %10900 = vmatmul.mubr.msk.bf16.gmra.mrb[56].mxu1 %vm322_vm0, %v17551_v15 }
 0x3fb   :  { %10903 = vmatprep.mubr.msk.bf16.mxu1 %vm322_vm0, %v17552_v17 }
 0x3fc   :  { %11512 = vmatmul.mubr.msk.bf16.gmra.mrb[56].mxu0 %vm322_vm0, %v17398_v20  ;;  %v8482_v20 = vpack.c.bf16 %v16377_v33, %v16372_v11 }
 0x3fd   :  { %11515 = vmatprep.mubr.msk.bf16.mxu0 %vm322_vm0, %v17553_v22 }
 0x402   :  { %10904 = vmatmul.mubr.msk.bf16.gmra.mrb[60].mxu1 %vm322_vm0, %v17554_v44 }
 0x403   :  { %10911 = vmatprep.mubr.msk.bf16.mxu1 %vm322_vm0, %v17555_v2 }
 0x404   :  { %11516 = vmatmul.mubr.msk.bf16.gmra.mrb[60].mxu0 %vm322_vm0, %v8104_v39 }
 0x405   :  { %11523 = vmatprep.mubr.msk.bf16.mxu0 %vm322_vm0, %v13710_v23  ;;  %v17556_v23 = vld [vmem:[#allocation87_spill] sm:$0xff] }
 0x40a   :  { %10912 = vmatmul.mubr.msk.bf16.vlgmr.msra.gmra.mrb[0].mxu1 %vm322_vm0, %v14598_v12  ;;  %v17557_v12 = vld [vmem:[#allocation177_spill] sm:$0xff] }
 0x40b   :  { %10915 = vmatprep.mubr.msk.bf16.mxu1 %vm322_vm0, %v14645_v51  ;;  %v17559_v51 = vld [vmem:[#allocation178_spill] sm:$0xff] }
 0x40c   :  { %11524 = vmatmul.mubr.msk.bf16.vlgmr.msra.gmra.mrb[0].mxu0 %vm322_vm0, %v14626_v28  ;;  %v17558_v28 = vld [vmem:[#allocation179_spill] sm:$0xff] }
 0x40d   :  { %11527 = vmatprep.mubr.msk.bf16.mxu0 %vm322_vm0, %v14683_v46  ;;  %v17561_v46 = vld [vmem:[#allocation88_spill] sm:$0xff] }
 0x412   :  { %10916 = vmatmul.mubr.msk.bf16.gmra.mrb[4].mxu1 %vm322_vm0, %v14662_v42  ;;  %v17560_v42 = vld [vmem:[#allocation89_spill] sm:$0xff] }
 0x413   :  { %10919 = vmatprep.mubr.msk.bf16.mxu1 %vm322_vm0, %v14706_v32  ;;  %v17563_v32 = vld [vmem:[#allocation96_spill] sm:$0xff] }
 0x414   :  { %11528 = vmatmul.mubr.msk.bf16.gmra.mrb[4].mxu0 %vm322_vm0, %v14692_v55  ;;  %v17562_v55 = vld [vmem:[#allocation95_spill] sm:$0xff] }
 0x415   :  { %11531 = vmatprep.mubr.msk.bf16.mxu0 %vm322_vm0, %v14724_v38  ;;  %v17565_v38 = vld [vmem:[#allocation98_spill] sm:$0xff] }
 0x41a   :  { %10920 = vmatmul.mubr.msk.bf16.gmra.mrb[8].mxu1 %vm322_vm0, %v14717_v25  ;;  %v17564_v25 = vld [vmem:[#allocation99_spill] sm:$0xff] }
 0x41b   :  { %10923 = vmatprep.mubr.msk.bf16.mxu1 %vm322_vm0, %v14756_v61  ;;  %v17567_v61 = vld [vmem:[#allocation154_spill] sm:$0xff] }
 0x41c   :  { %11532 = vmatmul.mubr.msk.bf16.gmra.mrb[8].mxu0 %vm322_vm0, %v14728_v18  ;;  %v17566_v18 = vld [vmem:[#allocation100_spill] sm:$0xff] }
 0x41d   :  { %11535 = vmatprep.mubr.msk.bf16.mxu0 %vm322_vm0, %v14780_v58  ;;  %v17569_v58 = vld [vmem:[#allocation118_spill] sm:$0xff] }
 0x422   :  { %10924 = vmatmul.mubr.msk.bf16.gmra.mrb[12].mxu1 %vm322_vm0, %v14765_v52  ;;  %v17568_v52 = vld [vmem:[#allocation109_spill] sm:$0xff] }
 0x423   :  { %10927 = vmatprep.mubr.msk.bf16.mxu1 %vm322_vm0, %v14802_v36  ;;  %v17571_v36 = vld [vmem:[#allocation113_spill] sm:$0xff] }
 0x424   :  { %11536 = vmatmul.mubr.msk.bf16.gmra.mrb[12].mxu0 %vm322_vm0, %v14789_v9  ;;  %v17570_v9 = vld [vmem:[#allocation114_spill] sm:$0xff] }
 0x425   :  { %11539 = vmatprep.mubr.msk.bf16.mxu0 %vm322_vm0, %v17556_v23 }
 0x42a   :  { %10928 = vmatmul.mubr.msk.bf16.gmra.mrb[16].mxu1 %vm322_vm0, %v17557_v12 }
 0x42b   :  { %10931 = vmatprep.mubr.msk.bf16.mxu1 %vm322_vm0, %v17558_v28 }
 0x42c   :  { %11540 = vmatmul.mubr.msk.bf16.gmra.mrb[16].mxu0 %vm322_vm0, %v17559_v51 }
 0x42d   :  { %11543 = vmatprep.mubr.msk.bf16.mxu0 %vm322_vm0, %v17560_v42 }
 0x432   :  { %10932 = vmatmul.mubr.msk.bf16.gmra.mrb[20].mxu1 %vm322_vm0, %v17561_v46 }
 0x433   :  { %10935 = vmatprep.mubr.msk.bf16.mxu1 %vm322_vm0, %v17562_v55 }
 0x434   :  { %11544 = vmatmul.mubr.msk.bf16.gmra.mrb[20].mxu0 %vm322_vm0, %v17407_v48  ;;  %v17573_v48 = vld [vmem:[#allocation133_spill] sm:$0xff] }
 0x435   :  { %11547 = vmatprep.mubr.msk.bf16.mxu0 %vm322_vm0, %v17408_v24  ;;  %v17574_v24 = vld [vmem:[#allocation132_spill] sm:$0xff] }
 0x43a   :  { %10936 = vmatmul.mubr.msk.bf16.gmra.mrb[24].mxu1 %vm322_vm0, %v17563_v32 }
 0x43b   :  { %10939 = vmatprep.mubr.msk.bf16.mxu1 %vm322_vm0, %v17564_v25 }
 0x43c   :  { %11548 = vmatmul.mubr.msk.bf16.gmra.mrb[24].mxu0 %vm322_vm0, %v17565_v38 }
 0x43d   :  { %11551 = vmatprep.mubr.msk.bf16.mxu0 %vm322_vm0, %v17566_v18 }
 0x442   :  { %10940 = vmatmul.mubr.msk.bf16.gmra.mrb[28].mxu1 %vm322_vm0, %v17567_v61 }
 0x443   :  { %10943 = vmatprep.mubr.msk.bf16.mxu1 %vm322_vm0, %v17568_v52 }
 0x444   :  { %11552 = vmatmul.mubr.msk.bf16.gmra.mrb[28].mxu0 %vm322_vm0, %v8481_v29 }
 0x445   :  { %11555 = vmatprep.mubr.msk.bf16.mxu0 %vm322_vm0, %v17416_v5  ;;  %v17576_v5 = vld [vmem:[#allocation134_spill] sm:$0xff] }
 0x44a   :  { %10944 = vmatmul.mubr.msk.bf16.gmra.mrb[32].mxu1 %vm322_vm0, %v17414_v49  ;;  %v17575_v49 = vld [vmem:[#allocation135_spill] sm:$0xff] }
 0x44b   :  { %10947 = vmatprep.mubr.msk.bf16.mxu1 %vm322_vm0, %v17417_v6  ;;  %v17578_v6 = vld [vmem:[#allocation141_spill] sm:$0xff] }
 0x44c   :  { %11556 = vmatmul.mubr.msk.bf16.gmra.mrb[32].mxu0 %vm322_vm0, %v17569_v58 }
 0x44d   :  { %11559 = vmatprep.mubr.msk.bf16.mxu0 %vm322_vm0, %v17570_v9 }
 0x452   :  { %10948 = vmatmul.mubr.msk.bf16.gmra.mrb[36].mxu1 %vm322_vm0, %v17571_v36 }
 0x453   :  { %10951 = vmatprep.mubr.msk.bf16.mxu1 %vm322_vm0, %v17421_v26 }
 0x454   :  { %11560 = vmatmul.mubr.msk.bf16.gmra.mrb[36].mxu0 %vm322_vm0, %v17423_v34 }
 0x455   :  { %11563 = vmatprep.mubr.msk.bf16.mxu0 %vm322_vm0, %v17424_v45 }
 0x45a   :  { %10952 = vmatmul.mubr.msk.bf16.gmra.mrb[40].mxu1 %vm322_vm0, %v17572_v63 }
 0x45b   :  { %10955 = vmatprep.mubr.msk.bf16.mxu1 %vm322_vm0, %v17425_v60  ;;  %v17577_v60 = vld [vmem:[#allocation140_spill] sm:$0xff] }
 0x45c   :  { %11564 = vmatmul.mubr.msk.bf16.gmra.mrb[40].mxu0 %vm322_vm0, %v17427_v41 }
 0x45d   :  { %11567 = vmatprep.mubr.msk.bf16.mxu0 %vm322_vm0, %v17428_v27 }
 0x462   :  { %10956 = vmatmul.mubr.msk.bf16.gmra.mrb[44].mxu1 %vm322_vm0, %v17426_v40  ;;  %v17581_v40 = vld [vmem:[#allocation155_spill] sm:$0xff] }
 0x463   :  { %10959 = vmatprep.mubr.msk.bf16.mxu1 %vm322_vm0, %v17573_v48 }
 0x464   :  { %11568 = vmatmul.mubr.msk.bf16.gmra.mrb[44].mxu0 %vm322_vm0, %v17574_v24 }
 0x465   :  { %11571 = vmatprep.mubr.msk.bf16.mxu0 %vm322_vm0, %v17575_v49 }
 0x46a   :  { %10960 = vmatmul.mubr.msk.bf16.gmra.mrb[48].mxu1 %vm322_vm0, %v17576_v5 }
 0x46b   :  { %10963 = vmatprep.mubr.msk.bf16.mxu1 %vm322_vm0, %v15261_v10  ;;  %v17579_v10 = vld [vmem:[#allocation142_spill] sm:$0xff] }
 0x46c   :  { %11572 = vmatmul.mubr.msk.bf16.gmra.mrb[48].mxu0 %vm322_vm0, %v17577_v60 }
 0x46d   :  { %11575 = vmatprep.mubr.msk.bf16.mxu0 %vm322_vm0, %v15279_v50  ;;  %v17580_v50 = vld [vmem:[#allocation143_spill] sm:$0xff] }
 0x472   :  { %10964 = vmatmul.mubr.msk.bf16.gmra.mrb[52].mxu1 %vm322_vm0, %v17578_v6 }
 0x473   :  { %10967 = vmatprep.mubr.msk.bf16.mxu1 %vm322_vm0, %v15309_v13 }
 0x474   :  { %11576 = vmatmul.mubr.msk.bf16.gmra.mrb[52].mxu0 %vm322_vm0, %v15296_v4 }
 0x475   :  { %11579 = vmatprep.mubr.msk.bf16.mxu0 %vm322_vm0, %v15326_v31 }
 0x47a   :  { %10968 = vmatmul.mubr.msk.bf16.gmra.mrb[56].mxu1 %vm322_vm0, %v15319_v54 }
 0x47b   :  { %10971 = vmatprep.mubr.msk.bf16.mxu1 %vm322_vm0, %v17579_v10 }
 0x47c   :  { %11580 = vmatmul.mubr.msk.bf16.gmra.mrb[56].mxu0 %vm322_vm0, %v15328_v62  ;;  %v16518_v62 = vld [vmem:[%s16664_s4] ss:$0 sm:$0xff]  ;;  %s12847_s4 = smov [#allocation2]  }
 0x47d   :  { %11583 = vmatprep.mubr.msk.bf16.mxu0 %vm322_vm0, %v17580_v50  ;;  %s9063_s13 = sshll.u32 %s12847_s4, 4  ;;  %s9064_s13 = int_to_ptr.vmem [resolvable:$true] %s9063_s13 }
 0x47e   :  { %s12823_s14 = scalar_lea.vmem %s9064_s13, 8192  ;;  %p12828_p1 = scmp.lt.s32.totalorder %s9064_s13, %s9064_s13 }
 0x47f   :  { %p12824_p0 = scmp.ne.s32.totalorder %s9064_s13, %s12823_s14  ;;  %p12829_p2 = scmp.lt.s32.totalorder %s12823_s14, %s12823_s14 }
 0x481   :  { %p12830_p3 = por %p12829_p2, %p12828_p1 }
 0x482   :  { %10972 = vmatmul.mubr.msk.bf16.gmra.mrb[60].mxu1 %vm322_vm0, %v17581_v40 }
 0x483   :  { %p12831_p4 = pnand %p12830_p3, %p12824_p0 }
 0x484   :  { %11584 = vmatmul.mubr.msk.bf16.gmra.mrb[60].mxu0 %vm322_vm0, %v8482_v20 }
 0x4dd   :  { %v10913_v4 = vpop.f32.mrb[0].mxu1 }
 0x4de   :  { %v5042_v13 = vpop.f32.mrb[1].mxu1 }
 0x4df   :  { %v10914_v54 = vpop.f32.mrb[2].mxu1  ;;  %v11525_v41 = vpop.f32.mrb[0].mxu0 }
 0x4e0   :  { %v5045_v31 = vpop.f32.mrb[3].mxu1  ;;  %v11587_v27 = vadd.f32 %v11525_v41, %v10913_v4  ;;  %v8540_v26 = vpop.f32.mrb[1].mxu0 }
 0x4e1   :  { %v11588_v34 = vadd.f32 %v8540_v26, %v5042_v13  ;;  %v11526_v45 = vpop.f32.mrb[2].mxu0 }
 0x4e2   :  { %v8868_v59 = vadd.f32 %v11587_v27, %v16518_v62  ;;  %v11589_v43 = vadd.f32 %v11526_v45, %v10914_v54  ;;  %v8543_v21 = vpop.f32.mrb[3].mxu0 }
 0x4e3   :  { %v8866_v39 = vadd.f32 %v11588_v34, %v16518_v62  ;;  %v11590_v57 = vadd.f32 %v8543_v21, %v5045_v31 }
 0x4e4   :  { %v8932_v29 = vmax.f32 %v8868_v59, 0.0  ;;  %v8869_v3 = vadd.f32 %v11589_v43, %v16518_v62 }
 0x4e5   :  { %v10917_v56 = vpop.f32.mrb[4].mxu1  ;;  %v8930_v14 = vmax.f32 %v8866_v39, 0.0  ;;  %v8867_v1 = vadd.f32 %v11590_v57, %v16518_v62 }
 0x4e6   :  { %v5058_v7 = vpop.f32.mrb[5].mxu1  ;;  %8996 = vst.msk [vmem:[#allocation2 + $0x10] sm:$0xff] %vm322_vm0, %v8932_v29  ;;  %v8933_v35 = vmax.f32 %v8869_v3, 0.0 }
 0x4e7   :  { %v10918_v53 = vpop.f32.mrb[6].mxu1  ;;  %8994 = vst.msk [vmem:[#allocation2] sm:$0xff] %vm322_vm0, %v8930_v14  ;;  %v8931_v30 = vmax.f32 %v8867_v1, 0.0  ;;  %v11529_v0 = vpop.f32.mrb[4].mxu0 }
 0x4e8   :  { %v5061_v19 = vpop.f32.mrb[7].mxu1  ;;  %8997 = vst.msk [vmem:[#allocation2 + $0x18] sm:$0xff] %vm322_vm0, %v8933_v35  ;;  %v11591_v16 = vadd.f32 %v11529_v0, %v10917_v56  ;;  %v8556_v15 = vpop.f32.mrb[5].mxu0 }
 0x4e9   :  { %8995 = vst.msk [vmem:[#allocation2 + $0x8] sm:$0xff] %vm322_vm0, %v8931_v30  ;;  %v11592_v17 = vadd.f32 %v8556_v15, %v5058_v7  ;;  %v11530_v37 = vpop.f32.mrb[6].mxu0 }
 0x4ea   :  { %v8872_v47 = vadd.f32 %v11591_v16, %v16518_v62  ;;  %v11593_v22 = vadd.f32 %v11530_v37, %v10918_v53  ;;  %v8559_v8 = vpop.f32.mrb[7].mxu0 }
 0x4eb   :  { %v8870_v44 = vadd.f32 %v11592_v17, %v16518_v62  ;;  %v11594_v11 = vadd.f32 %v8559_v8, %v5061_v19 }
 0x4ec   :  { %v8936_v33 = vmax.f32 %v8872_v47, 0.0  ;;  %v8873_v20 = vadd.f32 %v11593_v22, %v16518_v62 }
 0x4ed   :  { %v10921_v2 = vpop.f32.mrb[8].mxu1  ;;  %v8934_v12 = vmax.f32 %v8870_v44, 0.0  ;;  %v8871_v28 = vadd.f32 %v11594_v11, %v16518_v62 }
 0x4ee   :  { %v5074_v23 = vpop.f32.mrb[9].mxu1  ;;  %9000 = vst.msk [vmem:[#allocation2 + $0x30] sm:$0xff] %vm322_vm0, %v8936_v33  ;;  %v8937_v42 = vmax.f32 %v8873_v20, 0.0 }
 0x4ef   :  { %v10922_v51 = vpop.f32.mrb[10].mxu1  ;;  %8998 = vst.msk [vmem:[#allocation2 + $0x20] sm:$0xff] %vm322_vm0, %v8934_v12  ;;  %v8935_v55 = vmax.f32 %v8871_v28, 0.0  ;;  %v11533_v32 = vpop.f32.mrb[8].mxu0 }
 0x4f0   :  { %v5077_v46 = vpop.f32.mrb[11].mxu1  ;;  %9001 = vst.msk [vmem:[#allocation2 + $0x38] sm:$0xff] %vm322_vm0, %v8937_v42  ;;  %v11595_v25 = vadd.f32 %v11533_v32, %v10921_v2  ;;  %v8572_v38 = vpop.f32.mrb[9].mxu0 }
 0x4f1   :  { %8999 = vst.msk [vmem:[#allocation2 + $0x28] sm:$0xff] %vm322_vm0, %v8935_v55  ;;  %v11596_v18 = vadd.f32 %v8572_v38, %v5074_v23  ;;  %v11534_v61 = vpop.f32.mrb[10].mxu0 }
 0x4f2   :  { %v8876_v52 = vadd.f32 %v11595_v25, %v16518_v62  ;;  %v11597_v58 = vadd.f32 %v11534_v61, %v10922_v51  ;;  %v8575_v9 = vpop.f32.mrb[11].mxu0 }
 0x4f3   :  { %v8874_v36 = vadd.f32 %v11596_v18, %v16518_v62  ;;  %v11598_v63 = vadd.f32 %v8575_v9, %v5077_v46 }
 0x4f4   :  { %v8940_v24 = vmax.f32 %v8876_v52, 0.0  ;;  %v8877_v49 = vadd.f32 %v11597_v58, %v16518_v62 }
 0x4f5   :  { %v10925_v48 = vpop.f32.mrb[12].mxu1  ;;  %v8938_v60 = vmax.f32 %v8874_v36, 0.0  ;;  %v8875_v6 = vadd.f32 %v11598_v63, %v16518_v62 }
 0x4f6   :  { %v5090_v5 = vpop.f32.mrb[13].mxu1  ;;  %9004 = vst.msk [vmem:[#allocation2 + $0x50] sm:$0xff] %vm322_vm0, %v8940_v24  ;;  %v8941_v50 = vmax.f32 %v8877_v49, 0.0 }
 0x4f7   :  { %v10926_v10 = vpop.f32.mrb[14].mxu1  ;;  %9002 = vst.msk [vmem:[#allocation2 + $0x40] sm:$0xff] %vm322_vm0, %v8938_v60  ;;  %v8939_v4 = vmax.f32 %v8875_v6, 0.0  ;;  %v11537_v13 = vpop.f32.mrb[12].mxu0 }
 0x4f8   :  { %v5093_v40 = vpop.f32.mrb[15].mxu1  ;;  %9005 = vst.msk [vmem:[#allocation2 + $0x58] sm:$0xff] %vm322_vm0, %v8941_v50  ;;  %v11599_v54 = vadd.f32 %v11537_v13, %v10925_v48  ;;  %v8588_v31 = vpop.f32.mrb[13].mxu0 }
 0x4f9   :  { %9003 = vst.msk [vmem:[#allocation2 + $0x48] sm:$0xff] %vm322_vm0, %v8939_v4  ;;  %v11600_v41 = vadd.f32 %v8588_v31, %v5090_v5  ;;  %v11538_v27 = vpop.f32.mrb[14].mxu0 }
 0x4fa   :  { %v8880_v26 = vadd.f32 %v11599_v54, %v16518_v62  ;;  %v11601_v34 = vadd.f32 %v11538_v27, %v10926_v10  ;;  %v8591_v45 = vpop.f32.mrb[15].mxu0 }
 0x4fb   :  { %v8878_v59 = vadd.f32 %v11600_v41, %v16518_v62  ;;  %v11602_v43 = vadd.f32 %v8591_v45, %v5093_v40 }
 0x4fc   :  { %v8944_v39 = vmax.f32 %v8880_v26, 0.0  ;;  %v8881_v57 = vadd.f32 %v11601_v34, %v16518_v62 }
 0x4fd   :  { %v10929_v21 = vpop.f32.mrb[16].mxu1  ;;  %v8942_v29 = vmax.f32 %v8878_v59, 0.0  ;;  %v8879_v3 = vadd.f32 %v11602_v43, %v16518_v62 }
 0x4fe   :  { %v5106_v56 = vpop.f32.mrb[17].mxu1  ;;  %9008 = vst.msk [vmem:[#allocation2 + $0x70] sm:$0xff] %vm322_vm0, %v8944_v39  ;;  %v8945_v14 = vmax.f32 %v8881_v57, 0.0 }
 0x4ff   :  { %v10930_v7 = vpop.f32.mrb[18].mxu1  ;;  %9006 = vst.msk [vmem:[#allocation2 + $0x60] sm:$0xff] %vm322_vm0, %v8942_v29  ;;  %v8943_v53 = vmax.f32 %v8879_v3, 0.0  ;;  %v11541_v35 = vpop.f32.mrb[16].mxu0 }
 0x500   :  { %v5109_v1 = vpop.f32.mrb[19].mxu1  ;;  %9009 = vst.msk [vmem:[#allocation2 + $0x78] sm:$0xff] %vm322_vm0, %v8945_v14  ;;  %v11603_v19 = vadd.f32 %v11541_v35, %v10929_v21  ;;  %v8604_v30 = vpop.f32.mrb[17].mxu0 }
 0x501   :  { %9007 = vst.msk [vmem:[#allocation2 + $0x68] sm:$0xff] %vm322_vm0, %v8943_v53  ;;  %v11604_v0 = vadd.f32 %v8604_v30, %v5106_v56  ;;  %v11542_v16 = vpop.f32.mrb[18].mxu0 }
 0x502   :  { %v8884_v15 = vadd.f32 %v11603_v19, %v16518_v62  ;;  %v11605_v17 = vadd.f32 %v11542_v16, %v10930_v7  ;;  %v8607_v37 = vpop.f32.mrb[19].mxu0 }
 0x503   :  { %v8882_v47 = vadd.f32 %v11604_v0, %v16518_v62  ;;  %v11606_v22 = vadd.f32 %v8607_v37, %v5109_v1 }
 0x504   :  { %v8948_v44 = vmax.f32 %v8884_v15, 0.0  ;;  %v8885_v11 = vadd.f32 %v11605_v17, %v16518_v62 }
 0x505   :  { %v10933_v8 = vpop.f32.mrb[20].mxu1  ;;  %v8946_v33 = vmax.f32 %v8882_v47, 0.0  ;;  %v8883_v20 = vadd.f32 %v11606_v22, %v16518_v62 }
 0x506   :  { %v5122_v2 = vpop.f32.mrb[21].mxu1  ;;  %9012 = vst.msk [vmem:[#allocation2 + $0x90] sm:$0xff] %vm322_vm0, %v8948_v44  ;;  %v8949_v12 = vmax.f32 %v8885_v11, 0.0 }
 0x507   :  { %v10934_v23 = vpop.f32.mrb[22].mxu1  ;;  %9010 = vst.msk [vmem:[#allocation2 + $0x80] sm:$0xff] %vm322_vm0, %v8946_v33  ;;  %v8947_v51 = vmax.f32 %v8883_v20, 0.0  ;;  %v11545_v42 = vpop.f32.mrb[20].mxu0 }
 0x508   :  { %v5125_v28 = vpop.f32.mrb[23].mxu1  ;;  %9013 = vst.msk [vmem:[#allocation2 + $0x98] sm:$0xff] %vm322_vm0, %v8949_v12  ;;  %v11607_v46 = vadd.f32 %v11545_v42, %v10933_v8  ;;  %v8620_v55 = vpop.f32.mrb[21].mxu0 }
 0x509   :  { %9011 = vst.msk [vmem:[#allocation2 + $0x88] sm:$0xff] %vm322_vm0, %v8947_v51  ;;  %v11608_v32 = vadd.f32 %v8620_v55, %v5122_v2  ;;  %v11546_v25 = vpop.f32.mrb[22].mxu0 }
 0x50a   :  { %v8888_v38 = vadd.f32 %v11607_v46, %v16518_v62  ;;  %v11609_v18 = vadd.f32 %v11546_v25, %v10934_v23  ;;  %v8623_v61 = vpop.f32.mrb[23].mxu0 }
 0x50b   :  { %v8886_v52 = vadd.f32 %v11608_v32, %v16518_v62  ;;  %v11610_v58 = vadd.f32 %v8623_v61, %v5125_v28 }
 0x50c   :  { %v8952_v36 = vmax.f32 %v8888_v38, 0.0  ;;  %v8889_v63 = vadd.f32 %v11609_v18, %v16518_v62 }
 0x50d   :  { %v10937_v9 = vpop.f32.mrb[24].mxu1  ;;  %v8950_v24 = vmax.f32 %v8886_v52, 0.0  ;;  %v8887_v49 = vadd.f32 %v11610_v58, %v16518_v62 }
 0x50e   :  { %v5138_v48 = vpop.f32.mrb[25].mxu1  ;;  %9016 = vst.msk [vmem:[#allocation2 + $0xb0] sm:$0xff] %vm322_vm0, %v8952_v36  ;;  %v8953_v60 = vmax.f32 %v8889_v63, 0.0 }
 0x50f   :  { %v10938_v5 = vpop.f32.mrb[26].mxu1  ;;  %9014 = vst.msk [vmem:[#allocation2 + $0xa0] sm:$0xff] %vm322_vm0, %v8950_v24  ;;  %v8951_v10 = vmax.f32 %v8887_v49, 0.0  ;;  %v11549_v50 = vpop.f32.mrb[24].mxu0 }
 0x510   :  { %v5141_v6 = vpop.f32.mrb[27].mxu1  ;;  %9017 = vst.msk [vmem:[#allocation2 + $0xb8] sm:$0xff] %vm322_vm0, %v8953_v60  ;;  %v11611_v40 = vadd.f32 %v11549_v50, %v10937_v9  ;;  %v8636_v4 = vpop.f32.mrb[25].mxu0 }
 0x511   :  { %9015 = vst.msk [vmem:[#allocation2 + $0xa8] sm:$0xff] %vm322_vm0, %v8951_v10  ;;  %v11612_v13 = vadd.f32 %v8636_v4, %v5138_v48  ;;  %v11550_v54 = vpop.f32.mrb[26].mxu0 }
 0x512   :  { %v8892_v31 = vadd.f32 %v11611_v40, %v16518_v62  ;;  %v11613_v41 = vadd.f32 %v11550_v54, %v10938_v5  ;;  %v8639_v27 = vpop.f32.mrb[27].mxu0 }
 0x513   :  { %v8890_v26 = vadd.f32 %v11612_v13, %v16518_v62  ;;  %v11614_v34 = vadd.f32 %v8639_v27, %v5141_v6 }
 0x514   :  { %v8956_v59 = vmax.f32 %v8892_v31, 0.0  ;;  %v8893_v43 = vadd.f32 %v11613_v41, %v16518_v62 }
 0x515   :  { %v10941_v45 = vpop.f32.mrb[28].mxu1  ;;  %v8954_v39 = vmax.f32 %v8890_v26, 0.0  ;;  %v8891_v57 = vadd.f32 %v11614_v34, %v16518_v62 }
 0x516   :  { %v5154_v21 = vpop.f32.mrb[29].mxu1  ;;  %9020 = vst.msk [vmem:[#allocation2 + $0xd0] sm:$0xff] %vm322_vm0, %v8956_v59  ;;  %v8957_v29 = vmax.f32 %v8893_v43, 0.0 }
 0x517   :  { %v10942_v56 = vpop.f32.mrb[30].mxu1  ;;  %9018 = vst.msk [vmem:[#allocation2 + $0xc0] sm:$0xff] %vm322_vm0, %v8954_v39  ;;  %v8955_v7 = vmax.f32 %v8891_v57, 0.0  ;;  %v11553_v14 = vpop.f32.mrb[28].mxu0 }
 0x518   :  { %v5157_v3 = vpop.f32.mrb[31].mxu1  ;;  %9021 = vst.msk [vmem:[#allocation2 + $0xd8] sm:$0xff] %vm322_vm0, %v8957_v29  ;;  %v11615_v1 = vadd.f32 %v11553_v14, %v10941_v45  ;;  %v8652_v53 = vpop.f32.mrb[29].mxu0 }
 0x519   :  { %9019 = vst.msk [vmem:[#allocation2 + $0xc8] sm:$0xff] %vm322_vm0, %v8955_v7  ;;  %v11616_v35 = vadd.f32 %v8652_v53, %v5154_v21  ;;  %v11554_v19 = vpop.f32.mrb[30].mxu0 }
 0x51a   :  { %v8896_v30 = vadd.f32 %v11615_v1, %v16518_v62  ;;  %v11617_v0 = vadd.f32 %v11554_v19, %v10942_v56  ;;  %v8655_v16 = vpop.f32.mrb[31].mxu0 }
 0x51b   :  { %v8894_v15 = vadd.f32 %v11616_v35, %v16518_v62  ;;  %v11618_v17 = vadd.f32 %v8655_v16, %v5157_v3 }
 0x51c   :  { %v8960_v47 = vmax.f32 %v8896_v30, 0.0  ;;  %v8897_v22 = vadd.f32 %v11617_v0, %v16518_v62 }
 0x51d   :  { %v10945_v37 = vpop.f32.mrb[32].mxu1  ;;  %v8958_v44 = vmax.f32 %v8894_v15, 0.0  ;;  %v8895_v11 = vadd.f32 %v11618_v17, %v16518_v62 }
 0x51e   :  { %v5170_v8 = vpop.f32.mrb[33].mxu1  ;;  %9024 = vst.msk [vmem:[#allocation2 + $0xf0] sm:$0xff] %vm322_vm0, %v8960_v47  ;;  %v8961_v33 = vmax.f32 %v8897_v22, 0.0 }
 0x51f   :  { %v10946_v2 = vpop.f32.mrb[34].mxu1  ;;  %9022 = vst.msk [vmem:[#allocation2 + $0xe0] sm:$0xff] %vm322_vm0, %v8958_v44  ;;  %v8959_v23 = vmax.f32 %v8895_v11, 0.0  ;;  %v11557_v12 = vpop.f32.mrb[32].mxu0 }
 0x520   :  { %v5173_v20 = vpop.f32.mrb[35].mxu1  ;;  %9025 = vst.msk [vmem:[#allocation2 + $0xf8] sm:$0xff] %vm322_vm0, %v8961_v33  ;;  %v11619_v28 = vadd.f32 %v11557_v12, %v10945_v37  ;;  %v8668_v51 = vpop.f32.mrb[33].mxu0 }
 0x521   :  { %9023 = vst.msk [vmem:[#allocation2 + $0xe8] sm:$0xff] %vm322_vm0, %v8959_v23  ;;  %v11620_v42 = vadd.f32 %v8668_v51, %v5170_v8  ;;  %v11558_v46 = vpop.f32.mrb[34].mxu0 }
 0x522   :  { %v8900_v55 = vadd.f32 %v11619_v28, %v16518_v62  ;;  %v11621_v32 = vadd.f32 %v11558_v46, %v10946_v2  ;;  %v8671_v25 = vpop.f32.mrb[35].mxu0 }
 0x523   :  { %v8898_v38 = vadd.f32 %v11620_v42, %v16518_v62  ;;  %v11622_v18 = vadd.f32 %v8671_v25, %v5173_v20 }
 0x524   :  { %v8964_v52 = vmax.f32 %v8900_v55, 0.0  ;;  %v8901_v58 = vadd.f32 %v11621_v32, %v16518_v62 }
 0x525   :  { %v10949_v61 = vpop.f32.mrb[36].mxu1  ;;  %v8962_v36 = vmax.f32 %v8898_v38, 0.0  ;;  %v8899_v63 = vadd.f32 %v11622_v18, %v16518_v62 }
 0x526   :  { %v5186_v9 = vpop.f32.mrb[37].mxu1  ;;  %9028 = vst.msk [vmem:[#allocation2 + $0x110] sm:$0xff] %vm322_vm0, %v8964_v52  ;;  %v8965_v24 = vmax.f32 %v8901_v58, 0.0 }
 0x527   :  { %v10950_v48 = vpop.f32.mrb[38].mxu1  ;;  %9026 = vst.msk [vmem:[#allocation2 + $0x100] sm:$0xff] %vm322_vm0, %v8962_v36  ;;  %v8963_v5 = vmax.f32 %v8899_v63, 0.0  ;;  %v11561_v60 = vpop.f32.mrb[36].mxu0 }
 0x528   :  { %v5189_v49 = vpop.f32.mrb[39].mxu1  ;;  %9029 = vst.msk [vmem:[#allocation2 + $0x118] sm:$0xff] %vm322_vm0, %v8965_v24  ;;  %v11623_v6 = vadd.f32 %v11561_v60, %v10949_v61  ;;  %v8684_v10 = vpop.f32.mrb[37].mxu0 }
 0x529   :  { %9027 = vst.msk [vmem:[#allocation2 + $0x108] sm:$0xff] %vm322_vm0, %v8963_v5  ;;  %v11624_v50 = vadd.f32 %v8684_v10, %v5186_v9  ;;  %v11562_v40 = vpop.f32.mrb[38].mxu0 }
 0x52a   :  { %v8904_v4 = vadd.f32 %v11623_v6, %v16518_v62  ;;  %v11625_v13 = vadd.f32 %v11562_v40, %v10950_v48  ;;  %v8687_v54 = vpop.f32.mrb[39].mxu0 }
 0x52b   :  { %v8902_v31 = vadd.f32 %v11624_v50, %v16518_v62  ;;  %v11626_v41 = vadd.f32 %v8687_v54, %v5189_v49 }
 0x52c   :  { %v8968_v26 = vmax.f32 %v8904_v4, 0.0  ;;  %v8905_v34 = vadd.f32 %v11625_v13, %v16518_v62 }
 0x52d   :  { %v10953_v27 = vpop.f32.mrb[40].mxu1  ;;  %v8966_v59 = vmax.f32 %v8902_v31, 0.0  ;;  %v8903_v43 = vadd.f32 %v11626_v41, %v16518_v62 }
 0x52e   :  { %v5202_v45 = vpop.f32.mrb[41].mxu1  ;;  %9032 = vst.msk [vmem:[#allocation2 + $0x130] sm:$0xff] %vm322_vm0, %v8968_v26  ;;  %v8969_v39 = vmax.f32 %v8905_v34, 0.0 }
 0x52f   :  { %v10954_v21 = vpop.f32.mrb[42].mxu1  ;;  %9030 = vst.msk [vmem:[#allocation2 + $0x120] sm:$0xff] %vm322_vm0, %v8966_v59  ;;  %v8967_v56 = vmax.f32 %v8903_v43, 0.0  ;;  %v11565_v29 = vpop.f32.mrb[40].mxu0 }
 0x530   :  { %v5205_v57 = vpop.f32.mrb[43].mxu1  ;;  %9033 = vst.msk [vmem:[#allocation2 + $0x138] sm:$0xff] %vm322_vm0, %v8969_v39  ;;  %v11627_v3 = vadd.f32 %v11565_v29, %v10953_v27  ;;  %v8700_v7 = vpop.f32.mrb[41].mxu0 }
 0x531   :  { %9031 = vst.msk [vmem:[#allocation2 + $0x128] sm:$0xff] %vm322_vm0, %v8967_v56  ;;  %v11628_v14 = vadd.f32 %v8700_v7, %v5202_v45  ;;  %v11566_v1 = vpop.f32.mrb[42].mxu0 }
 0x532   :  { %v8908_v53 = vadd.f32 %v11627_v3, %v16518_v62  ;;  %v11629_v35 = vadd.f32 %v11566_v1, %v10954_v21  ;;  %v8703_v19 = vpop.f32.mrb[43].mxu0 }
 0x533   :  { %v8906_v30 = vadd.f32 %v11628_v14, %v16518_v62  ;;  %v11630_v0 = vadd.f32 %v8703_v19, %v5205_v57 }
 0x534   :  { %v8972_v15 = vmax.f32 %v8908_v53, 0.0  ;;  %v8909_v17 = vadd.f32 %v11629_v35, %v16518_v62 }
 0x535   :  { %v10957_v16 = vpop.f32.mrb[44].mxu1  ;;  %v8970_v47 = vmax.f32 %v8906_v30, 0.0  ;;  %v8907_v22 = vadd.f32 %v11630_v0, %v16518_v62 }
 0x536   :  { %v5218_v37 = vpop.f32.mrb[45].mxu1  ;;  %9036 = vst.msk [vmem:[#allocation2 + $0x150] sm:$0xff] %vm322_vm0, %v8972_v15  ;;  %v8973_v44 = vmax.f32 %v8909_v17, 0.0 }
 0x537   :  { %v10958_v8 = vpop.f32.mrb[46].mxu1  ;;  %9034 = vst.msk [vmem:[#allocation2 + $0x140] sm:$0xff] %vm322_vm0, %v8970_v47  ;;  %v8971_v2 = vmax.f32 %v8907_v22, 0.0  ;;  %v11569_v33 = vpop.f32.mrb[44].mxu0 }
 0x538   :  { %v5221_v11 = vpop.f32.mrb[47].mxu1  ;;  %9037 = vst.msk [vmem:[#allocation2 + $0x158] sm:$0xff] %vm322_vm0, %v8973_v44  ;;  %v11631_v20 = vadd.f32 %v11569_v33, %v10957_v16  ;;  %v8716_v23 = vpop.f32.mrb[45].mxu0 }
 0x539   :  { %9035 = vst.msk [vmem:[#allocation2 + $0x148] sm:$0xff] %vm322_vm0, %v8971_v2  ;;  %v11632_v12 = vadd.f32 %v8716_v23, %v5218_v37  ;;  %v11570_v28 = vpop.f32.mrb[46].mxu0 }
 0x53a   :  { %v8912_v51 = vadd.f32 %v11631_v20, %v16518_v62  ;;  %v11633_v42 = vadd.f32 %v11570_v28, %v10958_v8  ;;  %v8719_v46 = vpop.f32.mrb[47].mxu0 }
 0x53b   :  { %v8910_v55 = vadd.f32 %v11632_v12, %v16518_v62  ;;  %v11634_v32 = vadd.f32 %v8719_v46, %v5221_v11 }
 0x53c   :  { %v8976_v38 = vmax.f32 %v8912_v51, 0.0  ;;  %v8913_v18 = vadd.f32 %v11633_v42, %v16518_v62 }
 0x53d   :  { %v10961_v25 = vpop.f32.mrb[48].mxu1  ;;  %v8974_v52 = vmax.f32 %v8910_v55, 0.0  ;;  %v8911_v58 = vadd.f32 %v11634_v32, %v16518_v62 }
 0x53e   :  { %v5234_v61 = vpop.f32.mrb[49].mxu1  ;;  %9040 = vst.msk [vmem:[#allocation2 + $0x170] sm:$0xff] %vm322_vm0, %v8976_v38  ;;  %v8977_v36 = vmax.f32 %v8913_v18, 0.0 }
 0x53f   :  { %v10962_v9 = vpop.f32.mrb[50].mxu1  ;;  %9038 = vst.msk [vmem:[#allocation2 + $0x160] sm:$0xff] %vm322_vm0, %v8974_v52  ;;  %v8975_v48 = vmax.f32 %v8911_v58, 0.0  ;;  %v11573_v24 = vpop.f32.mrb[48].mxu0 }
 0x540   :  { %v5237_v63 = vpop.f32.mrb[51].mxu1  ;;  %9041 = vst.msk [vmem:[#allocation2 + $0x178] sm:$0xff] %vm322_vm0, %v8977_v36  ;;  %v11635_v49 = vadd.f32 %v11573_v24, %v10961_v25  ;;  %v8732_v5 = vpop.f32.mrb[49].mxu0 }
 0x541   :  { %9039 = vst.msk [vmem:[#allocation2 + $0x168] sm:$0xff] %vm322_vm0, %v8975_v48  ;;  %v11636_v60 = vadd.f32 %v8732_v5, %v5234_v61  ;;  %v11574_v6 = vpop.f32.mrb[50].mxu0 }
 0x542   :  { %v8916_v10 = vadd.f32 %v11635_v49, %v16518_v62  ;;  %v11637_v50 = vadd.f32 %v11574_v6, %v10962_v9  ;;  %v8735_v40 = vpop.f32.mrb[51].mxu0 }
 0x543   :  { %v8914_v4 = vadd.f32 %v11636_v60, %v16518_v62  ;;  %v11638_v13 = vadd.f32 %v8735_v40, %v5237_v63 }
 0x544   :  { %v8980_v31 = vmax.f32 %v8916_v10, 0.0  ;;  %v8917_v41 = vadd.f32 %v11637_v50, %v16518_v62 }
 0x545   :  { %v10965_v54 = vpop.f32.mrb[52].mxu1  ;;  %v8978_v26 = vmax.f32 %v8914_v4, 0.0  ;;  %v8915_v34 = vadd.f32 %v11638_v13, %v16518_v62 }
 0x546   :  { %v5250_v27 = vpop.f32.mrb[53].mxu1  ;;  %9044 = vst.msk [vmem:[#allocation2 + $0x190] sm:$0xff] %vm322_vm0, %v8980_v31  ;;  %v8981_v59 = vmax.f32 %v8917_v41, 0.0 }
 0x547   :  { %v10966_v45 = vpop.f32.mrb[54].mxu1  ;;  %9042 = vst.msk [vmem:[#allocation2 + $0x180] sm:$0xff] %vm322_vm0, %v8978_v26  ;;  %v8979_v21 = vmax.f32 %v8915_v34, 0.0  ;;  %v11577_v39 = vpop.f32.mrb[52].mxu0 }
 0x548   :  { %v5253_v43 = vpop.f32.mrb[55].mxu1  ;;  %9045 = vst.msk [vmem:[#allocation2 + $0x198] sm:$0xff] %vm322_vm0, %v8981_v59  ;;  %v11639_v57 = vadd.f32 %v11577_v39, %v10965_v54  ;;  %v8748_v56 = vpop.f32.mrb[53].mxu0 }
 0x549   :  { %9043 = vst.msk [vmem:[#allocation2 + $0x188] sm:$0xff] %vm322_vm0, %v8979_v21  ;;  %v11640_v29 = vadd.f32 %v8748_v56, %v5250_v27  ;;  %v11578_v3 = vpop.f32.mrb[54].mxu0 }
 0x54a   :  { %v8920_v7 = vadd.f32 %v11639_v57, %v16518_v62  ;;  %v11641_v14 = vadd.f32 %v11578_v3, %v10966_v45  ;;  %v8751_v1 = vpop.f32.mrb[55].mxu0 }
 0x54b   :  { %v8918_v53 = vadd.f32 %v11640_v29, %v16518_v62  ;;  %v11642_v35 = vadd.f32 %v8751_v1, %v5253_v43 }
 0x54c   :  { %v8984_v30 = vmax.f32 %v8920_v7, 0.0  ;;  %v8921_v0 = vadd.f32 %v11641_v14, %v16518_v62 }
 0x54d   :  { %v10969_v19 = vpop.f32.mrb[56].mxu1  ;;  %v8982_v15 = vmax.f32 %v8918_v53, 0.0  ;;  %v8919_v17 = vadd.f32 %v11642_v35, %v16518_v62 }
 0x54e   :  { %v5266_v16 = vpop.f32.mrb[57].mxu1  ;;  %9048 = vst.msk [vmem:[#allocation2 + $0x1b0] sm:$0xff] %vm322_vm0, %v8984_v30  ;;  %v8985_v47 = vmax.f32 %v8921_v0, 0.0 }
 0x54f   :  { %v10970_v37 = vpop.f32.mrb[58].mxu1  ;;  %9046 = vst.msk [vmem:[#allocation2 + $0x1a0] sm:$0xff] %vm322_vm0, %v8982_v15  ;;  %v8983_v8 = vmax.f32 %v8919_v17, 0.0  ;;  %v11581_v44 = vpop.f32.mrb[56].mxu0 }
 0x550   :  { %v5269_v22 = vpop.f32.mrb[59].mxu1  ;;  %9049 = vst.msk [vmem:[#allocation2 + $0x1b8] sm:$0xff] %vm322_vm0, %v8985_v47  ;;  %v11643_v11 = vadd.f32 %v11581_v44, %v10969_v19  ;;  %v8764_v2 = vpop.f32.mrb[57].mxu0 }
 0x551   :  { %9047 = vst.msk [vmem:[#allocation2 + $0x1a8] sm:$0xff] %vm322_vm0, %v8983_v8  ;;  %v11644_v33 = vadd.f32 %v8764_v2, %v5266_v16  ;;  %v11582_v20 = vpop.f32.mrb[58].mxu0 }
 0x552   :  { %v8924_v23 = vadd.f32 %v11643_v11, %v16518_v62  ;;  %v11645_v12 = vadd.f32 %v11582_v20, %v10970_v37  ;;  %v8767_v28 = vpop.f32.mrb[59].mxu0 }
 0x553   :  { %v8922_v51 = vadd.f32 %v11644_v33, %v16518_v62  ;;  %v11646_v42 = vadd.f32 %v8767_v28, %v5269_v22 }
 0x554   :  { %v8988_v55 = vmax.f32 %v8924_v23, 0.0  ;;  %v8925_v32 = vadd.f32 %v11645_v12, %v16518_v62 }
 0x555   :  { %v10973_v46 = vpop.f32.mrb[60].mxu1  ;;  %v8986_v38 = vmax.f32 %v8922_v51, 0.0  ;;  %v8923_v18 = vadd.f32 %v11646_v42, %v16518_v62 }
 0x556   :  { %v5282_v25 = vpop.f32.mrb[61].mxu1  ;;  %9052 = vst.msk [vmem:[#allocation2 + $0x1d0] sm:$0xff] %vm322_vm0, %v8988_v55  ;;  %v8989_v52 = vmax.f32 %v8925_v32, 0.0 }
 0x557   :  { %v10974_v61 = vpop.f32.mrb[62].mxu1  ;;  %9050 = vst.msk [vmem:[#allocation2 + $0x1c0] sm:$0xff] %vm322_vm0, %v8986_v38  ;;  %v8987_v9 = vmax.f32 %v8923_v18, 0.0  ;;  %v11585_v36 = vpop.f32.mrb[60].mxu0 }
 0x558   :  { %v5285_v58 = vpop.f32.mrb[63].mxu1  ;;  %9053 = vst.msk [vmem:[#allocation2 + $0x1d8] sm:$0xff] %vm322_vm0, %v8989_v52  ;;  %v11647_v63 = vadd.f32 %v11585_v36, %v10973_v46  ;;  %v8780_v48 = vpop.f32.mrb[61].mxu0 }
 0x559   :  { %9051 = vst.msk [vmem:[#allocation2 + $0x1c8] sm:$0xff] %vm322_vm0, %v8987_v9  ;;  %v11648_v24 = vadd.f32 %v8780_v48, %v5282_v25  ;;  %v11586_v49 = vpop.f32.mrb[62].mxu0 }
 0x55a   :  { %v8928_v5 = vadd.f32 %v11647_v63, %v16518_v62  ;;  %v11649_v60 = vadd.f32 %v11586_v49, %v10974_v61  ;;  %v8783_v6 = vpop.f32.mrb[63].mxu0 }
 0x55b   :  { %v8926_v10 = vadd.f32 %v11648_v24, %v16518_v62  ;;  %v11650_v50 = vadd.f32 %v8783_v6, %v5285_v58 }
 0x55c   :  { %v8992_v40 = vmax.f32 %v8928_v5, 0.0  ;;  %v8929_v4 = vadd.f32 %v11649_v60, %v16518_v62 }
 0x55d   :  { %v8990_v13 = vmax.f32 %v8926_v10, 0.0  ;;  %v8927_v54 = vadd.f32 %v11650_v50, %v16518_v62 }
 0x55e   :  { %9056 = vst.msk [vmem:[#allocation2 + $0x1f0] sm:$0xff] %vm322_vm0, %v8992_v40  ;;  %v8993_v31 = vmax.f32 %v8929_v4, 0.0 }
 0x55f   :  { %9054 = vst.msk [vmem:[#allocation2 + $0x1e0] sm:$0xff] %vm322_vm0, %v8990_v13  ;;  %v8991_v41 = vmax.f32 %v8927_v54, 0.0 }
 0x560   :  { %9057 = vst.msk [vmem:[#allocation2 + $0x1f8] sm:$0xff] %vm322_vm0, %v8993_v31 }
 0x561   :  { %9055 = vst.msk [vmem:[#allocation2 + $0x1e8] sm:$0xff] %vm322_vm0, %v8991_v41 }
 0x562   :  { %12834 = shalt.err (!%p12831_p4)
}
 0x563   :  { %s12835_s17 = scalar_lea.hbm %s16665_s5, 8192 }
 0x564   :  { %p12836_p5 = scmp.ne.s32.totalorder %s16665_s5, %s12835_s17  ;;  %p12839_p6 = scmp.lt.u32.totalorder %s12835_s17, %s16665_s5 }
 0x566   :  { %p12841_p7 = pnand %p12839_p6, %p12836_p5 }
 0x568   :  { %12844 = shalt.err (!%p12841_p7)
}
 0x569   :  { %s12848_s22 = smov 128   ;;  %s12849_s23 = smov 8  }
 0x56a   :  { %9069 = dma.vmem_to_hbm [thread:$0]  %s9064_s13, 8192, %s16665_s5, [#allocation3], %s12848_s22, %s12848_s22, %s12849_s23  }
 0x56b   :  { %12845 = dma.done.wait [#allocation3], 8192  }
 0x56c   :  { %12846 = vsyncadd [#allocation3], 4294959104 }
 0x56d   :  { %9073 = vsyncpa [#allocation3], 1 }

</bundles_post_ra>
